<compile_context>
chip_gen: v7x
topology: tpu7x:2x2x1
jax: 0.10.0
libtpu: 0.0.40
codegen_flags: <defaults>
</compile_context>

<pallas_src>
import functools

import jax
import jax.numpy as jnp
from jax.experimental import pallas as pl
from jax.experimental.pallas import tpu as pltpu


# ----------------------------------------------------------------------------
# Helpers
# ----------------------------------------------------------------------------
def _round_up(x, m):
    return (x + m - 1) // m * m


def _vmem_limit_bytes():
    # ~75% of physical VMEM (128 MiB v5e/v6e, 64 MiB v7x), leaving compiler headroom.
    try:
        cap = int(pltpu.get_tpu_info().vmem_capacity_bytes)
    except Exception:
        cap = 64 * 1024 * 1024
    return cap * 3 // 4


def _footprint_bytes(hb, tq, n_pad, c, d):
    """Rough per-grid-step VMEM footprint: double-buffered blocks + live temporaries."""
    x_blk = (n_pad + tq) * c * 2 * 2                 # bf16 x (K/V view + Q view), 2 bufs
    w_blk = 4 * c * hb * d * 2 * 2                   # wq/wk/wv/wproj slabs, bf16, 2 bufs
    attn_blk = hb * tq * n_pad * 4 * 2               # f32 attn output block, 2 bufs
    out_blk = tq * c * 4 * 2 + tq * c * 4            # f32 out block (2 bufs) + accumulator
    qkv = (tq + 2 * n_pad) * hb * d * 4              # q, k, v f32 intermediates
    sp = 3 * hb * tq * n_pad * 4                     # s / p / attn f32 temporaries
    ctx = hb * tq * d * 4 + hb * tq * c * 4          # ctx + per-head proj contribution
    return x_blk + w_blk + attn_blk + out_blk + qkv + sp + ctx


def _pick_block_sizes(num_heads, head_dim, n_pad, c):
    """(heads per block Hb, query tile Tq), sized against the chip's actual VMEM.

    Hb must divide num_heads and keep the weight-slab lane dim dense (Hb*d multiple
    of 128, or all heads).  Tq must divide n_pad and be a sublane multiple.  Prefer
    the full query extent (no K/V re-projection), then the largest Hb that fits.
    """
    budget = _vmem_limit_bytes() * 3 // 4
    hb_cands = sorted(
        {hb for hb in range(1, num_heads + 1)
         if num_heads % hb == 0 and ((hb * head_dim) % 128 == 0 or hb == num_heads)},
        reverse=True)
    tq_cands = sorted({t for t in range(8, n_pad, 8) if n_pad % t == 0} | {n_pad},
                      reverse=True)
    for tq in tq_cands:
        for hb in hb_cands:
            if _footprint_bytes(hb, tq, n_pad, c, head_dim) <= budget:
                return hb, tq
    return min(hb_cands), min(tq_cands)


# ----------------------------------------------------------------------------
# Fused kernel: qkv projection + attention + output projection
# ----------------------------------------------------------------------------
def _fused_attn_kernel(hb, d, n_real,
                       xq_ref, xkv_ref, wq_ref, wk_ref, wv_ref, wp_ref, bias_ref,
                       out_ref, attn_ref, acc_ref):
    """One (batch b, q-tile qt, head-block j) step.  j is the reduction axis."""
    j = pl.program_id(2)
    n_pad = xkv_ref.shape[1]

    xkv = xkv_ref[0]                                   # (N_pad, C) bf16, resident per b

    def project(xin, w_ref):
        # (n, C) @ (C, Hb*d) on the MXU (bf16 in, f32 accumulate), then head split.
        y = jnp.dot(xin, w_ref[...], preferred_element_type=jnp.float32)
        return y.reshape(y.shape[0], hb, d).transpose(1, 0, 2)   # (Hb, n, d) f32

    q = project(xq_ref[0], wq_ref)                     # scale pre-folded into wq
    k = project(xkv, wk_ref)
    v = project(xkv, wv_ref)

    # Scores + exact softmax (f32), batched over the Hb heads of this block.
    s = jnp.einsum('hqd,hkd->hqk', q.astype(jnp.bfloat16), k.astype(jnp.bfloat16),
                   preferred_element_type=jnp.float32)            # (Hb, Tq, N_pad)
    if n_pad != n_real:
        # Mask padded keys with a large negative (not -inf: keeps padded rows NaN-free).
        key_idx = jax.lax.broadcasted_iota(jnp.int32, s.shape, 2)
        s = jnp.where(key_idx < n_real, s, jnp.float32(-1e30))
    s = s - jnp.max(s, axis=-1, keepdims=True)
    p = jnp.exp(s)
    attn = p / jnp.sum(p, axis=-1, keepdims=True)      # exact divide: rows sum to 1
    attn_ref[0] = attn                                 # lane-dense (Tq, N_pad) stores

    # PV, then this head-block's slice of the output projection (ctx stays in VMEM).
    ctx = jnp.einsum('hqk,hkd->hqd', attn.astype(jnp.bfloat16), v.astype(jnp.bfloat16),
                     preferred_element_type=jnp.float32)          # (Hb, Tq, d)
    contrib = jnp.einsum('hqd,hdc->hqc', ctx.astype(jnp.bfloat16), wp_ref[...],
                         preferred_element_type=jnp.float32)      # (Hb, Tq, C)

    @pl.when(j == 0)
    def _():
        acc_ref[...] = jnp.zeros_like(acc_ref)

    acc_ref[...] += jnp.sum(contrib, axis=0)

    @pl.when(j == pl.num_programs(2) - 1)
    def _():
        out_ref[0] = acc_ref[...] + bias_ref[...]


# ----------------------------------------------------------------------------
# Wrapper
# ----------------------------------------------------------------------------
def basic_attention_forward(x, prep, num_heads, *, heads_per_block=None, q_tile=None):
    """Pallas forward of BasicAttention; returns (proj_out, attn)."""
    B, N, C = x.shape
    h = num_heads
    assert C % h == 0
    d = C // h

    n_pad = _round_up(N, 128)                   # lane-dense attn stores
    hb, tq = _pick_block_sizes(h, d, n_pad, C)
    if heads_per_block is not None:
        hb = heads_per_block
    if q_tile is not None:
        tq = q_tile
    assert h % hb == 0 and ((hb * d) % 128 == 0 or hb == h)
    assert n_pad % tq == 0 and (tq % 8 == 0 or tq == n_pad)

    xp = x.astype(jnp.bfloat16)                 # halve x DMA bytes; MXU rounds anyway
    if n_pad != N:
        xp = jnp.pad(xp, ((0, 0), (0, n_pad - N), (0, 0)))

    kernel = functools.partial(_fused_attn_kernel, hb, d, N)
    out, attn = pl.pallas_call(
        kernel,
        out_shape=(jax.ShapeDtypeStruct((B, n_pad, C), jnp.float32),
                   jax.ShapeDtypeStruct((B, h, n_pad, n_pad), jnp.float32)),
        grid_spec=pltpu.PrefetchScalarGridSpec(
            num_scalar_prefetch=0,
            grid=(B, n_pad // tq, h // hb),     # reduction (head-block) axis last
            in_specs=[
                pl.BlockSpec((1, tq, C), lambda b, qt, j: (b, qt, 0)),     # x (Q rows)
                pl.BlockSpec((1, n_pad, C), lambda b, qt, j: (b, 0, 0)),   # x (K/V rows)
                pl.BlockSpec((C, hb * d), lambda b, qt, j: (0, j)),        # wq (scaled)
                pl.BlockSpec((C, hb * d), lambda b, qt, j: (0, j)),        # wk
                pl.BlockSpec((C, hb * d), lambda b, qt, j: (0, j)),        # wv
                pl.BlockSpec((hb, d, C), lambda b, qt, j: (j, 0, 0)),      # wproj slab
                pl.BlockSpec((1, C), lambda b, qt, j: (0, 0)),             # proj bias
            ],
            out_specs=[
                pl.BlockSpec((1, tq, C), lambda b, qt, j: (b, qt, 0)),        # proj out
                pl.BlockSpec((1, hb, tq, n_pad), lambda b, qt, j: (b, j, qt, 0)),  # attn
            ],
            scratch_shapes=[pltpu.VMEM((tq, C), jnp.float32)],
        ),
        compiler_params=pltpu.CompilerParams(
            dimension_semantics=("parallel", "parallel", "arbitrary"),
            vmem_limit_bytes=_vmem_limit_bytes(),
        ),
    )(xp, xp, prep["wq"], prep["wk"], prep["wv"], prep["wp"], prep["b_proj"])

    if n_pad != N:
        out = out[:, :N, :]
        attn = attn[:, :, :N, :N]
    return out, attn


# ----------------------------------------------------------------------------
# One-time parameter preparation (re-layout / scale folding / bf16, out of hot path)
# ----------------------------------------------------------------------------
def prepare_params(params, dim, num_heads):
    h = num_heads
    d = dim // h
    scale = d ** -0.5
    # PyTorch qkv weight is (3C, C) with output rows ordered (qkv, head, d).
    w3 = params["w_qkv"].reshape(3, h * d, dim)
    return {
        "wq": (jnp.transpose(w3[0]) * scale).astype(jnp.bfloat16),  # (C, h*d), scale folded
        "wk": jnp.transpose(w3[1]).astype(jnp.bfloat16),
        "wv": jnp.transpose(w3[2]).astype(jnp.bfloat16),
        # proj weight (C_out, C_in) -> (h, d, C_out): per-head (d, C) slabs
        "wp": jnp.transpose(params["w_proj"]).reshape(h, d, dim).astype(jnp.bfloat16),
        "b_proj": params["b_proj"].astype(jnp.float32).reshape(1, dim),
    }


def init_params(key, dim):
    k1, k2, k3 = jax.random.split(key, 3)
    rnd = lambda k, shape: (0.1 * jax.random.normal(k, shape)).astype(jnp.float32)
    return {
        "w_qkv": rnd(k1, (3 * dim, dim)),   # qkv_bias=False (module default)
        "w_proj": rnd(k2, (dim, dim)),
        "b_proj": rnd(k3, (dim,)),
    }


# ----------------------------------------------------------------------------
# Pure-JAX references.  bf16_matmuls=True mirrors the kernel's MXU precision
# (bf16 inputs, f32 accumulate, scale folded into wq) for a tight comparison.
# ----------------------------------------------------------------------------
def basic_attention_reference(x, params, num_heads, *, bf16_matmuls=True):
    B, N, C = x.shape
    h, d = num_heads, C // num_heads
    scale = d ** -0.5
    cast = (lambda t: t.astype(jnp.bfloat16)) if bf16_matmuls else (lambda t: t)

    w_q, w_k, w_v = params["w_qkv"].reshape(3, C, C)
    if bf16_matmuls:
        w_q = w_q * scale    # mirror the kernel's prep-time scale folding

    def proj(w):
        y = jnp.einsum('bnc,oc->bno', cast(x), cast(w), preferred_element_type=jnp.float32)
        return y.reshape(B, N, h, d).transpose(0, 2, 1, 3)

    q, k, v = proj(w_q), proj(w_k), proj(w_v)
    logits = jnp.einsum('bhnd,bhmd->bhnm', cast(q), cast(k),
                        preferred_element_type=jnp.float32)
    if not bf16_matmuls:
        logits = logits * scale
    attn = jax.nn.softmax(logits, axis=-1)
    ctx = jnp.einsum('bhnm,bhmd->bhnd', cast(attn), cast(v),
                     preferred_element_type=jnp.float32)
    ctx = ctx.transpose(0, 2, 1, 3).reshape(B, N, C)
    out = jnp.einsum('bnc,oc->bno', cast(ctx), cast(params["w_proj"]),
                     preferred_element_type=jnp.float32) + params["b_proj"]
    return out, attn


# ----------------------------------------------------------------------------
if __name__ == "__main__":
    def run_case(key, B, N, C, num_heads, **kw):
        kx, kp = jax.random.split(key)
        x = jax.random.normal(kx, (B, N, C), dtype=jnp.float32)
        params = init_params(kp, C)
        prep = prepare_params(params, C, num_heads)

        fwd = jax.jit(functools.partial(basic_attention_forward, num_heads=num_heads, **kw))
        out, attn = fwd(x, prep)
        out = jax.block_until_ready(out)
        attn = jax.block_until_ready(attn)

        assert out.shape == (B, N, C)
        assert attn.shape == (B, num_heads, N, N)
        assert bool(jnp.all(jnp.isfinite(out))) and bool(jnp.all(jnp.isfinite(attn)))

        # exact softmax normalization in the kernel -> rows sum to 1
        row_err = float(jnp.max(jnp.abs(jnp.sum(attn, axis=-1) - 1.0)))
        assert row_err < 1e-4, f"softmax rows not normalized: {row_err}"

        # tight check vs a reference using the same MXU precision / scale folding
        ref_out, ref_attn = basic_attention_reference(x, params, num_heads, bf16_matmuls=True)
        err_o = float(jnp.max(jnp.abs(out - ref_out)))
        err_a = float(jnp.max(jnp.abs(attn - ref_attn)))
        assert err_o < 2e-2, f"proj output mismatch vs bf16-aware reference: {err_o}"
        assert err_a < 2e-2, f"attention mismatch vs bf16-aware reference: {err_a}"

        # loose check vs the full-f32 PyTorch-equivalent reference
        ref_out32, ref_attn32 = basic_attention_reference(x, params, num_heads, bf16_matmuls=False)
        assert float(jnp.max(jnp.abs(out - ref_out32))) < 1.5e-1
        assert float(jnp.max(jnp.abs(attn - ref_attn32))) < 1.5e-1

    key = jax.random.PRNGKey(0)
    k1, k2 = jax.random.split(key)

    # Case 1: basic shapes (head_dim=16); auto-picked Hb/Tq, N padded 32 -> 128.
    run_case(k1, B=2, N=32, C=64, num_heads=4)
    # Case 2: exercises the head-block reduction (h/Hb = 2), the q-tile axis (2 tiles)
    # and ragged-N padding/masking (N=20 -> 128).
    run_case(k2, B=1, N=20, C=256, num_heads=2, heads_per_block=1, q_tile=64)

    print("KERNEL_OK")
</pallas_src>

<mosaic_0001>
module attributes {stable_mosaic.version = 11 : i64} {
  func.func @_fused_attn_kernel(%arg0: i32, %arg1: i32, %arg2: i32, %arg3: memref<1x128x64xbf16, #tpu.memory_space<vmem>>, %arg4: memref<1x128x64xbf16, #tpu.memory_space<vmem>>, %arg5: memref<64x64xbf16, #tpu.memory_space<vmem>>, %arg6: memref<64x64xbf16, #tpu.memory_space<vmem>>, %arg7: memref<64x64xbf16, #tpu.memory_space<vmem>>, %arg8: memref<4x16x64xbf16, #tpu.memory_space<vmem>>, %arg9: memref<1x64xf32, #tpu.memory_space<vmem>>, %arg10: memref<1x128x64xf32, #tpu.memory_space<vmem>>, %arg11: memref<1x4x128x128xf32, #tpu.memory_space<vmem>>, %arg12: memref<128x64xf32, #tpu.memory_space<vmem>>) attributes {dimension_semantics = [#tpu.dimension_semantics<parallel>, #tpu.dimension_semantics<parallel>, #tpu.dimension_semantics<arbitrary>], iteration_bounds = array<i64: 2, 1, 1>, scalar_prefetch = 0 : i64, scratch_operands = 1 : i64, tpu.core_type = #tpu.core_type<tc>, window_params = [{transform_indices = @transform_0, window_bounds = array<i64: 1, 128, 64>}, {transform_indices = @transform_1, window_bounds = array<i64: 1, 128, 64>}, {transform_indices = @transform_2, window_bounds = array<i64: 64, 64>}, {transform_indices = @transform_3, window_bounds = array<i64: 64, 64>}, {transform_indices = @transform_4, window_bounds = array<i64: 64, 64>}, {transform_indices = @transform_5, window_bounds = array<i64: 4, 16, 64>}, {pipeline_mode = #tpu.pipeline_mode<synchronous>, transform_indices = @transform_6, window_bounds = array<i64: 1, 64>}, {transform_indices = @transform_7, window_bounds = array<i64: 1, 128, 64>}, {transform_indices = @transform_8, window_bounds = array<i64: 1, 4, 128, 128>}]} {
    %c0 = arith.constant 0 : index
    %c0_0 = arith.constant 0 : index
    %c0_1 = arith.constant 0 : index
    %0 = vector.load %arg4[%c0, %c0_0, %c0_1] : memref<1x128x64xbf16, #tpu.memory_space<vmem>>, vector<1x128x64xbf16>
    %1 = vector.shape_cast %0 : vector<1x128x64xbf16> to vector<128x64xbf16>
    %c0_2 = arith.constant 0 : index
    %c0_3 = arith.constant 0 : index
    %c0_4 = arith.constant 0 : index
    %2 = vector.load %arg3[%c0_2, %c0_3, %c0_4] : memref<1x128x64xbf16, #tpu.memory_space<vmem>>, vector<1x128x64xbf16>
    %3 = vector.shape_cast %2 : vector<1x128x64xbf16> to vector<128x64xbf16>
    %c0_5 = arith.constant 0 : index
    %c0_6 = arith.constant 0 : index
    %4 = vector.load %arg5[%c0_5, %c0_6] : memref<64x64xbf16, #tpu.memory_space<vmem>>, vector<64x64xbf16>
    %cst = arith.constant dense<0.000000e+00> : vector<128x64xf32>
    %5 = tpu.matmul %3, %4, %cst {dimension_numbers = #tpu.dot_dimension_numbers<[1], [0], [0], [1], [0, 0, 1, 1], [], []>} : vector<128x64xbf16>, vector<64x64xbf16>, vector<128x64xf32> -> vector<128x64xf32>
    %6 = vector.shape_cast %5 : vector<128x64xf32> to vector<128x4x16xf32>
    %7 = tpu.transpose %6, [1, 0, 2] : vector<128x4x16xf32> -> vector<4x128x16xf32>
    %c0_7 = arith.constant 0 : index
    %c0_8 = arith.constant 0 : index
    %8 = vector.load %arg6[%c0_7, %c0_8] : memref<64x64xbf16, #tpu.memory_space<vmem>>, vector<64x64xbf16>
    %cst_9 = arith.constant dense<0.000000e+00> : vector<128x64xf32>
    %9 = tpu.matmul %1, %8, %cst_9 {dimension_numbers = #tpu.dot_dimension_numbers<[1], [0], [0], [1], [0, 0, 1, 1], [], []>} : vector<128x64xbf16>, vector<64x64xbf16>, vector<128x64xf32> -> vector<128x64xf32>
    %10 = vector.shape_cast %9 : vector<128x64xf32> to vector<128x4x16xf32>
    %11 = tpu.transpose %10, [1, 0, 2] : vector<128x4x16xf32> -> vector<4x128x16xf32>
    %c0_10 = arith.constant 0 : index
    %c0_11 = arith.constant 0 : index
    %12 = vector.load %arg7[%c0_10, %c0_11] : memref<64x64xbf16, #tpu.memory_space<vmem>>, vector<64x64xbf16>
    %cst_12 = arith.constant dense<0.000000e+00> : vector<128x64xf32>
    %13 = tpu.matmul %1, %12, %cst_12 {dimension_numbers = #tpu.dot_dimension_numbers<[1], [0], [0], [1], [0, 0, 1, 1], [], []>} : vector<128x64xbf16>, vector<64x64xbf16>, vector<128x64xf32> -> vector<128x64xf32>
    %14 = vector.shape_cast %13 : vector<128x64xf32> to vector<128x4x16xf32>
    %15 = tpu.transpose %14, [1, 0, 2] : vector<128x4x16xf32> -> vector<4x128x16xf32>
    %16 = arith.truncf %7 : vector<4x128x16xf32> to vector<4x128x16xbf16>
    %17 = arith.truncf %11 : vector<4x128x16xf32> to vector<4x128x16xbf16>
    "tpu.trace_start"() <{level = 10 : i32, message = "hqd,hkd->hqk"}> : () -> ()
    %cst_13 = arith.constant dense<0.000000e+00> : vector<4x128x128xf32>
    %18 = tpu.matmul %16, %17, %cst_13 {dimension_numbers = #tpu.dot_dimension_numbers<[2], [2], [1], [1], [0, 0, 0, 1, 1, 1], [0], [0]>} : vector<4x128x16xbf16>, vector<4x128x16xbf16>, vector<4x128x128xf32> -> vector<4x128x128xf32>
    "tpu.trace_stop"() : () -> ()
    %19 = tpu.iota {dimensions = array<i32: 2>} : vector<4x128x128xi32>
    %c32_i32 = arith.constant 32 : i32
    %20 = vector.broadcast %c32_i32 : i32 to vector<4x128x128xi32>
    %21 = arith.cmpi slt, %19, %20 : vector<4x128x128xi32>
    %cst_14 = arith.constant -1.000000e+30 : f32
    %22 = vector.broadcast %cst_14 : f32 to vector<4x128x128xf32>
    %23 = arith.select %21, %18, %22 : vector<4x128x128xi1>, vector<4x128x128xf32>
    %cst_15 = arith.constant dense<0xFF800000> : vector<4x128xf32>
    %24 = vector.multi_reduction <maximumf>, %23, %cst_15 [2] : vector<4x128x128xf32> to vector<4x128xf32>
    %25 = vector.shape_cast %24 : vector<4x128xf32> to vector<4x128x1xf32>
    %26 = vector.broadcast %25 : vector<4x128x1xf32> to vector<4x128x128xf32>
    %27 = arith.subf %23, %26 : vector<4x128x128xf32>
    %28 = math.exp %27 : vector<4x128x128xf32>
    %cst_16 = arith.constant dense<0.000000e+00> : vector<4x128xf32>
    %29 = vector.multi_reduction <add>, %28, %cst_16 [2] : vector<4x128x128xf32> to vector<4x128xf32>
    %30 = vector.shape_cast %29 : vector<4x128xf32> to vector<4x128x1xf32>
    %31 = vector.broadcast %30 : vector<4x128x1xf32> to vector<4x128x128xf32>
    %32 = arith.divf %28, %31 : vector<4x128x128xf32>
    %c0_17 = arith.constant 0 : index
    %c0_18 = arith.constant 0 : index
    %c0_19 = arith.constant 0 : index
    %c0_20 = arith.constant 0 : index
    %33 = vector.load %arg11[%c0_17, %c0_18, %c0_19, %c0_20] : memref<1x4x128x128xf32, #tpu.memory_space<vmem>>, vector<1x4x128x128xf32>
    %34 = vector.shape_cast %33 : vector<1x4x128x128xf32> to vector<4x128x128xf32>
    %35 = vector.shape_cast %32 : vector<4x128x128xf32> to vector<1x4x128x128xf32>
    tpu.vector_store %arg11[%c0_17, %c0_18, %c0_19, %c0_20], %35 {strides = array<i32>} : memref<1x4x128x128xf32, #tpu.memory_space<vmem>>, vector<1x4x128x128xf32>,
    %36 = arith.truncf %32 : vector<4x128x128xf32> to vector<4x128x128xbf16>
    %37 = arith.truncf %15 : vector<4x128x16xf32> to vector<4x128x16xbf16>
    "tpu.trace_start"() <{level = 10 : i32, message = "hqk,hkd->hqd"}> : () -> ()
    %cst_21 = arith.constant dense<0.000000e+00> : vector<4x128x16xf32>
    %38 = tpu.matmul %36, %37, %cst_21 {dimension_numbers = #tpu.dot_dimension_numbers<[2], [1], [1], [2], [0, 0, 0, 1, 1, 2], [0], [0]>} : vector<4x128x128xbf16>, vector<4x128x16xbf16>, vector<4x128x16xf32> -> vector<4x128x16xf32>
    "tpu.trace_stop"() : () -> ()
    %39 = arith.truncf %38 : vector<4x128x16xf32> to vector<4x128x16xbf16>
    %c0_22 = arith.constant 0 : index
    %c0_23 = arith.constant 0 : index
    %c0_24 = arith.constant 0 : index
    %40 = vector.load %arg8[%c0_22, %c0_23, %c0_24] : memref<4x16x64xbf16, #tpu.memory_space<vmem>>, vector<4x16x64xbf16>
    "tpu.trace_start"() <{level = 10 : i32, message = "hqd,hdc->hqc"}> : () -> ()
    %cst_25 = arith.constant dense<0.000000e+00> : vector<4x128x64xf32>
    %41 = tpu.matmul %39, %40, %cst_25 {dimension_numbers = #tpu.dot_dimension_numbers<[2], [1], [1], [2], [0, 0, 0, 1, 1, 2], [0], [0]>} : vector<4x128x16xbf16>, vector<4x16x64xbf16>, vector<4x128x64xf32> -> vector<4x128x64xf32>
    %c0_i32 = arith.constant 0 : i32
    "tpu.trace_stop"() : () -> ()
    %42 = arith.cmpi eq, %arg2, %c0_i32 : i32
    %43 = arith.extui %42 : i1 to i32
    %c0_i32_26 = arith.constant 0 : i32
    %44 = arith.cmpi ne, %43, %c0_i32_26 : i32
    scf.if %44 {
      %cst_34 = arith.constant 0.000000e+00 : f32
      %52 = vector.broadcast %cst_34 : f32 to vector<128x64xf32>
      %c0_35 = arith.constant 0 : index
      %c0_36 = arith.constant 0 : index
      %53 = vector.load %arg12[%c0_35, %c0_36] : memref<128x64xf32, #tpu.memory_space<vmem>>, vector<128x64xf32>
      tpu.vector_store %arg12[%c0_35, %c0_36], %52 {strides = array<i32>} : memref<128x64xf32, #tpu.memory_space<vmem>>, vector<128x64xf32>,
    } else {
    }
    %c0_27 = arith.constant 0 : index
    %c0_28 = arith.constant 0 : index
    %45 = vector.load %arg12[%c0_27, %c0_28] : memref<128x64xf32, #tpu.memory_space<vmem>>, vector<128x64xf32>
    %cst_29 = arith.constant dense<0.000000e+00> : vector<128x64xf32>
    %46 = vector.multi_reduction <add>, %41, %cst_29 [0] : vector<4x128x64xf32> to vector<128x64xf32>
    %47 = arith.addf %45, %46 : vector<128x64xf32>
    %c0_30 = arith.constant 0 : index
    %c0_31 = arith.constant 0 : index
    %48 = vector.load %arg12[%c0_30, %c0_31] : memref<128x64xf32, #tpu.memory_space<vmem>>, vector<128x64xf32>
    tpu.vector_store %arg12[%c0_30, %c0_31], %47 {strides = array<i32>} : memref<128x64xf32, #tpu.memory_space<vmem>>, vector<128x64xf32>,
    %c0_i32_32 = arith.constant 0 : i32
    %49 = arith.cmpi eq, %arg2, %c0_i32_32 : i32
    %50 = arith.extui %49 : i1 to i32
    %c0_i32_33 = arith.constant 0 : i32
    %51 = arith.cmpi ne, %50, %c0_i32_33 : i32
    scf.if %51 {
      %c0_34 = arith.constant 0 : index
      %c0_35 = arith.constant 0 : index
      %52 = vector.load %arg12[%c0_34, %c0_35] : memref<128x64xf32, #tpu.memory_space<vmem>>, vector<128x64xf32>
      %c0_36 = arith.constant 0 : index
      %c0_37 = arith.constant 0 : index
      %53 = vector.load %arg9[%c0_36, %c0_37] : memref<1x64xf32, #tpu.memory_space<vmem>>, vector<1x64xf32>
      %54 = vector.broadcast %53 : vector<1x64xf32> to vector<128x64xf32>
      %55 = arith.addf %52, %54 : vector<128x64xf32>
      %c0_38 = arith.constant 0 : index
      %c0_39 = arith.constant 0 : index
      %c0_40 = arith.constant 0 : index
      %56 = vector.load %arg10[%c0_38, %c0_39, %c0_40] : memref<1x128x64xf32, #tpu.memory_space<vmem>>, vector<1x128x64xf32>
      %57 = vector.shape_cast %56 : vector<1x128x64xf32> to vector<128x64xf32>
      %58 = vector.shape_cast %55 : vector<128x64xf32> to vector<1x128x64xf32>
      tpu.vector_store %arg10[%c0_38, %c0_39, %c0_40], %58 {strides = array<i32>} : memref<1x128x64xf32, #tpu.memory_space<vmem>>, vector<1x128x64xf32>,
    } else {
    }
    return
  }
  func.func @transform_0(%arg0: i32, %arg1: i32, %arg2: i32) -> (i32, i32, i32) {
    %c0_i32 = arith.constant 0 : i32
    %c0_i32_0 = arith.constant 0 : i32
    return %arg0, %arg1, %c0_i32 : i32, i32, i32
  }
  func.func @transform_1(%arg0: i32, %arg1: i32, %arg2: i32) -> (i32, i32, i32) {
    %c0_i32 = arith.constant 0 : i32
    %c0_i32_0 = arith.constant 0 : i32
    %c0_i32_1 = arith.constant 0 : i32
    return %arg0, %c0_i32, %c0_i32_0 : i32, i32, i32
  }
  func.func @transform_2(%arg0: i32, %arg1: i32, %arg2: i32) -> (i32, i32) {
    %c0_i32 = arith.constant 0 : i32
    %c0_i32_0 = arith.constant 0 : i32
    return %c0_i32, %arg2 : i32, i32
  }
  func.func @transform_3(%arg0: i32, %arg1: i32, %arg2: i32) -> (i32, i32) {
    %c0_i32 = arith.constant 0 : i32
    %c0_i32_0 = arith.constant 0 : i32
    return %c0_i32, %arg2 : i32, i32
  }
  func.func @transform_4(%arg0: i32, %arg1: i32, %arg2: i32) -> (i32, i32) {
    %c0_i32 = arith.constant 0 : i32
    %c0_i32_0 = arith.constant 0 : i32
    return %c0_i32, %arg2 : i32, i32
  }
  func.func @transform_5(%arg0: i32, %arg1: i32, %arg2: i32) -> (i32, i32, i32) {
    %c0_i32 = arith.constant 0 : i32
    %c0_i32_0 = arith.constant 0 : i32
    %c0_i32_1 = arith.constant 0 : i32
    return %arg2, %c0_i32, %c0_i32_0 : i32, i32, i32
  }
  func.func @transform_6(%arg0: i32, %arg1: i32, %arg2: i32) -> (i32, i32) {
    %c0_i32 = arith.constant 0 : i32
    %c0_i32_0 = arith.constant 0 : i32
    %c0_i32_1 = arith.constant 0 : i32
    return %c0_i32, %c0_i32_0 : i32, i32
  }
  func.func @transform_7(%arg0: i32, %arg1: i32, %arg2: i32) -> (i32, i32, i32) {
    %c0_i32 = arith.constant 0 : i32
    %c0_i32_0 = arith.constant 0 : i32
    return %arg0, %arg1, %c0_i32 : i32, i32, i32
  }
  func.func @transform_8(%arg0: i32, %arg1: i32, %arg2: i32) -> (i32, i32, i32, i32) {
    %c0_i32 = arith.constant 0 : i32
    %c0_i32_0 = arith.constant 0 : i32
    return %arg0, %arg2, %arg1, %c0_i32 : i32, i32, i32, i32
  }
}

</mosaic_0001>

<bundles_post_ra>
// kernel: basic_attention_forward.1
= control target key start
LH: loop header
LB: loop body
LE: loop exit
PB: predicated region body
PF: predicated region fallthrough
CT: control target
= control target key end

     0   :  { %s12136_s27 = smov 0   ;;  %s12138_s28 = smov 0   ;;  %s16300_s0 = inlined_call_operand.vmem [shape: bf16[2,128,64], index: 0, kind: input, shape index: {}, may-alias: {0,1}]   ;;  %s16301_s1 = inlined_call_operand.vmem [shape: bf16[2,128,64], index: 1, kind: input, shape index: {}, may-alias: {0,1}]   ;;  %s16302_s2 = inlined_call_operand.vmem [shape: bf16[64,64], index: 2, kind: input, shape index: {}]   ;;  %s16303_s3 = inlined_call_operand.vmem [shape: bf16[64,64], index: 3, kind: input, shape index: {}]   ;;  %s16304_s4 = inlined_call_operand.vmem [shape: bf16[64,64], index: 4, kind: input, shape index: {}]   ;;  %s16305_s5 = inlined_call_operand.vmem [shape: bf16[4,16,64], index: 5, kind: input, shape index: {}]   ;;  %s16306_s6 = inlined_call_operand.vmem [shape: f32[1,64], index: 6, kind: input, shape index: {}]   ;;  %s16307_s7 = inlined_call_operand.vmem [shape: f32[2,128,64], index: 7, kind: output, shape index: {0}]   ;;  %s16308_s8 = inlined_call_operand.vmem [shape: f32[2,4,128,128], index: 8, kind: output, shape index: {1}]  }
   0x1   :  { %s12140_s29 = smov 0  }
   0x2 LB: > { %s38_s30 = sadd.s32 1, %s12079_s28  ;;  %p10871_p0 = scmp.ge.s32.totalorder %s12083_s29, 1  ;;  %s12083_s29 = sphi %s12140_s29, %s19_s29   ;;  %s12079_s28 = sphi %s12138_s28, %s16977_s28   ;;  %s12075_s27 = sphi %s12136_s27, %s16976_s27  }
   0x3   : > { %p40_p1 = scmp.ge.s32.totalorder %s38_s30, 2  ;;  %p346_p2 = scmp.lt.s32.totalorder %s12083_s29, 3 }
   0x5   : > { %s16979_s30 = smov (%p40_p1, %s38_s30), 0  ;;  %p347_p3 = pnand %p10871_p0, %p346_p2 }
   0x7   : > { %350 = sbr.rel (%p347_p3) target bundleno = 1730 (0x6c2), region = 48 }
   0xe   : > { %v11773_v0 = vld [vmem:[%s16302_s2] sm:$0xff]   ;;  %p426_p4 = scmp.lt.s32.totalorder %s12075_s27, 1  ;;  %v11774_v1 = vld [vmem:[%s16302_s2 + $0x8] sm:$0xff]   ;;  %v11775_v2 = vld [vmem:[%s16302_s2 + $0x10] sm:$0xff]   ;;  %vm590_vm0 = vcmask 523264   ;;  %s12085_s22 = smov 112  }
   0xf   : > { %11303 = vmatprep.subr.bf16.mxu0 %v11773_v0  ;;  %11703 = vmatprep.subr.bf16.mxu1 %v11773_v0  ;;  %v11776_v4 = vld [vmem:[%s16302_s2 + $0x18] sm:$0xff]   ;;  %v11781_v6 = vld [vmem:[%s16303_s3] sm:$0xff]   ;;  %v11782_v10 = vld [vmem:[%s16303_s3 + $0x8] sm:$0xff]   ;;  %s12086_s23 = smov 96   ;;  %s12087_s24 = smov 80   ;;  %vm8106_vm1 = vcmask 130048  }
  0x10   : > { %s16981_s27 = smov (!%p426_p4, %s12075_s27), 1  ;;  %11304 = vmatpush3.bf16.msra.mxu0 %v11773_v0  ;;  %11707 = vmatpush3.bf16.msra.mxu1 %v11773_v0  ;;  %v11785_v11 = vld [vmem:[%s16303_s3 + $0x10] sm:$0xff]   ;;  %v11786_v13 = vld [vmem:[%s16303_s3 + $0x18] sm:$0xff]   ;;  %v11797_v17 = vld [vmem:[%s16304_s4] sm:$0xff]   ;;  %v12088_v0 = vmov 1983009808  }
  0x11   : > { %11305 = vmatprep.subr.bf16.mxu0 %v11774_v1  ;;  %11704 = vmatprep.subr.bf16.mxu1 %v11774_v1  ;;  %s11099_s15 = sshll.u32 %s16981_s27, 6  ;;  %v11798_v18 = vld [vmem:[%s16304_s4 + $0x8] sm:$0xff]   ;;  %v11799_v20 = vld [vmem:[%s16304_s4 + $0x10] sm:$0xff]   ;;  %v11800_v22 = vld [vmem:[%s16304_s4 + $0x18] sm:$0xff]   ;;  %s11101_s19 = sshll.u32 %s16981_s27, 7 }
  0x12   : > { %s12169_s18 = scalar_lea.vmem %s16300_s0, %s11099_s15  ;;  %s12184_s25 = scalar_lea.vmem %s16301_s1, %s11099_s15 }
  0x13   : > { %v11777_v3 = vld [vmem:[%s12169_s18] sm:$0xff]   ;;  %v11778_v7 = vld [vmem:[%s12169_s18 + $0x8] sm:$0xff]   ;;  %v11783_v9 = vld [vmem:[%s12169_s18 + $0x30] sm:$0xff]  }
  0x14   : > { %11306 = vmatpush3.bf16.msra.mxu0 %v11774_v1  ;;  %11708 = vmatpush3.bf16.msra.mxu1 %v11774_v1  ;;  %v11779_v5 = vld [vmem:[%s12169_s18 + $0x20] sm:$0xff]   ;;  %v11780_v8 = vld [vmem:[%s12169_s18 + $0x28] sm:$0xff]   ;;  %v11784_v12 = vld [vmem:[%s12169_s18 + $0x38] sm:$0xff]   ;;  %v875_v1 = vunpack.c.l.s4 %v12088_v0 }
  0x15   : > { %11307 = vmatprep.subr.bf16.mxu0 %v11775_v2  ;;  %11705 = vmatprep.subr.bf16.mxu1 %v11775_v2  ;;  %v11787_v14 = vld [vmem:[%s12184_s25] sm:$0xff]   ;;  %v11795_v15 = vld [vmem:[%s12169_s18 + $0x10] sm:$0xff]   ;;  %v11796_v16 = vld [vmem:[%s12169_s18 + $0x18] sm:$0xff]  }
  0x16   : > { %11311 = vmatprep.mubr.msk.bf16.mxu0 %vm590_vm0, %v11777_v3  ;;  %11319 = vmatprep.mubr.msk.bf16.mxu1 %vm590_vm0, %v11779_v5  ;;  %v11788_v19 = vld [vmem:[%s12184_s25 + $0x8] sm:$0xff]   ;;  %v11789_v21 = vld [vmem:[%s12184_s25 + $0x10] sm:$0xff]   ;;  %v11790_v23 = vld [vmem:[%s12184_s25 + $0x18] sm:$0xff]  }
  0x17   : > { %v11791_v24 = vld [vmem:[%s12184_s25 + $0x20] sm:$0xff]   ;;  %v11792_v25 = vld [vmem:[%s12184_s25 + $0x28] sm:$0xff]   ;;  %v11793_v26 = vld [vmem:[%s12184_s25 + $0x30] sm:$0xff]  }
  0x18   : > { %11308 = vmatpush3.bf16.msra.mxu0 %v11775_v2  ;;  %11709 = vmatpush3.bf16.msra.mxu1 %v11775_v2  ;;  %v11794_v27 = vld [vmem:[%s12184_s25 + $0x38] sm:$0xff]   ;;  %v16309_v2 = vlaneseq  ;;  %s11102_s25 = sshll.u32 %s16981_s27, 9 }
  0x19   : > { %11309 = vmatprep.subr.bf16.mxu0 %v11776_v4  ;;  %11706 = vmatprep.subr.bf16.mxu1 %v11776_v4  ;;  %s15841_s10 = scalar_lea.vmem %s16308_s8, %s11102_s25 }
  0x1c   : > { %11310 = vmatpush3.bf16.msra.mxu0 %v11776_v4  ;;  %11710 = vmatpush3.bf16.msra.mxu1 %v11776_v4  ;;  %v12089_v4 = vmov 1934713408  }
  0x1d   : > { %11327 = vmatprep.subr.bf16.mxu1 %v11781_v6  ;;  %11351 = vmatprep.subr.bf16.mxu0 %v11797_v17  ;;  %v907_v5 = vunpack.c.l.s4 %v12089_v4 }
  0x1f   : > { %11312 = vmatmul.mubr.msk.bf16.vlgmr.msra.gmra.mrb[0].mxu0 %vm590_vm0, %v11778_v7  ;;  %11320 = vmatmul.mubr.msk.bf16.vlgmr.msra.gmra.mrb[0].mxu1 %vm590_vm0, %v11780_v8  ;;  %v876_v7 = vunpack.c.0.s8 %v875_v1  ;;  %v878_v8 = vshrl.u32 %v16309_v2, 7 }
  0x20   : > { %11328 = vmatpush3.bf16.msra.mxu1 %v11781_v6  ;;  %11323 = vmatprep.mubr.msk.bf16.mxu1 %vm590_vm0, %v11783_v9 }
  0x21   : > { %11329 = vmatprep.subr.bf16.mxu1 %v11782_v10  ;;  %11315 = vmatprep.mubr.msk.bf16.mxu0 %vm590_vm0, %v11795_v15 }
  0x22   : > { %11352 = vmatpush3.bf16.msra.mxu0 %v11797_v17 }
  0x23   : > { %11353 = vmatprep.subr.bf16.mxu0 %v11798_v18 }
  0x24   : > { %11330 = vmatpush3.bf16.msra.mxu1 %v11782_v10  ;;  %v908_v10 = vunpack.c.0.s8 %v907_v5 }
  0x25   : > { %11331 = vmatprep.subr.bf16.mxu1 %v11785_v11 }
  0x26   : > { %11354 = vmatpush3.bf16.msra.mxu0 %v11798_v18 }
  0x27   : > { %11324 = vmatmul.mubr.msk.bf16.gmra.mrb[4].mxu1 %vm590_vm0, %v11784_v12  ;;  %11316 = vmatmul.mubr.msk.bf16.gmra.mrb[4].mxu0 %vm590_vm0, %v11796_v16  ;;  %v12444_v16 = vsub.s32 %v908_v10, %v878_v8 }
  0x28   : > { %11332 = vmatpush3.bf16.msra.mxu1 %v11785_v11  ;;  %11335 = vmatprep.mubr.msk.bf16.mxu1 %vm590_vm0, %v11787_v14  ;;  %v12436_v11 = vsub.s32 %v876_v7, %v878_v8 }
  0x29   : > { %11333 = vmatprep.subr.bf16.mxu1 %v11786_v13  ;;  %11359 = vmatprep.mubr.msk.bf16.mxu0 %vm590_vm0, %v11787_v14  ;;  %16550 = vst [vmem:[#allocation20_spill] sm:$0xff] %v12444_v16 }
  0x2a   : > { %11355 = vmatprep.subr.bf16.mxu0 %v11799_v20 }
  0x2b   : > { %11356 = vmatpush3.bf16.msra.mxu0 %v11799_v20 }
  0x2c   : > { %11334 = vmatpush3.bf16.msra.mxu1 %v11786_v13  ;;  %11357 = vmatprep.subr.bf16.mxu0 %v11800_v22 }
  0x2f   : > { %11336 = vmatmul.mubr.msk.bf16.vlgmr.msra.gmra.mrb[8].mxu1 %vm590_vm0, %v11788_v19  ;;  %11358 = vmatpush3.bf16.msra.mxu0 %v11800_v22 }
  0x30   : > { %11339 = vmatprep.mubr.msk.bf16.mxu1 %vm590_vm0, %v11789_v21 }
  0x32   : > { %11360 = vmatmul.mubr.msk.bf16.vlgmr.msra.gmra.mrb[8].mxu0 %vm590_vm0, %v11788_v19 }
  0x33   : > { %11363 = vmatprep.mubr.msk.bf16.mxu0 %vm590_vm0, %v11789_v21 }
  0x37   : > { %11340 = vmatmul.mubr.msk.bf16.gmra.mrb[12].mxu1 %vm590_vm0, %v11790_v23 }
  0x38   : > { %11343 = vmatprep.mubr.msk.bf16.mxu1 %vm590_vm0, %v11791_v24 }
  0x3a   : > { %11364 = vmatmul.mubr.msk.bf16.gmra.mrb[12].mxu0 %vm590_vm0, %v11790_v23 }
  0x3b   : > { %11367 = vmatprep.mubr.msk.bf16.mxu0 %vm590_vm0, %v11791_v24 }
  0x3f   : > { %11344 = vmatmul.mubr.msk.bf16.gmra.mrb[16].mxu1 %vm590_vm0, %v11792_v25 }
  0x40   : > { %11347 = vmatprep.mubr.msk.bf16.mxu1 %vm590_vm0, %v11793_v26 }
  0x42   : > { %11368 = vmatmul.mubr.msk.bf16.gmra.mrb[16].mxu0 %vm590_vm0, %v11792_v25 }
  0x43   : > { %11371 = vmatprep.mubr.msk.bf16.mxu0 %vm590_vm0, %v11793_v26 }
  0x47   : > { %11348 = vmatmul.mubr.msk.bf16.gmra.mrb[20].mxu1 %vm590_vm0, %v11794_v27 }
  0x4a   : > { %11372 = vmatmul.mubr.msk.bf16.gmra.mrb[20].mxu0 %vm590_vm0, %v11794_v27 }
  0xf2   : > { %v12243_v28 = vpop.f32.mrb[0].mxu0  ;;  %v12245_v29 = vpop.f32.mrb[0].mxu1 }
  0xf3   : > { %16533 = vst [vmem:[#allocation3_spill] sm:$0xff] %v12245_v29  ;;  %732 = vrot.lane.b32.xlu0 %v12243_v28, %s12085_s22  ;;  %v12249_v30 = vpop.f32.mrb[1].mxu0  ;;  %v12251_v31 = vpop.f32.mrb[1].mxu1 }
  0xf4   : > { %16534 = vst [vmem:[#allocation4_spill] sm:$0xff] %v12251_v31  ;;  %v12253_v32 = vpop.f32.mrb[2].mxu0  ;;  %v12255_v33 = vpop.f32.mrb[2].mxu1 }
  0xf5   : > { %16535 = vst [vmem:[#allocation5_spill] sm:$0xff] %v12255_v33  ;;  %734 = vrot.lane.b32.xlu1 %v12253_v32, %s12085_s22  ;;  %v12259_v34 = vpop.f32.mrb[3].mxu0  ;;  %v12261_v35 = vpop.f32.mrb[3].mxu1 }
  0xf6   : > { %16536 = vst [vmem:[#allocation6_spill] sm:$0xff] %v12261_v35 }
  0xf7   : > { %780 = vrot.lane.b32.xlu0 %v12243_v28, %s12086_s23 }
  0xf9   : > { %782 = vrot.lane.b32.xlu1 %v12253_v32, %s12086_s23 }
  0xfa   : > { %v12267_v36 = vpop.f32.mrb[4].mxu1  ;;  %v12269_v37 = vpop.f32.mrb[4].mxu0 }
  0xfb   : > { %16537 = vst [vmem:[#allocation7_spill] sm:$0xff] %v12267_v36  ;;  %16538 = vst [vmem:[#allocation8_spill] sm:$0xff] %v12269_v37  ;;  %828 = vrot.lane.b32.xlu0 %v12243_v28, %s12087_s24  ;;  %v12273_v38 = vpop.f32.mrb[5].mxu1  ;;  %v12275_v39 = vpop.f32.mrb[5].mxu0 }
  0xfc   : > { %16539 = vst [vmem:[#allocation9_spill] sm:$0xff] %v12273_v38  ;;  %16540 = vst [vmem:[#allocation10_spill] sm:$0xff] %v12275_v39  ;;  %v12277_v40 = vpop.f32.mrb[6].mxu1  ;;  %v12279_v41 = vpop.f32.mrb[6].mxu0 }
  0xfd   : > { %16541 = vst [vmem:[#allocation11_spill] sm:$0xff] %v12277_v40  ;;  %16542 = vst [vmem:[#allocation12_spill] sm:$0xff] %v12279_v41  ;;  %830 = vrot.lane.b32.xlu1 %v12253_v32, %s12087_s24  ;;  %v12283_v42 = vpop.f32.mrb[7].mxu1  ;;  %v12285_v43 = vpop.f32.mrb[7].mxu0 }
  0xfe   : > { %16543 = vst [vmem:[#allocation13_spill] sm:$0xff] %v12283_v42  ;;  %16544 = vst [vmem:[#allocation14_spill] sm:$0xff] %v12285_v43 }
  0xff   : > { %728 = vrot.lane.b32.xlu0 %v12249_v30, %s12085_s22 }
 0x101   : > { %730 = vrot.lane.b32.xlu1 %v12259_v34, %s12085_s22 }
 0x102   : > { %v12291_v44 = vpop.f32.mrb[8].mxu1 }
 0x103   : > { %776 = vrot.lane.b32.xlu0 %v12249_v30, %s12086_s23  ;;  %v12295_v45 = vpop.f32.mrb[9].mxu1 }
 0x104   : > { %v12297_v46 = vpop.f32.mrb[10].mxu1 }
 0x105   : > { %778 = vrot.lane.b32.xlu1 %v12259_v34, %s12086_s23  ;;  %v12301_v47 = vpop.f32.mrb[11].mxu1  ;;  %v12395_v60 = vpop.f32.mrb[8].mxu0 }
 0x106   : > { %16546 = vst [vmem:[#allocation16_spill] sm:$0xff] %v12395_v60  ;;  %v12399_v61 = vpop.f32.mrb[9].mxu0 }
 0x107   : > { %824 = vrot.lane.b32.xlu0 %v12249_v30, %s12087_s24  ;;  %16547 = vst [vmem:[#allocation17_spill] sm:$0xff] %v12399_v61  ;;  %v12409_v62 = vpop.f32.mrb[10].mxu0 }
 0x108   : > { %16548 = vst [vmem:[#allocation18_spill] sm:$0xff] %v12409_v62  ;;  %v12413_v63 = vpop.f32.mrb[11].mxu0 }
 0x109   : > { %826 = vrot.lane.b32.xlu1 %v12259_v34, %s12087_s24  ;;  %16549 = vst [vmem:[#allocation19_spill] sm:$0xff] %v12413_v63 }
 0x10a   : > { %v12307_v48 = vpop.f32.mrb[12].mxu1 }
 0x10b   : > { %3261 = vrot.lane.b32.xlu0 %v12291_v44, %s12085_s22  ;;  %v12311_v49 = vpop.f32.mrb[13].mxu1 }
 0x10c   : > { %v12313_v50 = vpop.f32.mrb[14].mxu1 }
 0x10d   : > { %3305 = vrot.lane.b32.xlu1 %v12295_v45, %s12086_s23  ;;  %v12317_v51 = vpop.f32.mrb[15].mxu1  ;;  %v12458_v0 = vpop.f32.mrb[12].mxu0 }
 0x10e   : > { %16551 = vst [vmem:[#allocation21_spill] sm:$0xff] %v12458_v0  ;;  %v12460_v5 = vpop.f32.mrb[13].mxu0 }
 0x10f   : > { %3309 = vrot.lane.b32.xlu0 %v12291_v44, %s12086_s23  ;;  %16552 = vst [vmem:[#allocation22_spill] sm:$0xff] %v12460_v5 }
 0x111   : > { %3263 = vrot.lane.b32.xlu1 %v12297_v46, %s12085_s22 }
 0x112   : > { %v12323_v52 = vpop.f32.mrb[16].mxu1 }
 0x113   : > { %3357 = vrot.lane.b32.xlu0 %v12291_v44, %s12087_s24  ;;  %v12327_v53 = vpop.f32.mrb[17].mxu1 }
 0x114   : > { %v12329_v54 = vpop.f32.mrb[18].mxu1 }
 0x115   : > { %3311 = vrot.lane.b32.xlu1 %v12297_v46, %s12086_s23  ;;  %v12333_v55 = vpop.f32.mrb[19].mxu1 }
 0x117   : > { %3257 = vrot.lane.b32.xlu0 %v12295_v45, %s12085_s22 }
 0x119   : > { %3359 = vrot.lane.b32.xlu1 %v12297_v46, %s12087_s24 }
 0x11a   : > { %v12339_v56 = vpop.f32.mrb[20].mxu1 }
 0x11b   : > { %3353 = vrot.lane.b32.xlu0 %v12295_v45, %s12087_s24  ;;  %v12343_v57 = vpop.f32.mrb[21].mxu1 }
 0x11c   : > { %v12345_v58 = vpop.f32.mrb[22].mxu1 }
 0x11d   : > { %3307 = vrot.lane.b32.xlu1 %v12301_v47, %s12086_s23  ;;  %v12349_v59 = vpop.f32.mrb[23].mxu1 }
 0x11e   : > { %16545 = vst [vmem:[#allocation15_spill] sm:$0xff] %v12349_v59 }
 0x11f   : > { %3259 = vrot.lane.b32.xlu0 %v12301_v47, %s12085_s22 }
 0x121   : > { %3355 = vrot.lane.b32.xlu1 %v12301_v47, %s12087_s24 }
 0x123   : > { %3269 = vrot.lane.b32.xlu0 %v12307_v48, %s12085_s22 }
 0x125   : > { %3271 = vrot.lane.b32.xlu1 %v12313_v50, %s12085_s22 }
 0x127   : > { %3317 = vrot.lane.b32.xlu0 %v12307_v48, %s12086_s23 }
 0x129   : > { %3319 = vrot.lane.b32.xlu1 %v12313_v50, %s12086_s23 }
 0x12b   : > { %3365 = vrot.lane.b32.xlu0 %v12307_v48, %s12087_s24 }
 0x12d   : > { %3367 = vrot.lane.b32.xlu1 %v12313_v50, %s12087_s24 }
 0x12f   : > { %3265 = vrot.lane.b32.xlu0 %v12311_v49, %s12085_s22 }
 0x131   : > { %3267 = vrot.lane.b32.xlu1 %v12317_v51, %s12085_s22 }
 0x133   : > { %3313 = vrot.lane.b32.xlu0 %v12311_v49, %s12086_s23 }
 0x135   : > { %3315 = vrot.lane.b32.xlu1 %v12317_v51, %s12086_s23 }
 0x137   : > { %3361 = vrot.lane.b32.xlu0 %v12311_v49, %s12087_s24 }
 0x139   : > { %3363 = vrot.lane.b32.xlu1 %v12317_v51, %s12087_s24 }
 0x13b   : > { %3277 = vrot.lane.b32.xlu0 %v12323_v52, %s12085_s22 }
 0x13d   : > { %3279 = vrot.lane.b32.xlu1 %v12329_v54, %s12085_s22 }
 0x13f   : > { %3325 = vrot.lane.b32.xlu0 %v12323_v52, %s12086_s23 }
 0x141   : > { %3327 = vrot.lane.b32.xlu1 %v12329_v54, %s12086_s23 }
 0x143   : > { %3373 = vrot.lane.b32.xlu0 %v12323_v52, %s12087_s24 }
 0x145   : > { %3375 = vrot.lane.b32.xlu1 %v12329_v54, %s12087_s24 }
 0x147   : > { %3273 = vrot.lane.b32.xlu0 %v12327_v53, %s12085_s22 }
 0x149   : > { %3275 = vrot.lane.b32.xlu1 %v12333_v55, %s12085_s22 }
 0x14b   : > { %3321 = vrot.lane.b32.xlu0 %v12327_v53, %s12086_s23 }
 0x14d   : > { %3323 = vrot.lane.b32.xlu1 %v12333_v55, %s12086_s23 }
 0x14f   : > { %3369 = vrot.lane.b32.xlu0 %v12327_v53, %s12087_s24 }
 0x151   : > { %3371 = vrot.lane.b32.xlu1 %v12333_v55, %s12087_s24 }
 0x153   : > { %3285 = vrot.lane.b32.xlu0 %v12339_v56, %s12085_s22 }
 0x155   : > { %3287 = vrot.lane.b32.xlu1 %v12345_v58, %s12085_s22 }
 0x157   : > { %3333 = vrot.lane.b32.xlu0 %v12339_v56, %s12086_s23 }
 0x159   : > { %3335 = vrot.lane.b32.xlu1 %v12345_v58, %s12086_s23 }
 0x15b   : > { %3381 = vrot.lane.b32.xlu0 %v12339_v56, %s12087_s24 }
 0x15d   : > { %3383 = vrot.lane.b32.xlu1 %v12345_v58, %s12087_s24 }
 0x15f   : > { %3281 = vrot.lane.b32.xlu0 %v12343_v57, %s12085_s22 }
 0x161   : > { %3283 = vrot.lane.b32.xlu1 %v12349_v59, %s12085_s22 }
 0x163   : > { %3329 = vrot.lane.b32.xlu0 %v12343_v57, %s12086_s23 }
 0x165   : > { %v733_v3 = vpop.permute.xlu0 %732  ;;  %3331 = vrot.lane.b32.xlu1 %v12349_v59, %s12086_s23 }
 0x167   : > { %3377 = vrot.lane.b32.xlu0 %v12343_v57, %s12087_s24  ;;  %v735_v6 = vpop.permute.xlu1 %734 }
 0x169   : > { %v781_v9 = vpop.permute.xlu0 %780  ;;  %3379 = vrot.lane.b32.xlu1 %v12349_v59, %s12087_s24 }
 0x16a   : > { %v1008_v12 = vcombine.low %v12243_v28, %v781_v9  ;;  %v1009_v13 = vcombine.high %v12243_v28, %v781_v9 }
 0x16b   : > { %v783_v14 = vpop.permute.xlu1 %782  ;;  %736 = vrot.lane.b32.xlu0 %v12275_v39, %s12085_s22 }
 0x16c   : > { %v1016_v19 = vrot.slane %v1008_v12, %v12436_v11  ;;  %v1023_v20 = vrot.slane %v1009_v13, %v12436_v11  ;;  %v1076_v21 = vcombine.low %v12253_v32, %v783_v14  ;;  %v1077_v22 = vcombine.high %v12253_v32, %v783_v14 }
 0x16d   : > { %v829_v15 = vpop.permute.xlu0 %828  ;;  %738 = vrot.lane.b32.xlu1 %v12285_v43, %s12085_s22 }
 0x16e   : > { %v1024_v17 = vcombine.low %v733_v3, %v829_v15  ;;  %v1025_v18 = vcombine.high %v733_v3, %v829_v15  ;;  %v1084_v7 = vrot.slane %v1076_v21, %v12436_v11  ;;  %v1091_v8 = vrot.slane %v1077_v22, %v12436_v11 }
 0x16f   : > { %v831_v23 = vpop.permute.xlu1 %830  ;;  %784 = vrot.lane.b32.xlu0 %v12275_v39, %s12086_s23 }
 0x170   : > { %v1032_v24 = vrot.slane %v1024_v17, %v12436_v11  ;;  %v1039_v25 = vrot.slane %v1025_v18, %v12436_v11  ;;  %v1092_v26 = vcombine.low %v735_v6, %v831_v23  ;;  %v1093_v27 = vcombine.high %v735_v6, %v831_v23  ;;  %v12474_v17 = vpop.f32.mrb[14].mxu0 }
 0x171   : > { %v12454_v28 = vpop.permute.xlu0 %728  ;;  %786 = vrot.lane.b32.xlu1 %v12285_v43, %s12086_s23  ;;  %16553 = vst [vmem:[#allocation23_spill] sm:$0xff] %v12474_v17  ;;  %v12478_v23 = vpop.f32.mrb[15].mxu0 }
 0x172   : > { %v1040_v1 = vcombine.low %v1016_v19, %v1032_v24  ;;  %v1041_v3 = vcombine.high %v1016_v19, %v1032_v24  ;;  %v1056_v32 = vcombine.low %v1023_v20, %v1039_v25  ;;  %v1057_v4 = vcombine.high %v1023_v20, %v1039_v25  ;;  %16554 = vst [vmem:[#allocation24_spill] sm:$0xff] %v12478_v23 }
 0x173   : > { %v1100_v9 = vrot.slane %v1092_v26, %v12436_v11  ;;  %v1107_v6 = vrot.slane %v1093_v27, %v12436_v11  ;;  %v12466_v10 = vpop.permute.xlu1 %730  ;;  %832 = vrot.lane.b32.xlu0 %v12275_v39, %s12087_s24 }
 0x174   : > { %v1048_v12 = vrot.slane %v1040_v1, %v12444_v16  ;;  %v1055_v13 = vrot.slane %v1041_v3, %v12444_v16  ;;  %v1064_v14 = vrot.slane %v1056_v32, %v12444_v16  ;;  %v1071_v15 = vrot.slane %v1057_v4, %v12444_v16 }
 0x175   : > { %v1108_v18 = vcombine.low %v1084_v7, %v1100_v9  ;;  %v1109_v19 = vcombine.high %v1084_v7, %v1100_v9  ;;  %v1124_v20 = vcombine.low %v1091_v8, %v1107_v6  ;;  %v1125_v21 = vcombine.high %v1091_v8, %v1107_v6  ;;  %v777_v22 = vpop.permute.xlu0 %776  ;;  %834 = vrot.lane.b32.xlu1 %v12285_v43, %s12087_s24 }
 0x176   : > { %v2096_v24 = vcombine.low %v1048_v12, %v1055_v13  ;;  %v10904_v25 = vcombine.high %v1048_v12, %v1055_v13  ;;  %v2112_v26 = vcombine.low %v1064_v14, %v1071_v15  ;;  %v10905_v27 = vcombine.high %v1064_v14, %v1071_v15 }
 0x177   : > { %v1116_v1 = vrot.slane %v1108_v18, %v12444_v16  ;;  %v1123_v3 = vrot.slane %v1109_v19, %v12444_v16  ;;  %v1132_v32 = vrot.slane %v1124_v20, %v12444_v16  ;;  %v1139_v4 = vrot.slane %v1125_v21, %v12444_v16  ;;  %v779_v7 = vpop.permute.xlu1 %778  ;;  %740 = vrot.lane.b32.xlu0 %v12269_v37, %s12085_s22 }
 0x178   : > { %v2103_v8 = vrot.slane %v2096_v24, %v12436_v11  ;;  %v2111_v9 = vrot.slane %v10904_v25, %v12436_v11  ;;  %v2119_v6 = vrot.slane %v2112_v26, %v12436_v11  ;;  %v2127_v12 = vrot.slane %v10905_v27, %v12436_v11 }
 0x179   : > { %v2164_v13 = vcombine.low %v1116_v1, %v1123_v3  ;;  %v10906_v14 = vcombine.high %v1116_v1, %v1123_v3  ;;  %v2180_v15 = vcombine.low %v1132_v32, %v1139_v4  ;;  %v10907_v18 = vcombine.high %v1132_v32, %v1139_v4  ;;  %v825_v19 = vpop.permute.xlu0 %824  ;;  %742 = vrot.lane.b32.xlu1 %v12279_v41, %s12085_s22 }
 0x17a   : > { %v2128_v20 = vcombine.low %v2103_v8, %v2111_v9  ;;  %v2129_v21 = vcombine.high %v2103_v8, %v2111_v9  ;;  %v2144_v2 = vcombine.low %v2119_v6, %v2127_v12  ;;  %v2145_v43 = vcombine.high %v2119_v6, %v2127_v12 }
 0x17b   : > { %v2171_v24 = vrot.slane %v2164_v13, %v12436_v11  ;;  %v2179_v25 = vrot.slane %v10906_v14, %v12436_v11  ;;  %v2187_v26 = vrot.slane %v2180_v15, %v12436_v11  ;;  %v2195_v27 = vrot.slane %v10907_v18, %v12436_v11  ;;  %v827_v39 = vpop.permute.xlu1 %826  ;;  %788 = vrot.lane.b32.xlu0 %v12269_v37, %s12086_s23 }
 0x17c   : > { %v12499_v1 = vrot.slane %v2128_v20, %v12444_v16  ;;  %v12502_v3 = vrot.slane %v2129_v21, %v12444_v16  ;;  %v12505_v32 = vrot.slane %v2144_v2, %v12444_v16  ;;  %v12508_v4 = vrot.slane %v2145_v43, %v12444_v16 }
 0x17d   : > { %v2196_v8 = vcombine.low %v2171_v24, %v2179_v25  ;;  %v2197_v9 = vcombine.high %v2171_v24, %v2179_v25  ;;  %v2212_v6 = vcombine.low %v2187_v26, %v2195_v27  ;;  %v2213_v12 = vcombine.high %v2187_v26, %v2195_v27  ;;  %v12510_v13 = vpop.permute.xlu0 %3261  ;;  %790 = vrot.lane.b32.xlu1 %v12279_v41, %s12086_s23 }
 0x17e   : > { %16555 = vst [vmem:[#allocation25_spill] sm:$0xff] %v12499_v1  ;;  %16556 = vst [vmem:[#allocation26_spill] sm:$0xff] %v12502_v3  ;;  %v872_v14 = vcombine.low %v12249_v30, %v777_v22  ;;  %v873_v15 = vcombine.high %v12249_v30, %v777_v22  ;;  %v940_v18 = vcombine.low %v12259_v34, %v779_v7 }
 0x17f   : > { %16557 = vst [vmem:[#allocation27_spill] sm:$0xff] %v12505_v32  ;;  %16558 = vst [vmem:[#allocation28_spill] sm:$0xff] %v12508_v4  ;;  %v941_v2 = vcombine.high %v12259_v34, %v779_v7  ;;  %v12519_v43 = vrot.slane %v2196_v8, %v12444_v16  ;;  %v12522_v20 = vrot.slane %v2197_v9, %v12444_v16  ;;  %v3306_v25 = vpop.permute.xlu1 %3305  ;;  %836 = vrot.lane.b32.xlu0 %v12269_v37, %s12087_s24 }
 0x180   : > { %v12525_v21 = vrot.slane %v2212_v6, %v12444_v16  ;;  %v12528_v24 = vrot.slane %v2213_v12, %v12444_v16  ;;  %v880_v30 = vrot.slane %v872_v14, %v12436_v11  ;;  %v887_v34 = vrot.slane %v873_v15, %v12436_v11 }
 0x181   : > { %16559 = vst [vmem:[#allocation29_spill] sm:$0xff] %v12519_v43  ;;  %16560 = vst [vmem:[#allocation30_spill] sm:$0xff] %v12522_v20  ;;  %v948_v22 = vrot.slane %v940_v18, %v12436_v11  ;;  %v955_v7 = vrot.slane %v941_v2, %v12436_v11  ;;  %v888_v26 = vcombine.low %v12454_v28, %v825_v19  ;;  %v3310_v6 = vpop.permute.xlu0 %3309  ;;  %838 = vrot.lane.b32.xlu1 %v12279_v41, %s12087_s24 }
 0x182   : > { %16561 = vst [vmem:[#allocation31_spill] sm:$0xff] %v12525_v21  ;;  %16562 = vst [vmem:[#allocation32_spill] sm:$0xff] %v12528_v24  ;;  %v889_v27 = vcombine.high %v12454_v28, %v825_v19  ;;  %v956_v8 = vcombine.low %v12466_v10, %v827_v39  ;;  %v957_v9 = vcombine.high %v12466_v10, %v827_v39 }
 0x183   : > { %v3401_v12 = vcombine.low %v12295_v45, %v3306_v25  ;;  %v3402_v14 = vcombine.high %v12295_v45, %v3306_v25  ;;  %v3537_v15 = vcombine.low %v12291_v44, %v3310_v6  ;;  %v3538_v18 = vcombine.high %v12291_v44, %v3310_v6  ;;  %v12550_v10 = vpop.permute.xlu1 %3263  ;;  %744 = vrot.lane.b32.xlu0 %v12251_v31, %s12085_s22 }
 0x184   : > { %v896_v2 = vrot.slane %v888_v26, %v12436_v11  ;;  %v903_v28 = vrot.slane %v889_v27, %v12436_v11  ;;  %v964_v19 = vrot.slane %v956_v8, %v12436_v11  ;;  %v971_v39 = vrot.slane %v957_v9, %v12436_v11 }
 0x185   : > { %v12555_v20 = vrot.slane %v3401_v12, %v12436_v11  ;;  %v12558_v45 = vrot.slane %v3402_v14, %v12436_v11  ;;  %v12561_v44 = vrot.slane %v3537_v15, %v12436_v11  ;;  %v12564_v25 = vrot.slane %v3538_v18, %v12436_v11  ;;  %v3358_v6 = vpop.permute.xlu0 %3357  ;;  %746 = vrot.lane.b32.xlu1 %v12261_v35, %s12085_s22 }
 0x186   : > { %v904_v26 = vcombine.low %v880_v30, %v896_v2  ;;  %v905_v27 = vcombine.high %v880_v30, %v896_v2  ;;  %v920_v8 = vcombine.low %v887_v34, %v903_v28  ;;  %v921_v9 = vcombine.high %v887_v34, %v903_v28 }
 0x187   : > { %v972_v24 = vcombine.low %v948_v22, %v964_v19  ;;  %v973_v12 = vcombine.high %v948_v22, %v964_v19  ;;  %v988_v3 = vcombine.low %v955_v7, %v971_v39  ;;  %v989_v4 = vcombine.high %v955_v7, %v971_v39  ;;  %v3312_v21 = vpop.permute.xlu1 %3311  ;;  %792 = vrot.lane.b32.xlu0 %v12251_v31, %s12086_s23 }
 0x188   : > { %v912_v14 = vrot.slane %v904_v26, %v12444_v16  ;;  %v919_v15 = vrot.slane %v905_v27, %v12444_v16  ;;  %v928_v43 = vrot.slane %v920_v8, %v12444_v16  ;;  %v935_v18 = vrot.slane %v921_v9, %v12444_v16 }
 0x189   : > { %v980_v30 = vrot.slane %v972_v24, %v12444_v16  ;;  %v987_v34 = vrot.slane %v973_v12, %v12444_v16  ;;  %v996_v22 = vrot.slane %v988_v3, %v12444_v16  ;;  %v1003_v7 = vrot.slane %v989_v4, %v12444_v16  ;;  %v3258_v26 = vpop.permute.xlu0 %3257  ;;  %794 = vrot.lane.b32.xlu1 %v12261_v35, %s12086_s23 }
 0x18a   : > { %v1960_v2 = vcombine.low %v912_v14, %v919_v15  ;;  %v10900_v28 = vcombine.high %v912_v14, %v919_v15  ;;  %v1976_v19 = vcombine.low %v928_v43, %v935_v18  ;;  %v10901_v39 = vcombine.high %v928_v43, %v935_v18 }
 0x18b   : > { %v2028_v27 = vcombine.low %v980_v30, %v987_v34  ;;  %v10902_v8 = vcombine.high %v980_v30, %v987_v34  ;;  %v2044_v9 = vcombine.low %v996_v22, %v1003_v7  ;;  %v10903_v1 = vcombine.high %v996_v22, %v1003_v7  ;;  %v3360_v43 = vpop.permute.xlu1 %3359  ;;  %840 = vrot.lane.b32.xlu0 %v12251_v31, %s12087_s24 }
 0x18c   : > { %v12581_v24 = vrot.slane %v1960_v2, %v12436_v11  ;;  %v12584_v12 = vrot.slane %v10900_v28, %v12436_v11  ;;  %v12587_v3 = vrot.slane %v1976_v19, %v12436_v11  ;;  %v12590_v4 = vrot.slane %v10901_v39, %v12436_v11 }
 0x18d   : > { %v12595_v14 = vrot.slane %v2028_v27, %v12436_v11  ;;  %v12598_v15 = vrot.slane %v10902_v8, %v12436_v11  ;;  %v12601_v18 = vrot.slane %v2044_v9, %v12436_v11  ;;  %v12604_v30 = vrot.slane %v10903_v1, %v12436_v11  ;;  %v3354_v28 = vpop.permute.xlu0 %3353  ;;  %842 = vrot.lane.b32.xlu1 %v12261_v35, %s12087_s24 }
 0x18e   : > { %16563 = vst [vmem:[#allocation33_spill] sm:$0xff] %v12581_v24  ;;  %16564 = vst [vmem:[#allocation34_spill] sm:$0xff] %v12584_v12  ;;  %v3553_v34 = vcombine.low %v12510_v13, %v3358_v6  ;;  %v3554_v22 = vcombine.high %v12510_v13, %v3358_v6  ;;  %v3605_v7 = vcombine.low %v12297_v46, %v3312_v21 }
 0x18f   : > { %16565 = vst [vmem:[#allocation35_spill] sm:$0xff] %v12587_v3  ;;  %16566 = vst [vmem:[#allocation36_spill] sm:$0xff] %v12590_v4  ;;  %v3606_v2 = vcombine.high %v12297_v46, %v3312_v21  ;;  %v3621_v19 = vcombine.low %v12550_v10, %v3360_v43  ;;  %v3622_v39 = vcombine.high %v12550_v10, %v3360_v43  ;;  %v12618_v32 = vpop.permute.xlu1 %3307  ;;  %748 = vrot.lane.b32.xlu0 %v12245_v29, %s12085_s22 }
 0x190   : > { %16567 = vst [vmem:[#allocation37_spill] sm:$0xff] %v12595_v14  ;;  %16568 = vst [vmem:[#allocation38_spill] sm:$0xff] %v12598_v15  ;;  %v3417_v27 = vcombine.low %v3258_v26, %v3354_v28  ;;  %v3418_v8 = vcombine.high %v3258_v26, %v3354_v28  ;;  %v3561_v1 = vrot.slane %v3553_v34, %v12436_v11  ;;  %v12634_v28 = vpop.f32.mrb[16].mxu0 }
 0x191   : > { %16569 = vst [vmem:[#allocation39_spill] sm:$0xff] %v12601_v18  ;;  %16570 = vst [vmem:[#allocation40_spill] sm:$0xff] %v12604_v30  ;;  %v3568_v9 = vrot.slane %v3554_v22, %v12436_v11  ;;  %v3613_v13 = vrot.slane %v3605_v7, %v12436_v11  ;;  %v3620_v6 = vrot.slane %v3606_v2, %v12436_v11  ;;  %v12630_v2 = vpop.permute.xlu0 %3259  ;;  %750 = vrot.lane.b32.xlu1 %v12255_v33, %s12085_s22 }
 0x192   : > { %v3629_v46 = vrot.slane %v3621_v19, %v12436_v11  ;;  %v3636_v21 = vrot.slane %v3622_v39, %v12436_v11  ;;  %v3425_v10 = vrot.slane %v3417_v27, %v12436_v11  ;;  %v3432_v26 = vrot.slane %v3418_v8, %v12436_v11  ;;  %16571 = vst [vmem:[#allocation41_spill] sm:$0xff] %v12634_v28  ;;  %v12636_v8 = vpop.f32.mrb[17].mxu0 }
 0x193   : > { %v3569_v43 = vcombine.low %v12561_v44, %v3561_v1  ;;  %v3570_v34 = vcombine.high %v12561_v44, %v3561_v1  ;;  %v3585_v22 = vcombine.low %v12564_v25, %v3568_v9  ;;  %v3586_v7 = vcombine.high %v12564_v25, %v3568_v9  ;;  %16572 = vst [vmem:[#allocation42_spill] sm:$0xff] %v12636_v8  ;;  %v12642_v9 = vpop.permute.xlu1 %3355 }
 0x194   : > { %v3637_v19 = vcombine.low %v3613_v13, %v3629_v46  ;;  %v3638_v39 = vcombine.high %v3613_v13, %v3629_v46  ;;  %v3653_v27 = vcombine.low %v3620_v6, %v3636_v21  ;;  %v3654_v35 = vcombine.high %v3620_v6, %v3636_v21  ;;  %796 = vrot.lane.b32.xlu0 %v12245_v29, %s12086_s23  ;;  %v12650_v21 = vpop.f32.mrb[18].mxu0 }
 0x195   : > { %v3577_v31 = vrot.slane %v3569_v43, %v12444_v16  ;;  %v3584_v44 = vrot.slane %v3570_v34, %v12444_v16  ;;  %v3593_v1 = vrot.slane %v3585_v22, %v12444_v16  ;;  %v3600_v25 = vrot.slane %v3586_v7, %v12444_v16  ;;  %16573 = vst [vmem:[#allocation43_spill] sm:$0xff] %v12650_v21  ;;  %v12652_v7 = vpop.permute.xlu0 %3269  ;;  %v12656_v28 = vpop.f32.mrb[19].mxu0 }
 0x196   : > { %v3645_v41 = vrot.slane %v3637_v19, %v12444_v16  ;;  %v3652_v13 = vrot.slane %v3638_v39, %v12444_v16  ;;  %v3661_v6 = vrot.slane %v3653_v27, %v12444_v16  ;;  %v3668_v46 = vrot.slane %v3654_v35, %v12444_v16  ;;  %798 = vrot.lane.b32.xlu1 %v12255_v33, %s12086_s23 }
 0x197   : > { %v4625_v43 = vcombine.low %v3577_v31, %v3584_v44  ;;  %v10956_v34 = vcombine.high %v3577_v31, %v3584_v44  ;;  %v4641_v22 = vcombine.low %v3593_v1, %v3600_v25  ;;  %v10957_v37 = vcombine.high %v3593_v1, %v3600_v25  ;;  %16574 = vst [vmem:[#allocation44_spill] sm:$0xff] %v12656_v28  ;;  %v12670_v1 = vpop.permute.xlu1 %3271 }
 0x198   : > { %v4693_v19 = vcombine.low %v3645_v41, %v3652_v13  ;;  %v10958_v59 = vcombine.high %v3645_v41, %v3652_v13  ;;  %v4709_v39 = vcombine.low %v3661_v6, %v3668_v46  ;;  %v10959_v8 = vcombine.high %v3661_v6, %v3668_v46  ;;  %844 = vrot.lane.b32.xlu0 %v12245_v29, %s12087_s24 }
 0x199   : > { %v12659_v27 = vrot.slane %v4625_v43, %v12436_v11  ;;  %v12662_v35 = vrot.slane %v10956_v34, %v12436_v11  ;;  %v12665_v31 = vrot.slane %v4641_v22, %v12436_v11  ;;  %v12668_v44 = vrot.slane %v10957_v37, %v12436_v11  ;;  %v3318_v22 = vpop.permute.xlu0 %3317 }
 0x19a   : > { %v12675_v41 = vrot.slane %v4693_v19, %v12436_v11  ;;  %v12678_v25 = vrot.slane %v10958_v59, %v12436_v11  ;;  %v12681_v13 = vrot.slane %v4709_v39, %v12436_v11  ;;  %v12684_v6 = vrot.slane %v10959_v8, %v12436_v11  ;;  %846 = vrot.lane.b32.xlu1 %v12255_v33, %s12087_s24 }
 0x19b   : > { %16575 = vst [vmem:[#allocation45_spill] sm:$0xff] %v12659_v27  ;;  %16576 = vst [vmem:[#allocation46_spill] sm:$0xff] %v12662_v35  ;;  %v3433_v37 = vcombine.low %v12555_v20, %v3425_v10  ;;  %v3434_v46 = vcombine.high %v12555_v20, %v3425_v10  ;;  %v3449_v43 = vcombine.low %v12558_v45, %v3432_v26  ;;  %v3320_v33 = vpop.permute.xlu1 %3319 }
 0x19c   : > { %16577 = vst [vmem:[#allocation47_spill] sm:$0xff] %v12665_v31  ;;  %16578 = vst [vmem:[#allocation48_spill] sm:$0xff] %v12668_v44  ;;  %v3450_v34 = vcombine.high %v12558_v45, %v3432_v26  ;;  %v3469_v59 = vcombine.low %v12301_v47, %v12618_v32  ;;  %v3470_v19 = vcombine.high %v12301_v47, %v12618_v32  ;;  %752 = vrot.lane.b32.xlu0 %v12273_v38, %s12085_s22 }
 0x19d   : > { %16579 = vst [vmem:[#allocation49_spill] sm:$0xff] %v12675_v41  ;;  %16580 = vst [vmem:[#allocation50_spill] sm:$0xff] %v12678_v25  ;;  %v1992_v8 = vcombine.low %v12581_v24, %v12584_v12  ;;  %v2008_v20 = vcombine.low %v12587_v3, %v12590_v4  ;;  %v3441_v10 = vrot.slane %v3433_v37, %v12444_v16 }
 0x19e   : > { %v3448_v45 = vrot.slane %v3434_v46, %v12444_v16  ;;  %v3457_v26 = vrot.slane %v3449_v43, %v12444_v16  ;;  %v3464_v39 = vrot.slane %v3450_v34, %v12444_v16  ;;  %v3477_v47 = vrot.slane %v3469_v59, %v12436_v11  ;;  %v3366_v43 = vpop.permute.xlu0 %3365  ;;  %754 = vrot.lane.b32.xlu1 %v12283_v42, %s12085_s22 }
 0x19f   : > { %v3484_v32 = vrot.slane %v3470_v19, %v12436_v11  ;;  %v2000_v24 = vrot.slane %v1992_v8, %v12444_v16  ;;  %v2016_v3 = vrot.slane %v2008_v20, %v12444_v16  ;;  %v2060_v29 = vcombine.low %v12595_v14, %v12598_v15 }
 0x1a0   : > { %v4489_v37 = vcombine.low %v3441_v10, %v3448_v45  ;;  %v10952_v4 = vcombine.high %v3441_v10, %v3448_v45  ;;  %v4505_v46 = vcombine.low %v3457_v26, %v3464_v39  ;;  %v10953_v12 = vcombine.high %v3457_v26, %v3464_v39  ;;  %v12728_v26 = vpop.permute.xlu1 %3367  ;;  %800 = vrot.lane.b32.xlu0 %v12273_v38, %s12086_s23 }
 0x1a1   : > { %v2024_v34 = vcombine.low %v2000_v24, %v2016_v3  ;;  %v2076_v59 = vcombine.low %v12601_v18, %v12604_v30  ;;  %v2025_v19 = vcombine.high %v2000_v24, %v2016_v3  ;;  %v2068_v39 = vrot.slane %v2060_v29, %v12444_v16 }
 0x1a2   : > { %v12717_v8 = vrot.slane %v4489_v37, %v12436_v11  ;;  %v12720_v20 = vrot.slane %v10952_v4, %v12436_v11  ;;  %v12723_v10 = vrot.slane %v4505_v46, %v12436_v11  ;;  %v12726_v45 = vrot.slane %v10953_v12, %v12436_v11  ;;  %v12742_v30 = vpop.permute.xlu0 %3265  ;;  %802 = vrot.lane.b32.xlu1 %v12283_v42, %s12086_s23 }
 0x1a3   : > { %v2084_v24 = vrot.slane %v2076_v59, %v12444_v16  ;;  %v3485_v3 = vcombine.low %v12630_v2, %v12642_v9  ;;  %v3486_v4 = vcombine.high %v12630_v2, %v12642_v9  ;;  %v3809_v37 = vcombine.low %v12307_v48, %v3318_v22 }
 0x1a4   : > { %16581 = vst [vmem:[#allocation51_spill] sm:$0xff] %v12723_v10  ;;  %16582 = vst [vmem:[#allocation52_spill] sm:$0xff] %v12726_v45  ;;  %v3810_v12 = vcombine.high %v12307_v48, %v3318_v22  ;;  %v3877_v46 = vcombine.low %v12313_v50, %v3320_v33  ;;  %v3878_v18 = vcombine.high %v12313_v50, %v3320_v33  ;;  %v12754_v33 = vpop.permute.xlu1 %3267  ;;  %848 = vrot.lane.b32.xlu0 %v12273_v38, %s12087_s24 }
 0x1a5   : > { %v2092_v29 = vcombine.low %v2068_v39, %v2084_v24  ;;  %v2093_v59 = vcombine.high %v2068_v39, %v2084_v24  ;;  %v3493_v14 = vrot.slane %v3485_v3, %v12436_v11  ;;  %v3500_v15 = vrot.slane %v3486_v4, %v12436_v11 }
 0x1a6   : > { %v3817_v2 = vrot.slane %v3809_v37, %v12436_v11  ;;  %v3824_v9 = vrot.slane %v3810_v12, %v12436_v11  ;;  %v3885_v48 = vrot.slane %v3877_v46, %v12436_v11  ;;  %v12752_v22 = vrot.slane %v3878_v18, %v12436_v11  ;;  %v12760_v28 = vpop.permute.xlu0 %3313  ;;  %850 = vrot.lane.b32.xlu1 %v12283_v42, %s12087_s24 }
 0x1a7   : > { %v8042_v50 = vpack.c.bf16 %v2092_v29, %v2024_v34  ;;  %v8050_v39 = vpack.c.bf16 %v2093_v59, %v2025_v19  ;;  %v3501_v24 = vcombine.low %v3477_v47, %v3493_v14  ;;  %v3502_v3 = vcombine.high %v3477_v47, %v3493_v14 }
 0x1a8   : > { %v3517_v21 = vcombine.low %v3484_v32, %v3500_v15  ;;  %v3518_v4 = vcombine.high %v3484_v32, %v3500_v15  ;;  %v3825_v37 = vcombine.low %v12652_v7, %v3366_v43  ;;  %v3826_v12 = vcombine.high %v12652_v7, %v3366_v43  ;;  %v12774_v43 = vpop.permute.xlu1 %3315  ;;  %756 = vrot.lane.b32.xlu0 %v12267_v36, %s12085_s22 }
 0x1a9   : > { %11391 = vmatprep.mubr.msk.bf16.mxu1 %vm8106_vm1, %v8042_v50  ;;  %11423 = vmatprep.mubr.msk.bf16.mxu0 %vm8106_vm1, %v8050_v39  ;;  %v3509_v18 = vrot.slane %v3501_v24, %v12444_v16  ;;  %v3516_v34 = vrot.slane %v3502_v3, %v12444_v16  ;;  %v3893_v14 = vcombine.low %v12670_v1, %v12728_v26 }
 0x1aa   : > { %v3525_v15 = vrot.slane %v3517_v21, %v12444_v16  ;;  %v3532_v7 = vrot.slane %v3518_v4, %v12444_v16  ;;  %v3833_v47 = vrot.slane %v3825_v37, %v12436_v11  ;;  %v3840_v32 = vrot.slane %v3826_v12, %v12436_v11  ;;  %v12781_v3 = vpop.permute.xlu0 %3361  ;;  %758 = vrot.lane.b32.xlu1 %v12277_v40, %s12085_s22 }
 0x1ab   : > { %v4557_v19 = vcombine.low %v3509_v18, %v3516_v34  ;;  %v10954_v46 = vcombine.high %v3509_v18, %v3516_v34  ;;  %v3894_v29 = vcombine.high %v12670_v1, %v12728_v26  ;;  %v3901_v59 = vrot.slane %v3893_v14, %v12436_v11 }
 0x1ac   : > { %v4573_v50 = vcombine.low %v3525_v15, %v3532_v7  ;;  %v10955_v21 = vcombine.high %v3525_v15, %v3532_v7  ;;  %v3841_v39 = vcombine.low %v3817_v2, %v3833_v47  ;;  %v3842_v24 = vcombine.high %v3817_v2, %v3833_v47  ;;  %v12799_v14 = vpop.permute.xlu1 %3363  ;;  %804 = vrot.lane.b32.xlu0 %v12267_v36, %s12086_s23 }
 0x1ad   : > { %v12786_v4 = vrot.slane %v4557_v19, %v12436_v11  ;;  %v12789_v37 = vrot.slane %v10954_v46, %v12436_v11  ;;  %v3857_v12 = vcombine.low %v3824_v9, %v3840_v32  ;;  %v3858_v18 = vcombine.high %v3824_v9, %v3840_v32 }
 0x1ae   : > { %v12792_v1 = vrot.slane %v4573_v50, %v12436_v11  ;;  %v12795_v26 = vrot.slane %v10955_v21, %v12436_v11  ;;  %v3849_v2 = vrot.slane %v3841_v39, %v12444_v16  ;;  %v3856_v34 = vrot.slane %v3842_v24, %v12444_v16  ;;  %v12808_v21 = vpop.permute.xlu0 %3277  ;;  %806 = vrot.lane.b32.xlu1 %v12277_v40, %s12086_s23 }
 0x1af   : > { %16583 = vst [vmem:[#allocation53_spill] sm:$0xff] %v12786_v4  ;;  %16584 = vst [vmem:[#allocation54_spill] sm:$0xff] %v12789_v37  ;;  %v3865_v15 = vrot.slane %v3857_v12, %v12444_v16  ;;  %v3872_v7 = vrot.slane %v3858_v18, %v12444_v16  ;;  %v3908_v9 = vrot.slane %v3894_v29, %v12436_v11 }
 0x1b0   : > { %16585 = vst [vmem:[#allocation55_spill] sm:$0xff] %v12792_v1  ;;  %16586 = vst [vmem:[#allocation56_spill] sm:$0xff] %v12795_v26  ;;  %v3909_v47 = vcombine.low %v3885_v48, %v3901_v59  ;;  %v4897_v32 = vcombine.low %v3849_v2, %v3856_v34  ;;  %v10964_v19 = vcombine.high %v3849_v2, %v3856_v34  ;;  %852 = vrot.lane.b32.xlu0 %v12267_v36, %s12087_s24 }
 0x1b1   : > { %v3910_v46 = vcombine.high %v3885_v48, %v3901_v59  ;;  %v3673_v50 = vcombine.low %v12311_v49, %v12760_v28  ;;  %v4913_v39 = vcombine.low %v3865_v15, %v3872_v7  ;;  %v10965_v24 = vcombine.high %v3865_v15, %v3872_v7 }
 0x1b2   : > { %v3917_v12 = vrot.slane %v3909_v47, %v12444_v16  ;;  %v3925_v18 = vcombine.low %v12752_v22, %v3908_v9  ;;  %v12815_v29 = vrot.slane %v4897_v32, %v12436_v11  ;;  %v12818_v2 = vrot.slane %v10964_v19, %v12436_v11  ;;  %v12833_v32 = vpop.permute.xlu1 %3279  ;;  %v12837_v36 = vpop.permute.xlu0 %3325  ;;  %854 = vrot.lane.b32.xlu1 %v12277_v40, %s12087_s24 }
 0x1b3   : > { %v3924_v48 = vrot.slane %v3910_v46, %v12444_v16  ;;  %v3926_v59 = vcombine.high %v12752_v22, %v3908_v9  ;;  %v12825_v34 = vrot.slane %v4913_v39, %v12436_v11  ;;  %v12828_v15 = vrot.slane %v10965_v24, %v12436_v11 }
 0x1b4   : > { %16587 = vst [vmem:[#allocation57_spill] sm:$0xff] %v12815_v29  ;;  %16588 = vst [vmem:[#allocation58_spill] sm:$0xff] %v12818_v2  ;;  %v3933_v7 = vrot.slane %v3925_v18, %v12444_v16  ;;  %v3674_v47 = vcombine.high %v12311_v49, %v12760_v28  ;;  %v3681_v9 = vrot.slane %v3673_v50, %v12436_v11  ;;  %5724 = vrot.lane.b32.xlu0 %v12413_v63, %s12085_s22 }
 0x1b5   : > { %16589 = vst [vmem:[#allocation59_spill] sm:$0xff] %v12825_v34  ;;  %16590 = vst [vmem:[#allocation60_spill] sm:$0xff] %v12828_v15  ;;  %v3940_v19 = vrot.slane %v3926_v59, %v12444_v16  ;;  %v4965_v46 = vcombine.low %v3917_v12, %v3924_v48  ;;  %v10966_v22 = vcombine.high %v3917_v12, %v3924_v48 }
 0x1b6   : > { %v3688_v39 = vrot.slane %v3674_v47, %v12436_v11  ;;  %v3741_v24 = vcombine.low %v12317_v51, %v12774_v43  ;;  %v3742_v49 = vcombine.high %v12317_v51, %v12774_v43  ;;  %v4521_v28 = vcombine.low %v12717_v8, %v12720_v20  ;;  %5722 = vrot.lane.b32.xlu1 %v12399_v61, %s12085_s22  ;;  %v12886_v40 = vpop.permute.xlu1 %3327 }
 0x1b7   : > { %v12849_v12 = vrot.slane %v4965_v46, %v12436_v11  ;;  %v12852_v50 = vrot.slane %v10966_v22, %v12436_v11  ;;  %v4981_v18 = vcombine.low %v3933_v7, %v3940_v19  ;;  %v10967_v48 = vcombine.high %v3933_v7, %v3940_v19 }
 0x1b8   : > { %v12857_v59 = vrot.slane %v3741_v24, %v12436_v11  ;;  %v12860_v47 = vrot.slane %v3742_v49, %v12436_v11  ;;  %v4529_v51 = vrot.slane %v4521_v28, %v12444_v16  ;;  %v4537_v43 = vcombine.low %v12723_v10, %v12726_v45  ;;  %v12875_v24 = vpop.permute.xlu0 %3373  ;;  %5818 = vrot.lane.b32.xlu0 %v12399_v61, %s12087_s24 }
 0x1b9   : > { %16591 = vst [vmem:[#allocation61_spill] sm:$0xff] %v12849_v12  ;;  %16592 = vst [vmem:[#allocation62_spill] sm:$0xff] %v12852_v50  ;;  %v12866_v46 = vrot.slane %v4981_v18, %v12436_v11  ;;  %v12869_v22 = vrot.slane %v10967_v48, %v12436_v11  ;;  %v4589_v7 = vcombine.low %v12786_v4, %v12789_v37 }
 0x1ba   : > { %v4605_v19 = vcombine.low %v12792_v1, %v12795_v26  ;;  %v4545_v49 = vrot.slane %v4537_v43, %v12444_v16  ;;  %v3689_v28 = vcombine.low %v12742_v30, %v12781_v3  ;;  %v3690_v18 = vcombine.high %v12742_v30, %v12781_v3  ;;  %v12896_v26 = vpop.f32.mrb[20].mxu0  ;;  %5770 = vrot.lane.b32.xlu1 %v12399_v61, %s12086_s23 }
 0x1bb   : > { %v4657_v48 = vcombine.low %v12659_v27, %v12662_v35  ;;  %v4597_v42 = vrot.slane %v4589_v7, %v12444_v16  ;;  %v4673_v1 = vcombine.low %v12665_v31, %v12668_v44  ;;  %v4725_v43 = vcombine.low %v12675_v41, %v12678_v25  ;;  %16593 = vst [vmem:[#allocation63_spill] sm:$0xff] %v12896_v26  ;;  %v12904_v10 = vpop.f32.mrb[21].mxu0 }
 0x1bc   : > { %v4613_v38 = vrot.slane %v4605_v19, %v12444_v16  ;;  %v4553_v30 = vcombine.low %v4529_v51, %v4545_v49  ;;  %v4554_v3 = vcombine.high %v4529_v51, %v4545_v49  ;;  %v3697_v27 = vrot.slane %v3689_v28, %v12436_v11  ;;  %16594 = vst [vmem:[#allocation64_spill] sm:$0xff] %v12904_v10  ;;  %v12907_v45 = vpop.permute.xlu0 %3273 }
 0x1bd   : > { %v3704_v35 = vrot.slane %v3690_v18, %v12436_v11  ;;  %v4665_v19 = vrot.slane %v4657_v48, %v12444_v16  ;;  %v4681_v31 = vrot.slane %v4673_v1, %v12444_v16  ;;  %v4733_v18 = vrot.slane %v4725_v43, %v12444_v16  ;;  %5726 = vrot.lane.b32.xlu0 %v12395_v60, %s12085_s22  ;;  %v12915_v1 = vpop.permute.xlu1 %3375 }
 0x1be   : > { %v4621_v7 = vcombine.low %v4597_v42, %v4613_v38  ;;  %v4622_v4 = vcombine.high %v4597_v42, %v4613_v38  ;;  %v3705_v41 = vcombine.low %v3681_v9, %v3697_v27  ;;  %v3706_v25 = vcombine.high %v3681_v9, %v3697_v27  ;;  %5772 = vrot.lane.b32.xlu1 %v12413_v63, %s12086_s23 }
 0x1bf   : > { %v3721_v44 = vcombine.low %v3688_v39, %v3704_v35  ;;  %v3722_v37 = vcombine.high %v3688_v39, %v3704_v35  ;;  %v4689_v28 = vcombine.low %v4665_v19, %v4681_v31  ;;  %v4741_v39 = vcombine.low %v12681_v13, %v12684_v6 }
 0x1c0   : > { %v8074_v51 = vpack.c.bf16 %v4621_v7, %v4553_v30  ;;  %v8082_v49 = vpack.c.bf16 %v4622_v4, %v4554_v3  ;;  %v3713_v38 = vrot.slane %v3705_v41, %v12444_v16  ;;  %v3720_v42 = vrot.slane %v3706_v25, %v12444_v16 }
 0x1c1   : > { %v3729_v27 = vrot.slane %v3721_v44, %v12444_v16  ;;  %v3736_v35 = vrot.slane %v3722_v37, %v12444_v16  ;;  %v4690_v41 = vcombine.high %v4665_v19, %v4681_v31  ;;  %v4749_v37 = vrot.slane %v4741_v39, %v12444_v16  ;;  %5774 = vrot.lane.b32.xlu0 %v12395_v60, %s12086_s23  ;;  %v12957_v39 = vpop.permute.xlu1 %3275 }
 0x1c2   : > { %11711 = vmatprep.subr.msk.bf16.mxu1 %vm8106_vm1, %v8074_v51  ;;  %11719 = vmatprep.subr.msk.bf16.mxu0 %vm8106_vm1, %v8082_v49  ;;  %v8132_v4 = vsel %vm8106_vm1, %v8074_v51, 0  ;;  %v8277_v9 = vsel %vm8106_vm1, %v8082_v49, 0  ;;  %v4761_v48 = vcombine.low %v3713_v38, %v3720_v42  ;;  %v10960_v25 = vcombine.high %v3713_v38, %v3720_v42 }
 0x1c3   : > { %v4777_v43 = vcombine.low %v3729_v27, %v3736_v35  ;;  %v10961_v44 = vcombine.high %v3729_v27, %v3736_v35  ;;  %11376 = vmatpush3.bf16.xpose.msra.mxu1 %v8132_v4  ;;  %11408 = vmatpush3.bf16.xpose.msra.mxu0 %v8277_v9  ;;  %v3757_v30 = vcombine.low %v12754_v33, %v12799_v14  ;;  %v12946_v27 = vpop.permute.xlu0 %3321 }
 0x1c4   : > { %v3758_v3 = vcombine.high %v12754_v33, %v12799_v14  ;;  %v4081_v7 = vcombine.low %v12323_v52, %v12837_v36  ;;  %v12931_v51 = vrot.slane %v4761_v48, %v12436_v11  ;;  %v12934_v31 = vrot.slane %v10960_v25, %v12436_v11  ;;  %5820 = vrot.lane.b32.xlu1 %v12413_v63, %s12087_s24 }
 0x1c5   : > { %v12937_v19 = vrot.slane %v4777_v43, %v12436_v11  ;;  %v12940_v49 = vrot.slane %v10961_v44, %v12436_v11  ;;  %v4757_v38 = vcombine.low %v4733_v18, %v4749_v37  ;;  %v4758_v33 = vcombine.high %v4733_v18, %v4749_v37  ;;  %5822 = vrot.lane.b32.xlu0 %v12395_v60, %s12087_s24 }
 0x1c6   : > { %v3765_v14 = vrot.slane %v3757_v30, %v12436_v11  ;;  %v3772_v42 = vrot.slane %v3758_v3, %v12436_v11  ;;  %v4082_v35 = vcombine.high %v12323_v52, %v12837_v36  ;;  %v4089_v4 = vrot.slane %v4081_v7, %v12436_v11 }
 0x1c7   : > { %v4149_v9 = vcombine.low %v12329_v54, %v12886_v40  ;;  %v4150_v18 = vcombine.high %v12329_v54, %v12886_v40  ;;  %v8075_v48 = vpack.c.bf16 %v4757_v38, %v4689_v28  ;;  %v8083_v25 = vpack.c.bf16 %v4758_v33, %v4690_v41  ;;  %v12967_v40 = vpop.f32.mrb[22].mxu0 }
 0x1c8   : > { %v3773_v43 = vcombine.low %v12857_v59, %v3765_v14  ;;  %v3774_v44 = vcombine.high %v12857_v59, %v3765_v14  ;;  %v3789_v37 = vcombine.low %v12860_v47, %v3772_v42  ;;  %v3790_v36 = vcombine.high %v12860_v47, %v3772_v42  ;;  %16595 = vst [vmem:[#allocation65_spill] sm:$0xff] %v12967_v40 }
 0x1c9   : > { %v4096_v52 = vrot.slane %v4082_v35, %v12436_v11  ;;  %v4157_v30 = vrot.slane %v4149_v9, %v12436_v11  ;;  %11712 = vmatprep.subr.msk.bf16.mxu1 %vm8106_vm1, %v8075_v48  ;;  %11720 = vmatprep.subr.msk.bf16.mxu0 %vm8106_vm1, %v8083_v25  ;;  %v8135_v28 = vsel %vm8106_vm1, %v8075_v48, 0  ;;  %v8280_v47 = vsel %vm8106_vm1, %v8083_v25, 0  ;;  %v12984_v9 = vpop.permute.xlu0 %3369 }
 0x1ca   : > { %v3781_v54 = vrot.slane %v3773_v43, %v12444_v16  ;;  %v3788_v59 = vrot.slane %v3774_v44, %v12444_v16  ;;  %v3797_v41 = vrot.slane %v3789_v37, %v12444_v16  ;;  %v3804_v3 = vrot.slane %v3790_v36, %v12444_v16  ;;  %v12989_v44 = vpop.permute.xlu1 %3323  ;;  %5728 = vrot.lane.b32.xlu1 %v12409_v62, %s12085_s22 }
 0x1cb   : > { %11378 = vmatpush3.bf16.xpose.msra.mxu1 %v8135_v28  ;;  %v4164_v7 = vrot.slane %v4150_v18, %v12436_v11  ;;  %v4097_v38 = vcombine.low %v12808_v21, %v12875_v24  ;;  %11410 = vmatpush3.bf16.xpose.msra.mxu0 %v8280_v47  ;;  %v4098_v42 = vcombine.high %v12808_v21, %v12875_v24 }
 0x1cc   : > { %v4829_v33 = vcombine.low %v3781_v54, %v3788_v59  ;;  %v10962_v14 = vcombine.high %v3781_v54, %v3788_v59  ;;  %v4165_v35 = vcombine.low %v12833_v32, %v12915_v1  ;;  %v4845_v48 = vcombine.low %v3797_v41, %v3804_v3  ;;  %5730 = vrot.lane.b32.xlu0 %v12460_v5, %s12085_s22 }
 0x1cd   : > { %v10963_v25 = vcombine.high %v3797_v41, %v3804_v3  ;;  %v4105_v43 = vrot.slane %v4097_v38, %v12436_v11  ;;  %v4166_v18 = vcombine.high %v12833_v32, %v12915_v1  ;;  %v4112_v24 = vrot.slane %v4098_v42, %v12436_v11  ;;  %v13010_v38 = vpop.f32.mrb[23].mxu0 }
 0x1ce   : > { %v12994_v37 = vrot.slane %v4829_v33, %v12436_v11  ;;  %v12997_v21 = vrot.slane %v10962_v14, %v12436_v11  ;;  %v4173_v36 = vrot.slane %v4165_v35, %v12436_v11  ;;  %v13004_v32 = vrot.slane %v4845_v48, %v12436_v11  ;;  %16598 = vst [vmem:[#allocation68_spill] sm:$0xff] %v13010_v38 }
 0x1cf   : > { %v13007_v1 = vrot.slane %v10963_v25, %v12436_v11  ;;  %v4113_v54 = vcombine.low %v4089_v4, %v4105_v43  ;;  %v4114_v59 = vcombine.high %v4089_v4, %v4105_v43  ;;  %v4129_v28 = vcombine.low %v4096_v52, %v4112_v24  ;;  %5776 = vrot.lane.b32.xlu1 %v12409_v62, %s12086_s23  ;;  %v13021_v43 = vpop.permute.xlu0 %3285 }
 0x1d0   : > { %16596 = vst [vmem:[#allocation66_spill] sm:$0xff] %v13004_v32  ;;  %v4130_v47 = vcombine.high %v4096_v52, %v4112_v24  ;;  %v4180_v41 = vrot.slane %v4166_v18, %v12436_v11  ;;  %v4181_v3 = vcombine.low %v4157_v30, %v4173_v36  ;;  %v4182_v42 = vcombine.high %v4157_v30, %v4173_v36 }
 0x1d1   : > { %16597 = vst [vmem:[#allocation67_spill] sm:$0xff] %v13007_v1  ;;  %v4121_v33 = vrot.slane %v4113_v54, %v12444_v16  ;;  %v4128_v14 = vrot.slane %v4114_v59, %v12444_v16  ;;  %v3945_v35 = vcombine.low %v12327_v53, %v12946_v27  ;;  %v4137_v4 = vrot.slane %v4129_v28, %v12444_v16  ;;  %v13026_v54 = vpop.permute.xlu1 %3371 }
 0x1d2   : > { %v4144_v52 = vrot.slane %v4130_v47, %v12444_v16  ;;  %v4189_v48 = vrot.slane %v4181_v3, %v12444_v16  ;;  %v4197_v25 = vcombine.low %v4164_v7, %v4180_v41  ;;  %v4196_v24 = vrot.slane %v4182_v42, %v12444_v16  ;;  %5778 = vrot.lane.b32.xlu0 %v12460_v5, %s12086_s23 }
 0x1d3   : > { %v5169_v18 = vcombine.low %v4121_v33, %v4128_v14  ;;  %v10972_v30 = vcombine.high %v4121_v33, %v4128_v14  ;;  %v4198_v36 = vcombine.high %v4164_v7, %v4180_v41  ;;  %v3946_v47 = vcombine.high %v12327_v53, %v12946_v27  ;;  %5824 = vrot.lane.b32.xlu1 %v12409_v62, %s12087_s24 }
 0x1d4   : > { %v5185_v59 = vcombine.low %v4137_v4, %v4144_v52  ;;  %v10973_v60 = vcombine.high %v4137_v4, %v4144_v52  ;;  %v4205_v28 = vrot.slane %v4197_v25, %v12444_v16  ;;  %v5237_v14 = vcombine.low %v4189_v48, %v4196_v24 }
 0x1d5   : > { %v13032_v3 = vrot.slane %v5169_v18, %v12436_v11  ;;  %v13035_v63 = vrot.slane %v10972_v30, %v12436_v11  ;;  %v4212_v33 = vrot.slane %v4198_v36, %v12444_v16  ;;  %v10974_v42 = vcombine.high %v4189_v48, %v4196_v24  ;;  %v13062_v30 = vpop.permute.xlu0 %3333 }
 0x1d6   : > { %v13041_v7 = vrot.slane %v5185_v59, %v12436_v11  ;;  %v13044_v41 = vrot.slane %v10973_v60, %v12436_v11  ;;  %v3953_v53 = vrot.slane %v3945_v35, %v12436_v11  ;;  %v13050_v27 = vrot.slane %v5237_v14, %v12436_v11  ;;  %5826 = vrot.lane.b32.xlu0 %v12460_v5, %s12087_s24 }
 0x1d7   : > { %16599 = vst [vmem:[#allocation69_spill] sm:$0xff] %v13032_v3  ;;  %16600 = vst [vmem:[#allocation70_spill] sm:$0xff] %v13035_v63  ;;  %v5253_v4 = vcombine.low %v4205_v28, %v4212_v33  ;;  %v10975_v52 = vcombine.high %v4205_v28, %v4212_v33  ;;  %v3960_v25 = vrot.slane %v3946_v47, %v12436_v11  ;;  %v13074_v47 = vpop.permute.xlu1 %3287  ;;  %5732 = vrot.lane.b32.xlu1 %v12478_v23, %s12085_s22 }
 0x1d8   : > { %16601 = vst [vmem:[#allocation71_spill] sm:$0xff] %v13041_v7  ;;  %16602 = vst [vmem:[#allocation72_spill] sm:$0xff] %v13044_v41  ;;  %v13054_v18 = vrot.slane %v10974_v42, %v12436_v11  ;;  %v4013_v60 = vcombine.low %v12333_v55, %v12989_v44  ;;  %v4014_v48 = vcombine.high %v12333_v55, %v12989_v44 }
 0x1d9   : > { %16603 = vst [vmem:[#allocation73_spill] sm:$0xff] %v13050_v27  ;;  %v4793_v35 = vcombine.low %v12931_v51, %v12934_v31  ;;  %v13065_v24 = vrot.slane %v5253_v4, %v12436_v11  ;;  %v13068_v36 = vrot.slane %v10975_v52, %v12436_v11  ;;  %v4809_v59 = vcombine.low %v12937_v19, %v12940_v49 }
 0x1da   : > { %16604 = vst [vmem:[#allocation74_spill] sm:$0xff] %v13054_v18  ;;  %v4861_v28 = vcombine.low %v12994_v37, %v12997_v21  ;;  %v13079_v55 = vrot.slane %v4013_v60, %v12436_v11  ;;  %v13082_v44 = vrot.slane %v4014_v48, %v12436_v11  ;;  %v4877_v14 = vcombine.low %v13004_v32, %v13007_v1 }
 0x1db   : > { %16605 = vst [vmem:[#allocation75_spill] sm:$0xff] %v13065_v24  ;;  %16606 = vst [vmem:[#allocation76_spill] sm:$0xff] %v13068_v36  ;;  %v4801_v33 = vrot.slane %v4793_v35, %v12444_v16  ;;  %v4817_v42 = vrot.slane %v4809_v59, %v12444_v16  ;;  %v3961_v52 = vcombine.low %v12907_v45, %v12984_v9  ;;  %5780 = vrot.lane.b32.xlu1 %v12478_v23, %s12086_s23 }
 0x1dc   : > { %v4869_v4 = vrot.slane %v4861_v28, %v12444_v16  ;;  %v3962_v60 = vcombine.high %v12907_v45, %v12984_v9  ;;  %v4885_v48 = vrot.slane %v4877_v14, %v12444_v16  ;;  %v4929_v35 = vcombine.low %v12815_v29, %v12818_v2  ;;  %v13108_v2 = vpop.permute.xlu0 %3381  ;;  %5734 = vrot.lane.b32.xlu0 %v12458_v0, %s12085_s22 }
 0x1dd   : > { %v4945_v62 = vcombine.low %v12825_v34, %v12828_v15  ;;  %v4997_v5 = vcombine.low %v12849_v12, %v12852_v50  ;;  %v4825_v59 = vcombine.low %v4801_v33, %v4817_v42  ;;  %v4826_v61 = vcombine.high %v4801_v33, %v4817_v42  ;;  %v3336_v50 = vpop.permute.xlu1 %3335 }
 0x1de   : > { %v3969_v28 = vrot.slane %v3961_v52, %v12436_v11  ;;  %v3976_v32 = vrot.slane %v3962_v60, %v12436_v11  ;;  %v4893_v45 = vcombine.low %v4869_v4, %v4885_v48  ;;  %v4894_v9 = vcombine.high %v4869_v4, %v4885_v48 }
 0x1df   : > { %v4937_v14 = vrot.slane %v4929_v35, %v12444_v16  ;;  %v4953_v29 = vrot.slane %v4945_v62, %v12444_v16  ;;  %v5005_v1 = vrot.slane %v4997_v5, %v12444_v16  ;;  %5828 = vrot.lane.b32.xlu1 %v12478_v23, %s12087_s24  ;;  %v5013_v5 = vcombine.low %v12866_v46, %v12869_v22 }
 0x1e0   : > { %v3977_v12 = vcombine.low %v3953_v53, %v3969_v28  ;;  %v3978_v33 = vcombine.high %v3953_v53, %v3969_v28  ;;  %v3993_v42 = vcombine.low %v3960_v25, %v3976_v32  ;;  %v3994_v52 = vcombine.high %v3960_v25, %v3976_v32  ;;  %5782 = vrot.lane.b32.xlu0 %v12458_v0, %s12086_s23 }
 0x1e1   : > { %v8076_v60 = vpack.c.bf16 %v4893_v45, %v4825_v59  ;;  %v8084_v34 = vpack.c.bf16 %v4894_v9, %v4826_v61  ;;  %v4961_v15 = vcombine.low %v4937_v14, %v4953_v29  ;;  %v5021_v45 = vrot.slane %v5013_v5, %v12444_v16 }
 0x1e2   : > { %v3985_v4 = vrot.slane %v3977_v12, %v12444_v16  ;;  %v3992_v48 = vrot.slane %v3978_v33, %v12444_v16  ;;  %v4001_v62 = vrot.slane %v3993_v42, %v12444_v16  ;;  %v4008_v35 = vrot.slane %v3994_v52, %v12444_v16  ;;  %v13132_v42 = vpop.permute.xlu0 %3281 }
 0x1e3   : > { %11713 = vmatprep.subr.msk.bf16.mxu1 %vm8106_vm1, %v8076_v60  ;;  %11721 = vmatprep.subr.msk.bf16.mxu0 %vm8106_vm1, %v8084_v34  ;;  %v8138_v61 = vsel %vm8106_vm1, %v8076_v60, 0  ;;  %v8283_v32 = vsel %vm8106_vm1, %v8084_v34, 0  ;;  %v4962_v12 = vcombine.high %v4937_v14, %v4953_v29  ;;  %v4029_v9 = vcombine.low %v12957_v39, %v13026_v54 }
 0x1e4   : > { %v5033_v53 = vcombine.low %v3985_v4, %v3992_v48  ;;  %v10968_v25 = vcombine.high %v3985_v4, %v3992_v48  ;;  %v5049_v59 = vcombine.low %v4001_v62, %v4008_v35  ;;  %v10969_v28 = vcombine.high %v4001_v62, %v4008_v35  ;;  %11380 = vmatpush3.bf16.xpose.msra.mxu1 %v8138_v61  ;;  %v3384_v4 = vpop.permute.xlu1 %3383 }
 0x1e5   : > { %11412 = vmatpush3.bf16.xpose.msra.mxu0 %v8283_v32  ;;  %v4030_v33 = vcombine.high %v12957_v39, %v13026_v54  ;;  %v4353_v34 = vcombine.low %v12339_v56, %v13062_v30  ;;  %5736 = vrot.lane.b32.xlu1 %v12474_v17, %s12085_s22  ;;  %v5029_v39 = vcombine.low %v5005_v1, %v5021_v45 }
 0x1e6   : > { %v13135_v29 = vrot.slane %v5033_v53, %v12436_v11  ;;  %v13138_v14 = vrot.slane %v10968_v25, %v12436_v11  ;;  %v13141_v52 = vrot.slane %v5049_v59, %v12436_v11  ;;  %v13144_v60 = vrot.slane %v10969_v28, %v12436_v11  ;;  %5830 = vrot.lane.b32.xlu0 %v12458_v0, %s12087_s24 }
 0x1e7   : > { %v5030_v54 = vcombine.high %v5005_v1, %v5021_v45  ;;  %v4037_v48 = vrot.slane %v4029_v9, %v12436_v11  ;;  %v4044_v62 = vrot.slane %v4030_v33, %v12436_v11  ;;  %v4354_v35 = vcombine.high %v12339_v56, %v13062_v30 }
 0x1e8   : > { %16607 = vst [vmem:[#allocation77_spill] sm:$0xff] %v13141_v52  ;;  %v4361_v61 = vrot.slane %v4353_v34, %v12436_v11  ;;  %v4421_v32 = vcombine.low %v12345_v58, %v3336_v50  ;;  %v4422_v5 = vcombine.high %v12345_v58, %v3336_v50  ;;  %v8077_v53 = vpack.c.bf16 %v5029_v39, %v4961_v15  ;;  %v13178_v39 = vpop.permute.xlu1 %3283 }
 0x1e9   : > { %v8085_v25 = vpack.c.bf16 %v5030_v54, %v4962_v12  ;;  %v4045_v1 = vcombine.low %v13079_v55, %v4037_v48  ;;  %v4046_v59 = vcombine.high %v13079_v55, %v4037_v48  ;;  %v4061_v28 = vcombine.low %v13082_v44, %v4044_v62  ;;  %5784 = vrot.lane.b32.xlu1 %v12474_v17, %s12086_s23  ;;  %v13171_v55 = vpop.permute.xlu0 %3329 }
 0x1ea   : > { %v4062_v45 = vcombine.high %v13082_v44, %v4044_v62  ;;  %v4368_v9 = vrot.slane %v4354_v35, %v12436_v11  ;;  %v4429_v56 = vrot.slane %v4421_v32, %v12436_v11  ;;  %11714 = vmatprep.subr.msk.bf16.mxu1 %vm8106_vm1, %v8077_v53  ;;  %v8141_v50 = vsel %vm8106_vm1, %v8077_v53, 0 }
 0x1eb   : > { %11722 = vmatprep.subr.msk.bf16.mxu0 %vm8106_vm1, %v8085_v25  ;;  %v4053_v58 = vrot.slane %v4045_v1, %v12444_v16  ;;  %v4060_v15 = vrot.slane %v4046_v59, %v12444_v16  ;;  %v8286_v30 = vsel %vm8106_vm1, %v8085_v25, 0  ;;  %v4069_v44 = vrot.slane %v4061_v28, %v12444_v16 }
 0x1ec   : > { %v4076_v12 = vrot.slane %v4062_v45, %v12444_v16  ;;  %11382 = vmatpush3.bf16.xpose.msra.mxu1 %v8141_v50  ;;  %v4436_v33 = vrot.slane %v4422_v5, %v12436_v11  ;;  %v4369_v34 = vcombine.low %v13021_v43, %v13108_v2  ;;  %v4370_v62 = vcombine.high %v13021_v43, %v13108_v2 }
 0x1ed   : > { %v5101_v54 = vcombine.low %v4053_v58, %v4060_v15  ;;  %v10970_v48 = vcombine.high %v4053_v58, %v4060_v15  ;;  %11414 = vmatpush3.bf16.xpose.msra.mxu0 %v8286_v30  ;;  %v4437_v35 = vcombine.low %v13074_v47, %v3384_v4  ;;  %v4438_v1 = vcombine.high %v13074_v47, %v3384_v4 }
 0x1ee   : > { %v5117_v32 = vcombine.low %v4069_v44, %v4076_v12  ;;  %v10971_v53 = vcombine.high %v4069_v44, %v4076_v12  ;;  %v4377_v25 = vrot.slane %v4369_v34, %v12436_v11  ;;  %5832 = vrot.lane.b32.xlu1 %v12474_v17, %s12087_s24  ;;  %v4384_v28 = vrot.slane %v4370_v62, %v12436_v11  ;;  %v13204_v44 = vpop.permute.xlu0 %3377  ;;  %v3332_v62 = vpop.permute.xlu1 %3331 }
 0x1ef   : > { %v13188_v5 = vrot.slane %v5101_v54, %v12436_v11  ;;  %v13191_v59 = vrot.slane %v10970_v48, %v12436_v11  ;;  %v4445_v2 = vrot.slane %v4437_v35, %v12436_v11  ;;  %v4452_v50 = vrot.slane %v4438_v1, %v12436_v11  ;;  %v16612_v35 = vld [vmem:[#allocation44_spill] sm:$0xff] }
 0x1f0   : > { %v13198_v43 = vrot.slane %v5117_v32, %v12436_v11  ;;  %v13201_v47 = vrot.slane %v10971_v53, %v12436_v11  ;;  %v4385_v4 = vcombine.low %v4361_v61, %v4377_v25  ;;  %v4386_v45 = vcombine.high %v4361_v61, %v4377_v25  ;;  %v16613_v25 = vld [vmem:[#allocation42_spill] sm:$0xff] }
 0x1f1   : > { %16608 = vst [vmem:[#allocation78_spill] sm:$0xff] %v13188_v5  ;;  %16609 = vst [vmem:[#allocation79_spill] sm:$0xff] %v13191_v59  ;;  %v4401_v58 = vcombine.low %v4368_v9, %v4384_v28  ;;  %v4402_v15 = vcombine.high %v4368_v9, %v4384_v28  ;;  %v4453_v30 = vcombine.low %v4429_v56, %v4445_v2  ;;  %5738 = vrot.lane.b32.xlu0 %v16613_v25, %s12085_s22 }
 0x1f2   : > { %16610 = vst [vmem:[#allocation80_spill] sm:$0xff] %v13198_v43  ;;  %16611 = vst [vmem:[#allocation81_spill] sm:$0xff] %v13201_v47  ;;  %v4393_v12 = vrot.slane %v4385_v4, %v12444_v16  ;;  %v4400_v34 = vrot.slane %v4386_v45, %v12444_v16  ;;  %v4454_v54 = vcombine.high %v4429_v56, %v4445_v2  ;;  %5740 = vrot.lane.b32.xlu1 %v16612_v35, %s12085_s22 }
 0x1f3   : > { %v4217_v48 = vcombine.low %v12343_v57, %v13171_v55  ;;  %v4409_v61 = vrot.slane %v4401_v58, %v12444_v16  ;;  %v4416_v9 = vrot.slane %v4402_v15, %v12444_v16  ;;  %v4461_v32 = vrot.slane %v4453_v30, %v12444_v16 }
 0x1f4   : > { %v4469_v53 = vcombine.low %v4436_v33, %v4452_v50  ;;  %v5441_v1 = vcombine.low %v4393_v12, %v4400_v34  ;;  %v10980_v28 = vcombine.high %v4393_v12, %v4400_v34  ;;  %v4468_v56 = vrot.slane %v4454_v54, %v12444_v16 }
 0x1f5   : > { %v4470_v2 = vcombine.high %v4436_v33, %v4452_v50  ;;  %v5457_v4 = vcombine.low %v4409_v61, %v4416_v9  ;;  %v10981_v45 = vcombine.high %v4409_v61, %v4416_v9  ;;  %v4218_v58 = vcombine.high %v12343_v57, %v13171_v55  ;;  %v13237_v55 = vpop.permute.xlu0 %736  ;;  %5786 = vrot.lane.b32.xlu0 %v16613_v25, %s12086_s23 }
 0x1f6   : > { %v4477_v0 = vrot.slane %v4469_v53, %v12444_v16  ;;  %v13222_v15 = vrot.slane %v5441_v1, %v12436_v11  ;;  %v13225_v30 = vrot.slane %v10980_v28, %v12436_v11  ;;  %v5509_v23 = vcombine.low %v4461_v32, %v4468_v56  ;;  %5788 = vrot.lane.b32.xlu1 %v16612_v35, %s12086_s23  ;;  %v13245_v53 = vpop.permute.xlu1 %3379 }
 0x1f7   : > { %v4484_v17 = vrot.slane %v4470_v2, %v12444_v16  ;;  %v13231_v33 = vrot.slane %v5457_v4, %v12436_v11  ;;  %v13234_v50 = vrot.slane %v10981_v45, %v12436_v11  ;;  %v10982_v12 = vcombine.high %v4461_v32, %v4468_v56  ;;  %v16620_v32 = vld [vmem:[#allocation15_spill] sm:$0xff] }
 0x1f8   : > { %16614 = vst [vmem:[#allocation82_spill] sm:$0xff] %v13222_v15  ;;  %16615 = vst [vmem:[#allocation83_spill] sm:$0xff] %v13225_v30  ;;  %v4225_v57 = vrot.slane %v4217_v48, %v12436_v11  ;;  %v13242_v34 = vrot.slane %v5509_v23, %v12436_v11  ;;  %v4232_v9 = vrot.slane %v4218_v58, %v12436_v11 }
 0x1f9   : > { %16616 = vst [vmem:[#allocation84_spill] sm:$0xff] %v13231_v33  ;;  %16617 = vst [vmem:[#allocation85_spill] sm:$0xff] %v13234_v50  ;;  %v5525_v54 = vcombine.low %v4477_v0, %v4484_v17  ;;  %v10983_v61 = vcombine.high %v4477_v0, %v4484_v17  ;;  %v13248_v1 = vrot.slane %v10982_v12, %v12436_v11  ;;  %5834 = vrot.lane.b32.xlu0 %v16613_v25, %s12087_s24 }
 0x1fa   : > { %16618 = vst [vmem:[#allocation86_spill] sm:$0xff] %v13242_v34  ;;  %v4285_v28 = vcombine.low %v16620_v32, %v3332_v62  ;;  %v4286_v48 = vcombine.high %v16620_v32, %v3332_v62  ;;  %v5065_v56 = vcombine.low %v13135_v29, %v13138_v14  ;;  %v5081_v0 = vcombine.low %v13141_v52, %v13144_v60 }
 0x1fb   : > { %16619 = vst [vmem:[#allocation87_spill] sm:$0xff] %v13248_v1  ;;  %v13255_v2 = vrot.slane %v5525_v54, %v12436_v11  ;;  %v13258_v23 = vrot.slane %v10983_v61, %v12436_v11  ;;  %v5133_v17 = vcombine.low %v13188_v5, %v13191_v59  ;;  %5836 = vrot.lane.b32.xlu1 %v16612_v35, %s12087_s24 }
 0x1fc   : > { %v13267_v62 = vrot.slane %v4285_v28, %v12436_v11  ;;  %v13270_v4 = vrot.slane %v4286_v48, %v12436_v11  ;;  %v5073_v45 = vrot.slane %v5065_v56, %v12444_v16  ;;  %v5149_v58 = vcombine.low %v13198_v43, %v13201_v47 }
 0x1fd   : > { %16621 = vst [vmem:[#allocation15_spill] sm:$0xff] %v13255_v2  ;;  %16622 = vst [vmem:[#allocation88_spill] sm:$0xff] %v13258_v23  ;;  %v5089_v12 = vrot.slane %v5081_v0, %v12444_v16  ;;  %v5141_v54 = vrot.slane %v5133_v17, %v12444_v16  ;;  %v4233_v61 = vcombine.low %v13132_v42, %v13204_v44  ;;  %v13290_v0 = vpop.permute.xlu0 %784 }
 0x1fe   : > { %v4234_v32 = vcombine.high %v13132_v42, %v13204_v44  ;;  %v5157_v28 = vrot.slane %v5149_v58, %v12444_v16  ;;  %v5201_v48 = vcombine.low %v13032_v3, %v13035_v63  ;;  %v5217_v56 = vcombine.low %v13041_v7, %v13044_v41  ;;  %v13294_v42 = vpop.permute.xlu1 %738  ;;  %v16623_v44 = vld [vmem:[#allocation43_spill] sm:$0xff] }
 0x1ff   : > { %v5269_v25 = vcombine.low %v13050_v27, %v13054_v18  ;;  %v5097_v17 = vcombine.low %v5073_v45, %v5089_v12  ;;  %v5098_v35 = vcombine.high %v5073_v45, %v5089_v12  ;;  %v4241_v43 = vrot.slane %v4233_v61, %v12436_v11  ;;  %5744 = vrot.lane.b32.xlu1 %v16623_v44, %s12085_s22  ;;  %v16624_v27 = vld [vmem:[#allocation41_spill] sm:$0xff] }
 0x200   : > { %v4248_v47 = vrot.slane %v4234_v32, %v12436_v11  ;;  %v5165_v58 = vcombine.low %v5141_v54, %v5157_v28  ;;  %v5166_v3 = vcombine.high %v5141_v54, %v5157_v28  ;;  %v5209_v7 = vrot.slane %v5201_v48, %v12444_v16  ;;  %5742 = vrot.lane.b32.xlu0 %v16624_v27, %s12085_s22 }
 0x201   : > { %v5225_v41 = vrot.slane %v5217_v56, %v12444_v16  ;;  %v4249_v18 = vcombine.low %v4225_v57, %v4241_v43  ;;  %v4250_v45 = vcombine.high %v4225_v57, %v4241_v43  ;;  %v5277_v59 = vrot.slane %v5269_v25, %v12444_v16 }
 0x202   : > { %v4265_v12 = vcombine.low %v4232_v9, %v4248_v47  ;;  %v4266_v61 = vcombine.high %v4232_v9, %v4248_v47  ;;  %v8078_v63 = vpack.c.bf16 %v5165_v58, %v5097_v17  ;;  %v8086_v32 = vpack.c.bf16 %v5166_v3, %v5098_v35  ;;  %v833_v35 = vpop.permute.xlu0 %832  ;;  %v787_v17 = vpop.permute.xlu1 %786 }
 0x203   : > { %v5233_v5 = vcombine.low %v5209_v7, %v5225_v41  ;;  %v4257_v52 = vrot.slane %v4249_v18, %v12444_v16  ;;  %v4264_v54 = vrot.slane %v4250_v45, %v12444_v16  ;;  %5792 = vrot.lane.b32.xlu1 %v16623_v44, %s12086_s23  ;;  %v5285_v18 = vcombine.low %v13065_v24, %v13068_v36 }
 0x204   : > { %v4273_v28 = vrot.slane %v4265_v12, %v12444_v16  ;;  %v4280_v48 = vrot.slane %v4266_v61, %v12444_v16  ;;  %11715 = vmatprep.subr.msk.bf16.mxu1 %vm8106_vm1, %v8078_v63  ;;  %11723 = vmatprep.subr.msk.bf16.mxu0 %vm8106_vm1, %v8086_v32  ;;  %v8144_v3 = vsel %vm8106_vm1, %v8078_v63, 0  ;;  %v8289_v43 = vsel %vm8106_vm1, %v8086_v32, 0  ;;  %v16625_v12 = vld [vmem:[#allocation10_spill] sm:$0xff] }
 0x205   : > { %v5234_v47 = vcombine.high %v5209_v7, %v5225_v41  ;;  %v5305_v25 = vcombine.low %v4257_v52, %v4264_v54  ;;  %v10976_v57 = vcombine.high %v4257_v52, %v4264_v54  ;;  %11384 = vmatpush3.bf16.xpose.msra.mxu1 %v8144_v3  ;;  %11416 = vmatpush3.bf16.xpose.msra.mxu0 %v8289_v43  ;;  %v16626_v43 = vld [vmem:[#allocation14_spill] sm:$0xff] }
 0x206   : > { %v5321_v9 = vcombine.low %v4273_v28, %v4280_v48  ;;  %v10977_v56 = vcombine.high %v4273_v28, %v4280_v48  ;;  %v5293_v58 = vrot.slane %v5285_v18, %v12444_v16  ;;  %v4301_v45 = vcombine.low %v13178_v39, %v13245_v53  ;;  %5790 = vrot.lane.b32.xlu0 %v16624_v27, %s12086_s23 }
 0x207   : > { %v4302_v63 = vcombine.high %v13178_v39, %v13245_v53  ;;  %v1144_v61 = vcombine.low %v16625_v12, %v13290_v0  ;;  %v13323_v7 = vrot.slane %v5305_v25, %v12436_v11  ;;  %v13326_v41 = vrot.slane %v10976_v57, %v12436_v11  ;;  %5840 = vrot.lane.b32.xlu1 %v16623_v44, %s12087_s24 }
 0x208   : > { %v13329_v52 = vrot.slane %v5321_v9, %v12436_v11  ;;  %v13332_v32 = vrot.slane %v10977_v56, %v12436_v11  ;;  %v5301_v54 = vcombine.low %v5277_v59, %v5293_v58  ;;  %v5302_v39 = vcombine.high %v5277_v59, %v5293_v58  ;;  %v13347_v58 = vpop.permute.xlu0 %740 }
 0x209   : > { %v4309_v53 = vrot.slane %v4301_v45, %v12436_v11  ;;  %v4316_v28 = vrot.slane %v4302_v63, %v12436_v11  ;;  %v1145_v48 = vcombine.high %v16625_v12, %v13290_v0  ;;  %v1152_v3 = vrot.slane %v1144_v61, %v12436_v11  ;;  %v835_v61 = vpop.permute.xlu1 %834 }
 0x20a   : > { %v1212_v18 = vcombine.low %v16626_v43, %v787_v17  ;;  %v1213_v25 = vcombine.high %v16626_v43, %v787_v17  ;;  %v8079_v57 = vpack.c.bf16 %v5301_v54, %v5233_v5  ;;  %v8087_v9 = vpack.c.bf16 %v5302_v39, %v5234_v47  ;;  %5838 = vrot.lane.b32.xlu0 %v16624_v27, %s12087_s24 }
 0x20b   : > { %v4317_v59 = vcombine.low %v13267_v62, %v4309_v53  ;;  %v4318_v56 = vcombine.high %v13267_v62, %v4309_v53  ;;  %v4333_v45 = vcombine.low %v13270_v4, %v4316_v28  ;;  %v4334_v63 = vcombine.high %v13270_v4, %v4316_v28  ;;  %5746 = vrot.lane.b32.xlu1 %v12904_v10, %s12085_s22 }
 0x20c   : > { %v1159_v0 = vrot.slane %v1145_v48, %v12436_v11  ;;  %v1220_v12 = vrot.slane %v1212_v18, %v12436_v11  ;;  %11716 = vmatprep.subr.msk.bf16.mxu1 %vm8106_vm1, %v8079_v57  ;;  %11724 = vmatprep.subr.msk.bf16.mxu0 %vm8106_vm1, %v8087_v9  ;;  %v8147_v47 = vsel %vm8106_vm1, %v8079_v57, 0  ;;  %v8292_v4 = vsel %vm8106_vm1, %v8087_v9, 0 }
 0x20d   : > { %v4325_v5 = vrot.slane %v4317_v59, %v12444_v16  ;;  %v4332_v62 = vrot.slane %v4318_v56, %v12444_v16  ;;  %v4341_v17 = vrot.slane %v4333_v45, %v12444_v16  ;;  %v4348_v54 = vrot.slane %v4334_v63, %v12444_v16  ;;  %11386 = vmatpush3.bf16.xpose.msra.mxu1 %v8147_v47  ;;  %v13387_v47 = vpop.permute.xlu1 %742 }
 0x20e   : > { %v1227_v39 = vrot.slane %v1213_v25, %v12436_v11  ;;  %v1160_v53 = vcombine.low %v13237_v55, %v833_v35  ;;  %11418 = vmatpush3.bf16.xpose.msra.mxu0 %v8292_v4  ;;  %v1161_v43 = vcombine.high %v13237_v55, %v833_v35  ;;  %v1228_v18 = vcombine.low %v13294_v42, %v835_v61  ;;  %v789_v35 = vpop.permute.xlu0 %788 }
 0x20f   : > { %v5373_v28 = vcombine.low %v4325_v5, %v4332_v62  ;;  %v10978_v48 = vcombine.high %v4325_v5, %v4332_v62  ;;  %v5389_v59 = vcombine.low %v4341_v17, %v4348_v54  ;;  %v10979_v57 = vcombine.high %v4341_v17, %v4348_v54  ;;  %5794 = vrot.lane.b32.xlu1 %v12904_v10, %s12086_s23 }
 0x210   : > { %v1168_v9 = vrot.slane %v1160_v53, %v12436_v11  ;;  %v1229_v56 = vcombine.high %v13294_v42, %v835_v61  ;;  %v1175_v63 = vrot.slane %v1161_v43, %v12436_v11  ;;  %v1236_v55 = vrot.slane %v1228_v18, %v12436_v11  ;;  %v16630_v18 = vld [vmem:[#allocation8_spill] sm:$0xff]  ;;  %5748 = vrot.lane.b32.xlu0 %v13010_v38, %s12085_s22 }
 0x211   : > { %v13372_v25 = vrot.slane %v5373_v28, %v12436_v11  ;;  %v13375_v45 = vrot.slane %v10978_v48, %v12436_v11  ;;  %v13382_v5 = vrot.slane %v5389_v59, %v12436_v11  ;;  %v13385_v42 = vrot.slane %v10979_v57, %v12436_v11  ;;  %v791_v36 = vpop.permute.xlu1 %790 }
 0x212   : > { %v1176_v61 = vcombine.low %v1152_v3, %v1168_v9  ;;  %v1177_v62 = vcombine.high %v1152_v3, %v1168_v9  ;;  %v1192_v4 = vcombine.low %v1159_v0, %v1175_v63  ;;  %v1193_v17 = vcombine.high %v1159_v0, %v1175_v63 }
 0x213   : > { %16627 = vst [vmem:[#allocation10_spill] sm:$0xff] %v13372_v25  ;;  %16628 = vst [vmem:[#allocation14_spill] sm:$0xff] %v13382_v5  ;;  %v1243_v54 = vrot.slane %v1229_v56, %v12436_v11  ;;  %v1244_v53 = vcombine.low %v1220_v12, %v1236_v55  ;;  %v1245_v43 = vcombine.high %v1220_v12, %v1236_v55  ;;  %5796 = vrot.lane.b32.xlu1 %v13010_v38, %s12086_s23 }
 0x214   : > { %16629 = vst [vmem:[#allocation89_spill] sm:$0xff] %v13385_v42  ;;  %v1184_v28 = vrot.slane %v1176_v61, %v12444_v16  ;;  %v1191_v48 = vrot.slane %v1177_v62, %v12444_v16  ;;  %v1280_v59 = vcombine.low %v16630_v18, %v789_v35  ;;  %v1200_v57 = vrot.slane %v1192_v4, %v12444_v16 }
 0x215   : > { %v1207_v3 = vrot.slane %v1193_v17, %v12444_v16  ;;  %v1252_v9 = vrot.slane %v1244_v53, %v12444_v16  ;;  %v1260_v0 = vcombine.low %v1227_v39, %v1243_v54  ;;  %v1259_v61 = vrot.slane %v1245_v43, %v12444_v16  ;;  %5842 = vrot.lane.b32.xlu0 %v12904_v10, %s12087_s24 }
 0x216   : > { %v2232_v56 = vcombine.low %v1184_v28, %v1191_v48  ;;  %v10908_v63 = vcombine.high %v1184_v28, %v1191_v48  ;;  %v1261_v12 = vcombine.high %v1227_v39, %v1243_v54  ;;  %v1281_v44 = vcombine.high %v16630_v18, %v789_v35  ;;  %v837_v48 = vpop.permute.xlu0 %836 }
 0x217   : > { %v2248_v55 = vcombine.low %v1200_v57, %v1207_v3  ;;  %v10909_v62 = vcombine.high %v1200_v57, %v1207_v3  ;;  %v1268_v27 = vrot.slane %v1260_v0, %v12444_v16  ;;  %v2300_v24 = vcombine.low %v1252_v9, %v1259_v61  ;;  %5844 = vrot.lane.b32.xlu1 %v13010_v38, %s12087_s24  ;;  %v839_v38 = vpop.permute.xlu1 %838 }
 0x218   : > { %v13404_v4 = vrot.slane %v2232_v56, %v12436_v11  ;;  %v13407_v17 = vrot.slane %v10908_v63, %v12436_v11  ;;  %v1275_v53 = vrot.slane %v1261_v12, %v12444_v16  ;;  %v10910_v35 = vcombine.high %v1252_v9, %v1259_v61  ;;  %v16637_v56 = vld [vmem:[#allocation12_spill] sm:$0xff] }
 0x219   : > { %v13413_v39 = vrot.slane %v2248_v55, %v12436_v11  ;;  %v13416_v54 = vrot.slane %v10909_v62, %v12436_v11  ;;  %v1288_v28 = vrot.slane %v1280_v59, %v12436_v11  ;;  %v13422_v43 = vrot.slane %v2300_v24, %v12436_v11  ;;  %5752 = vrot.lane.b32.xlu0 %v12967_v40, %s12085_s22 }
 0x21a   : > { %16631 = vst [vmem:[#allocation8_spill] sm:$0xff] %v13404_v4  ;;  %16632 = vst [vmem:[#allocation90_spill] sm:$0xff] %v13407_v17  ;;  %v2316_v18 = vcombine.low %v1268_v27, %v1275_v53  ;;  %v10911_v57 = vcombine.high %v1268_v27, %v1275_v53  ;;  %v1295_v3 = vrot.slane %v1281_v44, %v12436_v11  ;;  %v13466_v10 = vpop.permute.xlu0 %744 }
 0x21b   : > { %16633 = vst [vmem:[#allocation91_spill] sm:$0xff] %v13413_v39  ;;  %16634 = vst [vmem:[#allocation92_spill] sm:$0xff] %v13416_v54  ;;  %v13426_v0 = vrot.slane %v10910_v35, %v12436_v11  ;;  %v1348_v63 = vcombine.low %v16637_v56, %v791_v36  ;;  %v1349_v9 = vcombine.high %v16637_v56, %v791_v36  ;;  %5750 = vrot.lane.b32.xlu1 %v12896_v26, %s12085_s22 }
 0x21c   : > { %16635 = vst [vmem:[#allocation93_spill] sm:$0xff] %v13422_v43  ;;  %v5337_v59 = vcombine.low %v13323_v7, %v13326_v41  ;;  %v13433_v61 = vrot.slane %v2316_v18, %v12436_v11  ;;  %v13436_v24 = vrot.slane %v10911_v57, %v12436_v11  ;;  %v5353_v27 = vcombine.low %v13329_v52, %v13332_v32 }
 0x21d   : > { %16636 = vst [vmem:[#allocation94_spill] sm:$0xff] %v13426_v0  ;;  %v5405_v44 = vcombine.low %v13372_v25, %v13375_v45  ;;  %v13445_v36 = vrot.slane %v1348_v63, %v12436_v11  ;;  %v13448_v12 = vrot.slane %v1349_v9, %v12436_v11  ;;  %v5421_v62 = vcombine.low %v13382_v5, %v13385_v42 }
 0x21e   : > { %16638 = vst [vmem:[#allocation12_spill] sm:$0xff] %v13433_v61  ;;  %16639 = vst [vmem:[#allocation95_spill] sm:$0xff] %v13436_v24  ;;  %v5345_v55 = vrot.slane %v5337_v59, %v12444_v16  ;;  %v5361_v53 = vrot.slane %v5353_v27, %v12444_v16  ;;  %v1296_v18 = vcombine.low %v13347_v58, %v837_v48  ;;  %5846 = vrot.lane.b32.xlu0 %v12896_v26, %s12087_s24 }
 0x21f   : > { %v5413_v35 = vrot.slane %v5405_v44, %v12444_v16  ;;  %v1297_v57 = vcombine.high %v13347_v58, %v837_v48  ;;  %v5429_v56 = vrot.slane %v5421_v62, %v12444_v16  ;;  %v5473_v63 = vcombine.low %v13222_v15, %v13225_v30  ;;  %5798 = vrot.lane.b32.xlu1 %v12896_v26, %s12086_s23 }
 0x220   : > { %v5489_v9 = vcombine.low %v13231_v33, %v13234_v50  ;;  %v5541_v59 = vcombine.low %v13242_v34, %v13248_v1  ;;  %v5369_v27 = vcombine.low %v5345_v55, %v5361_v53  ;;  %v5370_v44 = vcombine.high %v5345_v55, %v5361_v53 }
 0x221   : > { %v1304_v5 = vrot.slane %v1296_v18, %v12436_v11  ;;  %v1311_v58 = vrot.slane %v1297_v57, %v12436_v11  ;;  %v5437_v48 = vcombine.low %v5413_v35, %v5429_v56  ;;  %v5438_v62 = vcombine.high %v5413_v35, %v5429_v56 }
 0x222   : > { %v5481_v15 = vrot.slane %v5473_v63, %v12444_v16  ;;  %v5497_v33 = vrot.slane %v5489_v9, %v12444_v16  ;;  %v5549_v57 = vrot.slane %v5541_v59, %v12444_v16 }
 0x223   : > { %v1312_v34 = vcombine.low %v1288_v28, %v1304_v5  ;;  %v1313_v1 = vcombine.high %v1288_v28, %v1304_v5  ;;  %v1328_v50 = vcombine.low %v1295_v3, %v1311_v58  ;;  %v1329_v55 = vcombine.high %v1295_v3, %v1311_v58  ;;  %5800 = vrot.lane.b32.xlu1 %v12967_v40, %s12086_s23 }
 0x224   : > { %v8080_v53 = vpack.c.bf16 %v5437_v48, %v5369_v27  ;;  %v8088_v18 = vpack.c.bf16 %v5438_v62, %v5370_v44  ;;  %v5505_v30 = vcombine.low %v5481_v15, %v5497_v33  ;;  %v5506_v3 = vcombine.high %v5481_v15, %v5497_v33 }
 0x225   : > { %v1320_v42 = vrot.slane %v1312_v34, %v12444_v16  ;;  %v1327_v35 = vrot.slane %v1313_v1, %v12444_v16  ;;  %v1336_v56 = vrot.slane %v1328_v50, %v12444_v16  ;;  %v1343_v63 = vrot.slane %v1329_v55, %v12444_v16  ;;  %v13489_v1 = vpop.permute.xlu1 %746  ;;  %v793_v50 = vpop.permute.xlu0 %792 }
 0x226   : > { %11717 = vmatprep.subr.msk.bf16.mxu1 %vm8106_vm1, %v8080_v53  ;;  %11725 = vmatprep.subr.msk.bf16.mxu0 %vm8106_vm1, %v8088_v18  ;;  %v8150_v5 = vsel %vm8106_vm1, %v8080_v53, 0  ;;  %v8295_v28 = vsel %vm8106_vm1, %v8088_v18, 0  ;;  %v5557_v34 = vcombine.low %v13255_v2, %v13258_v23  ;;  %v1364_v48 = vcombine.low %v13387_v47, %v839_v38  ;;  %v16640_v53 = vld [vmem:[#allocation4_spill] sm:$0xff]  ;;  %v16648_v23 = vld [vmem:[#allocation27_spill] sm:$0xff] }
 0x227   : > { %11388 = vmatpush3.bf16.xpose.msra.mxu1 %v8150_v5  ;;  %11420 = vmatpush3.bf16.xpose.msra.mxu0 %v8295_v28  ;;  %v2368_v9 = vcombine.low %v1320_v42, %v1327_v35  ;;  %v10912_v59 = vcombine.high %v1320_v42, %v1327_v35  ;;  %v2384_v27 = vcombine.low %v1336_v56, %v1343_v63 }
 0x228   : > { %v10913_v44 = vcombine.high %v1336_v56, %v1343_v63  ;;  %v5565_v58 = vrot.slane %v5557_v34, %v12444_v16  ;;  %v1365_v62 = vcombine.high %v13387_v47, %v839_v38  ;;  %v1416_v18 = vcombine.low %v16640_v53, %v793_v50  ;;  %5848 = vrot.lane.b32.xlu1 %v12967_v40, %s12087_s24  ;;  %s16193_s24 = scalar_lea.vmem %s16307_s7, %s11101_s19 }
 0x229   : > { %v13495_v55 = vrot.slane %v2368_v9, %v12436_v11  ;;  %v13498_v15 = vrot.slane %v10912_v59, %v12436_v11  ;;  %v13501_v33 = vrot.slane %v2384_v27, %v12436_v11  ;;  %v1372_v38 = vrot.slane %v1364_v48, %v12436_v11 }
 0x22a   : > { %v13507_v42 = vrot.slane %v10913_v44, %v12436_v11  ;;  %v5573_v35 = vcombine.low %v5549_v57, %v5565_v58  ;;  %v5574_v56 = vcombine.high %v5549_v57, %v5565_v58  ;;  %v1379_v47 = vrot.slane %v1365_v62, %v12436_v11  ;;  %v795_v44 = vpop.permute.xlu1 %794  ;;  %v16641_v62 = vld [vmem:[#allocation52_spill] sm:$0xff] }
 0x22b   : > { %v1417_v63 = vcombine.high %v16640_v53, %v793_v50  ;;  %v13513_v5 = vrot.slane %v1416_v18, %v12436_v11  ;;  %v4522_v28 = vcombine.high %v12717_v8, %v12720_v20  ;;  %v1380_v59 = vcombine.low %v13445_v36, %v1372_v38  ;;  %v16642_v53 = vld [vmem:[#allocation51_spill] sm:$0xff] }
 0x22c   : > { %v8081_v34 = vpack.c.bf16 %v5573_v35, %v5505_v30  ;;  %v8089_v9 = vpack.c.bf16 %v5574_v56, %v5506_v3  ;;  %v1381_v27 = vcombine.high %v13445_v36, %v1372_v38  ;;  %v1396_v57 = vcombine.low %v13448_v12, %v1379_v47  ;;  %v16643_v38 = vld [vmem:[#allocation54_spill] sm:$0xff] }
 0x22d   : > { %v1397_v58 = vcombine.high %v13448_v12, %v1379_v47  ;;  %v13522_v48 = vrot.slane %v1417_v63, %v12436_v11  ;;  %v4536_v50 = vrot.slane %v4522_v28, %v12444_v16  ;;  %v1388_v8 = vrot.slane %v1380_v59, %v12444_v16  ;;  %v16644_v47 = vld [vmem:[#allocation53_spill] sm:$0xff]  ;;  %v16645_v28 = vld [vmem:[#allocation56_spill] sm:$0xff]  ;;  %v16646_v59 = vld [vmem:[#allocation55_spill] sm:$0xff] }
 0x22e   : > { %11718 = vmatprep.subr.msk.bf16.mxu1 %vm8106_vm1, %v8081_v34  ;;  %11726 = vmatprep.subr.msk.bf16.mxu0 %vm8106_vm1, %v8089_v9  ;;  %v1395_v20 = vrot.slane %v1381_v27, %v12444_v16  ;;  %v8153_v30 = vsel %vm8106_vm1, %v8081_v34, 0  ;;  %v8298_v36 = vsel %vm8106_vm1, %v8089_v9, 0  ;;  %v1404_v3 = vrot.slane %v1396_v57, %v12444_v16  ;;  %v16647_v57 = vld [vmem:[#allocation6_spill] sm:$0xff] }
 0x22f   : > { %v1411_v12 = vrot.slane %v1397_v58, %v12444_v16  ;;  %11390 = vmatpush3.bf16.xpose.msra.mxu1 %v8153_v30  ;;  %11422 = vmatpush3.bf16.xpose.msra.mxu0 %v8298_v36  ;;  %v4538_v18 = vcombine.high %v16642_v53, %v16641_v62  ;;  %v4590_v63 = vcombine.high %v16644_v47, %v16643_v38  ;;  %v841_v36 = vpop.permute.xlu0 %840  ;;  %v843_v62 = vpop.permute.xlu1 %842 }
 0x230   : > { %v2436_v35 = vcombine.low %v1388_v8, %v1395_v20  ;;  %v10914_v56 = vcombine.high %v1388_v8, %v1395_v20  ;;  %v4606_v27 = vcombine.high %v16646_v59, %v16645_v28  ;;  %v1484_v26 = vcombine.low %v16647_v57, %v795_v44 }
 0x231   : > { %v2452_v34 = vcombine.low %v1404_v3, %v1411_v12  ;;  %v10915_v40 = vcombine.high %v1404_v3, %v1411_v12  ;;  %v4552_v9 = vrot.slane %v4538_v18, %v12444_v16  ;;  %v4604_v8 = vrot.slane %v4590_v63, %v12444_v16 }
 0x232   : > { %v13542_v58 = vrot.slane %v2436_v35, %v12436_v11  ;;  %v13545_v30 = vrot.slane %v10914_v56, %v12436_v11  ;;  %v4620_v20 = vrot.slane %v4606_v27, %v12444_v16  ;;  %v1485_v47 = vcombine.high %v16647_v57, %v795_v44 }
 0x233   : > { %v13550_v53 = vrot.slane %v2452_v34, %v12436_v11  ;;  %v13553_v3 = vrot.slane %v10915_v40, %v12436_v11  ;;  %v4555_v12 = vcombine.low %v4536_v50, %v4552_v9  ;;  %v4556_v18 = vcombine.high %v4536_v50, %v4552_v9  ;;  %v16649_v50 = vld [vmem:[#allocation25_spill] sm:$0xff] }
 0x234   : > { %v4623_v38 = vcombine.low %v4604_v8, %v4620_v20  ;;  %v4624_v35 = vcombine.high %v4604_v8, %v4620_v20  ;;  %v1492_v56 = vrot.slane %v1484_v26, %v12436_v11  ;;  %v1432_v63 = vcombine.low %v13466_v10, %v841_v36 }
 0x235   : > { %v1433_v28 = vcombine.high %v13466_v10, %v841_v36  ;;  %v1500_v59 = vcombine.low %v13489_v1, %v843_v62  ;;  %v1501_v27 = vcombine.high %v13489_v1, %v843_v62  ;;  %v1499_v40 = vrot.slane %v1485_v47, %v12436_v11  ;;  %v16650_v10 = vld [vmem:[#allocation31_spill] sm:$0xff]  ;;  %v16651_v1 = vld [vmem:[#allocation29_spill] sm:$0xff] }
 0x236   : > { %v8090_v34 = vpack.c.bf16 %v4623_v38, %v4555_v12  ;;  %v8098_v2 = vpack.c.bf16 %v4624_v35, %v4556_v18  ;;  %v2160_v9 = vcombine.low %v16649_v50, %v16648_v23  ;;  %v1440_v8 = vrot.slane %v1432_v63, %v12436_v11 }
 0x237   : > { %v1447_v44 = vrot.slane %v1433_v28, %v12436_v11  ;;  %v1508_v26 = vrot.slane %v1500_v59, %v12436_v11  ;;  %v1515_v57 = vrot.slane %v1501_v27, %v12436_v11  ;;  %v2228_v20 = vcombine.low %v16651_v1, %v16650_v10 }
 0x238   : > { %11727 = vmatprep.subr.msk.bf16.mxu1 %vm8106_vm1, %v8090_v34  ;;  %11735 = vmatprep.subr.msk.bf16.mxu0 %vm8106_vm1, %v8098_v2  ;;  %v2161_v36 = vcombine.high %v16649_v50, %v16648_v23  ;;  %v2229_v62 = vcombine.high %v16651_v1, %v16650_v10  ;;  %v1448_v12 = vcombine.low %v13513_v5, %v1440_v8 }
 0x239   : > { %v1449_v18 = vcombine.high %v13513_v5, %v1440_v8  ;;  %v1464_v38 = vcombine.low %v13522_v48, %v1447_v44  ;;  %v1465_v35 = vcombine.high %v13522_v48, %v1447_v44  ;;  %v1516_v47 = vcombine.low %v1492_v56, %v1508_v26 }
 0x23a   : > { %v1517_v63 = vcombine.high %v1492_v56, %v1508_v26  ;;  %v1532_v28 = vcombine.low %v1499_v40, %v1515_v57  ;;  %v1533_v59 = vcombine.high %v1499_v40, %v1515_v57  ;;  %v1456_v27 = vrot.slane %v1448_v12, %v12444_v16  ;;  %v13588_v57 = vpop.permute.xlu0 %748 }
 0x23b   : > { %v1463_v25 = vrot.slane %v1449_v18, %v12444_v16  ;;  %v1472_v23 = vrot.slane %v1464_v38, %v12444_v16  ;;  %v1479_v50 = vrot.slane %v1465_v35, %v12444_v16  ;;  %v1524_v10 = vrot.slane %v1516_v47, %v12444_v16 }
 0x23c   : > { %v1531_v5 = vrot.slane %v1517_v63, %v12444_v16  ;;  %v1540_v8 = vrot.slane %v1532_v28, %v12444_v16  ;;  %v1547_v48 = vrot.slane %v1533_v59, %v12444_v16  ;;  %v8422_v28 = vsel %vm8106_vm1, %v8090_v34, 0 }
 0x23d   : > { %v2504_v44 = vcombine.low %v1456_v27, %v1463_v25  ;;  %v10916_v56 = vcombine.high %v1456_v27, %v1463_v25  ;;  %v2520_v26 = vcombine.low %v1472_v23, %v1479_v50  ;;  %v10917_v40 = vcombine.high %v1472_v23, %v1479_v50  ;;  %v13600_v25 = vpop.permute.xlu1 %750 }
 0x23e   : > { %v2572_v1 = vcombine.low %v1524_v10, %v1531_v5  ;;  %v10918_v12 = vcombine.high %v1524_v10, %v1531_v5  ;;  %v2588_v18 = vcombine.low %v1540_v8, %v1547_v48  ;;  %v10919_v38 = vcombine.high %v1540_v8, %v1547_v48 }
 0x23f   : > { %v13591_v35 = vrot.slane %v2504_v44, %v12436_v11  ;;  %v13594_v47 = vrot.slane %v10916_v56, %v12436_v11  ;;  %v13597_v63 = vrot.slane %v2520_v26, %v12436_v11  ;;  %v13603_v59 = vrot.slane %v10917_v40, %v12436_v11  ;;  %v16652_v26 = vld [vmem:[#allocation46_spill] sm:$0xff]  ;;  %v16653_v40 = vld [vmem:[#allocation45_spill] sm:$0xff] }
 0x240   : > { %v13606_v27 = vrot.slane %v2572_v1, %v12436_v11  ;;  %v13609_v23 = vrot.slane %v10918_v12, %v12436_v11  ;;  %v13612_v50 = vrot.slane %v2588_v18, %v12436_v11  ;;  %v13615_v10 = vrot.slane %v10919_v38, %v12436_v11  ;;  %v16656_v18 = vld [vmem:[#allocation50_spill] sm:$0xff]  ;;  %v16657_v38 = vld [vmem:[#allocation49_spill] sm:$0xff] }
 0x241   : > { %v8043_v5 = vpack.c.bf16 %v2228_v20, %v2160_v9  ;;  %v8051_v8 = vpack.c.bf16 %v2229_v62, %v2161_v36  ;;  %v2264_v34 = vcombine.low %v13404_v4, %v13407_v17  ;;  %v2280_v48 = vcombine.low %v13413_v39, %v13416_v54  ;;  %v16654_v36 = vld [vmem:[#allocation48_spill] sm:$0xff]  ;;  %v16655_v62 = vld [vmem:[#allocation47_spill] sm:$0xff]  ;;  %v16659_v54 = vld [vmem:[#allocation5_spill] sm:$0xff] }
 0x242   : > { %v2332_v44 = vcombine.low %v13422_v43, %v13426_v0  ;;  %v2348_v56 = vcombine.low %v13433_v61, %v13436_v24  ;;  %v4658_v1 = vcombine.high %v16653_v40, %v16652_v26  ;;  %v8567_v9 = vsel %vm8106_vm1, %v8098_v2, 0  ;;  %v797_v0 = vpop.permute.xlu0 %796  ;;  %v16658_v24 = vld [vmem:[#allocation3_spill] sm:$0xff] }
 0x243   : > { %11392 = vmatmul.mubr.msk.bf16.vlgmr.msra.gmra.mrb[24].mxu1 %vm8106_vm1, %v8043_v5  ;;  %11424 = vmatmul.mubr.msk.bf16.vlgmr.msra.gmra.mrb[24].mxu0 %vm8106_vm1, %v8051_v8  ;;  %v2272_v20 = vrot.slane %v2264_v34, %v12444_v16  ;;  %v4674_v12 = vcombine.high %v16655_v62, %v16654_v36  ;;  %v4726_v43 = vcombine.high %v16657_v38, %v16656_v18  ;;  %v799_v36 = vpop.permute.xlu1 %798 }
 0x244   : > { %11440 = vmatpush3.bf16.xpose.msra.mxu1 %v8422_v28  ;;  %11472 = vmatpush3.bf16.xpose.msra.mxu0 %v8567_v9  ;;  %v2288_v61 = vrot.slane %v2280_v48, %v12444_v16  ;;  %v2340_v26 = vrot.slane %v2332_v44, %v12444_v16  ;;  %v2356_v5 = vrot.slane %v2348_v56, %v12444_v16 }
 0x245   : > { %v4672_v8 = vrot.slane %v4658_v1, %v12444_v16  ;;  %v4688_v2 = vrot.slane %v4674_v12, %v12444_v16  ;;  %v4740_v34 = vrot.slane %v4726_v43, %v12444_v16  ;;  %v4742_v40 = vcombine.high %v12681_v13, %v12684_v6 }
 0x246   : > { %v2296_v62 = vcombine.low %v2272_v20, %v2288_v61  ;;  %v2364_v18 = vcombine.low %v2340_v26, %v2356_v5  ;;  %v2297_v28 = vcombine.high %v2272_v20, %v2288_v61  ;;  %v2365_v9 = vcombine.high %v2340_v26, %v2356_v5  ;;  %v845_v61 = vpop.permute.xlu0 %844 }
 0x247   : > { %v4691_v38 = vcombine.low %v4672_v8, %v4688_v2  ;;  %v4756_v48 = vrot.slane %v4742_v40, %v12444_v16  ;;  %v4692_v44 = vcombine.high %v4672_v8, %v4688_v2  ;;  %v1552_v56 = vcombine.low %v16658_v24, %v797_v0 }
 0x248   : > { %v8044_v39 = vpack.c.bf16 %v2364_v18, %v2296_v62  ;;  %v8052_v1 = vpack.c.bf16 %v2365_v9, %v2297_v28  ;;  %v1553_v12 = vcombine.high %v16658_v24, %v797_v0  ;;  %v1620_v43 = vcombine.low %v16659_v54, %v799_v36 }
 0x249   : > { %v4759_v4 = vcombine.low %v4740_v34, %v4756_v48  ;;  %v4760_v17 = vcombine.high %v4740_v34, %v4756_v48  ;;  %v1560_v13 = vrot.slane %v1552_v56, %v12436_v11  ;;  %v1621_v6 = vcombine.high %v16659_v54, %v799_v36  ;;  %v847_v36 = vpop.permute.xlu1 %846 }
 0x24a   : > { %11395 = vmatprep.mubr.msk.bf16.mxu1 %vm8106_vm1, %v8044_v39  ;;  %11427 = vmatprep.mubr.msk.bf16.mxu0 %vm8106_vm1, %v8052_v1  ;;  %v1567_v20 = vrot.slane %v1553_v12, %v12436_v11  ;;  %v13653_v26 = vrot.slane %v1620_v43, %v12436_v11  ;;  %v2400_v0 = vcombine.low %v13495_v55, %v13498_v15  ;;  %v13680_v12 = vpop.permute.xlu0 %752 }
 0x24b   : > { %v8091_v24 = vpack.c.bf16 %v4759_v4, %v4691_v38  ;;  %v8099_v5 = vpack.c.bf16 %v4760_v17, %v4692_v44  ;;  %v13658_v8 = vrot.slane %v1621_v6, %v12436_v11  ;;  %v2416_v54 = vcombine.low %v13501_v33, %v13507_v42 }
 0x24c   : > { %v2408_v39 = vrot.slane %v2400_v0, %v12444_v16  ;;  %v2468_v2 = vcombine.low %v13542_v58, %v13545_v30  ;;  %v2484_v34 = vcombine.low %v13550_v53, %v13553_v3  ;;  %v1568_v40 = vcombine.low %v13588_v57, %v845_v61 }
 0x24d   : > { %11728 = vmatprep.subr.msk.bf16.mxu1 %vm8106_vm1, %v8091_v24  ;;  %11736 = vmatprep.subr.msk.bf16.mxu0 %vm8106_vm1, %v8099_v5  ;;  %v2424_v4 = vrot.slane %v2416_v54, %v12444_v16  ;;  %v8425_v17 = vsel %vm8106_vm1, %v8091_v24, 0  ;;  %v8570_v62 = vsel %vm8106_vm1, %v8099_v5, 0  ;;  %v1569_v18 = vcombine.high %v13588_v57, %v845_v61 }
 0x24e   : > { %v2476_v28 = vrot.slane %v2468_v2, %v12444_v16  ;;  %v2492_v9 = vrot.slane %v2484_v34, %v12444_v16  ;;  %11442 = vmatpush3.bf16.xpose.msra.mxu1 %v8425_v17  ;;  %11474 = vmatpush3.bf16.xpose.msra.mxu0 %v8570_v62  ;;  %v1576_v38 = vrot.slane %v1568_v40, %v12436_v11  ;;  %v16660_v17 = vld [vmem:[#allocation67_spill] sm:$0xff]  ;;  %v16661_v62 = vld [vmem:[#allocation66_spill] sm:$0xff] }
 0x24f   : > { %v2432_v48 = vcombine.low %v2408_v39, %v2424_v4  ;;  %v2433_v44 = vcombine.high %v2408_v39, %v2424_v4  ;;  %v1583_v56 = vrot.slane %v1569_v18, %v12436_v11  ;;  %v4794_v1 = vcombine.high %v12931_v51, %v12934_v31  ;;  %v13687_v51 = vpop.permute.xlu1 %754 }
 0x250   : > { %v2500_v43 = vcombine.low %v2476_v28, %v2492_v9  ;;  %v2501_v6 = vcombine.high %v2476_v28, %v2492_v9  ;;  %v1584_v57 = vcombine.low %v1560_v13, %v1576_v38  ;;  %v1585_v61 = vcombine.high %v1560_v13, %v1576_v38 }
 0x251   : > { %v1600_v0 = vcombine.low %v1567_v20, %v1583_v56  ;;  %v1601_v24 = vcombine.high %v1567_v20, %v1583_v56  ;;  %v4808_v5 = vrot.slane %v4794_v1, %v12444_v16  ;;  %v4810_v54 = vcombine.high %v12937_v19, %v12940_v49 }
 0x252   : > { %v8045_v2 = vpack.c.bf16 %v2500_v43, %v2432_v48  ;;  %v8053_v39 = vpack.c.bf16 %v2501_v6, %v2433_v44  ;;  %v1592_v34 = vrot.slane %v1584_v57, %v12444_v16  ;;  %v1599_v40 = vrot.slane %v1585_v61, %v12444_v16  ;;  %v801_v44 = vpop.permute.xlu0 %800 }
 0x253   : > { %v1608_v31 = vrot.slane %v1600_v0, %v12444_v16  ;;  %v1615_v4 = vrot.slane %v1601_v24, %v12444_v16  ;;  %v4824_v13 = vrot.slane %v4810_v54, %v12444_v16  ;;  %v4862_v20 = vcombine.high %v12994_v37, %v12997_v21  ;;  %v16665_v54 = vld [vmem:[#allocation9_spill] sm:$0xff] }
 0x254   : > { %11396 = vmatmul.mubr.msk.bf16.gmra.mrb[28].mxu1 %vm8106_vm1, %v8045_v2  ;;  %11428 = vmatmul.mubr.msk.bf16.gmra.mrb[28].mxu0 %vm8106_vm1, %v8053_v39  ;;  %v2640_v19 = vcombine.low %v1592_v34, %v1599_v40  ;;  %v10920_v49 = vcombine.high %v1592_v34, %v1599_v40  ;;  %v4878_v18 = vcombine.high %v16661_v62, %v16660_v17  ;;  %v803_v34 = vpop.permute.xlu1 %802 }
 0x255   : > { %v2656_v28 = vcombine.low %v1608_v31, %v1615_v4  ;;  %v10921_v9 = vcombine.high %v1608_v31, %v1615_v4  ;;  %v4827_v38 = vcombine.low %v4808_v5, %v4824_v13  ;;  %v4876_v48 = vrot.slane %v4862_v20, %v12444_v16  ;;  %v16666_v31 = vld [vmem:[#allocation58_spill] sm:$0xff]  ;;  %v16667_v4 = vld [vmem:[#allocation57_spill] sm:$0xff]  ;;  %v16668_v20 = vld [vmem:[#allocation60_spill] sm:$0xff] }
 0x256   : > { %v13700_v56 = vrot.slane %v2640_v19, %v12436_v11  ;;  %v13703_v37 = vrot.slane %v10920_v49, %v12436_v11  ;;  %v4892_v21 = vrot.slane %v4878_v18, %v12444_v16  ;;  %v4828_v1 = vcombine.high %v4808_v5, %v4824_v13  ;;  %v16669_v19 = vld [vmem:[#allocation59_spill] sm:$0xff] }
 0x257   : > { %v13707_v43 = vrot.slane %v2656_v28, %v12436_v11  ;;  %v13710_v6 = vrot.slane %v10921_v9, %v12436_v11  ;;  %v1636_v57 = vcombine.low %v13600_v25, %v847_v36  ;;  %v1637_v61 = vcombine.high %v13600_v25, %v847_v36 }
 0x258   : > { %16662 = vst [vmem:[#allocation4_spill] sm:$0xff] %v13700_v56  ;;  %v4895_v0 = vcombine.low %v4876_v48, %v4892_v21  ;;  %v4896_v24 = vcombine.high %v4876_v48, %v4892_v21  ;;  %v1688_v2 = vcombine.low %v16665_v54, %v801_v44  ;;  %v1689_v39 = vcombine.high %v16665_v54, %v801_v44  ;;  %v16671_v54 = vld [vmem:[#allocation61_spill] sm:$0xff] }
 0x259   : > { %16663 = vst [vmem:[#allocation52_spill] sm:$0xff] %v13707_v43  ;;  %16664 = vst [vmem:[#allocation51_spill] sm:$0xff] %v13710_v6  ;;  %v1644_v40 = vrot.slane %v1636_v57, %v12436_v11  ;;  %v1651_v5 = vrot.slane %v1637_v61, %v12436_v11  ;;  %v4930_v13 = vcombine.high %v16667_v4, %v16666_v31 }
 0x25a   : > { %v4946_v49 = vcombine.high %v16669_v19, %v16668_v20  ;;  %v8092_v17 = vpack.c.bf16 %v4895_v0, %v4827_v38  ;;  %v8100_v62 = vpack.c.bf16 %v4896_v24, %v4828_v1  ;;  %v13723_v25 = vrot.slane %v1688_v2, %v12436_v11  ;;  %v16670_v24 = vld [vmem:[#allocation62_spill] sm:$0xff] }
 0x25b   : > { %v13726_v36 = vrot.slane %v1689_v39, %v12436_v11  ;;  %v1652_v18 = vcombine.low %v13653_v26, %v1644_v40  ;;  %v1653_v28 = vcombine.high %v13653_v26, %v1644_v40  ;;  %v1668_v9 = vcombine.low %v13658_v8, %v1651_v5 }
 0x25c   : > { %v1669_v48 = vcombine.high %v13658_v8, %v1651_v5  ;;  %11729 = vmatprep.subr.msk.bf16.mxu1 %vm8106_vm1, %v8092_v17  ;;  %11737 = vmatprep.subr.msk.bf16.mxu0 %vm8106_vm1, %v8100_v62  ;;  %v8428_v38 = vsel %vm8106_vm1, %v8092_v17, 0  ;;  %v8573_v44 = vsel %vm8106_vm1, %v8100_v62, 0  ;;  %v4944_v21 = vrot.slane %v4930_v13, %v12444_v16  ;;  %v851_v5 = vpop.permute.xlu1 %850  ;;  %v16672_v17 = vld [vmem:[#allocation13_spill] sm:$0xff] }
 0x25d   : > { %v4960_v1 = vrot.slane %v4946_v49, %v12444_v16  ;;  %v1660_v57 = vrot.slane %v1652_v18, %v12444_v16  ;;  %v1667_v26 = vrot.slane %v1653_v28, %v12444_v16  ;;  %v1676_v61 = vrot.slane %v1668_v9, %v12444_v16  ;;  %11444 = vmatpush3.bf16.xpose.msra.mxu1 %v8428_v38 }
 0x25e   : > { %v1683_v8 = vrot.slane %v1669_v48, %v12444_v16  ;;  %11476 = vmatpush3.bf16.xpose.msra.mxu0 %v8573_v44  ;;  %v4998_v2 = vcombine.high %v16671_v54, %v16670_v24  ;;  %v5014_v39 = vcombine.high %v12866_v46, %v12869_v22  ;;  %v1756_v62 = vcombine.low %v16672_v17, %v803_v34  ;;  %v849_v48 = vpop.permute.xlu0 %848 }
 0x25f   : > { %v4963_v0 = vcombine.low %v4944_v21, %v4960_v1  ;;  %v4964_v40 = vcombine.high %v4944_v21, %v4960_v1  ;;  %v2708_v31 = vcombine.low %v1660_v57, %v1667_v26  ;;  %v10922_v4 = vcombine.high %v1660_v57, %v1667_v26 }
 0x260   : > { %v2724_v13 = vcombine.low %v1676_v61, %v1683_v8  ;;  %v10923_v20 = vcombine.high %v1676_v61, %v1683_v8  ;;  %v5012_v19 = vrot.slane %v4998_v2, %v12444_v16  ;;  %v5028_v49 = vrot.slane %v5014_v39, %v12444_v16  ;;  %v13774_v39 = vpop.permute.xlu1 %758 }
 0x261   : > { %v1757_v18 = vcombine.high %v16672_v17, %v803_v34  ;;  %v13751_v28 = vrot.slane %v2708_v31, %v12436_v11  ;;  %v13754_v9 = vrot.slane %v10922_v4, %v12436_v11  ;;  %v1764_v21 = vrot.slane %v1756_v62, %v12436_v11 }
 0x262   : > { %v13757_v46 = vrot.slane %v2724_v13, %v12436_v11  ;;  %v13760_v22 = vrot.slane %v10923_v20, %v12436_v11  ;;  %v5031_v38 = vcombine.low %v5012_v19, %v5028_v49  ;;  %v5032_v44 = vcombine.high %v5012_v19, %v5028_v49 }
 0x263   : > { %16673 = vst [vmem:[#allocation54_spill] sm:$0xff] %v13751_v28  ;;  %16674 = vst [vmem:[#allocation53_spill] sm:$0xff] %v13754_v9  ;;  %v1771_v1 = vrot.slane %v1757_v18, %v12436_v11  ;;  %v2536_v34 = vcombine.low %v13591_v35, %v13594_v47  ;;  %v2552_v57 = vcombine.low %v13597_v63, %v13603_v59 }
 0x264   : > { %16675 = vst [vmem:[#allocation56_spill] sm:$0xff] %v13757_v46  ;;  %16676 = vst [vmem:[#allocation55_spill] sm:$0xff] %v13760_v22  ;;  %v2604_v26 = vcombine.low %v13606_v27, %v13609_v23  ;;  %v2620_v61 = vcombine.low %v13612_v50, %v13615_v10  ;;  %v8093_v8 = vpack.c.bf16 %v5031_v38, %v4963_v0 }
 0x265   : > { %v8101_v24 = vpack.c.bf16 %v5032_v44, %v4964_v40  ;;  %v1704_v54 = vcombine.low %v13680_v12, %v849_v48  ;;  %v1705_v2 = vcombine.high %v13680_v12, %v849_v48  ;;  %v2544_v31 = vrot.slane %v2536_v34, %v12444_v16 }
 0x266   : > { %v2560_v4 = vrot.slane %v2552_v57, %v12444_v16  ;;  %v2612_v13 = vrot.slane %v2604_v26, %v12444_v16  ;;  %v2628_v20 = vrot.slane %v2620_v61, %v12444_v16  ;;  %11730 = vmatprep.subr.msk.bf16.mxu1 %vm8106_vm1, %v8093_v8  ;;  %v1772_v12 = vcombine.low %v13687_v51, %v851_v5 }
 0x267   : > { %11738 = vmatprep.subr.msk.bf16.mxu0 %vm8106_vm1, %v8101_v24  ;;  %v1712_v0 = vrot.slane %v1704_v54, %v12436_v11  ;;  %v1719_v40 = vrot.slane %v1705_v2, %v12436_v11  ;;  %v8431_v19 = vsel %vm8106_vm1, %v8093_v8, 0  ;;  %v1773_v61 = vcombine.high %v13687_v51, %v851_v5 }
 0x268   : > { %v2568_v49 = vcombine.low %v2544_v31, %v2560_v4  ;;  %v2636_v17 = vcombine.low %v2612_v13, %v2628_v20  ;;  %v2569_v62 = vcombine.high %v2544_v31, %v2560_v4  ;;  %v2637_v18 = vcombine.high %v2612_v13, %v2628_v20  ;;  %11446 = vmatpush3.bf16.xpose.msra.mxu1 %v8431_v19  ;;  %v13796_v13 = vpop.permute.xlu0 %756 }
 0x269   : > { %v1720_v48 = vcombine.low %v13723_v25, %v1712_v0  ;;  %v1721_v38 = vcombine.high %v13723_v25, %v1712_v0  ;;  %v1736_v44 = vcombine.low %v13726_v36, %v1719_v40  ;;  %v1737_v34 = vcombine.high %v13726_v36, %v1719_v40  ;;  %v807_v25 = vpop.permute.xlu1 %806 }
 0x26a   : > { %v8046_v57 = vpack.c.bf16 %v2636_v17, %v2568_v49  ;;  %v8054_v26 = vpack.c.bf16 %v2637_v18, %v2569_v62  ;;  %v1780_v54 = vrot.slane %v1772_v12, %v12436_v11  ;;  %v1787_v36 = vrot.slane %v1773_v61, %v12436_v11  ;;  %v16677_v61 = vld [vmem:[#allocation77_spill] sm:$0xff] }
 0x26b   : > { %v1728_v8 = vrot.slane %v1720_v48, %v12444_v16  ;;  %v1735_v2 = vrot.slane %v1721_v38, %v12444_v16  ;;  %v1744_v31 = vrot.slane %v1736_v44, %v12444_v16  ;;  %v1751_v4 = vrot.slane %v1737_v34, %v12444_v16 }
 0x26c   : > { %11399 = vmatprep.mubr.msk.bf16.mxu1 %vm8106_vm1, %v8046_v57  ;;  %11431 = vmatprep.mubr.msk.bf16.mxu0 %vm8106_vm1, %v8054_v26  ;;  %v1788_v51 = vcombine.low %v1764_v21, %v1780_v54  ;;  %v1789_v5 = vcombine.high %v1764_v21, %v1780_v54  ;;  %v8576_v20 = vsel %vm8106_vm1, %v8101_v24, 0  ;;  %v1804_v62 = vcombine.low %v1771_v1, %v1787_v36 }
 0x26d   : > { %v2776_v0 = vcombine.low %v1728_v8, %v1735_v2  ;;  %v10924_v40 = vcombine.high %v1728_v8, %v1735_v2  ;;  %v2792_v12 = vcombine.low %v1744_v31, %v1751_v4  ;;  %v10925_v19 = vcombine.high %v1744_v31, %v1751_v4  ;;  %11478 = vmatpush3.bf16.xpose.msra.mxu0 %v8576_v20  ;;  %v16678_v8 = vld [vmem:[#allocation79_spill] sm:$0xff]  ;;  %v16679_v2 = vld [vmem:[#allocation78_spill] sm:$0xff]  ;;  %v16680_v4 = vld [vmem:[#allocation81_spill] sm:$0xff]  ;;  %v13826_v20 = vpop.permute.xlu1 %854 }
 0x26e   : > { %v1796_v49 = vrot.slane %v1788_v51, %v12444_v16  ;;  %v1803_v17 = vrot.slane %v1789_v5, %v12444_v16  ;;  %v1805_v18 = vcombine.high %v1771_v1, %v1787_v36  ;;  %v1812_v44 = vrot.slane %v1804_v62, %v12444_v16  ;;  %v16681_v36 = vld [vmem:[#allocation80_spill] sm:$0xff]  ;;  %v805_v5 = vpop.permute.xlu0 %804 }
 0x26f   : > { %v13805_v48 = vrot.slane %v2776_v0, %v12436_v11  ;;  %v13808_v38 = vrot.slane %v10924_v40, %v12436_v11  ;;  %v13811_v21 = vrot.slane %v2792_v12, %v12436_v11  ;;  %v13814_v24 = vrot.slane %v10925_v19, %v12436_v11 }
 0x270   : > { %v1819_v34 = vrot.slane %v1805_v18, %v12444_v16  ;;  %v2844_v57 = vcombine.low %v1796_v49, %v1803_v17  ;;  %v10926_v26 = vcombine.high %v1796_v49, %v1803_v17  ;;  %v5066_v1 = vcombine.high %v13135_v29, %v13138_v14  ;;  %v16684_v18 = vld [vmem:[#allocation7_spill] sm:$0xff] }
 0x271   : > { %v5082_v54 = vcombine.high %v16677_v61, %v13144_v60  ;;  %v5134_v31 = vcombine.high %v16679_v2, %v16678_v8  ;;  %v5150_v51 = vcombine.high %v16681_v36, %v16680_v4  ;;  %v16685_v2 = vld [vmem:[#allocation11_spill] sm:$0xff] }
 0x272   : > { %v13829_v0 = vrot.slane %v2844_v57, %v12436_v11  ;;  %v13832_v40 = vrot.slane %v10926_v26, %v12436_v11  ;;  %v2860_v12 = vcombine.low %v1812_v44, %v1819_v34  ;;  %v10927_v29 = vcombine.high %v1812_v44, %v1819_v34 }
 0x273   : > { %v5080_v14 = vrot.slane %v5066_v1, %v12444_v16  ;;  %v5096_v60 = vrot.slane %v5082_v54, %v12444_v16  ;;  %v5148_v19 = vrot.slane %v5134_v31, %v12444_v16  ;;  %v5164_v49 = vrot.slane %v5150_v51, %v12444_v16 }
 0x274   : > { %v13839_v17 = vrot.slane %v2860_v12, %v12436_v11  ;;  %v13842_v62 = vrot.slane %v10927_v29, %v12436_v11  ;;  %v1824_v57 = vcombine.low %v16684_v18, %v805_v5  ;;  %v1825_v26 = vcombine.high %v16684_v18, %v805_v5  ;;  %v853_v29 = vpop.permute.xlu0 %852  ;;  %v13854_v18 = vpop.permute.xlu1 %5722 }
 0x275   : > { %v5099_v61 = vcombine.low %v5080_v14, %v5096_v60  ;;  %v5167_v44 = vcombine.low %v5148_v19, %v5164_v49  ;;  %v5100_v34 = vcombine.high %v5080_v14, %v5096_v60  ;;  %v5168_v1 = vcombine.high %v5148_v19, %v5164_v49 }
 0x276   : > { %16682 = vst [vmem:[#allocation6_spill] sm:$0xff] %v13839_v17  ;;  %16683 = vst [vmem:[#allocation27_spill] sm:$0xff] %v13842_v62  ;;  %v1832_v54 = vrot.slane %v1824_v57, %v12436_v11  ;;  %v1839_v8 = vrot.slane %v1825_v26, %v12436_v11  ;;  %v1892_v31 = vcombine.low %v16685_v2, %v807_v25 }
 0x277   : > { %v1893_v4 = vcombine.high %v16685_v2, %v807_v25  ;;  %v8094_v36 = vpack.c.bf16 %v5167_v44, %v5099_v61  ;;  %v8102_v51 = vpack.c.bf16 %v5168_v1, %v5100_v34  ;;  %v2672_v12 = vcombine.low %v13700_v56, %v13703_v37 }
 0x278   : > { %v2688_v5 = vcombine.low %v13707_v43, %v13710_v6  ;;  %v13857_v14 = vrot.slane %v1892_v31, %v12436_v11  ;;  %v2740_v25 = vcombine.low %v13751_v28, %v13754_v9  ;;  %v2756_v19 = vcombine.low %v13757_v46, %v13760_v22  ;;  %v16686_v46 = vld [vmem:[#allocation70_spill] sm:$0xff]  ;;  %v16689_v9 = vld [vmem:[#allocation71_spill] sm:$0xff]  ;;  %v16691_v43 = vld [vmem:[#allocation73_spill] sm:$0xff] }
 0x279   : > { %v13860_v60 = vrot.slane %v1893_v4, %v12436_v11  ;;  %11731 = vmatprep.subr.msk.bf16.mxu1 %vm8106_vm1, %v8094_v36  ;;  %11739 = vmatprep.subr.msk.bf16.mxu0 %vm8106_vm1, %v8102_v51  ;;  %v2680_v49 = vrot.slane %v2672_v12, %v12444_v16  ;;  %v8434_v26 = vsel %vm8106_vm1, %v8094_v36, 0  ;;  %v8579_v61 = vsel %vm8106_vm1, %v8102_v51, 0  ;;  %v16687_v12 = vld [vmem:[#allocation69_spill] sm:$0xff]  ;;  %v16688_v51 = vld [vmem:[#allocation72_spill] sm:$0xff] }
 0x27a   : > { %v2696_v57 = vrot.slane %v2688_v5, %v12444_v16  ;;  %v2748_v44 = vrot.slane %v2740_v25, %v12444_v16  ;;  %v2764_v34 = vrot.slane %v2756_v19, %v12444_v16  ;;  %11448 = vmatpush3.bf16.xpose.msra.mxu1 %v8434_v26  ;;  %11480 = vmatpush3.bf16.xpose.msra.mxu0 %v8579_v61  ;;  %v16690_v61 = vld [vmem:[#allocation74_spill] sm:$0xff] }
 0x27b   : > { %v1840_v1 = vcombine.low %v13796_v13, %v853_v29  ;;  %v1841_v4 = vcombine.high %v13796_v13, %v853_v29  ;;  %v5202_v22 = vcombine.high %v16687_v12, %v16686_v46  ;;  %v5218_v25 = vcombine.high %v16689_v9, %v16688_v51  ;;  %v13887_v29 = vpop.permute.xlu1 %5770 }
 0x27c   : > { %v2704_v2 = vcombine.low %v2680_v49, %v2696_v57  ;;  %v2705_v31 = vcombine.high %v2680_v49, %v2696_v57  ;;  %v2772_v5 = vcombine.low %v2748_v44, %v2764_v34  ;;  %v2773_v28 = vcombine.high %v2748_v44, %v2764_v34  ;;  %v16692_v49 = vld [vmem:[#allocation76_spill] sm:$0xff]  ;;  %v16693_v57 = vld [vmem:[#allocation75_spill] sm:$0xff] }
 0x27d   : > { %v1848_v36 = vrot.slane %v1840_v1, %v12436_v11  ;;  %v1855_v19 = vrot.slane %v1841_v4, %v12436_v11  ;;  %v5216_v26 = vrot.slane %v5202_v22, %v12444_v16  ;;  %v5270_v6 = vcombine.high %v16691_v43, %v16690_v61 }
 0x27e   : > { %v5286_v13 = vcombine.high %v16693_v57, %v16692_v49  ;;  %v8047_v46 = vpack.c.bf16 %v2772_v5, %v2704_v2  ;;  %v8055_v12 = vpack.c.bf16 %v2773_v28, %v2705_v31  ;;  %v5232_v9 = vrot.slane %v5218_v25, %v12444_v16 }
 0x27f   : > { %v1856_v44 = vcombine.low %v1832_v54, %v1848_v36  ;;  %v1857_v34 = vcombine.high %v1832_v54, %v1848_v36  ;;  %v1872_v1 = vcombine.low %v1839_v8, %v1855_v19  ;;  %v1873_v56 = vcombine.high %v1839_v8, %v1855_v19  ;;  %v13902_v57 = vpop.permute.xlu1 %5772 }
 0x280   : > { %v5284_v4 = vrot.slane %v5270_v6, %v12444_v16  ;;  %11400 = vmatmul.mubr.msk.bf16.gmra.mrb[32].mxu1 %vm8106_vm1, %v8047_v46  ;;  %11432 = vmatmul.mubr.msk.bf16.gmra.mrb[32].mxu0 %vm8106_vm1, %v8055_v12  ;;  %v5300_v51 = vrot.slane %v5286_v13, %v12444_v16  ;;  %v5235_v2 = vcombine.low %v5216_v26, %v5232_v9 }
 0x281   : > { %v1864_v43 = vrot.slane %v1856_v44, %v12444_v16  ;;  %v1871_v22 = vrot.slane %v1857_v34, %v12444_v16  ;;  %v1880_v28 = vrot.slane %v1872_v1, %v12444_v16  ;;  %v1887_v54 = vrot.slane %v1873_v56, %v12444_v16 }
 0x282   : > { %v5236_v8 = vcombine.high %v5216_v26, %v5232_v9  ;;  %v5303_v36 = vcombine.low %v5284_v4, %v5300_v51  ;;  %v5304_v6 = vcombine.high %v5284_v4, %v5300_v51  ;;  %v1908_v61 = vcombine.low %v13774_v39, %v13826_v20 }
 0x283   : > { %v2912_v31 = vcombine.low %v1864_v43, %v1871_v22  ;;  %v10928_v5 = vcombine.high %v1864_v43, %v1871_v22  ;;  %v2928_v25 = vcombine.low %v1880_v28, %v1887_v54  ;;  %v10929_v19 = vcombine.high %v1880_v28, %v1887_v54 }
 0x284   : > { %v1909_v49 = vcombine.high %v13774_v39, %v13826_v20  ;;  %v8095_v26 = vpack.c.bf16 %v5303_v36, %v5235_v2  ;;  %v8103_v46 = vpack.c.bf16 %v5304_v6, %v5236_v8  ;;  %v1916_v34 = vrot.slane %v1908_v61, %v12436_v11  ;;  %v16694_v8 = vld [vmem:[#allocation10_spill] sm:$0xff]  ;;  %v13940_v36 = vpop.permute.xlu1 %5820 }
 0x285   : > { %v13905_v13 = vrot.slane %v2912_v31, %v12436_v11  ;;  %v13908_v56 = vrot.slane %v10928_v5, %v12436_v11  ;;  %v13911_v12 = vrot.slane %v2928_v25, %v12436_v11  ;;  %v13914_v44 = vrot.slane %v10929_v19, %v12436_v11  ;;  %v16696_v31 = vld [vmem:[#allocation14_spill] sm:$0xff] }
 0x286   : > { %v1923_v39 = vrot.slane %v1909_v49, %v12436_v11  ;;  %11732 = vmatprep.subr.msk.bf16.mxu1 %vm8106_vm1, %v8095_v26  ;;  %11740 = vmatprep.subr.msk.bf16.mxu0 %vm8106_vm1, %v8103_v46  ;;  %v8437_v20 = vsel %vm8106_vm1, %v8095_v26, 0  ;;  %v8582_v1 = vsel %vm8106_vm1, %v8103_v46, 0  ;;  %v5338_v9 = vcombine.high %v13323_v7, %v13326_v41  ;;  %v16695_v41 = vld [vmem:[#allocation89_spill] sm:$0xff] }
 0x287   : > { %v5354_v4 = vcombine.high %v13329_v52, %v13332_v32  ;;  %v1924_v43 = vcombine.low %v13857_v14, %v1916_v34  ;;  %v1925_v22 = vcombine.high %v13857_v14, %v1916_v34  ;;  %11450 = vmatpush3.bf16.xpose.msra.mxu1 %v8437_v20  ;;  %11482 = vmatpush3.bf16.xpose.msra.mxu0 %v8582_v1  ;;  %v16697_v20 = vld [vmem:[#allocation17_spill] sm:$0xff] }
 0x288   : > { %v1940_v51 = vcombine.low %v13860_v60, %v1923_v39  ;;  %v1941_v28 = vcombine.high %v13860_v60, %v1923_v39  ;;  %v5352_v54 = vrot.slane %v5338_v9, %v12444_v16  ;;  %v5406_v7 = vcombine.high %v16694_v8, %v13375_v45 }
 0x289   : > { %v5368_v2 = vrot.slane %v5354_v4, %v12444_v16  ;;  %v5422_v52 = vcombine.high %v16696_v31, %v16695_v41  ;;  %v1932_v32 = vrot.slane %v1924_v43, %v12444_v16  ;;  %v1939_v14 = vrot.slane %v1925_v22, %v12444_v16 }
 0x28a   : > { %v1948_v5 = vrot.slane %v1940_v51, %v12444_v16  ;;  %v1955_v60 = vrot.slane %v1941_v28, %v12444_v16  ;;  %v5420_v25 = vrot.slane %v5406_v7, %v12444_v16  ;;  %v5866_v1 = vcombine.low %v16697_v20, %v13887_v29 }
 0x28b   : > { %v5371_v6 = vcombine.low %v5352_v54, %v5368_v2  ;;  %v5436_v19 = vrot.slane %v5422_v52, %v12444_v16  ;;  %v5372_v61 = vcombine.high %v5352_v54, %v5368_v2  ;;  %v2980_v45 = vcombine.low %v1932_v32, %v1939_v14  ;;  %v13974_v52 = vpop.permute.xlu1 %5728 }
 0x28c   : > { %v10930_v49 = vcombine.high %v1932_v32, %v1939_v14  ;;  %v2996_v26 = vcombine.low %v1948_v5, %v1955_v60  ;;  %v10931_v46 = vcombine.high %v1948_v5, %v1955_v60  ;;  %v5867_v9 = vcombine.high %v16697_v20, %v13887_v29  ;;  %v16702_v32 = vld [vmem:[#allocation19_spill] sm:$0xff]  ;;  %v16706_v20 = vld [vmem:[#allocation84_spill] sm:$0xff] }
 0x28d   : > { %v5439_v34 = vcombine.low %v5420_v25, %v5436_v19  ;;  %v5440_v39 = vcombine.high %v5420_v25, %v5436_v19  ;;  %v13949_v4 = vrot.slane %v2980_v45, %v12436_v11  ;;  %v13961_v2 = vrot.slane %v5866_v1, %v12436_v11 }
 0x28e   : > { %v13952_v43 = vrot.slane %v10930_v49, %v12436_v11  ;;  %v13955_v22 = vrot.slane %v2996_v26, %v12436_v11  ;;  %v13958_v51 = vrot.slane %v10931_v46, %v12436_v11  ;;  %v13964_v8 = vrot.slane %v5867_v9, %v12436_v11  ;;  %v16704_v46 = vld [vmem:[#allocation82_spill] sm:$0xff] }
 0x28f   : > { %16698 = vst [vmem:[#allocation25_spill] sm:$0xff] %v13949_v4  ;;  %v8096_v28 = vpack.c.bf16 %v5439_v34, %v5371_v6  ;;  %v8104_v54 = vpack.c.bf16 %v5440_v39, %v5372_v61  ;;  %v2808_v29 = vcombine.low %v13805_v48, %v13808_v38  ;;  %v2824_v7 = vcombine.low %v13811_v21, %v13814_v24  ;;  %v16705_v39 = vld [vmem:[#allocation85_spill] sm:$0xff] }
 0x290   : > { %16699 = vst [vmem:[#allocation31_spill] sm:$0xff] %v13952_v43  ;;  %16700 = vst [vmem:[#allocation29_spill] sm:$0xff] %v13955_v22  ;;  %v2876_v41 = vcombine.low %v13829_v0, %v13832_v40  ;;  %v2892_v31 = vcombine.low %v13839_v17, %v13842_v62  ;;  %v5934_v14 = vcombine.low %v16702_v32, %v13902_v57 }
 0x291   : > { %16701 = vst [vmem:[#allocation46_spill] sm:$0xff] %v13958_v51  ;;  %11733 = vmatprep.subr.msk.bf16.mxu1 %vm8106_vm1, %v8096_v28  ;;  %11741 = vmatprep.subr.msk.bf16.mxu0 %vm8106_vm1, %v8104_v54  ;;  %v5935_v5 = vcombine.high %v16702_v32, %v13902_v57  ;;  %v8440_v60 = vsel %vm8106_vm1, %v8096_v28, 0  ;;  %v8585_v6 = vsel %vm8106_vm1, %v8104_v54, 0  ;;  %v2816_v25 = vrot.slane %v2808_v29, %v12444_v16  ;;  %v16703_v57 = vld [vmem:[#allocation83_spill] sm:$0xff]  ;;  %v16708_v32 = vld [vmem:[#allocation86_spill] sm:$0xff] }
 0x292   : > { %v2832_v19 = vrot.slane %v2824_v7, %v12444_v16  ;;  %v2884_v61 = vrot.slane %v2876_v41, %v12444_v16  ;;  %v2900_v45 = vrot.slane %v2892_v31, %v12444_v16  ;;  %11452 = vmatpush3.bf16.xpose.msra.mxu1 %v8440_v60  ;;  %v13989_v49 = vrot.slane %v5934_v14, %v12436_v11  ;;  %v16707_v31 = vld [vmem:[#allocation87_spill] sm:$0xff] }
 0x293   : > { %v13992_v26 = vrot.slane %v5935_v5, %v12436_v11  ;;  %11484 = vmatpush3.bf16.xpose.msra.mxu0 %v8585_v6  ;;  %v5474_v34 = vcombine.high %v16704_v46, %v16703_v57  ;;  %v5490_v1 = vcombine.high %v16706_v20, %v16705_v39  ;;  %v5542_v14 = vcombine.high %v16708_v32, %v16707_v31  ;;  %v16709_v5 = vld [vmem:[#allocation88_spill] sm:$0xff]  ;;  %v16710_v60 = vld [vmem:[#allocation15_spill] sm:$0xff]  ;;  %v16712_v31 = vld [vmem:[#allocation33_spill] sm:$0xff] }
 0x294   : > { %v2840_v9 = vcombine.low %v2816_v25, %v2832_v19  ;;  %v2908_v28 = vcombine.low %v2884_v61, %v2900_v45  ;;  %v2841_v54 = vcombine.high %v2816_v25, %v2832_v19  ;;  %v2909_v29 = vcombine.high %v2884_v61, %v2900_v45  ;;  %v5777_v25 = vpop.permute.xlu1 %5776 }
 0x295   : > { %v5488_v7 = vrot.slane %v5474_v34, %v12444_v16  ;;  %v5504_v41 = vrot.slane %v5490_v1, %v12444_v16  ;;  %v5558_v6 = vcombine.high %v16710_v60, %v16709_v5  ;;  %v2944_v57 = vcombine.low %v13905_v13, %v13908_v56 }
 0x296   : > { %v8048_v17 = vpack.c.bf16 %v2908_v28, %v2840_v9  ;;  %v8056_v62 = vpack.c.bf16 %v2909_v29, %v2841_v54  ;;  %v2960_v46 = vcombine.low %v13911_v12, %v13914_v44  ;;  %v5556_v61 = vrot.slane %v5542_v14, %v12444_v16  ;;  %v16711_v29 = vld [vmem:[#allocation34_spill] sm:$0xff]  ;;  %v16714_v14 = vld [vmem:[#allocation35_spill] sm:$0xff] }
 0x297   : > { %v5507_v19 = vcombine.low %v5488_v7, %v5504_v41  ;;  %v5572_v45 = vrot.slane %v5558_v6, %v12444_v16  ;;  %v5508_v34 = vcombine.high %v5488_v7, %v5504_v41  ;;  %v2952_v39 = vrot.slane %v2944_v57, %v12444_v16 }
 0x298   : > { %11403 = vmatprep.mubr.msk.bf16.mxu1 %vm8106_vm1, %v8048_v17  ;;  %11435 = vmatprep.mubr.msk.bf16.mxu0 %vm8106_vm1, %v8056_v62  ;;  %v2968_v20 = vrot.slane %v2960_v46, %v12444_v16  ;;  %v3012_v1 = vcombine.low %v13949_v4, %v13952_v43  ;;  %v3028_v54 = vcombine.low %v13955_v22, %v13958_v51  ;;  %v16713_v62 = vld [vmem:[#allocation36_spill] sm:$0xff]  ;;  %v16716_v22 = vld [vmem:[#allocation37_spill] sm:$0xff]  ;;  %v16719_v43 = vld [vmem:[#allocation18_spill] sm:$0xff] }
 0x299   : > { %v5575_v9 = vcombine.low %v5556_v61, %v5572_v45  ;;  %v5576_v28 = vcombine.high %v5556_v61, %v5572_v45  ;;  %v1993_v32 = vcombine.high %v16712_v31, %v16711_v29  ;;  %v2009_v5 = vcombine.high %v16714_v14, %v16713_v62  ;;  %v16715_v45 = vld [vmem:[#allocation38_spill] sm:$0xff]  ;;  %v16717_v4 = vld [vmem:[#allocation40_spill] sm:$0xff]  ;;  %v16718_v29 = vld [vmem:[#allocation39_spill] sm:$0xff] }
 0x29a   : > { %v2976_v7 = vcombine.low %v2952_v39, %v2968_v20  ;;  %v3020_v17 = vrot.slane %v3012_v1, %v12444_v16  ;;  %v2977_v41 = vcombine.high %v2952_v39, %v2968_v20  ;;  %v3036_v57 = vrot.slane %v3028_v54, %v12444_v16  ;;  %v5825_v39 = vpop.permute.xlu1 %5824 }
 0x29b   : > { %v8097_v60 = vpack.c.bf16 %v5575_v9, %v5507_v19  ;;  %v8105_v6 = vpack.c.bf16 %v5576_v28, %v5508_v34  ;;  %v2007_v46 = vrot.slane %v1993_v32, %v12444_v16  ;;  %v2023_v61 = vrot.slane %v2009_v5, %v12444_v16  ;;  %v5725_v5 = vpop.permute.xlu0 %5724 }
 0x29c   : > { %v2061_v51 = vcombine.high %v16716_v22, %v16715_v45  ;;  %v2077_v31 = vcombine.high %v16718_v29, %v16717_v4  ;;  %v6070_v1 = vcombine.low %v16719_v43, %v5777_v25  ;;  %v3044_v19 = vcombine.low %v3020_v17, %v3036_v57 }
 0x29d   : > { %11734 = vmatprep.subr.msk.bf16.mxu1 %vm8106_vm1, %v8097_v60  ;;  %11742 = vmatprep.subr.msk.bf16.mxu0 %vm8106_vm1, %v8105_v6  ;;  %v3045_v34 = vcombine.high %v3020_v17, %v3036_v57  ;;  %v8443_v20 = vsel %vm8106_vm1, %v8097_v60, 0  ;;  %v8588_v9 = vsel %vm8106_vm1, %v8105_v6, 0  ;;  %v2026_v28 = vcombine.low %v2007_v46, %v2023_v61 }
 0x29e   : > { %11454 = vmatpush3.bf16.xpose.msra.mxu1 %v8443_v20  ;;  %v2075_v22 = vrot.slane %v2061_v51, %v12444_v16  ;;  %v2091_v54 = vrot.slane %v2077_v31, %v12444_v16  ;;  %11486 = vmatpush3.bf16.xpose.msra.mxu0 %v8588_v9  ;;  %v8049_v4 = vpack.c.bf16 %v3044_v19, %v2976_v7  ;;  %v16721_v19 = vld [vmem:[#allocation26_spill] sm:$0xff]  ;;  %v16722_v20 = vld [vmem:[#allocation32_spill] sm:$0xff] }
 0x29f   : > { %v8057_v32 = vpack.c.bf16 %v3045_v34, %v2977_v41  ;;  %v2027_v62 = vcombine.high %v2007_v46, %v2023_v61  ;;  %v6071_v14 = vcombine.high %v16719_v43, %v5777_v25  ;;  %v6078_v17 = vrot.slane %v6070_v1, %v12436_v11  ;;  %v14047_v46 = vpop.permute.xlu1 %5732  ;;  %v16720_v1 = vld [vmem:[#allocation28_spill] sm:$0xff]  ;;  %v16723_v9 = vld [vmem:[#allocation30_spill] sm:$0xff] }
 0x2a0   : > { %v2094_v45 = vcombine.low %v2075_v22, %v2091_v54  ;;  %v2095_v29 = vcombine.high %v2075_v22, %v2091_v54  ;;  %v5950_v60 = vcombine.low %v5725_v5, %v13940_v36  ;;  %11404 = vmatmul.mubr.msk.bf16.gmra.mrb[36].mxu1 %vm8106_vm1, %v8049_v4  ;;  %v5951_v6 = vcombine.high %v5725_v5, %v13940_v36 }
 0x2a1   : > { %11436 = vmatmul.mubr.msk.bf16.gmra.mrb[36].mxu0 %vm8106_vm1, %v8057_v32  ;;  %v6085_v51 = vrot.slane %v6071_v14, %v12436_v11  ;;  %v6086_v7 = vcombine.low %v13974_v52, %v5825_v39  ;;  %v6087_v25 = vcombine.high %v13974_v52, %v5825_v39  ;;  %v2162_v34 = vcombine.low %v16721_v19, %v16720_v1 }
 0x2a2   : > { %v8058_v41 = vpack.c.bf16 %v2094_v45, %v2026_v28  ;;  %v8066_v57 = vpack.c.bf16 %v2095_v29, %v2027_v62  ;;  %v5958_v43 = vrot.slane %v5950_v60, %v12436_v11  ;;  %v5965_v61 = vrot.slane %v5951_v6, %v12436_v11 }
 0x2a3   : > { %v6094_v31 = vrot.slane %v6086_v7, %v12436_v11  ;;  %v2230_v36 = vcombine.low %v16723_v9, %v16722_v20  ;;  %v6101_v39 = vrot.slane %v6087_v25, %v12436_v11  ;;  %v16732_v7 = vld [vmem:[#allocation24_spill] sm:$0xff] }
 0x2a4   : > { %11455 = vmatprep.mubr.msk.bf16.mxu1 %vm8106_vm1, %v8058_v41  ;;  %11487 = vmatprep.mubr.msk.bf16.mxu0 %vm8106_vm1, %v8066_v57  ;;  %v5966_v28 = vcombine.low %v13989_v49, %v5958_v43  ;;  %v5967_v52 = vcombine.high %v13989_v49, %v5958_v43  ;;  %v5982_v22 = vcombine.low %v13992_v26, %v5965_v61  ;;  %v5781_v57 = vpop.permute.xlu1 %5780  ;;  %v16730_v43 = vld [vmem:[#allocation95_spill] sm:$0xff] }
 0x2a5   : > { %v5983_v54 = vcombine.high %v13992_v26, %v5965_v61  ;;  %v6102_v4 = vcombine.low %v6078_v17, %v6094_v31  ;;  %v6103_v32 = vcombine.high %v6078_v17, %v6094_v31  ;;  %v6118_v5 = vcombine.low %v6085_v51, %v6101_v39  ;;  %v5819_v17 = vpop.permute.xlu0 %5818  ;;  %v16727_v61 = vld [vmem:[#allocation91_spill] sm:$0xff] }
 0x2a6   : > { %v14063_v62 = vrot.slane %v5966_v28, %v12444_v16  ;;  %v14066_v14 = vrot.slane %v5967_v52, %v12444_v16  ;;  %v6119_v45 = vcombine.high %v6085_v51, %v6101_v39  ;;  %v14069_v29 = vrot.slane %v5982_v22, %v12444_v16  ;;  %v16726_v28 = vld [vmem:[#allocation92_spill] sm:$0xff]  ;;  %v16728_v52 = vld [vmem:[#allocation94_spill] sm:$0xff] }
 0x2a7   : > { %v14072_v49 = vrot.slane %v5983_v54, %v12444_v16  ;;  %v14075_v60 = vrot.slane %v6102_v4, %v12444_v16  ;;  %v14078_v26 = vrot.slane %v6103_v32, %v12444_v16  ;;  %v14085_v51 = vrot.slane %v6118_v5, %v12444_v16  ;;  %v16724_v5 = vld [vmem:[#allocation90_spill] sm:$0xff] }
 0x2a8   : > { %v14088_v41 = vrot.slane %v6119_v45, %v12444_v16  ;;  %v8059_v39 = vpack.c.bf16 %v2230_v36, %v2162_v34  ;;  %v2163_v22 = vcombine.high %v16721_v19, %v16720_v1  ;;  %v2231_v54 = vcombine.high %v16723_v9, %v16722_v20  ;;  %v16725_v45 = vld [vmem:[#allocation8_spill] sm:$0xff]  ;;  %v16729_v34 = vld [vmem:[#allocation93_spill] sm:$0xff] }
 0x2a9   : > { %v5882_v4 = vcombine.low %v13854_v18, %v5819_v17  ;;  %v5883_v32 = vcombine.high %v13854_v18, %v5819_v17  ;;  %v2265_v31 = vcombine.high %v16725_v45, %v16724_v5  ;;  %v2281_v25 = vcombine.high %v16727_v61, %v16726_v28  ;;  %v16731_v1 = vld [vmem:[#allocation12_spill] sm:$0xff]  ;;  %v14121_v5 = vpop.permute.xlu0 %5726 }
 0x2aa   : > { %11456 = vmatmul.mubr.msk.bf16.vlgmr.msra.gmra.mrb[40].mxu1 %vm8106_vm1, %v8059_v39  ;;  %v2333_v36 = vcombine.high %v16729_v34, %v16728_v52  ;;  %v2349_v19 = vcombine.high %v16731_v1, %v16730_v43  ;;  %v6206_v20 = vcombine.low %v16732_v7, %v5781_v57  ;;  %v8067_v9 = vpack.c.bf16 %v2231_v54, %v2163_v22  ;;  %v5829_v43 = vpop.permute.xlu1 %5828 }
 0x2ab   : > { %v5890_v6 = vrot.slane %v5882_v4, %v12436_v11  ;;  %v5897_v18 = vrot.slane %v5883_v32, %v12436_v11  ;;  %v2279_v17 = vrot.slane %v2265_v31, %v12444_v16  ;;  %v2295_v39 = vrot.slane %v2281_v25, %v12444_v16 }
 0x2ac   : > { %v2347_v61 = vrot.slane %v2333_v36, %v12444_v16  ;;  %v2363_v28 = vrot.slane %v2349_v19, %v12444_v16  ;;  %v6207_v52 = vcombine.high %v16732_v7, %v5781_v57  ;;  %11488 = vmatmul.mubr.msk.bf16.vlgmr.msra.gmra.mrb[40].mxu0 %vm8106_vm1, %v8067_v9 }
 0x2ad   : > { %v5898_v22 = vcombine.low %v13961_v2, %v5890_v6  ;;  %v5899_v54 = vcombine.high %v13961_v2, %v5890_v6  ;;  %v5914_v4 = vcombine.low %v13964_v8, %v5897_v18  ;;  %v5915_v31 = vcombine.high %v13964_v8, %v5897_v18 }
 0x2ae   : > { %v2298_v32 = vcombine.low %v2279_v17, %v2295_v39  ;;  %v2366_v45 = vcombine.low %v2347_v61, %v2363_v28  ;;  %v2299_v25 = vcombine.high %v2279_v17, %v2295_v39  ;;  %v2367_v34 = vcombine.high %v2347_v61, %v2363_v28  ;;  %v5775_v61 = vpop.permute.xlu0 %5774 }
 0x2af   : > { %v14133_v36 = vrot.slane %v5898_v22, %v12444_v16  ;;  %v14136_v7 = vrot.slane %v5899_v54, %v12444_v16  ;;  %v14139_v57 = vrot.slane %v5914_v4, %v12444_v16  ;;  %v14142_v1 = vrot.slane %v5915_v31, %v12444_v16  ;;  %v14164_v22 = vpop.permute.xlu1 %5736  ;;  %v16733_v4 = vld [vmem:[#allocation16_spill] sm:$0xff] }
 0x2b0   : > { %v8060_v2 = vpack.c.bf16 %v2366_v45, %v2298_v32  ;;  %v8068_v6 = vpack.c.bf16 %v2367_v34, %v2299_v25  ;;  %v6214_v8 = vrot.slane %v6206_v20, %v12436_v11  ;;  %v14146_v19 = vrot.slane %v6207_v52, %v12436_v11 }
 0x2b1   : > { %v6954_v9 = vcombine.low %v14133_v36, %v14136_v7  ;;  %v10996_v18 = vcombine.high %v14133_v36, %v14136_v7  ;;  %v6970_v17 = vcombine.low %v14139_v57, %v14142_v1  ;;  %v10997_v39 = vcombine.high %v14139_v57, %v14142_v1 }
 0x2b2   : > { %11459 = vmatprep.mubr.msk.bf16.mxu1 %vm8106_vm1, %v8060_v2  ;;  %11491 = vmatprep.mubr.msk.bf16.mxu0 %vm8106_vm1, %v8068_v6  ;;  %v2401_v20 = vcombine.high %v13495_v55, %v13498_v15  ;;  %v2417_v28 = vcombine.high %v13501_v33, %v13507_v42  ;;  %v2469_v52 = vcombine.high %v13542_v58, %v13545_v30 }
 0x2b3   : > { %v2485_v54 = vcombine.high %v13550_v53, %v13553_v3  ;;  %v6002_v31 = vcombine.low %v16733_v4, %v5775_v61  ;;  %v6003_v32 = vcombine.high %v16733_v4, %v5775_v61  ;;  %v2537_v45 = vcombine.high %v13591_v35, %v13594_v47  ;;  %v5823_v61 = vpop.permute.xlu0 %5822  ;;  %v14189_v4 = vpop.permute.xlu1 %5784 }
 0x2b4   : > { %v2415_v55 = vrot.slane %v2401_v20, %v12444_v16  ;;  %v2431_v15 = vrot.slane %v2417_v28, %v12444_v16  ;;  %v2483_v33 = vrot.slane %v2469_v52, %v12444_v16  ;;  %v2553_v42 = vcombine.high %v13597_v63, %v13603_v59 }
 0x2b5   : > { %v2499_v58 = vrot.slane %v2485_v54, %v12444_v16  ;;  %v6010_v30 = vrot.slane %v6002_v31, %v12436_v11  ;;  %v6017_v53 = vrot.slane %v6003_v32, %v12436_v11  ;;  %v2551_v3 = vrot.slane %v2537_v45, %v12444_v16 }
 0x2b6   : > { %v2434_v25 = vcombine.low %v2415_v55, %v2431_v15  ;;  %v2435_v34 = vcombine.high %v2415_v55, %v2431_v15  ;;  %v2567_v35 = vrot.slane %v2553_v42, %v12444_v16  ;;  %v2605_v47 = vcombine.high %v13606_v27, %v13609_v23  ;;  %v16734_v55 = vld [vmem:[#allocation4_spill] sm:$0xff] }
 0x2b7   : > { %v2502_v2 = vcombine.low %v2483_v33, %v2499_v58  ;;  %v2503_v6 = vcombine.high %v2483_v33, %v2499_v58  ;;  %v2621_v63 = vcombine.high %v13612_v50, %v13615_v10  ;;  %v6222_v59 = vcombine.low %v14047_v46, %v5829_v43  ;;  %v14200_v42 = vpop.permute.xlu0 %5730 }
 0x2b8   : > { %v2570_v20 = vcombine.low %v2551_v3, %v2567_v35  ;;  %v2619_v28 = vrot.slane %v2605_v47, %v12444_v16  ;;  %v2571_v52 = vcombine.high %v2551_v3, %v2567_v35  ;;  %v6223_v54 = vcombine.high %v14047_v46, %v5829_v43 }
 0x2b9   : > { %v8061_v31 = vpack.c.bf16 %v2502_v2, %v2434_v25  ;;  %v8069_v32 = vpack.c.bf16 %v2503_v6, %v2435_v34  ;;  %v2635_v27 = vrot.slane %v2621_v63, %v12444_v16  ;;  %v6230_v23 = vrot.slane %v6222_v59, %v12436_v11 }
 0x2ba   : > { %v6237_v45 = vrot.slane %v6223_v54, %v12436_v11  ;;  %v6018_v50 = vcombine.low %v14121_v5, %v5823_v61  ;;  %v6019_v10 = vcombine.high %v14121_v5, %v5823_v61  ;;  %v2673_v15 = vcombine.high %v16734_v55, %v13703_v37 }
 0x2bb   : > { %11460 = vmatmul.mubr.msk.bf16.gmra.mrb[44].mxu1 %vm8106_vm1, %v8061_v31  ;;  %11492 = vmatmul.mubr.msk.bf16.gmra.mrb[44].mxu0 %vm8106_vm1, %v8069_v32  ;;  %v2638_v46 = vcombine.low %v2619_v28, %v2635_v27  ;;  %v2639_v43 = vcombine.high %v2619_v28, %v2635_v27  ;;  %v6238_v33 = vcombine.low %v6214_v8, %v6230_v23 }
 0x2bc   : > { %v6239_v58 = vcombine.high %v6214_v8, %v6230_v23  ;;  %v6254_v3 = vcombine.low %v14146_v19, %v6237_v45  ;;  %v6255_v25 = vcombine.high %v14146_v19, %v6237_v45  ;;  %v6026_v34 = vrot.slane %v6018_v50, %v12436_v11  ;;  %v14218_v19 = vpop.permute.xlu1 %5832  ;;  %v5779_v23 = vpop.permute.xlu0 %5778  ;;  %v16735_v50 = vld [vmem:[#allocation51_spill] sm:$0xff] }
 0x2bd   : > { %v8062_v5 = vpack.c.bf16 %v2638_v46, %v2570_v20  ;;  %v8070_v35 = vpack.c.bf16 %v2639_v43, %v2571_v52  ;;  %v14206_v37 = vrot.slane %v6238_v33, %v12444_v16  ;;  %v6033_v47 = vrot.slane %v6019_v10, %v12436_v11  ;;  %v16736_v10 = vld [vmem:[#allocation52_spill] sm:$0xff]  ;;  %v16737_v46 = vld [vmem:[#allocation53_spill] sm:$0xff]  ;;  %v16738_v43 = vld [vmem:[#allocation54_spill] sm:$0xff] }
 0x2be   : > { %v14210_v2 = vrot.slane %v6239_v58, %v12444_v16  ;;  %v14213_v6 = vrot.slane %v6254_v3, %v12444_v16  ;;  %v14216_v8 = vrot.slane %v6255_v25, %v12444_v16  ;;  %v6034_v63 = vcombine.low %v6010_v30, %v6026_v34  ;;  %v16739_v58 = vld [vmem:[#allocation55_spill] sm:$0xff]  ;;  %v16740_v3 = vld [vmem:[#allocation56_spill] sm:$0xff] }
 0x2bf   : > { %11463 = vmatprep.mubr.msk.bf16.mxu1 %vm8106_vm1, %v8062_v5  ;;  %11495 = vmatprep.mubr.msk.bf16.mxu0 %vm8106_vm1, %v8070_v35  ;;  %v6035_v59 = vcombine.high %v6010_v30, %v6026_v34  ;;  %v6050_v61 = vcombine.low %v6017_v53, %v6033_v47  ;;  %v6051_v20 = vcombine.high %v6017_v53, %v6033_v47 }
 0x2c0   : > { %v14231_v32 = vrot.slane %v6034_v63, %v12444_v16  ;;  %v2687_v45 = vrot.slane %v2673_v15, %v12444_v16  ;;  %v2689_v55 = vcombine.high %v16736_v10, %v16735_v50  ;;  %v2741_v33 = vcombine.high %v16738_v43, %v16737_v46  ;;  %v16741_v46 = vld [vmem:[#allocation27_spill] sm:$0xff]  ;;  %v16742_v43 = vld [vmem:[#allocation6_spill] sm:$0xff] }
 0x2c1   : > { %v14234_v27 = vrot.slane %v6035_v59, %v12444_v16  ;;  %v14237_v30 = vrot.slane %v6050_v61, %v12444_v16  ;;  %v14240_v53 = vrot.slane %v6051_v20, %v12444_v16  ;;  %v2757_v25 = vcombine.high %v16740_v3, %v16739_v58  ;;  %v14262_v20 = vpop.permute.xlu1 %5740 }
 0x2c2   : > { %v2703_v47 = vrot.slane %v2689_v55, %v12444_v16  ;;  %v2755_v63 = vrot.slane %v2741_v33, %v12444_v16  ;;  %v2809_v61 = vcombine.high %v13805_v48, %v13808_v38  ;;  %v2825_v50 = vcombine.high %v13811_v21, %v13814_v24  ;;  %v16743_v55 = vld [vmem:[#allocation23_spill] sm:$0xff]  ;;  %v5827_v24 = vpop.permute.xlu0 %5826 }
 0x2c3   : > { %v7090_v34 = vcombine.low %v14231_v32, %v14234_v27  ;;  %v11000_v5 = vcombine.high %v14231_v32, %v14234_v27  ;;  %v7106_v35 = vcombine.low %v14237_v30, %v14240_v53  ;;  %v2771_v59 = vrot.slane %v2757_v25, %v12444_v16 }
 0x2c4   : > { %v2877_v10 = vcombine.high %v13829_v0, %v13832_v40  ;;  %v2893_v58 = vcombine.high %v16742_v43, %v16741_v46  ;;  %v6342_v3 = vcombine.low %v16743_v55, %v14189_v4  ;;  %v2706_v33 = vcombine.low %v2687_v45, %v2703_v47 }
 0x2c5   : > { %v2774_v31 = vcombine.low %v2755_v63, %v2771_v59  ;;  %v2707_v25 = vcombine.high %v2687_v45, %v2703_v47  ;;  %v2775_v54 = vcombine.high %v2755_v63, %v2771_v59  ;;  %v2823_v48 = vrot.slane %v2809_v61, %v12444_v16  ;;  %v16744_v59 = vld [vmem:[#allocation22_spill] sm:$0xff] }
 0x2c6   : > { %v2839_v38 = vrot.slane %v2825_v50, %v12444_v16  ;;  %v2891_v52 = vrot.slane %v2877_v10, %v12444_v16  ;;  %v2907_v21 = vrot.slane %v2893_v58, %v12444_v16  ;;  %v6343_v46 = vcombine.high %v16743_v55, %v14189_v4 }
 0x2c7   : > { %v8063_v0 = vpack.c.bf16 %v2774_v31, %v2706_v33  ;;  %v8071_v40 = vpack.c.bf16 %v2775_v54, %v2707_v25  ;;  %v6350_v43 = vrot.slane %v6342_v3, %v12436_v11  ;;  %v6138_v61 = vcombine.low %v16744_v59, %v5779_v23  ;;  %v14284_v54 = vpop.permute.xlu1 %5788  ;;  %v16745_v33 = vld [vmem:[#allocation31_spill] sm:$0xff]  ;;  %v14302_v25 = vpop.permute.xlu0 %5734 }
 0x2c8   : > { %v2842_v28 = vcombine.low %v2823_v48, %v2839_v38  ;;  %v2910_v15 = vcombine.low %v2891_v52, %v2907_v21  ;;  %v2843_v45 = vcombine.high %v2823_v48, %v2839_v38  ;;  %v2911_v47 = vcombine.high %v2891_v52, %v2907_v21  ;;  %v16748_v38 = vld [vmem:[#allocation29_spill] sm:$0xff] }
 0x2c9   : > { %11464 = vmatmul.mubr.msk.bf16.gmra.mrb[48].mxu1 %vm8106_vm1, %v8063_v0  ;;  %11496 = vmatmul.mubr.msk.bf16.gmra.mrb[48].mxu0 %vm8106_vm1, %v8071_v40  ;;  %v6357_v63 = vrot.slane %v6343_v46, %v12436_v11  ;;  %v6139_v31 = vcombine.high %v16744_v59, %v5779_v23  ;;  %v6358_v10 = vcombine.low %v14164_v22, %v14218_v19 }
 0x2ca   : > { %v8064_v50 = vpack.c.bf16 %v2910_v15, %v2842_v28  ;;  %v8072_v4 = vpack.c.bf16 %v2911_v47, %v2843_v45  ;;  %v6359_v52 = vcombine.high %v14164_v22, %v14218_v19  ;;  %v6146_v58 = vrot.slane %v6138_v61, %v12436_v11  ;;  %v16746_v22 = vld [vmem:[#allocation25_spill] sm:$0xff] }
 0x2cb   : > { %v6153_v55 = vrot.slane %v6139_v31, %v12436_v11  ;;  %v2945_v3 = vcombine.high %v13905_v13, %v13908_v56  ;;  %v2961_v23 = vcombine.high %v13911_v12, %v13914_v44  ;;  %v6366_v28 = vrot.slane %v6358_v10, %v12436_v11  ;;  %v16747_v56 = vld [vmem:[#allocation46_spill] sm:$0xff]  ;;  %v14311_v31 = vpop.permute.xlu1 %5836 }
 0x2cc   : > { %11467 = vmatprep.mubr.msk.bf16.mxu1 %vm8106_vm1, %v8064_v50  ;;  %11499 = vmatprep.mubr.msk.bf16.mxu0 %vm8106_vm1, %v8072_v4  ;;  %v6373_v15 = vrot.slane %v6359_v52, %v12436_v11  ;;  %v3013_v19 = vcombine.high %v16746_v22, %v16745_v33  ;;  %v3029_v12 = vcombine.high %v16748_v38, %v16747_v56 }
 0x2cd   : > { %v2959_v48 = vrot.slane %v2945_v3, %v12444_v16  ;;  %v2975_v13 = vrot.slane %v2961_v23, %v12444_v16  ;;  %v6154_v44 = vcombine.low %v14200_v42, %v5827_v24  ;;  %v6374_v21 = vcombine.low %v6350_v43, %v6366_v28 }
 0x2ce   : > { %v6375_v0 = vcombine.high %v6350_v43, %v6366_v28  ;;  %v6390_v40 = vcombine.low %v6357_v63, %v6373_v15  ;;  %v6391_v46 = vcombine.high %v6357_v63, %v6373_v15  ;;  %v3027_v47 = vrot.slane %v3013_v19, %v12444_v16  ;;  %v14335_v19 = vpop.permute.xlu0 %5782 }
 0x2cf   : > { %v2978_v45 = vcombine.low %v2959_v48, %v2975_v13  ;;  %v3043_v59 = vrot.slane %v3029_v12, %v12444_v16  ;;  %v2979_v61 = vcombine.high %v2959_v48, %v2975_v13  ;;  %v14314_v50 = vrot.slane %v6374_v21, %v12444_v16 }
 0x2d0   : > { %v14317_v4 = vrot.slane %v6375_v0, %v12444_v16  ;;  %v14320_v10 = vrot.slane %v6390_v40, %v12444_v16  ;;  %v14323_v43 = vrot.slane %v6391_v46, %v12444_v16  ;;  %v6155_v3 = vcombine.high %v14200_v42, %v5827_v24  ;;  %v14361_v0 = vpop.permute.xlu1 %5744 }
 0x2d1   : > { %v3046_v63 = vcombine.low %v3027_v47, %v3043_v59  ;;  %v3047_v52 = vcombine.high %v3027_v47, %v3043_v59  ;;  %v6162_v23 = vrot.slane %v6154_v44, %v12436_v11  ;;  %v14342_v38 = vrot.slane %v6954_v9, %v12436_v11 }
 0x2d2   : > { %v6169_v42 = vrot.slane %v6155_v3, %v12436_v11  ;;  %v14348_v12 = vrot.slane %v10996_v18, %v12436_v11  ;;  %v14354_v44 = vrot.slane %v6970_v17, %v12436_v11  ;;  %v14370_v7 = vrot.slane %v10997_v39, %v12436_v11 }
 0x2d3   : > { %v8065_v48 = vpack.c.bf16 %v3046_v63, %v2978_v45  ;;  %v8073_v13 = vpack.c.bf16 %v3047_v52, %v2979_v61  ;;  %v6170_v24 = vcombine.low %v6146_v58, %v6162_v23  ;;  %v6171_v56 = vcombine.high %v6146_v58, %v6162_v23 }
 0x2d4   : > { %v6186_v9 = vcombine.low %v6153_v55, %v6169_v42  ;;  %v6187_v21 = vcombine.high %v6153_v55, %v6169_v42  ;;  %v6986_v18 = vcombine.low %v14342_v38, %v14348_v12  ;;  %v16749_v17 = vcombine.low %v14063_v62, %v14066_v14  ;;  %v16753_v42 = vld [vmem:[#allocation44_spill] sm:$0xff] }
 0x2d5   : > { %11468 = vmatmul.mubr.msk.bf16.gmra.mrb[52].mxu1 %vm8106_vm1, %v8065_v48  ;;  %11500 = vmatmul.mubr.msk.bf16.gmra.mrb[52].mxu0 %vm8106_vm1, %v8073_v13  ;;  %v14359_v58 = vrot.slane %v6170_v24, %v12444_v16  ;;  %v14364_v36 = vrot.slane %v6171_v56, %v12444_v16  ;;  %v16750_v57 = vcombine.high %v14063_v62, %v14066_v14  ;;  %v14405_v62 = vpop.permute.xlu0 %5830 }
 0x2d6   : > { %v14378_v40 = vrot.slane %v16749_v17, %v12436_v11  ;;  %v14381_v55 = vrot.slane %v6186_v9, %v12444_v16  ;;  %v14384_v46 = vrot.slane %v6187_v21, %v12444_v16  ;;  %v16751_v39 = vcombine.low %v14069_v29, %v14072_v49 }
 0x2d7   : > { %v14390_v1 = vrot.slane %v16750_v57, %v12436_v11  ;;  %v7226_v47 = vcombine.low %v14359_v58, %v14364_v36  ;;  %v11004_v59 = vcombine.high %v14359_v58, %v14364_v36  ;;  %v6994_v61 = vrot.slane %v6986_v18, %v12444_v16  ;;  %v14445_v18 = vpop.permute.xlu1 %5792 }
 0x2d8   : > { %v14396_v45 = vrot.slane %v16751_v39, %v12436_v11  ;;  %v7002_v63 = vcombine.low %v14354_v44, %v14370_v7  ;;  %v7242_v14 = vcombine.low %v14381_v55, %v14384_v46  ;;  %v16752_v3 = vcombine.high %v14069_v29, %v14072_v49 }
 0x2d9   : > { %v7054_v48 = vcombine.low %v14378_v40, %v14390_v1  ;;  %v6478_v24 = vcombine.low %v16753_v42, %v14284_v54  ;;  %v6479_v56 = vcombine.high %v16753_v42, %v14284_v54  ;;  %v14428_v9 = vrot.slane %v7090_v34, %v12436_v11 }
 0x2da   : > { %v14415_v23 = vrot.slane %v16752_v3, %v12436_v11  ;;  %v7010_v13 = vrot.slane %v7002_v63, %v12444_v16  ;;  %v14437_v21 = vrot.slane %v11000_v5, %v12436_v11  ;;  %v14443_v54 = vrot.slane %v7106_v35, %v12436_v11 }
 0x2db   : > { %16754 = vst [vmem:[#allocation45_spill] sm:$0xff] %v14428_v9  ;;  %v7062_v29 = vrot.slane %v7054_v48, %v12444_v16  ;;  %v6486_v57 = vrot.slane %v6478_v24, %v12436_v11  ;;  %v6493_v39 = vrot.slane %v6479_v56, %v12436_v11  ;;  %v16757_v32 = vcombine.high %v14237_v30, %v14240_v53  ;;  %v16767_v24 = vld [vmem:[#allocation21_spill] sm:$0xff] }
 0x2dc   : > { %v7070_v49 = vcombine.low %v14396_v45, %v14415_v23  ;;  %16755 = vst [vmem:[#allocation48_spill] sm:$0xff] %v14437_v21  ;;  %16756 = vst [vmem:[#allocation47_spill] sm:$0xff] %v14443_v54  ;;  %v7018_v34 = vcombine.low %v6994_v61, %v7010_v13  ;;  %v7019_v17 = vcombine.high %v6994_v61, %v7010_v13 }
 0x2dd   : > { %v14454_v27 = vrot.slane %v16757_v32, %v12436_v11  ;;  %v7122_v5 = vcombine.low %v14428_v9, %v14437_v21  ;;  %v16759_v35 = vcombine.low %v14075_v60, %v14078_v26  ;;  %v16761_v3 = vcombine.high %v14075_v60, %v14078_v26 }
 0x2de   : > { %v7078_v63 = vrot.slane %v7070_v49, %v12444_v16  ;;  %v16763_v30 = vcombine.low %v14085_v51, %v14088_v41  ;;  %v16765_v13 = vcombine.high %v14085_v51, %v14088_v41  ;;  %v6274_v56 = vcombine.low %v16767_v24, %v14335_v19  ;;  %v14484_v49 = vpop.permute.xlu0 %5738 }
 0x2df   : > { %16758 = vst [vmem:[#allocation50_spill] sm:$0xff] %v14454_v27  ;;  %v14462_v61 = vrot.slane %v16759_v35, %v12436_v11  ;;  %v14468_v48 = vrot.slane %v16761_v3, %v12436_v11  ;;  %v7130_v32 = vrot.slane %v7122_v5, %v12444_v16  ;;  %v7138_v35 = vcombine.low %v14443_v54, %v14454_v27  ;;  %v14499_v5 = vpop.permute.xlu1 %5840  ;;  %v16798_v54 = vld [vmem:[#allocation63_spill] sm:$0xff] }
 0x2e0   : > { %v14474_v53 = vrot.slane %v16763_v30, %v12436_v11  ;;  %v14480_v42 = vrot.slane %v16765_v13, %v12436_v11  ;;  %v7086_v60 = vcombine.low %v7062_v29, %v7078_v63  ;;  %v7087_v26 = vcombine.high %v7062_v29, %v7078_v63 }
 0x2e1   : > { %16760 = vst [vmem:[#allocation49_spill] sm:$0xff] %v14462_v61  ;;  %16762 = vst [vmem:[#allocation3_spill] sm:$0xff] %v14468_v48  ;;  %v7190_v3 = vcombine.low %v14462_v61, %v14468_v48  ;;  %v6275_v41 = vcombine.high %v16767_v24, %v14335_v19  ;;  %v6282_v30 = vrot.slane %v6274_v56, %v12436_v11 }
 0x2e2   : > { %16764 = vst [vmem:[#allocation5_spill] sm:$0xff] %v14474_v53  ;;  %16766 = vst [vmem:[#allocation67_spill] sm:$0xff] %v14480_v42  ;;  %v7206_v51 = vcombine.low %v14474_v53, %v14480_v42  ;;  %v9426_v13 = vpack.c.bf16 %v7086_v60, %v7018_v34  ;;  %v9434_v22 = vpack.c.bf16 %v7087_v26, %v7019_v17 }
 0x2e3   : > { %v7146_v29 = vrot.slane %v7138_v35, %v12444_v16  ;;  %v6494_v63 = vcombine.low %v14262_v20, %v14311_v31  ;;  %v7198_v33 = vrot.slane %v7190_v3, %v12444_v16  ;;  %v6289_v28 = vrot.slane %v6275_v41, %v12436_v11  ;;  %v5787_v35 = vpop.permute.xlu0 %5786 }
 0x2e4   : > { %v7214_v15 = vrot.slane %v7206_v51, %v12444_v16  ;;  %v6495_v19 = vcombine.high %v14262_v20, %v14311_v31  ;;  %11503 = vmatprep.subr.bf16.mxu1 %v9426_v13  ;;  %11535 = vmatprep.subr.bf16.mxu0 %v9434_v22  ;;  %v6290_v41 = vcombine.low %v14302_v25, %v14405_v62 }
 0x2e5   : > { %v7154_v34 = vcombine.low %v7130_v32, %v7146_v29  ;;  %v7155_v17 = vcombine.high %v7130_v32, %v7146_v29  ;;  %v6502_v24 = vrot.slane %v6494_v63, %v12436_v11  ;;  %11504 = vmatpush3.bf16.msra.mxu1 %v9426_v13  ;;  %11536 = vmatpush3.bf16.msra.mxu0 %v9434_v22 }
 0x2e6   : > { %v7222_v56 = vcombine.low %v7198_v33, %v7214_v15  ;;  %v7223_v60 = vcombine.high %v7198_v33, %v7214_v15  ;;  %v6509_v26 = vrot.slane %v6495_v19, %v12436_v11  ;;  %v6291_v20 = vcombine.high %v14302_v25, %v14405_v62 }
 0x2e7   : > { %v6510_v3 = vcombine.low %v6486_v57, %v6502_v24  ;;  %v6511_v51 = vcombine.high %v6486_v57, %v6502_v24  ;;  %v6298_v33 = vrot.slane %v6290_v41, %v12436_v11  ;;  %v14520_v57 = vpop.permute.xlu1 %5746  ;;  %v16773_v58 = vcombine.high %v14381_v55, %v14384_v46 }
 0x2e8   : > { %v9427_v31 = vpack.c.bf16 %v7222_v56, %v7154_v34  ;;  %v9435_v52 = vpack.c.bf16 %v7223_v60, %v7155_v17  ;;  %v6526_v32 = vcombine.low %v6493_v39, %v6509_v26  ;;  %v6527_v29 = vcombine.high %v6493_v39, %v6509_v26  ;;  %v16768_v39 = vld [vmem:[#allocation43_spill] sm:$0xff] }
 0x2e9   : > { %v14513_v13 = vrot.slane %v6510_v3, %v12444_v16  ;;  %v14516_v15 = vrot.slane %v6511_v51, %v12444_v16  ;;  %v6305_v22 = vrot.slane %v6291_v20, %v12436_v11  ;;  %v6614_v63 = vcombine.low %v16768_v39, %v14445_v18  ;;  %v5835_v3 = vpop.permute.xlu0 %5834 }
 0x2ea   : > { %11505 = vmatprep.subr.bf16.mxu1 %v9427_v31  ;;  %11537 = vmatprep.subr.bf16.mxu0 %v9435_v52  ;;  %v14523_v25 = vrot.slane %v6526_v32, %v12444_v16  ;;  %v14526_v62 = vrot.slane %v6527_v29, %v12444_v16  ;;  %v6306_v17 = vcombine.low %v6282_v30, %v6298_v33  ;;  %v16769_v29 = vld [vmem:[#allocation42_spill] sm:$0xff] }
 0x2eb   : > { %11506 = vmatpush3.bf16.msra.mxu1 %v9427_v31  ;;  %11538 = vmatpush3.bf16.msra.mxu0 %v9435_v52  ;;  %v6307_v60 = vcombine.high %v6282_v30, %v6298_v33  ;;  %v6322_v26 = vcombine.low %v6289_v28, %v6305_v22  ;;  %v6323_v52 = vcombine.high %v6289_v28, %v6305_v22 }
 0x2ec   : > { %v14539_v51 = vrot.slane %v6306_v17, %v12444_v16  ;;  %v6615_v41 = vcombine.high %v16768_v39, %v14445_v18  ;;  %v6622_v20 = vrot.slane %v6614_v63, %v12436_v11  ;;  %v6410_v56 = vcombine.low %v16769_v29, %v5787_v35  ;;  %v14560_v39 = vpop.permute.xlu1 %5794  ;;  %v16784_v17 = vld [vmem:[#allocation41_spill] sm:$0xff] }
 0x2ed   : > { %v14545_v31 = vrot.slane %v6307_v60, %v12444_v16  ;;  %v14548_v32 = vrot.slane %v6322_v26, %v12444_v16  ;;  %v6411_v30 = vcombine.high %v16769_v29, %v5787_v35  ;;  %v14553_v33 = vrot.slane %v6323_v52, %v12444_v16  ;;  %v14576_v24 = vpop.permute.xlu0 %5742 }
 0x2ee   : > { %v6629_v28 = vrot.slane %v6615_v41, %v12436_v11  ;;  %v6630_v18 = vcombine.low %v14361_v0, %v14499_v5  ;;  %v6631_v22 = vcombine.high %v14361_v0, %v14499_v5  ;;  %v6418_v35 = vrot.slane %v6410_v56, %v12436_v11 }
 0x2ef   : > { %v6425_v60 = vrot.slane %v6411_v30, %v12436_v11  ;;  %v6426_v41 = vcombine.low %v14484_v49, %v5835_v3  ;;  %v6427_v29 = vcombine.high %v14484_v49, %v5835_v3  ;;  %v14582_v56 = vrot.slane %v7226_v47, %v12436_v11 }
 0x2f0   : > { %v6638_v0 = vrot.slane %v6630_v18, %v12436_v11  ;;  %v6645_v5 = vrot.slane %v6631_v22, %v12436_v11  ;;  %v14588_v30 = vrot.slane %v11004_v59, %v12436_v11  ;;  %v14596_v47 = vrot.slane %v7242_v14, %v12436_v11  ;;  %v14616_v14 = vpop.permute.xlu1 %5796 }
 0x2f1   : > { %16770 = vst [vmem:[#allocation66_spill] sm:$0xff] %v14582_v56  ;;  %v6434_v49 = vrot.slane %v6426_v41, %v12436_v11  ;;  %v6441_v3 = vrot.slane %v6427_v29, %v12436_v11  ;;  %v14602_v36 = vrot.slane %v16773_v58, %v12436_v11 }
 0x2f2   : > { %16771 = vst [vmem:[#allocation9_spill] sm:$0xff] %v14588_v30  ;;  %v6646_v18 = vcombine.low %v6622_v20, %v6638_v0  ;;  %v6647_v22 = vcombine.high %v6622_v20, %v6638_v0  ;;  %v6662_v34 = vcombine.low %v6629_v28, %v6645_v5  ;;  %v6663_v19 = vcombine.high %v6629_v28, %v6645_v5 }
 0x2f3   : > { %16772 = vst [vmem:[#allocation58_spill] sm:$0xff] %v14596_v47  ;;  %16774 = vst [vmem:[#allocation57_spill] sm:$0xff] %v14602_v36  ;;  %v6442_v5 = vcombine.low %v6418_v35, %v6434_v49  ;;  %v6443_v41 = vcombine.high %v6418_v35, %v6434_v49  ;;  %v6458_v29 = vcombine.low %v6425_v60, %v6441_v3  ;;  %v5791_v49 = vpop.permute.xlu0 %5790 }
 0x2f4   : > { %v14605_v59 = vrot.slane %v6646_v18, %v12444_v16  ;;  %v14608_v20 = vrot.slane %v6647_v22, %v12444_v16  ;;  %v14611_v28 = vrot.slane %v6662_v34, %v12444_v16  ;;  %v14614_v0 = vrot.slane %v6663_v19, %v12444_v16  ;;  %v14676_v46 = vpop.permute.xlu1 %5844 }
 0x2f5   : > { %v6459_v55 = vcombine.high %v6425_v60, %v6441_v3  ;;  %v14627_v19 = vrot.slane %v6442_v5, %v12444_v16  ;;  %v14630_v58 = vrot.slane %v6443_v41, %v12444_v16  ;;  %v14633_v35 = vrot.slane %v6458_v29, %v12444_v16 }
 0x2f6   : > { %v7258_v3 = vcombine.low %v14582_v56, %v14588_v30  ;;  %v7274_v22 = vcombine.low %v14596_v47, %v14602_v36  ;;  %v16775_v5 = vcombine.low %v14206_v37, %v14210_v2  ;;  %v16777_v41 = vcombine.high %v14206_v37, %v14210_v2 }
 0x2f7   : > { %v14636_v60 = vrot.slane %v6459_v55, %v12444_v16  ;;  %v16779_v37 = vcombine.low %v14213_v6, %v14216_v8 }
 0x2f8   : > { %v14646_v34 = vrot.slane %v16775_v5, %v12436_v11  ;;  %v14652_v29 = vrot.slane %v16777_v41, %v12436_v11  ;;  %v7266_v5 = vrot.slane %v7258_v3, %v12444_v16  ;;  %v7282_v26 = vrot.slane %v7274_v22, %v12444_v16  ;;  %v16783_v3 = vld [vmem:[#allocation64_spill] sm:$0xff] }
 0x2f9   : > { %v14668_v2 = vrot.slane %v16779_v37, %v12436_v11  ;;  %v16781_v41 = vcombine.high %v14213_v6, %v14216_v8  ;;  %v6682_v22 = vcombine.low %v16783_v3, %v14560_v39  ;;  %v6683_v55 = vcombine.high %v16783_v3, %v14560_v39  ;;  %v5839_v39 = vpop.permute.xlu0 %5838 }
 0x2fa   : > { %16776 = vst [vmem:[#allocation60_spill] sm:$0xff] %v14646_v34  ;;  %16778 = vst [vmem:[#allocation59_spill] sm:$0xff] %v14652_v29  ;;  %v7326_v52 = vcombine.low %v14646_v34, %v14652_v29  ;;  %v6546_v37 = vcombine.low %v16784_v17, %v5791_v49  ;;  %v7290_v63 = vcombine.low %v7266_v5, %v7282_v26 }
 0x2fb   : > { %16780 = vst [vmem:[#allocation62_spill] sm:$0xff] %v14668_v2  ;;  %v14674_v18 = vrot.slane %v16781_v41, %v12436_v11  ;;  %v7291_v6 = vcombine.high %v7266_v5, %v7282_v26  ;;  %v6547_v8 = vcombine.high %v16784_v17, %v5791_v49  ;;  %v14690_v36 = vrot.slane %v6682_v22, %v12436_v11 }
 0x2fc   : > { %v7334_v41 = vrot.slane %v7326_v52, %v12444_v16  ;;  %v14693_v34 = vrot.slane %v6683_v55, %v12436_v11  ;;  %v6554_v29 = vrot.slane %v6546_v37, %v12436_v11  ;;  %v16785_v26 = vcombine.low %v14539_v51, %v14545_v31 }
 0x2fd   : > { %16782 = vst [vmem:[#allocation61_spill] sm:$0xff] %v14674_v18  ;;  %v7342_v47 = vcombine.low %v14668_v2, %v14674_v18  ;;  %v6561_v56 = vrot.slane %v6547_v8, %v12436_v11  ;;  %v16786_v52 = vcombine.high %v14539_v51, %v14545_v31  ;;  %v16787_v55 = vcombine.low %v14548_v32, %v14553_v33 }
 0x2fe   : > { %v14702_v17 = vrot.slane %v16785_v26, %v12436_v11  ;;  %v16789_v37 = vcombine.low %v14314_v50, %v14317_v4  ;;  %v16791_v51 = vcombine.high %v14314_v50, %v14317_v4  ;;  %v16795_v50 = vcombine.high %v14320_v10, %v14323_v43 }
 0x2ff   : > { %v7350_v3 = vrot.slane %v7342_v47, %v12444_v16  ;;  %v14708_v49 = vrot.slane %v16786_v52, %v12436_v11  ;;  %v14714_v5 = vrot.slane %v16787_v55, %v12436_v11  ;;  %v16788_v47 = vcombine.high %v14548_v32, %v14553_v33 }
 0x300   : > { %v14726_v8 = vrot.slane %v16789_v37, %v12436_v11  ;;  %v14732_v31 = vrot.slane %v16791_v51, %v12436_v11  ;;  %v16793_v32 = vcombine.low %v14320_v10, %v14323_v43  ;;  %v14750_v4 = vrot.slane %v16795_v50, %v12436_v11  ;;  %v5749_v50 = vpop.permute.xlu0 %5748 }
 0x301   : > { %v14720_v22 = vrot.slane %v16788_v47, %v12436_v11  ;;  %v7358_v26 = vcombine.low %v7334_v41, %v7350_v3  ;;  %v7359_v52 = vcombine.high %v7334_v41, %v7350_v3  ;;  %v7394_v55 = vcombine.low %v14702_v17, %v14708_v49  ;;  %v14742_v47 = vpop.permute.xlu1 %5750  ;;  %v16797_v3 = vld [vmem:[#allocation68_spill] sm:$0xff] }
 0x302   : > { %16790 = vst [vmem:[#allocation13_spill] sm:$0xff] %v14726_v8  ;;  %16792 = vst [vmem:[#allocation77_spill] sm:$0xff] %v14732_v31  ;;  %v14740_v33 = vrot.slane %v16793_v32, %v12436_v11  ;;  %v7462_v41 = vcombine.low %v14726_v8, %v14732_v31  ;;  %v6750_v51 = vcombine.low %v16797_v3, %v14616_v14 }
 0x303   : > { %v7410_v37 = vcombine.low %v14714_v5, %v14720_v22  ;;  %16796 = vst [vmem:[#allocation78_spill] sm:$0xff] %v14750_v4  ;;  %v9428_v2 = vpack.c.bf16 %v7358_v26, %v7290_v63  ;;  %v9436_v32 = vpack.c.bf16 %v7359_v52, %v7291_v6  ;;  %v7402_v18 = vrot.slane %v7394_v55, %v12444_v16 }
 0x304   : > { %16794 = vst [vmem:[#allocation79_spill] sm:$0xff] %v14740_v33  ;;  %v6751_v30 = vcombine.high %v16797_v3, %v14616_v14  ;;  %v7470_v42 = vrot.slane %v7462_v41, %v12444_v16  ;;  %v7478_v10 = vcombine.low %v14740_v33, %v14750_v4  ;;  %v6758_v43 = vrot.slane %v6750_v51, %v12436_v11  ;;  %v5843_v9 = vpop.permute.xlu0 %5842 }
 0x305   : > { %v7418_v53 = vrot.slane %v7410_v37, %v12444_v16  ;;  %11507 = vmatprep.subr.bf16.mxu1 %v9428_v2  ;;  %11539 = vmatprep.subr.bf16.mxu0 %v9436_v32  ;;  %v6562_v6 = vcombine.low %v14576_v24, %v5839_v39  ;;  %v6563_v26 = vcombine.high %v14576_v24, %v5839_v39  ;;  %v5799_v61 = vpop.permute.xlu1 %5798 }
 0x306   : > { %v6765_v63 = vrot.slane %v6751_v30, %v12436_v11  ;;  %11508 = vmatpush3.bf16.msra.mxu1 %v9428_v2  ;;  %11540 = vmatpush3.bf16.msra.mxu0 %v9436_v32  ;;  %v7486_v52 = vrot.slane %v7478_v10, %v12444_v16  ;;  %v6766_v3 = vcombine.low %v5749_v50, %v14676_v46 }
 0x307   : > { %v7426_v14 = vcombine.low %v7402_v18, %v7418_v53  ;;  %v7427_v55 = vcombine.high %v7402_v18, %v7418_v53  ;;  %v6570_v37 = vrot.slane %v6562_v6, %v12436_v11  ;;  %v6577_v41 = vrot.slane %v6563_v26, %v12436_v11 }
 0x308   : > { %v6767_v51 = vcombine.high %v5749_v50, %v14676_v46  ;;  %v7494_v30 = vcombine.low %v7470_v42, %v7486_v52  ;;  %v7495_v48 = vcombine.high %v7470_v42, %v7486_v52  ;;  %v6818_v27 = vcombine.low %v16798_v54, %v5799_v61 }
 0x309   : > { %v6819_v24 = vcombine.high %v16798_v54, %v5799_v61  ;;  %v6578_v2 = vcombine.low %v6554_v29, %v6570_v37  ;;  %v6579_v39 = vcombine.high %v6554_v29, %v6570_v37  ;;  %v6594_v32 = vcombine.low %v6561_v56, %v6577_v41 }
 0x30a   : > { %v6595_v10 = vcombine.high %v6561_v56, %v6577_v41  ;;  %v9429_v53 = vpack.c.bf16 %v7494_v30, %v7426_v14  ;;  %v9437_v18 = vpack.c.bf16 %v7495_v48, %v7427_v55  ;;  %v6774_v6 = vrot.slane %v6766_v3, %v12436_v11 }
 0x30b   : > { %v6781_v26 = vrot.slane %v6767_v51, %v12436_v11  ;;  %v14777_v46 = vrot.slane %v6578_v2, %v12444_v16  ;;  %v14780_v42 = vrot.slane %v6579_v39, %v12444_v16  ;;  %v14783_v50 = vrot.slane %v6594_v32, %v12444_v16 }
 0x30c   : > { %v14786_v54 = vrot.slane %v6595_v10, %v12444_v16  ;;  %11509 = vmatprep.subr.bf16.mxu1 %v9429_v53  ;;  %11541 = vmatprep.subr.bf16.mxu0 %v9437_v18  ;;  %v6782_v61 = vcombine.low %v6758_v43, %v6774_v6  ;;  %v6783_v48 = vcombine.high %v6758_v43, %v6774_v6  ;;  %v16799_v55 = vlaneseq  ;;  %v5801_v6 = vpop.permute.xlu1 %5800 }
 0x30d   : > { %v6798_v56 = vcombine.low %v6765_v63, %v6781_v26  ;;  %11510 = vmatpush3.bf16.msra.mxu1 %v9429_v53  ;;  %11542 = vmatpush3.bf16.msra.mxu0 %v9437_v18  ;;  %v6799_v51 = vcombine.high %v6765_v63, %v6781_v26  ;;  %v14809_v2 = vrot.slane %v6818_v27, %v12436_v11  ;;  %v5753_v26 = vpop.permute.xlu0 %5752 }
 0x30e   : > { %v14795_v37 = vand.u32 127, %v16799_v55  ;;  %v14800_v43 = vrot.slane %v6782_v61, %v12444_v16  ;;  %v14803_v3 = vrot.slane %v6783_v48, %v12444_v16  ;;  %v14812_v39 = vrot.slane %v6819_v24, %v12436_v11  ;;  %v16800_v61 = vld [vmem:[#allocation65_spill] sm:$0xff] }
 0x30f   : > { %v14806_v30 = vrot.slane %v6798_v56, %v12444_v16  ;;  %v6698_v32 = vcombine.low %v14520_v57, %v5843_v9  ;;  %v14816_v10 = vrot.slane %v6799_v51, %v12444_v16  ;;  %v6699_v18 = vcombine.high %v14520_v57, %v5843_v9 }
 0x310   : > { %v6886_v24 = vcombine.low %v16800_v61, %v5801_v6  ;;  %v6887_v48 = vcombine.high %v16800_v61, %v5801_v6  ;;  %v16801_v56 = vcombine.low %v14627_v19, %v14630_v58  ;;  %vm8689_vm2 = vcmp.lt.s32.totalorder %v14795_v37, 32 }
 0x311   : > { %v6706_v27 = vrot.slane %v6698_v32, %v12436_v11  ;;  %v6713_v57 = vrot.slane %v6699_v18, %v12436_v11  ;;  %v16803_v32 = vcombine.high %v14627_v19, %v14630_v58  ;;  %v16805_v18 = vcombine.low %v14633_v35, %v14636_v60 }
 0x312   : > { %v14830_v55 = vrot.slane %v16801_v56, %v12436_v11  ;;  %v6894_v56 = vrot.slane %v6886_v24, %v12436_v11  ;;  %v6901_v53 = vrot.slane %v6887_v48, %v12436_v11  ;;  %v16807_v19 = vcombine.high %v14633_v35, %v14636_v60 }
 0x313   : > { %v14841_v63 = vrot.slane %v16803_v32, %v12436_v11  ;;  %v6714_v6 = vcombine.low %v14690_v36, %v6706_v27  ;;  %v6715_v61 = vcombine.high %v14690_v36, %v6706_v27  ;;  %v6730_v51 = vcombine.low %v14693_v34, %v6713_v57 }
 0x314   : > { %16802 = vst [vmem:[#allocation81_spill] sm:$0xff] %v14830_v55  ;;  %v6731_v9 = vcombine.high %v14693_v34, %v6713_v57  ;;  %v14853_v41 = vrot.slane %v16805_v18, %v12436_v11  ;;  %v14859_v58 = vrot.slane %v16807_v19, %v12436_v11  ;;  %v16809_v24 = vcombine.low %v14513_v13, %v14516_v15  ;;  %v5847_v18 = vpop.permute.xlu0 %5846 }
 0x315   : > { %16804 = vst [vmem:[#allocation80_spill] sm:$0xff] %v14841_v63  ;;  %v14862_v36 = vrot.slane %v6714_v6, %v12444_v16  ;;  %v14865_v27 = vrot.slane %v6715_v61, %v12444_v16  ;;  %v7530_v34 = vcombine.low %v14830_v55, %v14841_v63  ;;  %v14876_v57 = vrot.slane %v6730_v51, %v12444_v16  ;;  %v5849_v61 = vpop.permute.xlu1 %5848 }
 0x316   : > { %16806 = vst [vmem:[#allocation7_spill] sm:$0xff] %v14853_v41  ;;  %16808 = vst [vmem:[#allocation11_spill] sm:$0xff] %v14859_v58  ;;  %v14873_v48 = vrot.slane %v16809_v24, %v12436_v11  ;;  %v14879_v35 = vrot.slane %v6731_v9, %v12444_v16  ;;  %v7546_v60 = vcombine.low %v14853_v41, %v14859_v58  ;;  %v11393_v14 = vpop.f32.mrb[24].mxu1 }
 0x317   : > { %v16811_v32 = vcombine.high %v14513_v13, %v14516_v15  ;;  %v7538_v9 = vrot.slane %v7530_v34, %v12444_v16  ;;  %v16813_v24 = vcombine.low %v14523_v25, %v14526_v62  ;;  %v11425_v13 = vpop.f32.mrb[24].mxu0  ;;  %v16815_v34 = vcombine.high %v14523_v25, %v14526_v62 }
 0x318   : > { %16810 = vst [vmem:[#allocation70_spill] sm:$0xff] %v14873_v48  ;;  %v7554_v51 = vrot.slane %v7546_v60, %v12444_v16  ;;  %v14914_v29 = vpop.f32.mrb[25].mxu0  ;;  %v6902_v41 = vcombine.low %v5753_v26, %v5849_v61  ;;  %v6903_v15 = vcombine.high %v5753_v26, %v5849_v61  ;;  %v6834_v58 = vcombine.low %v14742_v47, %v5847_v18 }
 0x319   : > { %v14887_v6 = vrot.slane %v16811_v32, %v12436_v11  ;;  %v14898_v52 = vrot.slane %v16813_v24, %v12436_v11  ;;  %v14910_v19 = vrot.slane %v16815_v34, %v12436_v11  ;;  %v14912_v24 = vpop.f32.mrb[25].mxu1  ;;  %v14921_v60 = vpop.f32.mrb[26].mxu0  ;;  %v6835_v34 = vcombine.high %v14742_v47, %v5847_v18 }
 0x31a   : > { %v14919_v32 = vpop.f32.mrb[26].mxu1  ;;  %v7562_v55 = vcombine.low %v7538_v9, %v7554_v51  ;;  %v7563_v62 = vcombine.high %v7538_v9, %v7554_v51  ;;  %v14928_v33 = vpop.f32.mrb[27].mxu0  ;;  %v6910_v26 = vrot.slane %v6902_v41, %v12436_v11  ;;  %v6917_v61 = vrot.slane %v6903_v15, %v12436_v11 }
 0x31b   : > { %16812 = vst [vmem:[#allocation69_spill] sm:$0xff] %v14887_v6  ;;  %16814 = vst [vmem:[#allocation72_spill] sm:$0xff] %v14898_v52  ;;  %v7598_v21 = vcombine.low %v14873_v48, %v14887_v6  ;;  %v7614_v25 = vcombine.low %v14898_v52, %v14910_v19  ;;  %v14926_v63 = vpop.f32.mrb[27].mxu1  ;;  %v6842_v6 = vrot.slane %v6834_v58, %v12436_v11 }
 0x31c   : > { %16816 = vst [vmem:[#allocation71_spill] sm:$0xff] %v14910_v19  ;;  %v6849_v8 = vrot.slane %v6835_v34, %v12436_v11  ;;  %v16817_v47 = vcombine.low %v14777_v46, %v14780_v42  ;;  %v6918_v41 = vcombine.low %v6894_v56, %v6910_v26  ;;  %v6919_v9 = vcombine.high %v6894_v56, %v6910_v26 }
 0x31d   : > { %v7606_v48 = vrot.slane %v7598_v21, %v12444_v16  ;;  %v7622_v4 = vrot.slane %v7614_v25, %v12444_v16  ;;  %v16818_v21 = vcombine.high %v14777_v46, %v14780_v42  ;;  %v6934_v15 = vcombine.low %v6901_v53, %v6917_v61 }
 0x31e   : > { %v14940_v18 = vrot.slane %v16817_v47, %v12436_v11  ;;  %v6935_v58 = vcombine.high %v6901_v53, %v6917_v61  ;;  %v6850_v34 = vcombine.low %v14809_v2, %v6842_v6  ;;  %v6851_v19 = vcombine.high %v14809_v2, %v6842_v6 }
 0x31f   : > { %v14946_v51 = vrot.slane %v16818_v21, %v12436_v11  ;;  %v7630_v52 = vcombine.low %v7606_v48, %v7622_v4  ;;  %v7631_v25 = vcombine.high %v7606_v48, %v7622_v4  ;;  %v14951_v31 = vrot.slane %v6918_v41, %v12444_v16 }
 0x320   : > { %v14954_v47 = vrot.slane %v6919_v9, %v12444_v16  ;;  %v14957_v46 = vrot.slane %v6934_v15, %v12444_v16  ;;  %v14960_v42 = vrot.slane %v6935_v58, %v12444_v16  ;;  %v14963_v4 = vrot.slane %v6850_v34, %v12444_v16 }
 0x321   : > { %v9430_v56 = vpack.c.bf16 %v7630_v52, %v7562_v55  ;;  %v9438_v53 = vpack.c.bf16 %v7631_v25, %v7563_v62  ;;  %v14966_v48 = vrot.slane %v6851_v19, %v12444_v16  ;;  %v6866_v52 = vcombine.low %v14812_v39, %v6849_v8 }
 0x322   : > { %v6867_v55 = vcombine.high %v14812_v39, %v6849_v8  ;;  %v14982_v62 = vsel %vm8689_vm2, %v11393_v14, -1e+30  ;;  %v16820_v41 = vcombine.low %v14783_v50, %v14786_v54  ;;  %v16821_v8 = vcombine.high %v14783_v50, %v14786_v54 }
 0x323   : > { %11511 = vmatprep.subr.bf16.mxu1 %v9430_v56  ;;  %11543 = vmatprep.subr.bf16.mxu0 %v9438_v53  ;;  %v7906_v19 = vcombine.low %v14963_v4, %v14966_v48  ;;  %16819 = vst [vmem:[#allocation74_spill] sm:$0xff] %v14982_v62  ;;  %v11024_v21 = vcombine.high %v14963_v4, %v14966_v48  ;;  %v15000_v14 = vsel %vm8689_vm2, %v11425_v13, -1e+30 }
 0x324   : > { %11512 = vmatpush3.bf16.msra.mxu1 %v9430_v56  ;;  %11544 = vmatpush3.bf16.msra.mxu0 %v9438_v53  ;;  %v14990_v9 = vrot.slane %v16820_v41, %v12436_v11  ;;  %v14996_v39 = vrot.slane %v16821_v8, %v12436_v11  ;;  %16822 = vst [vmem:[#allocation73_spill] sm:$0xff] %v15000_v14 }
 0x325   : > { %v6874_v15 = vrot.slane %v6866_v52, %v12444_v16  ;;  %v6881_v58 = vrot.slane %v6867_v55, %v12444_v16  ;;  %v7666_v25 = vcombine.low %v14940_v18, %v14946_v51  ;;  %v16823_v34 = vcombine.low %v14605_v59, %v14608_v20  ;;  %8758 = vmax.xlane.f32.xlu0 %v14982_v62 }
 0x326   : > { %v7682_v50 = vcombine.low %v14990_v9, %v14996_v39  ;;  %v16824_v54 = vcombine.high %v14605_v59, %v14608_v20  ;;  %v16825_v53 = vcombine.low %v14611_v28, %v14614_v0  ;;  %v16826_v48 = vcombine.high %v14611_v28, %v14614_v0  ;;  %8790 = vmax.xlane.f32.xlu1 %v15000_v14 }
 0x327   : > { %v15010_v56 = vrot.slane %v16823_v34, %v12436_v11  ;;  %v7922_v55 = vcombine.low %v6874_v15, %v6881_v58  ;;  %v11025_v41 = vcombine.high %v6874_v15, %v6881_v58  ;;  %v7674_v59 = vrot.slane %v7666_v25, %v12444_v16 }
 0x328   : > { %v15019_v13 = vrot.slane %v16824_v54, %v12436_v11  ;;  %v15025_v4 = vrot.slane %v16825_v53, %v12436_v11  ;;  %v15031_v52 = vrot.slane %v16826_v48, %v12436_v11  ;;  %v16827_v20 = vcombine.low %v14862_v36, %v14865_v27 }
 0x329   : > { %v7690_v34 = vrot.slane %v7682_v50, %v12444_v16  ;;  %v16829_v0 = vcombine.high %v14862_v36, %v14865_v27  ;;  %v16831_v58 = vcombine.low %v14876_v57, %v14879_v35  ;;  %v16833_v50 = vcombine.high %v14876_v57, %v14879_v35 }
 0x32a   : > { %v15039_v8 = vrot.slane %v16827_v20, %v12436_v11  ;;  %v7734_v54 = vcombine.low %v15010_v56, %v15019_v13  ;;  %v7750_v28 = vcombine.low %v15025_v4, %v15031_v52  ;;  %v16835_v48 = vcombine.low %v14800_v43, %v14803_v3 }
 0x32b   : > { %v15050_v15 = vrot.slane %v16829_v0, %v12436_v11  ;;  %v15056_v25 = vrot.slane %v16831_v58, %v12436_v11  ;;  %v15062_v53 = vrot.slane %v16833_v50, %v12436_v11  ;;  %v16837_v36 = vcombine.high %v14800_v43, %v14803_v3  ;;  %v15076_v0 = vpop.f32.mrb[28].mxu1  ;;  %v15078_v58 = vpop.f32.mrb[28].mxu0 }
 0x32c   : > { %16828 = vst [vmem:[#allocation76_spill] sm:$0xff] %v15039_v8  ;;  %v15068_v20 = vrot.slane %v16835_v48, %v12436_v11  ;;  %v7698_v61 = vcombine.low %v7674_v59, %v7690_v34  ;;  %v7742_v57 = vrot.slane %v7734_v54, %v12444_v16  ;;  %v7758_v35 = vrot.slane %v7750_v28, %v12444_v16  ;;  %v15082_v26 = vpop.f32.mrb[29].mxu1  ;;  %v15084_v48 = vpop.f32.mrb[29].mxu0 }
 0x32d   : > { %16830 = vst [vmem:[#allocation75_spill] sm:$0xff] %v15050_v15  ;;  %16832 = vst [vmem:[#allocation10_spill] sm:$0xff] %v15056_v25  ;;  %v15074_v27 = vrot.slane %v16837_v36, %v12436_v11  ;;  %v7699_v50 = vcombine.high %v7674_v59, %v7690_v34  ;;  %v7802_v6 = vcombine.low %v15039_v8, %v15050_v15  ;;  %v15102_v54 = vpop.f32.mrb[30].mxu1  ;;  %v15104_v28 = vpop.f32.mrb[30].mxu0 }
 0x32e   : > { %16834 = vst [vmem:[#allocation89_spill] sm:$0xff] %v15062_v53  ;;  %16836 = vst [vmem:[#allocation14_spill] sm:$0xff] %v15068_v20  ;;  %v7818_v43 = vcombine.low %v15056_v25, %v15062_v53  ;;  %v16839_v3 = vcombine.low %v14806_v30, %v14816_v10  ;;  %v16840_v59 = vcombine.high %v14806_v30, %v14816_v10  ;;  %v15113_v53 = vpop.f32.mrb[31].mxu0 }
 0x32f   : > { %16838 = vst [vmem:[#allocation17_spill] sm:$0xff] %v15074_v27  ;;  %v7766_v2 = vcombine.low %v7742_v57, %v7758_v35  ;;  %v7767_v14 = vcombine.high %v7742_v57, %v7758_v35  ;;  %v7870_v62 = vcombine.low %v15068_v20, %v15074_v27  ;;  %v15109_v25 = vrot.slane %v7906_v19, %v12436_v11 }
 0x330   : > { %v15094_v36 = vrot.slane %v16839_v3, %v12436_v11  ;;  %v15100_v34 = vrot.slane %v16840_v59, %v12436_v11  ;;  %v15111_v3 = vpop.f32.mrb[31].mxu1  ;;  %16841 = vst [vmem:[#allocation19_spill] sm:$0xff] %v15113_v53  ;;  %v7810_v30 = vrot.slane %v7802_v6, %v12444_v16  ;;  %v7826_v10 = vrot.slane %v7818_v43, %v12444_v16 }
 0x331   : > { %v15120_v8 = vrot.slane %v11024_v21, %v12436_v11  ;;  %v9431_v57 = vpack.c.bf16 %v7766_v2, %v7698_v61  ;;  %v9439_v35 = vpack.c.bf16 %v7767_v14, %v7699_v50  ;;  %v7878_v20 = vrot.slane %v7870_v62, %v12444_v16 }
 0x332   : > { %v7886_v59 = vcombine.low %v15094_v36, %v15100_v34  ;;  %v15124_v19 = vrot.slane %v7922_v55, %v12436_v11  ;;  %v7834_v27 = vcombine.low %v7810_v30, %v7826_v10  ;;  %v7835_v53 = vcombine.high %v7810_v30, %v7826_v10 }
 0x333   : > { %v15128_v6 = vrot.slane %v11025_v41, %v12436_v11  ;;  %11513 = vmatprep.subr.bf16.mxu1 %v9431_v57  ;;  %11545 = vmatprep.subr.bf16.mxu0 %v9439_v35  ;;  %v7938_v21 = vcombine.low %v15109_v25, %v15120_v8  ;;  %v16842_v2 = vcombine.low %v14951_v31, %v14954_v47  ;;  %v15147_v55 = vsel %vm8689_vm2, %v14912_v24, -1e+30 }
 0x334   : > { %v7894_v15 = vrot.slane %v7886_v59, %v12444_v16  ;;  %v16843_v62 = vcombine.high %v14951_v31, %v14954_v47  ;;  %11514 = vmatpush3.bf16.msra.mxu1 %v9431_v57  ;;  %11546 = vmatpush3.bf16.msra.mxu0 %v9439_v35  ;;  %v15154_v30 = vsel %vm8689_vm2, %v14914_v29, -1e+30  ;;  %v16844_v47 = vcombine.low %v14957_v46, %v14960_v42 }
 0x335   : > { %v15136_v61 = vrot.slane %v16842_v2, %v12436_v11  ;;  %v7954_v43 = vcombine.low %v15124_v19, %v15128_v6  ;;  %v7946_v31 = vrot.slane %v7938_v21, %v12444_v16  ;;  %8754 = vmax.xlane.f32.xlu0 %v15147_v55  ;;  %v6987_v35 = vcombine.high %v14342_v38, %v14348_v12 }
 0x336   : > { %v15142_v14 = vrot.slane %v16843_v62, %v12436_v11  ;;  %v7902_v41 = vcombine.low %v7878_v20, %v7894_v15  ;;  %v7903_v50 = vcombine.high %v7878_v20, %v7894_v15  ;;  %v15161_v24 = vrot.slane %v16844_v47, %v12436_v11  ;;  %8786 = vmax.xlane.f32.xlu1 %v15154_v30 }
 0x337   : > { %v16845_v15 = vcombine.high %v14957_v46, %v14960_v42  ;;  %v7962_v57 = vrot.slane %v7954_v43, %v12444_v16  ;;  %v7003_v46 = vcombine.high %v14354_v44, %v14370_v7  ;;  %v7055_v42 = vcombine.high %v14378_v40, %v14390_v1 }
 0x338   : > { %v8006_v10 = vcombine.low %v15136_v61, %v15142_v14  ;;  %v9432_v29 = vpack.c.bf16 %v7902_v41, %v7834_v27  ;;  %v9440_v59 = vpack.c.bf16 %v7903_v50, %v7835_v53  ;;  %v7001_v27 = vrot.slane %v6987_v35, %v12444_v16  ;;  %v16848_v35 = vld [vmem:[#allocation77_spill] sm:$0xff] }
 0x339   : > { %v15167_v20 = vrot.slane %v16845_v15, %v12436_v11  ;;  %v7970_v53 = vcombine.low %v7946_v31, %v7962_v57  ;;  %v7971_v12 = vcombine.high %v7946_v31, %v7962_v57  ;;  %v7017_v2 = vrot.slane %v7003_v46, %v12444_v16  ;;  %v16850_v46 = vld [vmem:[#allocation78_spill] sm:$0xff] }
 0x33a   : > { %v8014_v21 = vrot.slane %v8006_v10, %v12444_v16  ;;  %11515 = vmatprep.subr.bf16.mxu1 %v9432_v29  ;;  %11547 = vmatprep.subr.bf16.mxu0 %v9440_v59  ;;  %v15189_v62 = vsel %vm8689_vm2, %v14919_v32, -1e+30  ;;  %v7069_v44 = vrot.slane %v7055_v42, %v12444_v16  ;;  %v7071_v7 = vcombine.high %v14396_v45, %v14415_v23  ;;  %v16851_v42 = vld [vmem:[#allocation79_spill] sm:$0xff] }
 0x33b   : > { %v8022_v11 = vcombine.low %v15161_v24, %v15167_v20  ;;  %11516 = vmatpush3.bf16.msra.mxu1 %v9432_v29  ;;  %11548 = vmatpush3.bf16.msra.mxu0 %v9440_v59  ;;  %v15197_v40 = vsel %vm8689_vm2, %v14926_v63, -1e+30  ;;  %v7020_v50 = vcombine.low %v7001_v27, %v7017_v2  ;;  %v7021_v43 = vcombine.high %v7001_v27, %v7017_v2  ;;  %v16852_v27 = vld [vmem:[#allocation80_spill] sm:$0xff] }
 0x33c   : > { %8760 = vmax.xlane.f32.xlu0 %v15189_v62  ;;  %8756 = vmax.xlane.f32.xlu1 %v15197_v40  ;;  %v7085_v32 = vrot.slane %v7071_v7, %v12444_v16  ;;  %v15205_v45 = vsel %vm8689_vm2, %v14921_v60, -1e+30  ;;  %v15215_v29 = vsel %vm8689_vm2, %v15076_v0, -1e+30  ;;  %v15223_v60 = vsel %vm8689_vm2, %v14928_v33, -1e+30 }
 0x33d   : > { %v8030_v38 = vrot.slane %v8022_v11, %v12444_v16  ;;  %v15229_v59 = vsel %vm8689_vm2, %v15078_v58, -1e+30  ;;  %v7395_v0 = vcombine.high %v14702_v17, %v14708_v49  ;;  %v7411_v57 = vcombine.high %v14714_v5, %v14720_v22  ;;  %v16855_v7 = vld [vmem:[#allocation7_spill] sm:$0xff] }
 0x33e   : > { %v7088_v23 = vcombine.low %v7069_v44, %v7085_v32  ;;  %v7089_v63 = vcombine.high %v7069_v44, %v7085_v32  ;;  %v15241_v33 = vsel %vm8689_vm2, %v15102_v54, -1e+30  ;;  %v7479_v58 = vcombine.high %v16851_v42, %v16850_v46 }
 0x33f   : > { %v8038_v1 = vcombine.low %v8014_v21, %v8030_v38  ;;  %v8039_v41 = vcombine.high %v8014_v21, %v8030_v38  ;;  %v16849_v21 = vld [vmem:[#allocation13_spill] sm:$0xff]  ;;  %v7425_v17 = vrot.slane %v7411_v57, %v12444_v16  ;;  %v15252_v5 = vsel %vm8689_vm2, %v15082_v26, -1e+30  ;;  %v16854_v26 = vld [vmem:[#allocation11_spill] sm:$0xff] }
 0x340   : > { %8792 = vmax.xlane.f32.xlu0 %v15205_v45  ;;  %v15208_v15 = vpack.c.bf16 %v7088_v23, %v7020_v50  ;;  %v15210_v10 = vpack.c.bf16 %v7089_v63, %v7021_v43  ;;  %8766 = vmax.xlane.f32.xlu1 %v15215_v29  ;;  %v7463_v11 = vcombine.high %v16849_v21, %v16848_v35  ;;  %v15257_v22 = vsel %vm8689_vm2, %v15084_v48, -1e+30  ;;  %v16853_v38 = vld [vmem:[#allocation81_spill] sm:$0xff]  ;;  %v16857_v50 = vld [vmem:[#allocation70_spill] sm:$0xff] }
 0x341   : > { %v9433_v31 = vpack.c.bf16 %v8038_v1, %v7970_v53  ;;  %v9441_v47 = vpack.c.bf16 %v8039_v41, %v7971_v12  ;;  %v7409_v53 = vrot.slane %v7395_v0, %v12444_v16  ;;  %v7493_v54 = vrot.slane %v7479_v58, %v12444_v16  ;;  %v16856_v41 = vld [vmem:[#allocation69_spill] sm:$0xff] }
 0x342   : > { %16846 = vst [vmem:[#allocation83_spill] sm:$0xff] %v15208_v15  ;;  %16847 = vst [vmem:[#allocation82_spill] sm:$0xff] %v15210_v10  ;;  %v7477_v49 = vrot.slane %v7463_v11, %v12444_v16  ;;  %v7531_v12 = vcombine.high %v16853_v38, %v16852_v27  ;;  %v15265_v2 = vsel %vm8689_vm2, %v15104_v28, -1e+30  ;;  %v7547_v1 = vcombine.high %v16855_v7, %v16854_v26  ;;  %v16859_v28 = vld [vmem:[#allocation72_spill] sm:$0xff] }
 0x343   : > { %11517 = vmatprep.subr.bf16.mxu1 %v9433_v31  ;;  %11549 = vmatprep.subr.bf16.mxu0 %v9441_v47  ;;  %v7428_v44 = vcombine.low %v7409_v53, %v7425_v17  ;;  %v7599_v48 = vcombine.high %v16857_v50, %v16856_v41  ;;  %v15275_v32 = vsel %vm8689_vm2, %v15111_v3, -1e+30  ;;  %v7429_v57 = vcombine.high %v7409_v53, %v7425_v17  ;;  %v16867_v41 = vld [vmem:[#allocation75_spill] sm:$0xff]  ;;  %v16868_v50 = vld [vmem:[#allocation76_spill] sm:$0xff] }
 0x344   : > { %11518 = vmatpush3.bf16.msra.mxu1 %v9433_v31  ;;  %11550 = vmatpush3.bf16.msra.mxu0 %v9441_v47  ;;  %v7496_v43 = vcombine.low %v7477_v49, %v7493_v54  ;;  %v7545_v31 = vrot.slane %v7531_v12, %v12444_v16  ;;  %v16858_v47 = vld [vmem:[#allocation71_spill] sm:$0xff]  ;;  %v7561_v63 = vrot.slane %v7547_v1, %v12444_v16 }
 0x345   : > { %11567 = vmatprep.subr.bf16.mxu1 %v15208_v15  ;;  %11599 = vmatprep.subr.bf16.mxu0 %v15210_v10  ;;  %v7615_v23 = vcombine.high %v16859_v28, %v16858_v47  ;;  %v7613_v0 = vrot.slane %v7599_v48, %v12444_v16  ;;  %v7497_v35 = vcombine.high %v7477_v49, %v7493_v54  ;;  %v16871_v28 = vld [vmem:[#allocation17_spill] sm:$0xff] }
 0x346   : > { %8788 = vmax.xlane.f32.xlu0 %v15223_v60  ;;  %8798 = vmax.xlane.f32.xlu1 %v15229_v59  ;;  %v15283_v21 = vpack.c.bf16 %v7496_v43, %v7428_v44  ;;  %v7667_v3 = vcombine.high %v14940_v18, %v14946_v51  ;;  %v7683_v46 = vcombine.high %v14990_v9, %v14996_v39  ;;  %v16869_v43 = vld [vmem:[#allocation89_spill] sm:$0xff] }
 0x347   : > { %v7629_v11 = vrot.slane %v7615_v23, %v12444_v16  ;;  %v7564_v42 = vcombine.low %v7545_v31, %v7561_v63  ;;  %v15291_v58 = vpack.c.bf16 %v7497_v35, %v7429_v57  ;;  %v7735_v27 = vcombine.high %v15010_v56, %v15019_v13  ;;  %v16872_v23 = vld [vmem:[#allocation14_spill] sm:$0xff] }
 0x348   : > { %16860 = vst [vmem:[#allocation85_spill] sm:$0xff] %v15283_v21  ;;  %v7751_v53 = vcombine.high %v15025_v4, %v15031_v52  ;;  %v7681_v49 = vrot.slane %v7667_v3, %v12444_v16  ;;  %v7697_v54 = vrot.slane %v7683_v46, %v12444_v16  ;;  %v7565_v18 = vcombine.high %v7545_v31, %v7561_v63  ;;  %v16864_v52 = vld [vmem:[#allocation19_spill] sm:$0xff]  ;;  %v16870_v31 = vld [vmem:[#allocation10_spill] sm:$0xff] }
 0x349   : > { %16861 = vst [vmem:[#allocation84_spill] sm:$0xff] %v15291_v58  ;;  %v7632_v17 = vcombine.low %v7613_v0, %v7629_v11  ;;  %v7749_v51 = vrot.slane %v7735_v27, %v12444_v16  ;;  %v7633_v39 = vcombine.high %v7613_v0, %v7629_v11  ;;  %v15309_v26 = vsel %vm8689_vm2, %v16864_v52, -1e+30 }
 0x34a   : > { %8768 = vmax.xlane.f32.xlu0 %v15241_v33  ;;  %8762 = vmax.xlane.f32.xlu1 %v15252_v5  ;;  %v7765_v9 = vrot.slane %v7751_v53, %v12444_v16  ;;  %v7700_v12 = vcombine.low %v7681_v49, %v7697_v54  ;;  %v7701_v56 = vcombine.high %v7681_v49, %v7697_v54 }
 0x34b   : > { %v15302_v38 = vpack.c.bf16 %v7632_v17, %v7564_v42  ;;  %v15304_v44 = vpack.c.bf16 %v7633_v39, %v7565_v18  ;;  %v7803_v48 = vcombine.high %v16868_v50, %v16867_v41  ;;  %v7819_v47 = vcombine.high %v16870_v31, %v16869_v43 }
 0x34c   : > { %v7768_v13 = vcombine.low %v7749_v51, %v7765_v9  ;;  %v7769_v4 = vcombine.high %v7749_v51, %v7765_v9  ;;  %v7871_v63 = vcombine.high %v16872_v23, %v16871_v28  ;;  %v7887_v0 = vcombine.high %v15094_v36, %v15100_v34 }
 0x34d   : > { %16862 = vst [vmem:[#allocation87_spill] sm:$0xff] %v15302_v38  ;;  %16863 = vst [vmem:[#allocation86_spill] sm:$0xff] %v15304_v44  ;;  %v7939_v57 = vcombine.high %v15109_v25, %v15120_v8  ;;  %v7955_v35 = vcombine.high %v15124_v19, %v15128_v6  ;;  %v8007_v11 = vcombine.high %v15136_v61, %v15142_v14 }
 0x34e   : > { %8800 = vmax.xlane.f32.xlu0 %v15265_v2  ;;  %8794 = vmax.xlane.f32.xlu1 %v15257_v22  ;;  %v15312_v7 = vpack.c.bf16 %v7768_v13, %v7700_v12  ;;  %v15314_v1 = vpack.c.bf16 %v7769_v4, %v7701_v56  ;;  %v8023_v3 = vcombine.high %v15161_v24, %v15167_v20 }
 0x34f   : > { %v7817_v27 = vrot.slane %v7803_v48, %v12444_v16  ;;  %v7833_v53 = vrot.slane %v7819_v47, %v12444_v16  ;;  %v7885_v36 = vrot.slane %v7871_v63, %v12444_v16  ;;  %v7901_v34 = vrot.slane %v7887_v0, %v12444_v16 }
 0x350   : > { %16865 = vst [vmem:[#allocation88_spill] sm:$0xff] %v15312_v7  ;;  %16866 = vst [vmem:[#allocation15_spill] sm:$0xff] %v15314_v1  ;;  %v7953_v6 = vrot.slane %v7939_v57, %v12444_v16  ;;  %v7969_v61 = vrot.slane %v7955_v35, %v12444_v16  ;;  %v8021_v9 = vrot.slane %v8007_v11, %v12444_v16 }
 0x351   : > { %v7836_v20 = vcombine.low %v7817_v27, %v7833_v53  ;;  %v7904_v17 = vcombine.low %v7885_v36, %v7901_v34  ;;  %v8037_v12 = vrot.slane %v8023_v3, %v12444_v16  ;;  %v7837_v13 = vcombine.high %v7817_v27, %v7833_v53 }
 0x352   : > { %8764 = vmax.xlane.f32.xlu0 %v15275_v32  ;;  %v7972_v51 = vcombine.low %v7953_v6, %v7969_v61  ;;  %v7905_v4 = vcombine.high %v7885_v36, %v7901_v34  ;;  %v7973_v52 = vcombine.high %v7953_v6, %v7969_v61 }
 0x353   : > { %v11401_v46 = vpop.f32.mrb[32].mxu1  ;;  %v11433_v42 = vpop.f32.mrb[32].mxu0  ;;  %v15349_v39 = vpack.c.bf16 %v7904_v17, %v7836_v20  ;;  %v8040_v41 = vcombine.low %v8021_v9, %v8037_v12  ;;  %v8041_v50 = vcombine.high %v8021_v9, %v8037_v12 }
 0x354   : > { %v15338_v8 = vsel %vm8689_vm2, %v11401_v46, -1e+30  ;;  %v8221_v25 = vpop.f32.mrb[33].mxu1  ;;  %v8366_v19 = vpop.f32.mrb[33].mxu0  ;;  %v15354_v56 = vsel %vm8689_vm2, %v11433_v42, -1e+30  ;;  %v15361_v43 = vpack.c.bf16 %v7905_v4, %v7837_v13 }
 0x355   : > { %v11402_v14 = vpop.f32.mrb[34].mxu1  ;;  %8774 = vmax.xlane.f32.xlu1 %v15338_v8  ;;  %v11434_v24 = vpop.f32.mrb[34].mxu0  ;;  %16873 = vst [vmem:[#allocation34_spill] sm:$0xff] %v15349_v39  ;;  %v15364_v31 = vpack.c.bf16 %v8040_v41, %v7972_v51  ;;  %v15366_v47 = vpack.c.bf16 %v8041_v50, %v7973_v52  ;;  %v15370_v28 = vsel %vm8689_vm2, %v8221_v25, -1e+30 }
 0x356   : > { %8796 = vmax.xlane.f32.xlu0 %v15309_v26  ;;  %v15345_v49 = vsel %vm8689_vm2, %v11402_v14, -1e+30  ;;  %v8224_v54 = vpop.f32.mrb[35].mxu1  ;;  %v8369_v18 = vpop.f32.mrb[35].mxu0  ;;  %v15359_v48 = vsel %vm8689_vm2, %v11434_v24, -1e+30 }
 0x357   : > { %16874 = vst [vmem:[#allocation33_spill] sm:$0xff] %v15361_v43  ;;  %16875 = vst [vmem:[#allocation36_spill] sm:$0xff] %v15364_v31  ;;  %v15375_v23 = vsel %vm8689_vm2, %v8224_v54, -1e+30  ;;  %v15380_v63 = vsel %vm8689_vm2, %v8366_v19, -1e+30 }
 0x358   : > { %16876 = vst [vmem:[#allocation35_spill] sm:$0xff] %v15366_v47  ;;  %v15385_v0 = vsel %vm8689_vm2, %v8369_v18, -1e+30 }
 0x359   : > { %8806 = vmax.xlane.f32.xlu1 %v15354_v56 }
 0x35a   : > { %8776 = vmax.xlane.f32.xlu0 %v15345_v49 }
 0x35d   : > { %8770 = vmax.xlane.f32.xlu1 %v15370_v28 }
 0x35e   : > { %8808 = vmax.xlane.f32.xlu0 %v15359_v48 }
 0x361   : > { %8802 = vmax.xlane.f32.xlu1 %v15380_v63 }
 0x362   : > { %8772 = vmax.xlane.f32.xlu0 %v15375_v23 }
 0x366   : > { %8804 = vmax.xlane.f32.xlu0 %v15385_v0 }
 0x373   : > { %v11405_v57 = vpop.f32.mrb[36].mxu1 }
 0x374   : > { %v11437_v35 = vpop.f32.mrb[36].mxu0  ;;  %v15390_v11 = vsel %vm8689_vm2, %v11405_v57, -1e+30  ;;  %v8237_v3 = vpop.f32.mrb[37].mxu1 }
 0x375   : > { %v8382_v46 = vpop.f32.mrb[37].mxu0  ;;  %v11406_v42 = vpop.f32.mrb[38].mxu1  ;;  %8782 = vmax.xlane.f32.xlu1 %v15390_v11  ;;  %v15400_v25 = vsel %vm8689_vm2, %v11437_v35, -1e+30  ;;  %v15410_v6 = vsel %vm8689_vm2, %v8237_v3, -1e+30 }
 0x376   : > { %v11438_v27 = vpop.f32.mrb[38].mxu0  ;;  %v15395_v53 = vsel %vm8689_vm2, %v11406_v42, -1e+30  ;;  %v8240_v36 = vpop.f32.mrb[39].mxu1  ;;  %v15420_v20 = vsel %vm8689_vm2, %v8382_v46, -1e+30 }
 0x377   : > { %v8385_v34 = vpop.f32.mrb[39].mxu0  ;;  %8784 = vmax.xlane.f32.xlu0 %v15395_v53  ;;  %v15405_v19 = vsel %vm8689_vm2, %v11438_v27, -1e+30  ;;  %v15415_v61 = vsel %vm8689_vm2, %v8240_v36, -1e+30 }
 0x378   : > { %v15425_v51 = vsel %vm8689_vm2, %v8385_v34, -1e+30 }
 0x379   : > { %8814 = vmax.xlane.f32.xlu1 %v15400_v25 }
 0x37b   : > { %8816 = vmax.xlane.f32.xlu0 %v15405_v19 }
 0x37d   : > { %8778 = vmax.xlane.f32.xlu1 %v15410_v6  ;;  %v11457_v14 = vpop.f32.mrb[40].mxu1 }
 0x37e   : > { %v8479_v24 = vpop.f32.mrb[41].mxu1  ;;  %v15430_v13 = vsel %vm8689_vm2, %v11457_v14, -1e+30 }
 0x37f   : > { %8780 = vmax.xlane.f32.xlu0 %v15415_v61  ;;  %v11458_v17 = vpop.f32.mrb[42].mxu1  ;;  %v11489_v54 = vpop.f32.mrb[40].mxu0  ;;  %v15450_v57 = vsel %vm8689_vm2, %v8479_v24, -1e+30 }
 0x380   : > { %v8482_v18 = vpop.f32.mrb[43].mxu1  ;;  %v8624_v9 = vpop.f32.mrb[41].mxu0  ;;  %v15435_v52 = vsel %vm8689_vm2, %v11458_v17, -1e+30  ;;  %v15440_v41 = vsel %vm8689_vm2, %v11489_v54, -1e+30 }
 0x381   : > { %8810 = vmax.xlane.f32.xlu1 %v15420_v20  ;;  %v11490_v12 = vpop.f32.mrb[42].mxu0  ;;  %v15455_v35 = vsel %vm8689_vm2, %v8482_v18, -1e+30  ;;  %v15460_v42 = vsel %vm8689_vm2, %v8624_v9, -1e+30 }
 0x382   : > { %v8627_v4 = vpop.f32.mrb[43].mxu0  ;;  %v15445_v50 = vsel %vm8689_vm2, %v11490_v12, -1e+30 }
 0x383   : > { %8812 = vmax.xlane.f32.xlu0 %v15425_v51  ;;  %v15465_v24 = vsel %vm8689_vm2, %v8627_v4, -1e+30 }
 0x385   : > { %8822 = vmax.xlane.f32.xlu1 %v15430_v13 }
 0x387   : > { %8824 = vmax.xlane.f32.xlu0 %v15435_v52 }
 0x389   : > { %8854 = vmax.xlane.f32.xlu1 %v15440_v41 }
 0x38b   : > { %8856 = vmax.xlane.f32.xlu0 %v15445_v50 }
 0x38d   : > { %8818 = vmax.xlane.f32.xlu1 %v15450_v57 }
 0x38e   : > { %v11461_v3 = vpop.f32.mrb[44].mxu1  ;;  %v11493_v46 = vpop.f32.mrb[44].mxu0 }
 0x38f   : > { %8820 = vmax.xlane.f32.xlu0 %v15455_v35  ;;  %v8495_v27 = vpop.f32.mrb[45].mxu1  ;;  %v8640_v36 = vpop.f32.mrb[45].mxu0  ;;  %v15470_v18 = vsel %vm8689_vm2, %v11461_v3, -1e+30  ;;  %v15480_v12 = vsel %vm8689_vm2, %v11493_v46, -1e+30 }
 0x390   : > { %v11462_v34 = vpop.f32.mrb[46].mxu1  ;;  %v11494_v14 = vpop.f32.mrb[46].mxu0  ;;  %v15490_v3 = vsel %vm8689_vm2, %v8495_v27, -1e+30 }
 0x391   : > { %8850 = vmax.xlane.f32.xlu1 %v15460_v42  ;;  %v8498_v17 = vpop.f32.mrb[47].mxu1  ;;  %v8643_v54 = vpop.f32.mrb[47].mxu0  ;;  %v15475_v9 = vsel %vm8689_vm2, %v11462_v34, -1e+30  ;;  %v15485_v4 = vsel %vm8689_vm2, %v11494_v14, -1e+30 }
 0x392   : > { %v15495_v34 = vsel %vm8689_vm2, %v8498_v17, -1e+30  ;;  %v15500_v14 = vsel %vm8689_vm2, %v8640_v36, -1e+30  ;;  %v15505_v17 = vsel %vm8689_vm2, %v8643_v54, -1e+30 }
 0x393   : > { %8852 = vmax.xlane.f32.xlu0 %v15465_v24  ;;  %16877 = vst [vmem:[#allocation38_spill] sm:$0xff] %v15505_v17 }
 0x395   : > { %8830 = vmax.xlane.f32.xlu1 %v15470_v18 }
 0x397   : > { %8832 = vmax.xlane.f32.xlu0 %v15475_v9 }
 0x399   : > { %8862 = vmax.xlane.f32.xlu1 %v15480_v12 }
 0x39b   : > { %8864 = vmax.xlane.f32.xlu0 %v15485_v4 }
 0x39c   : > { %v11465_v46 = vpop.f32.mrb[48].mxu1  ;;  %v11497_v47 = vpop.f32.mrb[48].mxu0 }
 0x39d   : > { %8826 = vmax.xlane.f32.xlu1 %v15490_v3  ;;  %v8511_v43 = vpop.f32.mrb[49].mxu1  ;;  %v8656_v31 = vpop.f32.mrb[49].mxu0  ;;  %v15510_v7 = vsel %vm8689_vm2, %v11465_v46, -1e+30  ;;  %v15520_v58 = vsel %vm8689_vm2, %v11497_v47, -1e+30 }
 0x39e   : > { %v11466_v1 = vpop.f32.mrb[50].mxu1  ;;  %v11498_v39 = vpop.f32.mrb[50].mxu0  ;;  %16878 = vst [vmem:[#allocation37_spill] sm:$0xff] %v15510_v7  ;;  %16880 = vst [vmem:[#allocation39_spill] sm:$0xff] %v15520_v58 }
 0x39f   : > { %8828 = vmax.xlane.f32.xlu0 %v15495_v34  ;;  %v8514_v27 = vpop.f32.mrb[51].mxu1  ;;  %v8659_v44 = vpop.f32.mrb[51].mxu0  ;;  %v15515_v36 = vsel %vm8689_vm2, %v11466_v1, -1e+30  ;;  %v15525_v54 = vsel %vm8689_vm2, %v11498_v39, -1e+30 }
 0x3a0   : > { %16879 = vst [vmem:[#allocation40_spill] sm:$0xff] %v15515_v36  ;;  %16881 = vst [vmem:[#allocation18_spill] sm:$0xff] %v15525_v54  ;;  %v15530_v1 = vsel %vm8689_vm2, %v8511_v43, -1e+30  ;;  %v15535_v39 = vsel %vm8689_vm2, %v8514_v27, -1e+30 }
 0x3a1   : > { %8858 = vmax.xlane.f32.xlu1 %v15500_v14  ;;  %16882 = vst [vmem:[#allocation28_spill] sm:$0xff] %v15535_v39 }
 0x3a3   : > { %8860 = vmax.xlane.f32.xlu0 %v15505_v17 }
 0x3a5   : > { %8838 = vmax.xlane.f32.xlu1 %v15510_v7  ;;  %v16884_v7 = vld [vmem:[#allocation74_spill] sm:$0xff] }
 0x3a7   : > { %8840 = vmax.xlane.f32.xlu0 %v15515_v36 }
 0x3a8   : > { %v11469_v46 = vpop.f32.mrb[52].mxu1  ;;  %v11501_v38 = vpop.f32.mrb[52].mxu0 }
 0x3a9   : > { %8870 = vmax.xlane.f32.xlu1 %v15520_v58  ;;  %v8527_v21 = vpop.f32.mrb[53].mxu1  ;;  %v8672_v10 = vpop.f32.mrb[53].mxu0  ;;  %v15540_v58 = vsel %vm8689_vm2, %v8656_v31, -1e+30  ;;  %v15551_v27 = vsel %vm8689_vm2, %v11469_v46, -1e+30 }
 0x3aa   : > { %v11470_v15 = vpop.f32.mrb[54].mxu1  ;;  %v11502_v16 = vpop.f32.mrb[54].mxu0  ;;  %16883 = vst [vmem:[#allocation26_spill] sm:$0xff] %v15540_v58 }
 0x3ab   : > { %8872 = vmax.xlane.f32.xlu0 %v15525_v54  ;;  %v8530_v47 = vpop.f32.mrb[55].mxu1  ;;  %v8675_v36 = vpop.f32.mrb[55].mxu0  ;;  %v15545_v54 = vsel %vm8689_vm2, %v8659_v44, -1e+30  ;;  %v15556_v31 = vsel %vm8689_vm2, %v11470_v15, -1e+30 }
 0x3ac   : > { %v15561_v44 = vsel %vm8689_vm2, %v11501_v38, -1e+30  ;;  %v15567_v46 = vsel %vm8689_vm2, %v11502_v16, -1e+30  ;;  %v15572_v15 = vsel %vm8689_vm2, %v8527_v21, -1e+30 }
 0x3ad   : > { %8834 = vmax.xlane.f32.xlu1 %v15530_v1  ;;  %16885 = vst [vmem:[#allocation32_spill] sm:$0xff] %v15561_v44  ;;  %16887 = vst [vmem:[#allocation30_spill] sm:$0xff] %v15567_v46  ;;  %v15577_v38 = vsel %vm8689_vm2, %v8530_v47, -1e+30  ;;  %v15589_v47 = vsel %vm8689_vm2, %v8675_v36, -1e+30 }
 0x3ae   : > { %16888 = vst [vmem:[#allocation90_spill] sm:$0xff] %v15589_v47 }
 0x3af   : > { %8836 = vmax.xlane.f32.xlu0 %v15535_v39 }
 0x3b1   : > { %8866 = vmax.xlane.f32.xlu1 %v15540_v58 }
 0x3b2   : > { %v8759_v43 = vpop.xlane.xlu0 %8758 }
 0x3b3   : > { %v8884_v17 = vsub.f32 %v16884_v7, %v8759_v43  ;;  %8868 = vmax.xlane.f32.xlu0 %v15545_v54  ;;  %v8791_v39 = vpop.xlane.xlu1 %8790  ;;  %v16886_v7 = vld [vmem:[#allocation73_spill] sm:$0xff] }
 0x3b4   : > { %v8900_v43 = vsub.f32 %v16886_v7, %v8791_v39 }
 0x3b5   : > { %8846 = vmax.xlane.f32.xlu1 %v15551_v27  ;;  %v8950_v58 = vmul.f32 1.442695, %v8884_v17 }
 0x3b6   : > { %v8982_v17 = vmul.f32 1.442695, %v8900_v43 }
 0x3b7   : > { %8848 = vmax.xlane.f32.xlu0 %v15556_v31  ;;  %11805 = vpow2.f32 %v8950_v58  ;;  %v15583_v58 = vsel %vm8689_vm2, %v8672_v10, -1e+30 }
 0x3b8   : > { %11807 = vpow2.f32 %v8982_v17 }
 0x3b9   : > { %8878 = vmax.xlane.f32.xlu1 %v15561_v44 }
 0x3bb   : > { %8880 = vmax.xlane.f32.xlu0 %v15567_v46 }
 0x3bd   : > { %8842 = vmax.xlane.f32.xlu1 %v15572_v15 }
 0x3bf   : > { %8844 = vmax.xlane.f32.xlu0 %v15577_v38 }
 0x3c1   : > { %8874 = vmax.xlane.f32.xlu1 %v15583_v58  ;;  %v15592_v44 = vpop.eup %11805 }
 0x3c2   : > { %v8755_v39 = vpop.xlane.xlu0 %8754 }
 0x3c3   : > { %v8882_v16 = vsub.f32 %v15147_v55, %v8755_v39  ;;  %v8787_v7 = vpop.xlane.xlu1 %8786  ;;  %8876 = vmax.xlane.f32.xlu0 %v15589_v47 }
 0x3c4   : > { %v8898_v21 = vsub.f32 %v15154_v30, %v8787_v7 }
 0x3c5   : > { %v8946_v43 = vmul.f32 1.442695, %v8882_v16  ;;  %v15598_v16 = vpop.eup %11807 }
 0x3c6   : > { %v8978_v55 = vmul.f32 1.442695, %v8898_v21 }
 0x3c7   : > { %11809 = vpow2.f32 %v8946_v43  ;;  %9078 = vadd.xlane.f32.xlu0 %v15592_v44 }
 0x3c8   : > { %11811 = vpow2.f32 %v8978_v55 }
 0x3c9   : > { %v8761_v46 = vpop.xlane.xlu0 %8760  ;;  %v8757_v39 = vpop.xlane.xlu1 %8756 }
 0x3ca   : > { %v8885_v10 = vsub.f32 %v15189_v62, %v8761_v46  ;;  %v8883_v17 = vsub.f32 %v15197_v40, %v8757_v39 }
 0x3cb   : > { %9110 = vadd.xlane.f32.xlu0 %v15598_v16 }
 0x3cc   : > { %v8948_v30 = vmul.f32 1.442695, %v8883_v17  ;;  %v8952_v37 = vmul.f32 1.442695, %v8885_v10 }
 0x3cd   : > { %v8793_v7 = vpop.xlane.xlu0 %8792  ;;  %v8767_v47 = vpop.xlane.xlu1 %8766 }
 0x3ce   : > { %v8901_v36 = vsub.f32 %v15205_v45, %v8793_v7  ;;  %11813 = vpow2.f32 %v8948_v30  ;;  %v8888_v62 = vsub.f32 %v15215_v29, %v8767_v47 }
 0x3cf   : > { %11815 = vpow2.f32 %v8952_v37 }
 0x3d0   : > { %v8984_v46 = vmul.f32 1.442695, %v8901_v36  ;;  %v8958_v45 = vmul.f32 1.442695, %v8888_v62 }
 0x3d1   : > { %v15603_v43 = vpop.eup %11809 }
 0x3d2   : > { %9074 = vadd.xlane.f32.xlu0 %v15603_v43  ;;  %11817 = vpow2.f32 %v8984_v46  ;;  %v15607_v7 = vpop.eup %11811 }
 0x3d3   : > { %v8789_v21 = vpop.xlane.xlu0 %8788  ;;  %v8799_v39 = vpop.xlane.xlu1 %8798 }
 0x3d4   : > { %v8899_v40 = vsub.f32 %v15223_v60, %v8789_v21  ;;  %v8904_v10 = vsub.f32 %v15229_v59, %v8799_v39 }
 0x3d6   : > { %v8980_v55 = vmul.f32 1.442695, %v8899_v40  ;;  %v8990_v30 = vmul.f32 1.442695, %v8904_v10  ;;  %9106 = vadd.xlane.f32.xlu0 %v15607_v7 }
 0x3d7   : > { %v8769_v17 = vpop.xlane.xlu0 %8768  ;;  %v8763_v29 = vpop.xlane.xlu1 %8762 }
 0x3d8   : > { %11819 = vpow2.f32 %v8980_v55  ;;  %v15609_v47 = vpop.eup %11813  ;;  %v8886_v60 = vsub.f32 %v15252_v5, %v8763_v29  ;;  %v8889_v37 = vsub.f32 %v15241_v33, %v8769_v17 }
 0x3d9   : > { %11821 = vpow2.f32 %v8958_v45  ;;  %9076 = vadd.xlane.f32.xlu1 %v15609_v47  ;;  %v15615_v62 = vpop.eup %11815 }
 0x3da   : > { %11823 = vpow2.f32 %v8990_v30  ;;  %v8954_v36 = vmul.f32 1.442695, %v8886_v60  ;;  %9080 = vadd.xlane.f32.xlu0 %v15615_v62  ;;  %v8960_v40 = vmul.f32 1.442695, %v8889_v37 }
 0x3db   : > { %v8801_v59 = vpop.xlane.xlu0 %8800  ;;  %v8795_v46 = vpop.xlane.xlu1 %8794 }
 0x3dc   : > { %v8902_v21 = vsub.f32 %v15257_v22, %v8795_v46  ;;  %11825 = vpow2.f32 %v8954_v36  ;;  %v8905_v5 = vsub.f32 %v15265_v2, %v8801_v59  ;;  %v15621_v10 = vpop.eup %11817 }
 0x3de   : > { %v8986_v55 = vmul.f32 1.442695, %v8902_v21  ;;  %9112 = vadd.xlane.f32.xlu0 %v15621_v10  ;;  %v8992_v22 = vmul.f32 1.442695, %v8905_v5 }
 0x3df   : > { %v8765_v39 = vpop.xlane.xlu0 %8764 }
 0x3e0   : > { %v8887_v33 = vsub.f32 %v15275_v32, %v8765_v39  ;;  %11827 = vpow2.f32 %v8986_v55 }
 0x3e1   : > { %11829 = vpow2.f32 %v8960_v40 }
 0x3e2   : > { %v15623_v45 = vpop.eup %11819  ;;  %v8956_v17 = vmul.f32 1.442695, %v8887_v33  ;;  %v8775_v59 = vpop.xlane.xlu1 %8774 }
 0x3e3   : > { %v8797_v30 = vpop.xlane.xlu0 %8796  ;;  %9108 = vadd.xlane.f32.xlu1 %v15623_v45  ;;  %v15628_v29 = vpop.eup %11821  ;;  %v8892_v36 = vsub.f32 %v15338_v8, %v8775_v59 }
 0x3e4   : > { %11831 = vpow2.f32 %v8956_v17  ;;  %v8903_v2 = vsub.f32 %v15309_v26, %v8797_v30  ;;  %v15630_v60 = vpop.eup %11823  ;;  %9086 = vadd.xlane.f32.xlu0 %v15628_v29 }
 0x3e5   : > { %11833 = vpow2.f32 %v8992_v22  ;;  %v8966_v21 = vmul.f32 1.442695, %v8892_v36 }
 0x3e6   : > { %v8988_v32 = vmul.f32 1.442695, %v8903_v2  ;;  %v15634_v37 = vpop.eup %11825  ;;  %v8807_v39 = vpop.xlane.xlu1 %8806 }
 0x3e7   : > { %9118 = vadd.xlane.f32.xlu1 %v15630_v60  ;;  %v8777_v46 = vpop.xlane.xlu0 %8776  ;;  %v8908_v8 = vsub.f32 %v15354_v56, %v8807_v39 }
 0x3e8   : > { %9082 = vadd.xlane.f32.xlu0 %v15634_v37  ;;  %11835 = vpow2.f32 %v8988_v32  ;;  %v8893_v40 = vsub.f32 %v15345_v49, %v8777_v46 }
 0x3e9   : > { %11837 = vpow2.f32 %v8966_v21  ;;  %v8998_v22 = vmul.f32 1.442695, %v8908_v8 }
 0x3ea   : > { %v15638_v26 = vpop.eup %11827  ;;  %v8968_v33 = vmul.f32 1.442695, %v8893_v40  ;;  %v8771_v49 = vpop.xlane.xlu1 %8770 }
 0x3eb   : > { %v15641_v5 = vpop.eup %11829  ;;  %9114 = vadd.xlane.f32.xlu1 %v15638_v26  ;;  %v8809_v17 = vpop.xlane.xlu0 %8808  ;;  %v8890_v32 = vsub.f32 %v15370_v28, %v8771_v49 }
 0x3ec   : > { %9088 = vadd.xlane.f32.xlu0 %v15641_v5  ;;  %11839 = vpow2.f32 %v8968_v33  ;;  %v8909_v30 = vsub.f32 %v15359_v48, %v8809_v17 }
 0x3ed   : > { %11841 = vpow2.f32 %v8998_v22  ;;  %v8962_v56 = vmul.f32 1.442695, %v8890_v32 }
 0x3ee   : > { %v15644_v55 = vpop.eup %11831  ;;  %v9000_v59 = vmul.f32 1.442695, %v8909_v30  ;;  %v8803_v40 = vpop.xlane.xlu1 %8802 }
 0x3ef   : > { %v15649_v2 = vpop.eup %11833  ;;  %9084 = vadd.xlane.f32.xlu1 %v15644_v55  ;;  %v8773_v36 = vpop.xlane.xlu0 %8772  ;;  %v8906_v48 = vsub.f32 %v15380_v63, %v8803_v40 }
 0x3f0   : > { %9120 = vadd.xlane.f32.xlu0 %v15649_v2  ;;  %11843 = vpow2.f32 %v9000_v59  ;;  %v8891_v46 = vsub.f32 %v15375_v23, %v8773_v36 }
 0x3f1   : > { %11845 = vpow2.f32 %v8962_v56  ;;  %v8994_v28 = vmul.f32 1.442695, %v8906_v48 }
 0x3f2   : > { %v15655_v21 = vpop.eup %11835  ;;  %v8964_v39 = vmul.f32 1.442695, %v8891_v46 }
 0x3f3   : > { %v8805_v33 = vpop.xlane.xlu0 %8804  ;;  %v15659_v8 = vpop.eup %11837 }
 0x3f4   : > { %9116 = vadd.xlane.f32.xlu0 %v15655_v21  ;;  %11847 = vpow2.f32 %v8964_v39  ;;  %v8907_v17 = vsub.f32 %v15385_v0, %v8805_v33  ;;  %9094 = vadd.xlane.f32.xlu1 %v15659_v8 }
 0x3f5   : > { %11849 = vpow2.f32 %v8994_v28 }
 0x3f6   : > { %v15663_v22 = vpop.eup %11839  ;;  %v8996_v23 = vmul.f32 1.442695, %v8907_v17 }
 0x3f7   : > { %v15666_v30 = vpop.eup %11841 }
 0x3f8   : > { %9096 = vadd.xlane.f32.xlu0 %v15663_v22  ;;  %11851 = vpow2.f32 %v8996_v23  ;;  %9126 = vadd.xlane.f32.xlu1 %v15666_v30 }
 0x3fa   : > { %v15669_v63 = vpop.eup %11843 }
 0x3fb   : > { %v15672_v49 = vpop.eup %11845 }
 0x3fc   : > { %9128 = vadd.xlane.f32.xlu0 %v15669_v63  ;;  %16889 = vst [vmem:[#allocation8_spill] sm:$0xff] %v15672_v49  ;;  %9090 = vadd.xlane.f32.xlu1 %v15672_v49 }
 0x3fe   : > { %v15675_v0 = vpop.eup %11847 }
 0x3ff   : > { %16890 = vst [vmem:[#allocation92_spill] sm:$0xff] %v15675_v0  ;;  %v15678_v32 = vpop.eup %11849 }
 0x400   : > { %9092 = vadd.xlane.f32.xlu0 %v15675_v0  ;;  %16891 = vst [vmem:[#allocation91_spill] sm:$0xff] %v15678_v32  ;;  %9122 = vadd.xlane.f32.xlu1 %v15678_v32 }
 0x402   : > { %v15681_v59 = vpop.eup %11851  ;;  %v8783_v36 = vpop.xlane.xlu1 %8782 }
 0x403   : > { %16892 = vst [vmem:[#allocation94_spill] sm:$0xff] %v15681_v59  ;;  %v8896_v56 = vsub.f32 %v15390_v11, %v8783_v36 }
 0x404   : > { %9124 = vadd.xlane.f32.xlu0 %v15681_v59  ;;  %v8785_v46 = vpop.xlane.xlu0 %8784 }
 0x405   : > { %v8974_v40 = vmul.f32 1.442695, %v8896_v56  ;;  %v8897_v48 = vsub.f32 %v15395_v53, %v8785_v46 }
 0x406   : > { %v8815_v39 = vpop.xlane.xlu1 %8814 }
 0x407   : > { %11853 = vpow2.f32 %v8974_v40  ;;  %v8976_v33 = vmul.f32 1.442695, %v8897_v48  ;;  %v8912_v28 = vsub.f32 %v15400_v25, %v8815_v39 }
 0x408   : > { %v8817_v17 = vpop.xlane.xlu0 %8816 }
 0x409   : > { %11855 = vpow2.f32 %v8976_v33  ;;  %v9006_v23 = vmul.f32 1.442695, %v8912_v28  ;;  %v8913_v32 = vsub.f32 %v15405_v19, %v8817_v17 }
 0x40a   : > { %v8779_v0 = vpop.xlane.xlu1 %8778 }
 0x40b   : > { %11857 = vpow2.f32 %v9006_v23  ;;  %v9008_v59 = vmul.f32 1.442695, %v8913_v32  ;;  %v8894_v49 = vsub.f32 %v15410_v6, %v8779_v0 }
 0x40c   : > { %v8781_v11 = vpop.xlane.xlu0 %8780 }
 0x40d   : > { %11859 = vpow2.f32 %v9008_v59  ;;  %v8970_v36 = vmul.f32 1.442695, %v8894_v49  ;;  %v8895_v53 = vsub.f32 %v15415_v61, %v8781_v11 }
 0x40e   : > { %v8811_v56 = vpop.xlane.xlu1 %8810 }
 0x40f   : > { %11861 = vpow2.f32 %v8970_v36  ;;  %v8972_v46 = vmul.f32 1.442695, %v8895_v53  ;;  %v8910_v25 = vsub.f32 %v15420_v20, %v8811_v56 }
 0x410   : > { %v8813_v40 = vpop.xlane.xlu0 %8812 }
 0x411   : > { %v15691_v48 = vpop.eup %11853  ;;  %11863 = vpow2.f32 %v8972_v46  ;;  %v9002_v19 = vmul.f32 1.442695, %v8910_v25  ;;  %v8911_v39 = vsub.f32 %v15425_v51, %v8813_v40 }
 0x412   : > { %v8823_v32 = vpop.xlane.xlu1 %8822  ;;  %9102 = vadd.xlane.f32.xlu1 %v15691_v48 }
 0x413   : > { %v15695_v6 = vpop.eup %11855  ;;  %11865 = vpow2.f32 %v9002_v19  ;;  %v9004_v49 = vmul.f32 1.442695, %v8911_v39  ;;  %v8916_v61 = vsub.f32 %v15430_v13, %v8823_v32 }
 0x414   : > { %v8825_v0 = vpop.xlane.xlu0 %8824  ;;  %9104 = vadd.xlane.f32.xlu0 %v15695_v6 }
 0x415   : > { %v15699_v20 = vpop.eup %11857  ;;  %11867 = vpow2.f32 %v9004_v49  ;;  %v9014_v59 = vmul.f32 1.442695, %v8916_v61  ;;  %v8917_v33 = vsub.f32 %v15435_v52, %v8825_v0 }
 0x416   : > { %v8855_v28 = vpop.xlane.xlu1 %8854  ;;  %9134 = vadd.xlane.f32.xlu1 %v15699_v20 }
 0x417   : > { %v15703_v51 = vpop.eup %11859  ;;  %11869 = vpow2.f32 %v9014_v59  ;;  %v9016_v17 = vmul.f32 1.442695, %v8917_v33  ;;  %v8932_v23 = vsub.f32 %v15440_v41, %v8855_v28 }
 0x418   : > { %v8857_v11 = vpop.xlane.xlu0 %8856  ;;  %9136 = vadd.xlane.f32.xlu0 %v15703_v51 }
 0x419   : > { %v15707_v13 = vpop.eup %11861  ;;  %11871 = vpow2.f32 %v9016_v17  ;;  %v9046_v36 = vmul.f32 1.442695, %v8932_v23  ;;  %v8933_v53 = vsub.f32 %v15445_v50, %v8857_v11 }
 0x41a   : > { %v8819_v56 = vpop.xlane.xlu1 %8818  ;;  %9098 = vadd.xlane.f32.xlu1 %v15707_v13 }
 0x41b   : > { %v15711_v52 = vpop.eup %11863  ;;  %11873 = vpow2.f32 %v9046_v36  ;;  %v9048_v46 = vmul.f32 1.442695, %v8933_v53  ;;  %v8914_v25 = vsub.f32 %v15450_v57, %v8819_v56 }
 0x41c   : > { %v8821_v40 = vpop.xlane.xlu0 %8820  ;;  %9100 = vadd.xlane.f32.xlu0 %v15711_v52 }
 0x41d   : > { %v15715_v41 = vpop.eup %11865  ;;  %11875 = vpow2.f32 %v9048_v46  ;;  %v9010_v19 = vmul.f32 1.442695, %v8914_v25  ;;  %v8915_v39 = vsub.f32 %v15455_v35, %v8821_v40 }
 0x41e   : > { %v8851_v32 = vpop.xlane.xlu1 %8850  ;;  %9130 = vadd.xlane.f32.xlu1 %v15715_v41 }
 0x41f   : > { %v15719_v50 = vpop.eup %11867  ;;  %11877 = vpow2.f32 %v9010_v19  ;;  %v9012_v49 = vmul.f32 1.442695, %v8915_v39  ;;  %v8930_v61 = vsub.f32 %v15460_v42, %v8851_v32 }
 0x420   : > { %v8853_v0 = vpop.xlane.xlu0 %8852  ;;  %9132 = vadd.xlane.f32.xlu0 %v15719_v50 }
 0x421   : > { %v15723_v57 = vpop.eup %11869  ;;  %11879 = vpow2.f32 %v9012_v49  ;;  %v9042_v59 = vmul.f32 1.442695, %v8930_v61  ;;  %v8931_v33 = vsub.f32 %v15465_v24, %v8853_v0 }
 0x422   : > { %v8831_v28 = vpop.xlane.xlu1 %8830  ;;  %9142 = vadd.xlane.f32.xlu1 %v15723_v57 }
 0x423   : > { %v15727_v35 = vpop.eup %11871  ;;  %11881 = vpow2.f32 %v9042_v59  ;;  %v9044_v17 = vmul.f32 1.442695, %v8931_v33  ;;  %v8920_v23 = vsub.f32 %v15470_v18, %v8831_v28 }
 0x424   : > { %v8833_v11 = vpop.xlane.xlu0 %8832  ;;  %9144 = vadd.xlane.f32.xlu0 %v15727_v35 }
 0x425   : > { %v15731_v42 = vpop.eup %11873  ;;  %11883 = vpow2.f32 %v9044_v17  ;;  %v9022_v36 = vmul.f32 1.442695, %v8920_v23  ;;  %v8921_v53 = vsub.f32 %v15475_v9, %v8833_v11 }
 0x426   : > { %v8863_v56 = vpop.xlane.xlu1 %8862  ;;  %9174 = vadd.xlane.f32.xlu1 %v15731_v42 }
 0x427   : > { %v15735_v24 = vpop.eup %11875  ;;  %11885 = vpow2.f32 %v9022_v36  ;;  %v9024_v46 = vmul.f32 1.442695, %v8921_v53  ;;  %v8936_v25 = vsub.f32 %v15480_v12, %v8863_v56  ;;  %v16893_v53 = vld [vmem:[#allocation38_spill] sm:$0xff] }
 0x428   : > { %v8865_v40 = vpop.xlane.xlu0 %8864  ;;  %9176 = vadd.xlane.f32.xlu0 %v15735_v24 }
 0x429   : > { %v15739_v18 = vpop.eup %11877  ;;  %11887 = vpow2.f32 %v9024_v46  ;;  %v9054_v19 = vmul.f32 1.442695, %v8936_v25  ;;  %v8937_v39 = vsub.f32 %v15485_v4, %v8865_v40  ;;  %v16894_v40 = vld [vmem:[#allocation37_spill] sm:$0xff] }
 0x42a   : > { %v8827_v32 = vpop.xlane.xlu1 %8826  ;;  %9138 = vadd.xlane.f32.xlu1 %v15739_v18 }
 0x42b   : > { %v15743_v9 = vpop.eup %11879  ;;  %11889 = vpow2.f32 %v9054_v19  ;;  %v9056_v49 = vmul.f32 1.442695, %v8937_v39  ;;  %v8918_v61 = vsub.f32 %v15490_v3, %v8827_v32 }
 0x42c   : > { %v8829_v0 = vpop.xlane.xlu0 %8828  ;;  %9140 = vadd.xlane.f32.xlu0 %v15743_v9 }
 0x42d   : > { %v15747_v12 = vpop.eup %11881  ;;  %11891 = vpow2.f32 %v9056_v49  ;;  %v9018_v59 = vmul.f32 1.442695, %v8918_v61  ;;  %v8919_v33 = vsub.f32 %v15495_v34, %v8829_v0  ;;  %v16895_v49 = vld [vmem:[#allocation40_spill] sm:$0xff] }
 0x42e   : > { %v8859_v28 = vpop.xlane.xlu1 %8858  ;;  %9170 = vadd.xlane.f32.xlu1 %v15747_v12 }
 0x42f   : > { %v15751_v4 = vpop.eup %11883  ;;  %11893 = vpow2.f32 %v9018_v59  ;;  %v9020_v17 = vmul.f32 1.442695, %v8919_v33  ;;  %v8934_v23 = vsub.f32 %v15500_v14, %v8859_v28  ;;  %v16896_v28 = vld [vmem:[#allocation39_spill] sm:$0xff] }
 0x430   : > { %v8861_v11 = vpop.xlane.xlu0 %8860  ;;  %9172 = vadd.xlane.f32.xlu0 %v15751_v4 }
 0x431   : > { %v15755_v3 = vpop.eup %11885  ;;  %11895 = vpow2.f32 %v9020_v17  ;;  %v9050_v36 = vmul.f32 1.442695, %v8934_v23  ;;  %v8935_v56 = vsub.f32 %v16893_v53, %v8861_v11  ;;  %v16898_v53 = vld [vmem:[#allocation18_spill] sm:$0xff] }
 0x432   : > { %v8839_v46 = vpop.xlane.xlu1 %8838  ;;  %9150 = vadd.xlane.f32.xlu1 %v15755_v3 }
 0x433   : > { %v15759_v34 = vpop.eup %11887  ;;  %11897 = vpow2.f32 %v9050_v36  ;;  %v9052_v25 = vmul.f32 1.442695, %v8935_v56  ;;  %v8924_v19 = vsub.f32 %v16894_v40, %v8839_v46 }
 0x434   : > { %v8841_v39 = vpop.xlane.xlu0 %8840  ;;  %9152 = vadd.xlane.f32.xlu0 %v15759_v34 }
 0x435   : > { %v15763_v14 = vpop.eup %11889  ;;  %11899 = vpow2.f32 %v9052_v25  ;;  %v9030_v32 = vmul.f32 1.442695, %v8924_v19  ;;  %v8925_v61 = vsub.f32 %v16895_v49, %v8841_v39 }
 0x436   : > { %v8871_v0 = vpop.xlane.xlu1 %8870  ;;  %9182 = vadd.xlane.f32.xlu1 %v15763_v14 }
 0x437   : > { %v15767_v59 = vpop.eup %11891  ;;  %11901 = vpow2.f32 %v9030_v32  ;;  %v9032_v33 = vmul.f32 1.442695, %v8925_v61  ;;  %v8940_v17 = vsub.f32 %v16896_v28, %v8871_v0  ;;  %v16901_v61 = vld [vmem:[#allocation28_spill] sm:$0xff] }
 0x438   : > { %v8873_v23 = vpop.xlane.xlu0 %8872  ;;  %9184 = vadd.xlane.f32.xlu0 %v15767_v59 }
 0x439   : > { %v15771_v11 = vpop.eup %11893  ;;  %11903 = vpow2.f32 %v9032_v33  ;;  %v9062_v36 = vmul.f32 1.442695, %v8940_v17  ;;  %v8941_v56 = vsub.f32 %v16898_v53, %v8873_v23  ;;  %v16903_v23 = vld [vmem:[#allocation26_spill] sm:$0xff] }
 0x43a   : > { %16897 = vst [vmem:[#allocation93_spill] sm:$0xff] %v15771_v11  ;;  %v8835_v46 = vpop.xlane.xlu1 %8834  ;;  %9146 = vadd.xlane.f32.xlu1 %v15771_v11 }
 0x43b   : > { %v15775_v25 = vpop.eup %11895  ;;  %11905 = vpow2.f32 %v9062_v36  ;;  %v9064_v40 = vmul.f32 1.442695, %v8941_v56  ;;  %v8922_v19 = vsub.f32 %v15530_v1, %v8835_v46 }
 0x43c   : > { %16899 = vst [vmem:[#allocation95_spill] sm:$0xff] %v15775_v25  ;;  %v8837_v39 = vpop.xlane.xlu0 %8836  ;;  %9148 = vadd.xlane.f32.xlu0 %v15775_v25 }
 0x43d   : > { %v15779_v32 = vpop.eup %11897  ;;  %11907 = vpow2.f32 %v9064_v40  ;;  %v9026_v49 = vmul.f32 1.442695, %v8922_v19  ;;  %v8923_v0 = vsub.f32 %v16901_v61, %v8837_v39 }
 0x43e   : > { %16900 = vst [vmem:[#allocation12_spill] sm:$0xff] %v15779_v32  ;;  %v8867_v33 = vpop.xlane.xlu1 %8866  ;;  %9178 = vadd.xlane.f32.xlu1 %v15779_v32  ;;  %v16939_v32 = vld [vmem:[#allocation62_spill] sm:$0xff] }
 0x43f   : > { %v15783_v28 = vpop.eup %11899  ;;  %11909 = vpow2.f32 %v9026_v49  ;;  %v9028_v17 = vmul.f32 1.442695, %v8923_v0  ;;  %v8938_v36 = vsub.f32 %v16903_v23, %v8867_v33 }
 0x440   : > { %16902 = vst [vmem:[#allocation24_spill] sm:$0xff] %v15783_v28  ;;  %v8869_v53 = vpop.xlane.xlu0 %8868  ;;  %9180 = vadd.xlane.f32.xlu0 %v15783_v28  ;;  %v16938_v28 = vld [vmem:[#allocation61_spill] sm:$0xff] }
 0x441   : > { %v15787_v1 = vpop.eup %11901  ;;  %11911 = vpow2.f32 %v9028_v17  ;;  %v9058_v56 = vmul.f32 1.442695, %v8938_v36  ;;  %v8939_v46 = vsub.f32 %v15545_v54, %v8869_v53  ;;  %v7343_v25 = vcombine.high %v16939_v32, %v16938_v28 }
 0x442   : > { %16904 = vst [vmem:[#allocation16_spill] sm:$0xff] %v15787_v1  ;;  %v8847_v40 = vpop.xlane.xlu1 %8846  ;;  %9158 = vadd.xlane.f32.xlu1 %v15787_v1  ;;  %v16937_v1 = vld [vmem:[#allocation60_spill] sm:$0xff] }
 0x443   : > { %v15791_v19 = vpop.eup %11903  ;;  %11913 = vpow2.f32 %v9058_v56  ;;  %v9060_v39 = vmul.f32 1.442695, %v8939_v46  ;;  %v8928_v49 = vsub.f32 %v15551_v27, %v8847_v40 }
 0x444   : > { %16905 = vst [vmem:[#allocation4_spill] sm:$0xff] %v15791_v19  ;;  %v8849_v61 = vpop.xlane.xlu0 %8848  ;;  %9160 = vadd.xlane.f32.xlu0 %v15791_v19 }
 0x445   : > { %v15795_v0 = vpop.eup %11905  ;;  %11915 = vpow2.f32 %v9060_v39  ;;  %v9038_v33 = vmul.f32 1.442695, %v8928_v49  ;;  %v8929_v17 = vsub.f32 %v15556_v31, %v8849_v61 }
 0x446   : > { %16906 = vst [vmem:[#allocation51_spill] sm:$0xff] %v15795_v0  ;;  %v8879_v23 = vpop.xlane.xlu1 %8878  ;;  %9190 = vadd.xlane.f32.xlu1 %v15795_v0 }
 0x447   : > { %v15799_v54 = vpop.eup %11907  ;;  %11917 = vpow2.f32 %v9038_v33  ;;  %v9040_v36 = vmul.f32 1.442695, %v8929_v17 }
 0x448   : > { %16907 = vst [vmem:[#allocation52_spill] sm:$0xff] %v15799_v54  ;;  %v8881_v53 = vpop.xlane.xlu0 %8880  ;;  %9192 = vadd.xlane.f32.xlu0 %v15799_v54 }
 0x449   : > { %v15802_v27 = vpop.eup %11909  ;;  %11919 = vpow2.f32 %v9040_v36  ;;  %v16912_v36 = vld [vmem:[#allocation32_spill] sm:$0xff] }
 0x44a   : > { %16908 = vst [vmem:[#allocation53_spill] sm:$0xff] %v15802_v27  ;;  %v8843_v56 = vpop.xlane.xlu1 %8842  ;;  %9154 = vadd.xlane.f32.xlu1 %v15802_v27  ;;  %v8944_v54 = vsub.f32 %v16912_v36, %v8879_v23 }
 0x44b   : > { %v15805_v46 = vpop.eup %11911  ;;  %v8926_v31 = vsub.f32 %v15572_v15, %v8843_v56  ;;  %v16913_v15 = vld [vmem:[#allocation30_spill] sm:$0xff] }
 0x44c   : > { %16909 = vst [vmem:[#allocation54_spill] sm:$0xff] %v15805_v46  ;;  %v8845_v40 = vpop.xlane.xlu0 %8844  ;;  %9156 = vadd.xlane.f32.xlu0 %v15805_v46  ;;  %v8945_v56 = vsub.f32 %v16913_v15, %v8881_v53  ;;  %v9070_v23 = vmul.f32 1.442695, %v8944_v54 }
 0x44d   : > { %v15809_v39 = vpop.eup %11913  ;;  %v9034_v49 = vmul.f32 1.442695, %v8926_v31  ;;  %v8927_v61 = vsub.f32 %v15577_v38, %v8845_v40  ;;  %v16915_v31 = vld [vmem:[#allocation90_spill] sm:$0xff] }
 0x44e   : > { %16910 = vst [vmem:[#allocation55_spill] sm:$0xff] %v15809_v39  ;;  %9186 = vadd.xlane.f32.xlu1 %v15809_v39  ;;  %v8875_v33 = vpop.xlane.xlu1 %8874 }
 0x44f   : > { %v15813_v17 = vpop.eup %11915  ;;  %11921 = vpow2.f32 %v9034_v49  ;;  %v9036_v27 = vmul.f32 1.442695, %v8927_v61  ;;  %v8942_v0 = vsub.f32 %v15583_v58, %v8875_v33  ;;  %v9072_v58 = vmul.f32 1.442695, %v8945_v56 }
 0x450   : > { %16911 = vst [vmem:[#allocation56_spill] sm:$0xff] %v15813_v17  ;;  %v8877_v19 = vpop.xlane.xlu0 %8876  ;;  %9188 = vadd.xlane.f32.xlu0 %v15813_v17  ;;  %v16936_v17 = vld [vmem:[#allocation59_spill] sm:$0xff] }
 0x451   : > { %v15819_v46 = vpop.eup %11917  ;;  %11923 = vpow2.f32 %v9036_v27  ;;  %v9066_v38 = vmul.f32 1.442695, %v8942_v0  ;;  %v8943_v40 = vsub.f32 %v16915_v31, %v8877_v19 }
 0x452   : > { %16914 = vst [vmem:[#allocation27_spill] sm:$0xff] %v15819_v46  ;;  %9166 = vadd.xlane.f32.xlu1 %v15819_v46 }
 0x453   : > { %v15823_v39 = vpop.eup %11919  ;;  %11925 = vpow2.f32 %v9066_v38  ;;  %v9068_v49 = vmul.f32 1.442695, %v8943_v40 }
 0x454   : > { %16916 = vst [vmem:[#allocation6_spill] sm:$0xff] %v15823_v39  ;;  %9168 = vadd.xlane.f32.xlu0 %v15823_v39  ;;  %v9079_v53 = vpop.xlane.xlu0 %9078 }
 0x455   : > { %11927 = vpow2.f32 %v9068_v49 }
 0x456   : > { %11929 = vrcp.f32 %v9079_v53  ;;  %v16924_v53 = vld [vmem:[#allocation45_spill] sm:$0xff] }
 0x457   : > { %11931 = vpow2.f32 %v9070_v23 }
 0x458   : > { %11933 = vpow2.f32 %v9072_v58  ;;  %v9111_v27 = vpop.xlane.xlu0 %9110 }
 0x459   : > { %v15826_v0 = vpop.eup %11921  ;;  %11935 = vrcp.f32 %v9111_v27 }
 0x45a   : > { %16917 = vst [vmem:[#allocation23_spill] sm:$0xff] %v15826_v0  ;;  %9162 = vadd.xlane.f32.xlu1 %v15826_v0  ;;  %v16930_v0 = vld [vmem:[#allocation5_spill] sm:$0xff] }
 0x45b   : > { %v15829_v19 = vpop.eup %11923 }
 0x45c   : > { %16918 = vst [vmem:[#allocation22_spill] sm:$0xff] %v15829_v19  ;;  %9164 = vadd.xlane.f32.xlu0 %v15829_v19  ;;  %v16929_v19 = vld [vmem:[#allocation67_spill] sm:$0xff] }
 0x45d   : > { %v15832_v61 = vpop.eup %11925 }
 0x45e   : > { %16919 = vst [vmem:[#allocation31_spill] sm:$0xff] %v15832_v61  ;;  %9194 = vadd.xlane.f32.xlu1 %v15832_v61 }
 0x45f   : > { %v9075_v54 = vpop.xlane.xlu0 %9074  ;;  %v15836_v33 = vpop.eup %11927 }
 0x460   : > { %11937 = vrcp.f32 %v9075_v54  ;;  %16920 = vst [vmem:[#allocation25_spill] sm:$0xff] %v15836_v33  ;;  %v11930_v36 = vpop.eup %11929  ;;  %9196 = vadd.xlane.f32.xlu0 %v15836_v33  ;;  %v16928_v33 = vld [vmem:[#allocation49_spill] sm:$0xff] }
 0x461   : > { %v15844_v56 = vpop.eup %11931  ;;  %v9207_v38 = vmul.f32 %v11930_v36, %v15592_v44  ;;  %v16923_v44 = vld [vmem:[#allocation48_spill] sm:$0xff]  ;;  %v16925_v36 = vld [vmem:[#allocation50_spill] sm:$0xff] }
 0x462   : > { %16921 = vst [vmem:[#allocation46_spill] sm:$0xff] %v15844_v56  ;;  %v15847_v40 = vpop.eup %11933  ;;  %9198 = vadd.xlane.f32.xlu1 %v15844_v56  ;;  %v7123_v27 = vcombine.high %v16924_v53, %v16923_v44 }
 0x463   : > { %v9107_v15 = vpop.xlane.xlu0 %9106  ;;  %16922 = vst [vmem:[#allocation29_spill] sm:$0xff] %v15847_v40  ;;  %v11936_v23 = vpop.eup %11935  ;;  %9332 = vst [vmem:[%s15841_s10 + $0x10] sm:$0xff] %v9207_v38 }
 0x464   : > { %11939 = vrcp.f32 %v9107_v15  ;;  %9200 = vadd.xlane.f32.xlu0 %v15847_v40  ;;  %v15853_v49 = vmul.f32 %v11936_v23, %v15598_v16  ;;  %v16926_v15 = vld [vmem:[#allocation47_spill] sm:$0xff]  ;;  %v7207_v40 = vcombine.high %v16930_v0, %v16929_v19  ;;  %v16932_v19 = vld [vmem:[#allocation9_spill] sm:$0xff] }
 0x465   : > { %v7139_v56 = vcombine.high %v16926_v15, %v16925_v36 }
 0x466   : > { %v9077_v31 = vpop.xlane.xlu1 %9076  ;;  %9348 = vst [vmem:[%s15841_s10 + $0x90] sm:$0xff] %v15853_v49 }
 0x467   : > { %11941 = vrcp.f32 %v9077_v31  ;;  %v9081_v58 = vpop.xlane.xlu0 %9080  ;;  %v16927_v31 = vld [vmem:[#allocation3_spill] sm:$0xff] }
 0x468   : > { %11943 = vrcp.f32 %v9081_v58  ;;  %v7191_v61 = vcombine.high %v16928_v33, %v16927_v31  ;;  %v16931_v58 = vld [vmem:[#allocation20_spill] sm:$0xff]  ;;  %v16935_v31 = vld [vmem:[#allocation58_spill] sm:$0xff] }
 0x469   : > { %v15868_v46 = vrot.slane %v7123_v27, %v16931_v58  ;;  %v15871_v53 = vrot.slane %v7139_v56, %v16931_v58  ;;  %v7221_v0 = vrot.slane %v7207_v40, %v16931_v58  ;;  %v16934_v27 = vld [vmem:[#allocation57_spill] sm:$0xff]  ;;  %v7327_v56 = vcombine.high %v16937_v1, %v16936_v17 }
 0x46a   : > { %v11938_v54 = vpop.eup %11937  ;;  %v15874_v33 = vrot.slane %v7191_v61, %v16931_v58 }
 0x46b   : > { %v9113_v39 = vpop.xlane.xlu0 %9112  ;;  %v9203_v16 = vmul.f32 %v11938_v54, %v15603_v43  ;;  %v16933_v43 = vld [vmem:[#allocation66_spill] sm:$0xff] }
 0x46c   : > { %11945 = vrcp.f32 %v9113_v39  ;;  %v7259_v54 = vcombine.high %v16933_v43, %v16932_v19  ;;  %v7357_v43 = vrot.slane %v7343_v25, %v16931_v58  ;;  %v16940_v25 = vld [vmem:[#allocation83_spill] sm:$0xff] }
 0x46d   : > { %9330 = vst [vmem:[%s15841_s10] sm:$0xff] %v9203_v16 }
 0x46e   : > { %v11940_v44 = vpop.eup %11939  ;;  %v7273_v1 = vrot.slane %v7259_v54, %v16931_v58 }
 0x46f   : > { %v9235_v15 = vmul.f32 %v11940_v44, %v15607_v7  ;;  %v7156_v7 = vcombine.low %v15868_v46, %v15871_v53  ;;  %v7224_v44 = vcombine.low %v15874_v33, %v7221_v0 }
 0x470   : > { %v9109_v23 = vpop.xlane.xlu1 %9108 }
 0x471   : > { %11947 = vrcp.f32 %v9109_v23  ;;  %v11942_v39 = vpop.eup %11941  ;;  %v9087_v36 = vpop.xlane.xlu0 %9086  ;;  %v7275_v23 = vcombine.high %v16935_v31, %v16934_v27  ;;  %9346 = vst [vmem:[%s15841_s10 + $0x80] sm:$0xff] %v9235_v15 }
 0x472   : > { %v9205_v11 = vmul.f32 %v11942_v39, %v15609_v47  ;;  %11949 = vrcp.f32 %v9087_v36  ;;  %v11944_v40 = vpop.eup %11943  ;;  %v7341_v47 = vrot.slane %v7327_v56, %v16931_v58  ;;  %v9443_v36 = vpack.c.bf16 %v7224_v44, %v7156_v7 }
 0x473   : > { %v9209_v17 = vmul.f32 %v11944_v40, %v15615_v62  ;;  %v7289_v28 = vrot.slane %v7275_v23, %v16931_v58  ;;  %v7157_v58 = vcombine.high %v15868_v46, %v15871_v53 }
 0x474   : > { %v9119_v61 = vpop.xlane.xlu1 %9118  ;;  %9331 = vst [vmem:[%s15841_s10 + $0x8] sm:$0xff] %v9205_v11  ;;  %v9394_v19 = vpack.c.bf16 %v9205_v11, %v9203_v16  ;;  %v7360_v23 = vcombine.low %v7341_v47, %v7357_v43 }
 0x475   : > { %11951 = vrcp.f32 %v9119_v61  ;;  %v9083_v32 = vpop.xlane.xlu0 %9082  ;;  %9333 = vst [vmem:[%s15841_s10 + $0x18] sm:$0xff] %v9209_v17  ;;  %v9395_v11 = vpack.c.bf16 %v9209_v17, %v9207_v38  ;;  %v7292_v31 = vcombine.low %v7273_v1, %v7289_v28  ;;  %v7293_v53 = vcombine.high %v7273_v1, %v7289_v28 }
 0x476   : > { %11519 = vmatprep.mubr.bf16.mxu1 %v9394_v19  ;;  %11953 = vrcp.f32 %v9083_v32  ;;  %v11946_v16 = vpop.eup %11945 }
 0x477   : > { %v9241_v54 = vmul.f32 %v11946_v16, %v15621_v10  ;;  %11520 = vmatmul.mubr.bf16.vlgmr.msra.gmra.mrb[56].mxu1 %v9395_v11  ;;  %v7225_v10 = vcombine.high %v15874_v33, %v7221_v0  ;;  %v9444_v44 = vpack.c.bf16 %v7360_v23, %v7292_v31  ;;  %v7361_v33 = vcombine.high %v7341_v47, %v7357_v43  ;;  %v16942_v11 = vld [vmem:[#allocation85_spill] sm:$0xff] }
 0x478   : > { %v9115_v39 = vpop.xlane.xlu1 %9114  ;;  %11568 = vmatpush3.bf16.msra.mxu1 %v16940_v25  ;;  %v16945_v25 = vld [vmem:[#allocation88_spill] sm:$0xff] }
 0x479   : > { %11955 = vrcp.f32 %v9115_v39  ;;  %v9089_v62 = vpop.xlane.xlu0 %9088  ;;  %9349 = vst [vmem:[%s15841_s10 + $0x98] sm:$0xff] %v9241_v54  ;;  %11569 = vmatprep.subr.bf16.mxu1 %v9443_v36  ;;  %v9403_v38 = vpack.c.bf16 %v9241_v54, %v15853_v49  ;;  %v9451_v46 = vpack.c.bf16 %v7225_v10, %v7157_v58  ;;  %v9452_v16 = vpack.c.bf16 %v7361_v33, %v7293_v53 }
 0x47a   : > { %11957 = vrcp.f32 %v9089_v62 }
 0x47b   : > { %v11948_v27 = vpop.eup %11947 }
 0x47c   : > { %v9237_v56 = vmul.f32 %v11948_v27, %v15623_v45  ;;  %v11950_v61 = vpop.eup %11949  ;;  %v9085_v40 = vpop.xlane.xlu1 %9084  ;;  %11570 = vmatpush3.bf16.msra.mxu1 %v9443_v36  ;;  %v16943_v36 = vld [vmem:[#allocation87_spill] sm:$0xff] }
 0x47d   : > { %11959 = vrcp.f32 %v9085_v40  ;;  %v9121_v45 = vpop.xlane.xlu0 %9120  ;;  %v9215_v17 = vmul.f32 %v11950_v61, %v15628_v29  ;;  %11571 = vmatprep.subr.bf16.mxu1 %v9444_v44  ;;  %v16947_v40 = vld [vmem:[#allocation34_spill] sm:$0xff] }
 0x47e   : > { %9347 = vst [vmem:[%s15841_s10 + $0x88] sm:$0xff] %v9237_v56  ;;  %v9402_v19 = vpack.c.bf16 %v9237_v56, %v9235_v15  ;;  %11961 = vrcp.f32 %v9121_v45  ;;  %v16941_v15 = vld [vmem:[#allocation82_spill] sm:$0xff] }
 0x47f   : > { %v11952_v7 = vpop.eup %11951  ;;  %9336 = vst [vmem:[%s15841_s10 + $0x30] sm:$0xff] %v9215_v17 }
 0x480   : > { %11551 = vmatprep.mubr.bf16.mxu0 %v9402_v19  ;;  %v15909_v49 = vmul.f32 %v11952_v7, %v15630_v60  ;;  %v11954_v0 = vpop.eup %11953  ;;  %11572 = vmatpush3.bf16.msra.mxu1 %v9444_v44 }
 0x481   : > { %11552 = vmatmul.mubr.bf16.vlgmr.msra.gmra.mrb[56].mxu0 %v9403_v38  ;;  %v9117_v29 = vpop.xlane.xlu0 %9116  ;;  %v9211_v32 = vmul.f32 %v11954_v0, %v15634_v37  ;;  %11573 = vmatprep.subr.bf16.mxu1 %v16942_v11  ;;  %v9095_v28 = vpop.xlane.xlu1 %9094  ;;  %v16949_v0 = vld [vmem:[#allocation36_spill] sm:$0xff] }
 0x482   : > { %11600 = vmatpush3.bf16.msra.mxu0 %v16941_v15  ;;  %9352 = vst [vmem:[%s15841_s10 + $0xb0] sm:$0xff] %v15909_v49  ;;  %11963 = vrcp.f32 %v9117_v29  ;;  %v16950_v15 = vld [vmem:[#allocation33_spill] sm:$0xff] }
 0x483   : > { %11601 = vmatprep.subr.bf16.mxu0 %v9451_v46  ;;  %v11956_v60 = vpop.eup %11955  ;;  %9334 = vst [vmem:[%s15841_s10 + $0x20] sm:$0xff] %v9211_v32  ;;  %11965 = vrcp.f32 %v9095_v28 }
 0x484   : > { %v11958_v1 = vpop.eup %11957  ;;  %v9243_v47 = vmul.f32 %v11956_v60, %v15638_v26  ;;  %11574 = vmatpush3.bf16.msra.mxu1 %v16942_v11  ;;  %v16944_v26 = vld [vmem:[#allocation84_spill] sm:$0xff] }
 0x485   : > { %v9217_v43 = vmul.f32 %v11958_v1, %v15641_v5  ;;  %v9097_v37 = vpop.xlane.xlu0 %9096  ;;  %11575 = vmatprep.subr.bf16.mxu1 %v16943_v36  ;;  %v9127_v54 = vpop.xlane.xlu1 %9126 }
 0x486   : > { %11602 = vmatpush3.bf16.msra.mxu0 %v9451_v46  ;;  %9350 = vst [vmem:[%s15841_s10 + $0xa0] sm:$0xff] %v9243_v47  ;;  %11967 = vrcp.f32 %v9097_v37 }
 0x487   : > { %11603 = vmatprep.subr.bf16.mxu0 %v9452_v16  ;;  %v11960_v39 = vpop.eup %11959  ;;  %9337 = vst [vmem:[%s15841_s10 + $0x38] sm:$0xff] %v9217_v43  ;;  %11969 = vrcp.f32 %v9127_v54  ;;  %v9397_v5 = vpack.c.bf16 %v9217_v43, %v9215_v17 }
 0x488   : > { %v11962_v27 = vpop.eup %11961  ;;  %v9213_v62 = vmul.f32 %v11960_v39, %v15644_v55  ;;  %11576 = vmatpush3.bf16.msra.mxu1 %v16943_v36  ;;  %v16946_v55 = vld [vmem:[#allocation86_spill] sm:$0xff] }
 0x489   : > { %v9249_v31 = vmul.f32 %v11962_v27, %v15649_v2  ;;  %v9129_v56 = vpop.xlane.xlu0 %9128  ;;  %11577 = vmatprep.subr.bf16.mxu1 %v16945_v25  ;;  %v9091_v58 = vpop.xlane.xlu1 %9090  ;;  %v16955_v36 = vld [vmem:[#allocation94_spill] sm:$0xff] }
 0x48a   : > { %11604 = vmatpush3.bf16.msra.mxu0 %v9452_v16  ;;  %9335 = vst [vmem:[%s15841_s10 + $0x28] sm:$0xff] %v9213_v62  ;;  %v9396_v23 = vpack.c.bf16 %v9213_v62, %v9211_v32  ;;  %11971 = vrcp.f32 %v9129_v56  ;;  %v16951_v32 = vld [vmem:[#allocation8_spill] sm:$0xff]  ;;  %v16952_v16 = vld [vmem:[#allocation35_spill] sm:$0xff] }
 0x48b   : > { %11605 = vmatprep.subr.bf16.mxu0 %v16944_v26  ;;  %9353 = vst [vmem:[%s15841_s10 + $0xb8] sm:$0xff] %v9249_v31  ;;  %11973 = vrcp.f32 %v9091_v58  ;;  %v9405_v45 = vpack.c.bf16 %v9249_v31, %v15909_v49 }
 0x48c   : > { %v11964_v38 = vpop.eup %11963  ;;  %11523 = vmatprep.mubr.bf16.mxu1 %v9396_v23  ;;  %11578 = vmatpush3.bf16.msra.mxu1 %v16945_v25 }
 0x48d   : > { %11524 = vmatmul.mubr.bf16.gmra.mrb[60].mxu1 %v9397_v5  ;;  %v9245_v2 = vmul.f32 %v11964_v38, %v15655_v21  ;;  %v9093_v10 = vpop.xlane.xlu0 %9092  ;;  %v11966_v61 = vpop.eup %11965  ;;  %11579 = vmatprep.subr.bf16.mxu1 %v16947_v40  ;;  %v16948_v21 = vld [vmem:[#allocation15_spill] sm:$0xff] }
 0x48e   : > { %11606 = vmatpush3.bf16.msra.mxu0 %v16944_v26  ;;  %11975 = vrcp.f32 %v9093_v10  ;;  %v9123_v7 = vpop.xlane.xlu1 %9122  ;;  %v9223_v44 = vmul.f32 %v11966_v61, %v15659_v8 }
 0x48f   : > { %11607 = vmatprep.subr.bf16.mxu0 %v16946_v55  ;;  %9351 = vst [vmem:[%s15841_s10 + $0xa8] sm:$0xff] %v9245_v2  ;;  %v9404_v19 = vpack.c.bf16 %v9245_v2, %v9243_v47  ;;  %11977 = vrcp.f32 %v9123_v7  ;;  %v16954_v47 = vld [vmem:[#allocation91_spill] sm:$0xff] }
 0x490   : > { %v11968_v17 = vpop.eup %11967  ;;  %11580 = vmatpush3.bf16.msra.mxu1 %v16947_v40  ;;  %9340 = vst [vmem:[%s15841_s10 + $0x50] sm:$0xff] %v9223_v44 }
 0x491   : > { %11555 = vmatprep.mubr.bf16.mxu0 %v9404_v19  ;;  %v9125_v46 = vpop.xlane.xlu0 %9124  ;;  %v9225_v53 = vmul.f32 %v11968_v17, %v15663_v22  ;;  %v11970_v33 = vpop.eup %11969  ;;  %11581 = vmatprep.subr.bf16.mxu1 %v16949_v0 }
 0x492   : > { %11608 = vmatpush3.bf16.msra.mxu0 %v16946_v55  ;;  %11979 = vrcp.f32 %v9125_v46  ;;  %v9255_v8 = vmul.f32 %v11970_v33, %v15666_v30  ;;  %v16953_v30 = vld [vmem:[#allocation92_spill] sm:$0xff] }
 0x493   : > { %11609 = vmatprep.subr.bf16.mxu0 %v16948_v21  ;;  %11556 = vmatmul.mubr.bf16.gmra.mrb[60].mxu0 %v9405_v45  ;;  %9341 = vst [vmem:[%s15841_s10 + $0x58] sm:$0xff] %v9225_v53  ;;  %v9399_v39 = vpack.c.bf16 %v9225_v53, %v9223_v44 }
 0x494   : > { %v11972_v49 = vpop.eup %11971  ;;  %11582 = vmatpush3.bf16.msra.mxu1 %v16949_v0  ;;  %9356 = vst [vmem:[%s15841_s10 + $0xd0] sm:$0xff] %v9255_v8 }
 0x495   : > { %v9257_v22 = vmul.f32 %v11972_v49, %v15669_v63  ;;  %v11974_v29 = vpop.eup %11973 }
 0x496   : > { %11610 = vmatpush3.bf16.msra.mxu0 %v16948_v21  ;;  %v9219_v60 = vmul.f32 %v11974_v29, %v16951_v32 }
 0x497   : > { %11611 = vmatprep.subr.bf16.mxu0 %v16950_v15  ;;  %9357 = vst [vmem:[%s15841_s10 + $0xd8] sm:$0xff] %v9257_v22  ;;  %v9407_v62 = vpack.c.bf16 %v9257_v22, %v9255_v8 }
 0x498   : > { %v11976_v11 = vpop.eup %11975  ;;  %9338 = vst [vmem:[%s15841_s10 + $0x40] sm:$0xff] %v9219_v60 }
 0x499   : > { %v9221_v1 = vmul.f32 %v11976_v11, %v16953_v30  ;;  %v11978_v28 = vpop.eup %11977 }
 0x49a   : > { %11612 = vmatpush3.bf16.msra.mxu0 %v16950_v15  ;;  %v9251_v43 = vmul.f32 %v11978_v28, %v16954_v47 }
 0x49b   : > { %11613 = vmatprep.subr.bf16.mxu0 %v16952_v16  ;;  %9339 = vst [vmem:[%s15841_s10 + $0x48] sm:$0xff] %v9221_v1  ;;  %v9398_v63 = vpack.c.bf16 %v9221_v1, %v9219_v60 }
 0x49c   : > { %v11980_v37 = vpop.eup %11979  ;;  %9354 = vst [vmem:[%s15841_s10 + $0xc0] sm:$0xff] %v9251_v43 }
 0x49d   : > { %11527 = vmatprep.mubr.bf16.mxu1 %v9398_v63  ;;  %v9253_v27 = vmul.f32 %v11980_v37, %v16955_v36 }
 0x49e   : > { %11614 = vmatpush3.bf16.msra.mxu0 %v16952_v16  ;;  %11528 = vmatmul.mubr.bf16.gmra.mrb[64].mxu1 %v9399_v39 }
 0x49f   : > { %9355 = vst [vmem:[%s15841_s10 + $0xc8] sm:$0xff] %v9253_v27  ;;  %v9406_v54 = vpack.c.bf16 %v9253_v27, %v9251_v43  ;;  %v9103_v26 = vpop.xlane.xlu1 %9102 }
 0x4a0   : > { %11981 = vrcp.f32 %v9103_v26 }
 0x4a1   : > { %11559 = vmatprep.mubr.bf16.mxu0 %v9406_v54  ;;  %v9105_v5 = vpop.xlane.xlu0 %9104 }
 0x4a2   : > { %11560 = vmatmul.mubr.bf16.gmra.mrb[64].mxu0 %v9407_v62  ;;  %11983 = vrcp.f32 %v9105_v5 }
 0x4a3   : > { %v9135_v31 = vpop.xlane.xlu1 %9134 }
 0x4a4   : > { %11985 = vrcp.f32 %v9135_v31 }
 0x4a5   : > { %v9137_v23 = vpop.xlane.xlu0 %9136 }
 0x4a6   : > { %11987 = vrcp.f32 %v9137_v23 }
 0x4a7   : > { %v9099_v56 = vpop.xlane.xlu1 %9098 }
 0x4a8   : > { %11989 = vrcp.f32 %v9099_v56 }
 0x4a9   : > { %v9101_v25 = vpop.xlane.xlu0 %9100 }
 0x4aa   : > { %v11982_v38 = vpop.eup %11981  ;;  %11991 = vrcp.f32 %v9101_v25 }
 0x4ab   : > { %v9131_v58 = vpop.xlane.xlu1 %9130  ;;  %v9231_v55 = vmul.f32 %v11982_v38, %v15691_v48 }
 0x4ac   : > { %v11984_v2 = vpop.eup %11983  ;;  %11993 = vrcp.f32 %v9131_v58 }
 0x4ad   : > { %v9133_v10 = vpop.xlane.xlu0 %9132  ;;  %v9233_v61 = vmul.f32 %v11984_v2, %v15695_v6  ;;  %9344 = vst [vmem:[%s15841_s10 + $0x70] sm:$0xff] %v9231_v55 }
 0x4ae   : > { %v11986_v40 = vpop.eup %11985  ;;  %11995 = vrcp.f32 %v9133_v10 }
 0x4af   : > { %v9143_v19 = vpop.xlane.xlu1 %9142  ;;  %9345 = vst [vmem:[%s15841_s10 + $0x78] sm:$0xff] %v9233_v61  ;;  %v9263_v7 = vmul.f32 %v11986_v40, %v15699_v20 }
 0x4b0   : > { %v11988_v45 = vpop.eup %11987  ;;  %11997 = vrcp.f32 %v9143_v19 }
 0x4b1   : > { %v9145_v44 = vpop.xlane.xlu0 %9144  ;;  %v9265_v48 = vmul.f32 %v11988_v45, %v15703_v51  ;;  %9360 = vst [vmem:[%s15841_s10 + $0xf0] sm:$0xff] %v9263_v7 }
 0x4b2   : > { %v11990_v17 = vpop.eup %11989  ;;  %11999 = vrcp.f32 %v9145_v44  ;;  %v16956_v44 = vld [vmem:[#allocation93_spill] sm:$0xff] }
 0x4b3   : > { %v9175_v21 = vpop.xlane.xlu1 %9174  ;;  %v9227_v6 = vmul.f32 %v11990_v17, %v15707_v13  ;;  %9361 = vst [vmem:[%s15841_s10 + $0xf8] sm:$0xff] %v9265_v48  ;;  %v9401_v13 = vpack.c.bf16 %v9233_v61, %v9231_v55  ;;  %v9409_v11 = vpack.c.bf16 %v9265_v48, %v9263_v7 }
 0x4b4   : > { %v11992_v46 = vpop.eup %11991  ;;  %12001 = vrcp.f32 %v9175_v21  ;;  %v16957_v21 = vld [vmem:[#allocation95_spill] sm:$0xff] }
 0x4b5   : > { %v9177_v53 = vpop.xlane.xlu0 %9176  ;;  %v9229_v33 = vmul.f32 %v11992_v46, %v15711_v52  ;;  %9342 = vst [vmem:[%s15841_s10 + $0x60] sm:$0xff] %v9227_v6 }
 0x4b6   : > { %v11994_v20 = vpop.eup %11993  ;;  %12003 = vrcp.f32 %v9177_v53 }
 0x4b7   : > { %v9139_v0 = vpop.xlane.xlu1 %9138  ;;  %9343 = vst [vmem:[%s15841_s10 + $0x68] sm:$0xff] %v9229_v33  ;;  %v9400_v51 = vpack.c.bf16 %v9229_v33, %v9227_v6  ;;  %v9259_v8 = vmul.f32 %v11994_v20, %v15715_v41  ;;  %v16958_v33 = vld [vmem:[#allocation12_spill] sm:$0xff] }
 0x4b8   : > { %v11996_v49 = vpop.eup %11995  ;;  %12005 = vrcp.f32 %v9139_v0 }
 0x4b9   : > { %11531 = vmatprep.mubr.bf16.mxu1 %v9400_v51  ;;  %v9141_v15 = vpop.xlane.xlu0 %9140  ;;  %v9261_v22 = vmul.f32 %v11996_v49, %v15719_v50  ;;  %9358 = vst [vmem:[%s15841_s10 + $0xe0] sm:$0xff] %v9259_v8  ;;  %v16959_v49 = vld [vmem:[#allocation24_spill] sm:$0xff] }
 0x4ba   : > { %v11998_v29 = vpop.eup %11997  ;;  %12007 = vrcp.f32 %v9141_v15  ;;  %11532 = vmatmul.mubr.bf16.gmra.mrb[68].mxu1 %v9401_v13 }
 0x4bb   : > { %v9271_v52 = vmul.f32 %v11998_v29, %v15723_v57  ;;  %v9171_v32 = vpop.xlane.xlu1 %9170  ;;  %9359 = vst [vmem:[%s15841_s10 + $0xe8] sm:$0xff] %v9261_v22  ;;  %v9408_v60 = vpack.c.bf16 %v9261_v22, %v9259_v8 }
 0x4bc   : > { %v12000_v41 = vpop.eup %11999  ;;  %12009 = vrcp.f32 %v9171_v32 }
 0x4bd   : > { %9364 = vst [vmem:[%s15841_s10 + $0x110] sm:$0xff] %v9271_v52  ;;  %v9273_v16 = vmul.f32 %v12000_v41, %v15727_v35  ;;  %11563 = vmatprep.mubr.bf16.mxu0 %v9408_v60  ;;  %v9173_v50 = vpop.xlane.xlu0 %9172 }
 0x4be   : > { %v12002_v30 = vpop.eup %12001  ;;  %12011 = vrcp.f32 %v9173_v50  ;;  %11564 = vmatmul.mubr.bf16.gmra.mrb[68].mxu0 %v9409_v11 }
 0x4bf   : > { %v9303_v1 = vmul.f32 %v12002_v30, %v15731_v42  ;;  %9365 = vst [vmem:[%s15841_s10 + $0x118] sm:$0xff] %v9273_v16  ;;  %v9151_v57 = vpop.xlane.xlu1 %9150  ;;  %v9411_v5 = vpack.c.bf16 %v9273_v16, %v9271_v52  ;;  %v16960_v52 = vld [vmem:[#allocation16_spill] sm:$0xff] }
 0x4c0   : > { %v12004_v28 = vpop.eup %12003  ;;  %12013 = vrcp.f32 %v9151_v57  ;;  %v16961_v16 = vld [vmem:[#allocation4_spill] sm:$0xff]  ;;  %v16962_v57 = vld [vmem:[#allocation51_spill] sm:$0xff] }
 0x4c1   : > { %9380 = vst [vmem:[%s15841_s10 + $0x190] sm:$0xff] %v9303_v1  ;;  %v9305_v63 = vmul.f32 %v12004_v28, %v15735_v24  ;;  %v9153_v47 = vpop.xlane.xlu0 %9152 }
 0x4c2   : > { %v12006_v43 = vpop.eup %12005  ;;  %12015 = vrcp.f32 %v9153_v47 }
 0x4c3   : > { %9381 = vst [vmem:[%s15841_s10 + $0x198] sm:$0xff] %v9305_v63  ;;  %v9183_v35 = vpop.xlane.xlu1 %9182  ;;  %v9267_v37 = vmul.f32 %v12006_v43, %v15739_v18  ;;  %v9419_v58 = vpack.c.bf16 %v9305_v63, %v9303_v1  ;;  %v16963_v43 = vld [vmem:[#allocation52_spill] sm:$0xff] }
 0x4c4   : > { %v12008_v39 = vpop.eup %12007  ;;  %12017 = vrcp.f32 %v9183_v35 }
 0x4c5   : > { %v9185_v42 = vpop.xlane.xlu0 %9184  ;;  %v9269_v36 = vmul.f32 %v12008_v39, %v15743_v9  ;;  %9362 = vst [vmem:[%s15841_s10 + $0x100] sm:$0xff] %v9267_v37  ;;  %v16964_v39 = vld [vmem:[#allocation53_spill] sm:$0xff] }
 0x4c6   : > { %v12010_v27 = vpop.eup %12009  ;;  %12019 = vrcp.f32 %v9185_v42 }
 0x4c7   : > { %v9147_v54 = vpop.xlane.xlu1 %9146  ;;  %9363 = vst [vmem:[%s15841_s10 + $0x108] sm:$0xff] %v9269_v36  ;;  %v9410_v24 = vpack.c.bf16 %v9269_v36, %v9267_v37  ;;  %v9299_v62 = vmul.f32 %v12010_v27, %v15747_v12  ;;  %v11801_v12 = vld [vmem:[%s16305_s5] sm:$0xff]   ;;  %v16965_v27 = vld [vmem:[#allocation54_spill] sm:$0xff] }
 0x4c8   : > { %v12012_v26 = vpop.eup %12011  ;;  %12021 = vrcp.f32 %v9147_v54  ;;  %11631 = vmatprep.subr.bf16.mxu1 %v11801_v12 }
 0x4c9   : > { %11583 = vmatprep.mubr.bf16.mxu1 %v9410_v24  ;;  %v9149_v18 = vpop.xlane.xlu0 %9148  ;;  %v9301_v31 = vmul.f32 %v12012_v26, %v15751_v4  ;;  %9378 = vst [vmem:[%s15841_s10 + $0x180] sm:$0xff] %v9299_v62 }
 0x4ca   : > { %v12014_v23 = vpop.eup %12013  ;;  %12023 = vrcp.f32 %v9149_v18  ;;  %11584 = vmatmul.mubr.bf16.vlgmr.msra.gmra.mrb[72].mxu1 %v9411_v5  ;;  %v16966_v5 = vld [vmem:[#allocation55_spill] sm:$0xff] }
 0x4cb   : > { %v9179_v9 = vpop.xlane.xlu1 %9178  ;;  %9379 = vst [vmem:[%s15841_s10 + $0x188] sm:$0xff] %v9301_v31  ;;  %v9418_v56 = vpack.c.bf16 %v9301_v31, %v9299_v62  ;;  %v9279_v25 = vmul.f32 %v12014_v23, %v15755_v3  ;;  %11632 = vmatpush3.bf16.msra.mxu1 %v11801_v12 }
 0x4cc   : > { %v12016_v38 = vpop.eup %12015  ;;  %12025 = vrcp.f32 %v9179_v9 }
 0x4cd   : > { %11615 = vmatprep.mubr.bf16.mxu0 %v9418_v56  ;;  %v9181_v4 = vpop.xlane.xlu0 %9180  ;;  %v9281_v55 = vmul.f32 %v12016_v38, %v15759_v34  ;;  %9368 = vst [vmem:[%s15841_s10 + $0x130] sm:$0xff] %v9279_v25  ;;  %v11802_v34 = vld [vmem:[%s16305_s5 + $0x8] sm:$0xff]  }
 0x4ce   : > { %v12018_v2 = vpop.eup %12017  ;;  %12027 = vrcp.f32 %v9181_v4  ;;  %11616 = vmatmul.mubr.bf16.vlgmr.msra.gmra.mrb[72].mxu0 %v9419_v58  ;;  %11649 = vmatprep.subr.bf16.mxu0 %v11802_v34  ;;  %v16967_v56 = vld [vmem:[#allocation56_spill] sm:$0xff]  ;;  %v16968_v4 = vld [vmem:[#allocation27_spill] sm:$0xff] }
 0x4cf   : > { %v9159_v3 = vpop.xlane.xlu1 %9158  ;;  %9369 = vst [vmem:[%s15841_s10 + $0x138] sm:$0xff] %v9281_v55  ;;  %v9311_v10 = vmul.f32 %v12018_v2, %v15763_v14  ;;  %11650 = vmatpush3.bf16.msra.mxu0 %v11802_v34  ;;  %v9413_v51 = vpack.c.bf16 %v9281_v55, %v9279_v25 }
 0x4d0   : > { %v12020_v61 = vpop.eup %12019  ;;  %12029 = vrcp.f32 %v9159_v3 }
 0x4d1   : > { %v9161_v40 = vpop.xlane.xlu0 %9160  ;;  %v9313_v19 = vmul.f32 %v12020_v61, %v15767_v59  ;;  %9384 = vst [vmem:[%s15841_s10 + $0x1b0] sm:$0xff] %v9311_v10  ;;  %v16969_v61 = vld [vmem:[#allocation6_spill] sm:$0xff] }
 0x4d2   : > { %v12022_v7 = vpop.eup %12021  ;;  %12031 = vrcp.f32 %v9161_v40 }
 0x4d3   : > { %v9191_v45 = vpop.xlane.xlu1 %9190  ;;  %v9275_v48 = vmul.f32 %v12022_v7, %v16956_v44  ;;  %9385 = vst [vmem:[%s15841_s10 + $0x1b8] sm:$0xff] %v9313_v19  ;;  %v9421_v41 = vpack.c.bf16 %v9313_v19, %v9311_v10 }
 0x4d4   : > { %v12024_v14 = vpop.eup %12023  ;;  %12033 = vrcp.f32 %v9191_v45  ;;  %v16970_v45 = vld [vmem:[#allocation23_spill] sm:$0xff] }
 0x4d5   : > { %v9193_v17 = vpop.xlane.xlu0 %9192  ;;  %v9277_v59 = vmul.f32 %v12024_v14, %v16957_v21  ;;  %9366 = vst [vmem:[%s15841_s10 + $0x120] sm:$0xff] %v9275_v48  ;;  %v16971_v14 = vld [vmem:[#allocation22_spill] sm:$0xff] }
 0x4d6   : > { %v12026_v6 = vpop.eup %12025  ;;  %12035 = vrcp.f32 %v9193_v17 }
 0x4d7   : > { %v9155_v46 = vpop.xlane.xlu1 %9154  ;;  %9367 = vst [vmem:[%s15841_s10 + $0x128] sm:$0xff] %v9277_v59  ;;  %v9412_v53 = vpack.c.bf16 %v9277_v59, %v9275_v48  ;;  %v9307_v20 = vmul.f32 %v12026_v6, %v16958_v33  ;;  %v16972_v6 = vld [vmem:[#allocation31_spill] sm:$0xff] }
 0x4d8   : > { %v12028_v0 = vpop.eup %12027  ;;  %12037 = vrcp.f32 %v9155_v46 }
 0x4d9   : > { %11587 = vmatprep.mubr.bf16.mxu1 %v9412_v53  ;;  %v9157_v8 = vpop.xlane.xlu0 %9156  ;;  %v9309_v13 = vmul.f32 %v12028_v0, %v16959_v49  ;;  %9382 = vst [vmem:[%s15841_s10 + $0x1a0] sm:$0xff] %v9307_v20  ;;  %v16974_v49 = vld [vmem:[#allocation46_spill] sm:$0xff] }
 0x4da   : > { %v12030_v15 = vpop.eup %12029  ;;  %12039 = vrcp.f32 %v9157_v8  ;;  %11588 = vmatmul.mubr.bf16.gmra.mrb[76].mxu1 %v9413_v51 }
 0x4db   : > { %v9187_v22 = vpop.xlane.xlu1 %9186  ;;  %9383 = vst [vmem:[%s15841_s10 + $0x1a8] sm:$0xff] %v9309_v13  ;;  %v9420_v29 = vpack.c.bf16 %v9309_v13, %v9307_v20  ;;  %v9287_v32 = vmul.f32 %v12030_v15, %v16960_v52  ;;  %v16973_v20 = vld [vmem:[#allocation25_spill] sm:$0xff] }
 0x4dc   : > { %v12032_v60 = vpop.eup %12031  ;;  %12041 = vrcp.f32 %v9187_v22  ;;  %v16975_v22 = vld [vmem:[#allocation29_spill] sm:$0xff] }
 0x4dd   : > { %11619 = vmatprep.mubr.bf16.mxu0 %v9420_v29  ;;  %v9189_v11 = vpop.xlane.xlu0 %9188  ;;  %v9289_v50 = vmul.f32 %v12032_v60, %v16961_v16  ;;  %9372 = vst [vmem:[%s15841_s10 + $0x150] sm:$0xff] %v9287_v32  ;;  %v11804_v60 = vld [vmem:[%s16305_s5 + $0x18] sm:$0xff]  }
 0x4de   : > { %v12034_v30 = vpop.eup %12033  ;;  %12043 = vrcp.f32 %v9189_v11  ;;  %11620 = vmatmul.mubr.bf16.gmra.mrb[76].mxu0 %v9421_v41  ;;  %11685 = vmatprep.subr.bf16.mxu0 %v11804_v60 }
 0x4df   : > { %v9167_v1 = vpop.xlane.xlu1 %9166  ;;  %9373 = vst [vmem:[%s15841_s10 + $0x158] sm:$0xff] %v9289_v50  ;;  %v9319_v28 = vmul.f32 %v12034_v30, %v16962_v57  ;;  %v9415_v23 = vpack.c.bf16 %v9289_v50, %v9287_v32  ;;  %v11803_v32 = vld [vmem:[%s16305_s5 + $0x10] sm:$0xff]  }
 0x4e0   : > { %v12036_v63 = vpop.eup %12035  ;;  %12045 = vrcp.f32 %v9167_v1  ;;  %11667 = vmatprep.subr.bf16.mxu1 %v11803_v32 }
 0x4e1   : > { %v9169_v47 = vpop.xlane.xlu0 %9168  ;;  %v9321_v35 = vmul.f32 %v12036_v63, %v16963_v43  ;;  %9388 = vst [vmem:[%s15841_s10 + $0x1d0] sm:$0xff] %v9319_v28 }
 0x4e2   : > { %v12038_v37 = vpop.eup %12037  ;;  %12047 = vrcp.f32 %v9169_v47 }
 0x4e3   : > { %v9283_v42 = vmul.f32 %v12038_v37, %v16964_v39  ;;  %9389 = vst [vmem:[%s15841_s10 + $0x1d8] sm:$0xff] %v9321_v35  ;;  %v9423_v3 = vpack.c.bf16 %v9321_v35, %v9319_v28 }
 0x4e4   : > { %v12040_v36 = vpop.eup %12039 }
 0x4e5   : > { %v9285_v54 = vmul.f32 %v12040_v36, %v16965_v27  ;;  %9370 = vst [vmem:[%s15841_s10 + $0x140] sm:$0xff] %v9283_v42 }
 0x4e6   : > { %v12042_v24 = vpop.eup %12041 }
 0x4e7   : > { %v9163_v62 = vpop.xlane.xlu1 %9162  ;;  %9371 = vst [vmem:[%s15841_s10 + $0x148] sm:$0xff] %v9285_v54  ;;  %v9414_v26 = vpack.c.bf16 %v9285_v54, %v9283_v42  ;;  %v9315_v18 = vmul.f32 %v12042_v24, %v16966_v5 }
 0x4e8   : > { %v12044_v31 = vpop.eup %12043  ;;  %12049 = vrcp.f32 %v9163_v62 }
 0x4e9   : > { %v9165_v9 = vpop.xlane.xlu0 %9164  ;;  %11591 = vmatprep.mubr.bf16.mxu1 %v9414_v26  ;;  %v9317_v25 = vmul.f32 %v12044_v31, %v16967_v56  ;;  %9386 = vst [vmem:[%s15841_s10 + $0x1c0] sm:$0xff] %v9315_v18 }
 0x4ea   : > { %v12046_v12 = vpop.eup %12045  ;;  %12051 = vrcp.f32 %v9165_v9  ;;  %11592 = vmatmul.mubr.bf16.gmra.mrb[80].mxu1 %v9415_v23 }
 0x4eb   : > { %v9195_v38 = vpop.xlane.xlu1 %9194  ;;  %9387 = vst [vmem:[%s15841_s10 + $0x1c8] sm:$0xff] %v9317_v25  ;;  %v9422_v58 = vpack.c.bf16 %v9317_v25, %v9315_v18  ;;  %v9295_v55 = vmul.f32 %v12046_v12, %v16968_v4 }
 0x4ec   : > { %v12048_v2 = vpop.eup %12047  ;;  %12053 = vrcp.f32 %v9195_v38 }
 0x4ed   : > { %v9197_v10 = vpop.xlane.xlu0 %9196  ;;  %11623 = vmatprep.mubr.bf16.mxu0 %v9422_v58  ;;  %v9297_v40 = vmul.f32 %v12048_v2, %v16969_v61  ;;  %9376 = vst [vmem:[%s15841_s10 + $0x170] sm:$0xff] %v9295_v55 }
 0x4ee   : > { %12055 = vrcp.f32 %v9197_v10  ;;  %11624 = vmatmul.mubr.bf16.gmra.mrb[80].mxu0 %v9423_v3 }
 0x4ef   : > { %v9199_v19 = vpop.xlane.xlu1 %9198  ;;  %9377 = vst [vmem:[%s15841_s10 + $0x178] sm:$0xff] %v9297_v40  ;;  %v9417_v33 = vpack.c.bf16 %v9297_v40, %v9295_v55 }
 0x4f0   : > { %12057 = vrcp.f32 %v9199_v19 }
 0x4f1   : > { %v9201_v34 = vpop.xlane.xlu0 %9200 }
 0x4f2   : > { %v12050_v7 = vpop.eup %12049  ;;  %12059 = vrcp.f32 %v9201_v34 }
 0x4f3   : > { %v9291_v44 = vmul.f32 %v12050_v7, %v16970_v45 }
 0x4f4   : > { %v12052_v48 = vpop.eup %12051 }
 0x4f5   : > { %v9293_v17 = vmul.f32 %v12052_v48, %v16971_v14  ;;  %9374 = vst [vmem:[%s15841_s10 + $0x160] sm:$0xff] %v9291_v44 }
 0x4f6   : > { %v12054_v21 = vpop.eup %12053 }
 0x4f7   : > { %9375 = vst [vmem:[%s15841_s10 + $0x168] sm:$0xff] %v9293_v17  ;;  %v9416_v59 = vpack.c.bf16 %v9293_v17, %v9291_v44  ;;  %v9323_v46 = vmul.f32 %v12054_v21, %v16972_v6 }
 0x4f8   : > { %v12056_v53 = vpop.eup %12055 }
 0x4f9   : > { %11595 = vmatprep.mubr.bf16.mxu1 %v9416_v59  ;;  %v9325_v0 = vmul.f32 %v12056_v53, %v16973_v20  ;;  %9390 = vst [vmem:[%s15841_s10 + $0x1e0] sm:$0xff] %v9323_v46 }
 0x4fa   : > { %v12058_v51 = vpop.eup %12057  ;;  %11596 = vmatmul.mubr.bf16.gmra.mrb[84].mxu1 %v9417_v33 }
 0x4fb   : > { %9391 = vst [vmem:[%s15841_s10 + $0x1e8] sm:$0xff] %v9325_v0  ;;  %v9424_v8 = vpack.c.bf16 %v9325_v0, %v9323_v46  ;;  %v9327_v13 = vmul.f32 %v12058_v51, %v16974_v49 }
 0x4fc   : > { %v12060_v15 = vpop.eup %12059 }
 0x4fd   : > { %11627 = vmatprep.mubr.bf16.mxu0 %v9424_v8  ;;  %v9329_v29 = vmul.f32 %v12060_v15, %v16975_v22  ;;  %9392 = vst [vmem:[%s15841_s10 + $0x1f0] sm:$0xff] %v9327_v13 }
 0x4ff   : > { %9393 = vst [vmem:[%s15841_s10 + $0x1f8] sm:$0xff] %v9329_v29  ;;  %v9425_v52 = vpack.c.bf16 %v9329_v29, %v9327_v13 }
 0x501   : > { %11628 = vmatmul.mubr.bf16.gmra.mrb[84].mxu0 %v9425_v52 }
 0x54a   : > { %v11521_v41 = vpop.f32.mrb[56].mxu1 }
 0x54b   : > { %v9492_v11 = vpop.f32.mrb[57].mxu1 }
 0x54c   : > { %v11522_v16 = vpop.f32.mrb[58].mxu1 }
 0x54d   : > { %v9847_v50 = vpack.c.bf16 %v11522_v16, %v11521_v41  ;;  %v9495_v30 = vpop.f32.mrb[59].mxu1 }
 0x54e   : > { %v9846_v1 = vpack.c.bf16 %v9495_v30, %v9492_v11 }
 0x550   : > { %11633 = vmatprep.mubr.msk.bf16.mxu1 %vm8106_vm1, %v9846_v1 }
 0x551   : > { %11634 = vmatmul.mubr.msk.bf16.vlgmr.msra.gmra.mrb[88].mxu1 %vm8106_vm1, %v9847_v50 }
 0x552   : > { %11668 = vmatpush3.bf16.msra.mxu1 %v11803_v32 }
 0x554   : > { %v11553_v57 = vpop.f32.mrb[56].mxu0 }
 0x555   : > { %v9589_v28 = vpop.f32.mrb[57].mxu0 }
 0x556   : > { %v11554_v63 = vpop.f32.mrb[58].mxu0 }
 0x557   : > { %v9855_v47 = vpack.c.bf16 %v11554_v63, %v11553_v57  ;;  %v9592_v43 = vpop.f32.mrb[59].mxu0 }
 0x558   : > { %v9854_v35 = vpack.c.bf16 %v9592_v43, %v9589_v28 }
 0x55a   : > { %11651 = vmatprep.mubr.msk.bf16.mxu0 %vm8106_vm1, %v9854_v35 }
 0x55b   : > { %11652 = vmatmul.mubr.msk.bf16.vlgmr.msra.gmra.mrb[88].mxu0 %vm8106_vm1, %v9855_v47 }
 0x55c   : > { %11686 = vmatpush3.bf16.msra.mxu0 %v11804_v60 }
 0x560   : > { %v11525_v37 = vpop.f32.mrb[60].mxu1 }
 0x561   : > { %v9508_v39 = vpop.f32.mrb[61].mxu1 }
 0x562   : > { %v11526_v42 = vpop.f32.mrb[62].mxu1 }
 0x563   : > { %v9849_v36 = vpack.c.bf16 %v11526_v42, %v11525_v37  ;;  %v9511_v27 = vpop.f32.mrb[63].mxu1 }
 0x564   : > { %v9848_v54 = vpack.c.bf16 %v9511_v27, %v9508_v39 }
 0x566   : > { %v11557_v24 = vpop.f32.mrb[60].mxu0  ;;  %11637 = vmatprep.mubr.msk.bf16.mxu1 %vm8106_vm1, %v9848_v54 }
 0x567   : > { %v9605_v62 = vpop.f32.mrb[61].mxu0  ;;  %11638 = vmatmul.mubr.msk.bf16.gmra.mrb[92].mxu1 %vm8106_vm1, %v9849_v36 }
 0x568   : > { %v11558_v26 = vpop.f32.mrb[62].mxu0 }
 0x569   : > { %v9857_v5 = vpack.c.bf16 %v11558_v26, %v11557_v24  ;;  %v9608_v18 = vpop.f32.mrb[63].mxu0 }
 0x56a   : > { %v9856_v31 = vpack.c.bf16 %v9608_v18, %v9605_v62 }
 0x56c   : > { %11655 = vmatprep.mubr.msk.bf16.mxu0 %vm8106_vm1, %v9856_v31 }
 0x56d   : > { %11656 = vmatmul.mubr.msk.bf16.gmra.mrb[92].mxu0 %vm8106_vm1, %v9857_v5 }
 0x571   : > { %v11529_v23 = vpop.f32.mrb[64].mxu1 }
 0x572   : > { %v9524_v9 = vpop.f32.mrb[65].mxu1 }
 0x573   : > { %v11530_v56 = vpop.f32.mrb[66].mxu1 }
 0x574   : > { %v9851_v25 = vpack.c.bf16 %v11530_v56, %v11529_v23  ;;  %v9527_v12 = vpop.f32.mrb[67].mxu1 }
 0x575   : > { %v9850_v38 = vpack.c.bf16 %v9527_v12, %v9524_v9  ;;  %v11561_v58 = vpop.f32.mrb[64].mxu0 }
 0x576   : > { %v9621_v4 = vpop.f32.mrb[65].mxu0 }
 0x577   : > { %v11562_v55 = vpop.f32.mrb[66].mxu0  ;;  %11641 = vmatprep.mubr.msk.bf16.mxu1 %vm8106_vm1, %v9850_v38 }
 0x578   : > { %v9859_v2 = vpack.c.bf16 %v11562_v55, %v11561_v58  ;;  %v9624_v3 = vpop.f32.mrb[67].mxu0  ;;  %11642 = vmatmul.mubr.msk.bf16.gmra.mrb[96].mxu1 %vm8106_vm1, %v9851_v25  ;;  %v12090_v55 = vmov 0.0  }
 0x579   : > { %v9858_v10 = vpack.c.bf16 %v9624_v3, %v9621_v4  ;;  %10400 = vst.msk [vmem:[#allocation2 + $0x10] sm:$0xff] %vm590_vm0, %v12090_v55  ;;  %10398 = vst.msk [vmem:[#allocation2] sm:$0xff] %vm590_vm0, %v12090_v55 }
 0x57a   : > { %10399 = vst.msk [vmem:[#allocation2 + $0x8] sm:$0xff] %vm590_vm0, %v12090_v55  ;;  %10401 = vst.msk [vmem:[#allocation2 + $0x18] sm:$0xff] %vm590_vm0, %v12090_v55 }
 0x57b   : > { %11659 = vmatprep.mubr.msk.bf16.mxu0 %vm8106_vm1, %v9858_v10  ;;  %10402 = vst.msk [vmem:[#allocation2 + $0x20] sm:$0xff] %vm590_vm0, %v12090_v55  ;;  %10403 = vst.msk [vmem:[#allocation2 + $0x28] sm:$0xff] %vm590_vm0, %v12090_v55 }
 0x57c   : > { %11660 = vmatmul.mubr.msk.bf16.gmra.mrb[96].mxu0 %vm8106_vm1, %v9859_v2  ;;  %10404 = vst.msk [vmem:[#allocation2 + $0x30] sm:$0xff] %vm590_vm0, %v12090_v55  ;;  %10405 = vst.msk [vmem:[#allocation2 + $0x38] sm:$0xff] %vm590_vm0, %v12090_v55 }
 0x57d   : > { %10406 = vst.msk [vmem:[#allocation2 + $0x40] sm:$0xff] %vm590_vm0, %v12090_v55  ;;  %10407 = vst.msk [vmem:[#allocation2 + $0x48] sm:$0xff] %vm590_vm0, %v12090_v55 }
 0x57e   : > { %10408 = vst.msk [vmem:[#allocation2 + $0x50] sm:$0xff] %vm590_vm0, %v12090_v55  ;;  %10409 = vst.msk [vmem:[#allocation2 + $0x58] sm:$0xff] %vm590_vm0, %v12090_v55 }
 0x57f   : > { %10410 = vst.msk [vmem:[#allocation2 + $0x60] sm:$0xff] %vm590_vm0, %v12090_v55  ;;  %10411 = vst.msk [vmem:[#allocation2 + $0x68] sm:$0xff] %vm590_vm0, %v12090_v55 }
 0x580   : > { %10412 = vst.msk [vmem:[#allocation2 + $0x70] sm:$0xff] %vm590_vm0, %v12090_v55  ;;  %10413 = vst.msk [vmem:[#allocation2 + $0x78] sm:$0xff] %vm590_vm0, %v12090_v55 }
 0x58d   : > { %v11533_v61 = vpop.f32.mrb[68].mxu1 }
 0x58e   : > { %v9540_v40 = vpop.f32.mrb[69].mxu1 }
 0x58f   : > { %v11534_v19 = vpop.f32.mrb[70].mxu1 }
 0x590   : > { %v9853_v34 = vpack.c.bf16 %v11534_v19, %v11533_v61  ;;  %v9543_v7 = vpop.f32.mrb[71].mxu1 }
 0x591   : > { %v9852_v45 = vpack.c.bf16 %v9543_v7, %v9540_v40  ;;  %v11565_v44 = vpop.f32.mrb[68].mxu0 }
 0x592   : > { %v9637_v48 = vpop.f32.mrb[69].mxu0 }
 0x593   : > { %v11566_v14 = vpop.f32.mrb[70].mxu0  ;;  %11645 = vmatprep.mubr.msk.bf16.mxu1 %vm8106_vm1, %v9852_v45 }
 0x594   : > { %v9861_v17 = vpack.c.bf16 %v11566_v14, %v11565_v44  ;;  %v9640_v21 = vpop.f32.mrb[71].mxu0  ;;  %11646 = vmatmul.mubr.msk.bf16.gmra.mrb[100].mxu1 %vm8106_vm1, %v9853_v34 }
 0x595   : > { %v9860_v59 = vpack.c.bf16 %v9640_v21, %v9637_v48 }
 0x597   : > { %11663 = vmatprep.mubr.msk.bf16.mxu0 %vm8106_vm1, %v9860_v59 }
 0x598   : > { %11664 = vmatmul.mubr.msk.bf16.gmra.mrb[100].mxu0 %vm8106_vm1, %v9861_v17 }
 0x59d   : > { %v11585_v6 = vpop.f32.mrb[72].mxu1 }
 0x59e   : > { %v9686_v46 = vpop.f32.mrb[73].mxu1 }
 0x59f   : > { %v11586_v53 = vpop.f32.mrb[74].mxu1 }
 0x5a0   : > { %v9863_v33 = vpack.c.bf16 %v11586_v53, %v11585_v6  ;;  %v9689_v20 = vpop.f32.mrb[75].mxu1 }
 0x5a1   : > { %v9862_v0 = vpack.c.bf16 %v9689_v20, %v9686_v46  ;;  %v11617_v51 = vpop.f32.mrb[72].mxu0 }
 0x5a2   : > { %v9783_v8 = vpop.f32.mrb[73].mxu0 }
 0x5a3   : > { %v11618_v49 = vpop.f32.mrb[74].mxu0  ;;  %11669 = vmatprep.mubr.msk.bf16.mxu1 %vm8106_vm1, %v9862_v0 }
 0x5a4   : > { %v9871_v13 = vpack.c.bf16 %v11618_v49, %v11617_v51  ;;  %v9786_v15 = vpop.f32.mrb[75].mxu0  ;;  %11670 = vmatmul.mubr.msk.bf16.vlgmr.msra.gmra.mrb[104].mxu1 %vm8106_vm1, %v9863_v33 }
 0x5a5   : > { %v9870_v22 = vpack.c.bf16 %v9786_v15, %v9783_v8 }
 0x5a7   : > { %11687 = vmatprep.mubr.msk.bf16.mxu0 %vm8106_vm1, %v9870_v22 }
 0x5a8   : > { %11688 = vmatmul.mubr.msk.bf16.vlgmr.msra.gmra.mrb[104].mxu0 %vm8106_vm1, %v9871_v13 }
 0x5ad   : > { %v11589_v29 = vpop.f32.mrb[76].mxu1 }
 0x5ae   : > { %v9702_v52 = vpop.f32.mrb[77].mxu1 }
 0x5af   : > { %v11590_v32 = vpop.f32.mrb[78].mxu1 }
 0x5b0   : > { %v9865_v60 = vpack.c.bf16 %v11590_v32, %v11589_v29  ;;  %v9705_v41 = vpop.f32.mrb[79].mxu1 }
 0x5b1   : > { %v9864_v11 = vpack.c.bf16 %v9705_v41, %v9702_v52  ;;  %v11621_v16 = vpop.f32.mrb[76].mxu0 }
 0x5b2   : > { %v9799_v50 = vpop.f32.mrb[77].mxu0 }
 0x5b3   : > { %v11622_v30 = vpop.f32.mrb[78].mxu0  ;;  %11673 = vmatprep.mubr.msk.bf16.mxu1 %vm8106_vm1, %v9864_v11 }
 0x5b4   : > { %v9873_v1 = vpack.c.bf16 %v11622_v30, %v11621_v16  ;;  %v9802_v57 = vpop.f32.mrb[79].mxu0  ;;  %11674 = vmatmul.mubr.msk.bf16.gmra.mrb[108].mxu1 %vm8106_vm1, %v9865_v60 }
 0x5b5   : > { %v9872_v28 = vpack.c.bf16 %v9802_v57, %v9799_v50 }
 0x5b7   : > { %11691 = vmatprep.mubr.msk.bf16.mxu0 %vm8106_vm1, %v9872_v28 }
 0x5b8   : > { %11692 = vmatmul.mubr.msk.bf16.gmra.mrb[108].mxu0 %vm8106_vm1, %v9873_v1 }
 0x5bd   : > { %v11593_v63 = vpop.f32.mrb[80].mxu1 }
 0x5be   : > { %v9718_v47 = vpop.f32.mrb[81].mxu1 }
 0x5bf   : > { %v11594_v43 = vpop.f32.mrb[82].mxu1 }
 0x5c0   : > { %v9867_v35 = vpack.c.bf16 %v11594_v43, %v11593_v63  ;;  %v9721_v37 = vpop.f32.mrb[83].mxu1 }
 0x5c1   : > { %v9866_v39 = vpack.c.bf16 %v9721_v37, %v9718_v47  ;;  %v11625_v42 = vpop.f32.mrb[80].mxu0 }
 0x5c2   : > { %v9815_v36 = vpop.f32.mrb[81].mxu0 }
 0x5c3   : > { %v11626_v27 = vpop.f32.mrb[82].mxu0  ;;  %11677 = vmatprep.mubr.msk.bf16.mxu1 %vm8106_vm1, %v9866_v39 }
 0x5c4   : > { %v9875_v54 = vpack.c.bf16 %v11626_v27, %v11625_v42  ;;  %v9818_v24 = vpop.f32.mrb[83].mxu0  ;;  %11678 = vmatmul.mubr.msk.bf16.gmra.mrb[112].mxu1 %vm8106_vm1, %v9867_v35 }
 0x5c5   : > { %v9874_v62 = vpack.c.bf16 %v9818_v24, %v9815_v36 }
 0x5c7   : > { %11695 = vmatprep.mubr.msk.bf16.mxu0 %vm8106_vm1, %v9874_v62 }
 0x5c8   : > { %11696 = vmatmul.mubr.msk.bf16.gmra.mrb[112].mxu0 %vm8106_vm1, %v9875_v54 }
 0x5cd   : > { %v11597_v26 = vpop.f32.mrb[84].mxu1 }
 0x5ce   : > { %v9734_v5 = vpop.f32.mrb[85].mxu1 }
 0x5cf   : > { %v11598_v18 = vpop.f32.mrb[86].mxu1 }
 0x5d0   : > { %v9869_v31 = vpack.c.bf16 %v11598_v18, %v11597_v26  ;;  %v9737_v23 = vpop.f32.mrb[87].mxu1 }
 0x5d1   : > { %v9868_v9 = vpack.c.bf16 %v9737_v23, %v9734_v5 }
 0x5d3   : > { %11681 = vmatprep.mubr.msk.bf16.mxu1 %vm8106_vm1, %v9868_v9 }
 0x5d4   : > { %v11629_v56 = vpop.f32.mrb[84].mxu0  ;;  %11682 = vmatmul.mubr.msk.bf16.gmra.mrb[116].mxu1 %vm8106_vm1, %v9869_v31 }
 0x5d5   : > { %v9831_v25 = vpop.f32.mrb[85].mxu0 }
 0x5d6   : > { %v11630_v12 = vpop.f32.mrb[86].mxu0 }
 0x5d7   : > { %v9877_v38 = vpack.c.bf16 %v11630_v12, %v11629_v56  ;;  %v9834_v58 = vpop.f32.mrb[87].mxu0 }
 0x5d8   : > { %v9876_v4 = vpack.c.bf16 %v9834_v58, %v9831_v25 }
 0x5da   : > { %11699 = vmatprep.mubr.msk.bf16.mxu0 %vm8106_vm1, %v9876_v4 }
 0x5db   : > { %11700 = vmatmul.mubr.msk.bf16.gmra.mrb[116].mxu0 %vm8106_vm1, %v9877_v38 }
 0x624   : > { %v11635_v2 = vpop.f32.mrb[88].mxu1 }
 0x625   : > { %v9950_v3 = vpop.f32.mrb[89].mxu1  ;;  %v10444_v19 = vsel %vm590_vm0, %v11635_v2, 0.0 }
 0x626   : > { %v11636_v10 = vpop.f32.mrb[90].mxu1  ;;  %v10430_v45 = vsel %vm590_vm0, %v9950_v3, 0.0 }
 0x627   : > { %v9953_v61 = vpop.f32.mrb[91].mxu1  ;;  %v10451_v17 = vsel %vm590_vm0, %v11636_v10, 0.0 }
 0x628   : > { %v10437_v46 = vsel %vm590_vm0, %v9953_v61, 0.0 }
 0x62e   : > { %v11653_v40 = vpop.f32.mrb[88].mxu0 }
 0x62f   : > { %v10445_v34 = vsel %vm590_vm0, %v11653_v40, 0.0  ;;  %v10077_v7 = vpop.f32.mrb[89].mxu0 }
 0x630   : > { %v16107_v44 = vadd.f32 %v10445_v34, %v10444_v19  ;;  %v10431_v48 = vsel %vm590_vm0, %v10077_v7, 0.0  ;;  %v11654_v14 = vpop.f32.mrb[90].mxu0 }
 0x631   : > { %v16111_v21 = vadd.f32 %v10431_v48, %v10430_v45  ;;  %v10452_v59 = vsel %vm590_vm0, %v11654_v14, 0.0  ;;  %v10080_v6 = vpop.f32.mrb[91].mxu0 }
 0x632   : > { %v16115_v53 = vadd.f32 %v10452_v59, %v10451_v17  ;;  %v10438_v33 = vsel %vm590_vm0, %v10080_v6, 0.0 }
 0x633   : > { %v16118_v20 = vadd.f32 %v10438_v33, %v10437_v46 }
 0x63a   : > { %v11639_v0 = vpop.f32.mrb[92].mxu1 }
 0x63b   : > { %v9966_v51 = vpop.f32.mrb[93].mxu1  ;;  %v10472_v15 = vsel %vm590_vm0, %v11639_v0, 0.0 }
 0x63c   : > { %v11640_v8 = vpop.f32.mrb[94].mxu1  ;;  %v10458_v52 = vsel %vm590_vm0, %v9966_v51, 0.0 }
 0x63d   : > { %v9969_v49 = vpop.f32.mrb[95].mxu1  ;;  %v10479_v11 = vsel %vm590_vm0, %v11640_v8, 0.0 }
 0x63e   : > { %v10465_v1 = vsel %vm590_vm0, %v9969_v49, 0.0 }
 0x640   : > { %v11657_v13 = vpop.f32.mrb[92].mxu0 }
 0x641   : > { %v10473_v22 = vsel %vm590_vm0, %v11657_v13, 0.0  ;;  %v10093_v29 = vpop.f32.mrb[93].mxu0 }
 0x642   : > { %v16123_v32 = vadd.f32 %v10473_v22, %v10472_v15  ;;  %v10459_v60 = vsel %vm590_vm0, %v10093_v29, 0.0  ;;  %v11658_v41 = vpop.f32.mrb[94].mxu0 }
 0x643   : > { %v16127_v16 = vadd.f32 %v10459_v60, %v10458_v52  ;;  %v10480_v50 = vsel %vm590_vm0, %v11658_v41, 0.0  ;;  %v10096_v30 = vpop.f32.mrb[95].mxu0 }
 0x644   : > { %v16131_v57 = vadd.f32 %v10480_v50, %v10479_v11  ;;  %v10466_v28 = vsel %vm590_vm0, %v10096_v30, 0.0  ;;  %v10416_v30 = vld [vmem:[#allocation2 + $0x10] sm:$0xff] }
 0x645   : > { %v16134_v63 = vadd.f32 %v10466_v28, %v10465_v1 }
 0x64b   : > { %v11643_v47 = vpop.f32.mrb[96].mxu1 }
 0x64c   : > { %v9982_v43 = vpop.f32.mrb[97].mxu1  ;;  %v10500_v42 = vsel %vm590_vm0, %v11643_v47, 0.0  ;;  %v10414_v47 = vld [vmem:[#allocation2] sm:$0xff] }
 0x64d   : > { %v11644_v35 = vpop.f32.mrb[98].mxu1  ;;  %v10486_v54 = vsel %vm590_vm0, %v9982_v43, 0.0 }
 0x64e   : > { %v9985_v37 = vpop.f32.mrb[99].mxu1  ;;  %v10507_v5 = vsel %vm590_vm0, %v11644_v35, 0.0 }
 0x64f   : > { %v11661_v39 = vpop.f32.mrb[96].mxu0  ;;  %v10493_v9 = vsel %vm590_vm0, %v9985_v37, 0.0  ;;  %v10417_v37 = vld [vmem:[#allocation2 + $0x18] sm:$0xff] }
 0x650   : > { %v10501_v36 = vsel %vm590_vm0, %v11661_v39, 0.0  ;;  %v10109_v27 = vpop.f32.mrb[97].mxu0 }
 0x651   : > { %v16139_v24 = vadd.f32 %v10501_v36, %v10500_v42  ;;  %v10487_v62 = vsel %vm590_vm0, %v10109_v27, 0.0  ;;  %v11662_v26 = vpop.f32.mrb[98].mxu0  ;;  %v10415_v27 = vld [vmem:[#allocation2 + $0x8] sm:$0xff] }
 0x652   : > { %v16143_v18 = vadd.f32 %v10487_v62, %v10486_v54  ;;  %v10508_v31 = vsel %vm590_vm0, %v11662_v26, 0.0  ;;  %v10112_v23 = vpop.f32.mrb[99].mxu0 }
 0x653   : > { %v16147_v56 = vadd.f32 %v10508_v31, %v10507_v5  ;;  %v10494_v25 = vsel %vm590_vm0, %v10112_v23, 0.0  ;;  %v16188_v31 = vld [vmem:[%s16306_s6] ss:$0 sm:$0xff] }
 0x654   : > { %v16150_v12 = vadd.f32 %v10494_v25, %v10493_v9 }
 0x667   : > { %v11647_v38 = vpop.f32.mrb[100].mxu1 }
 0x668   : > { %v9998_v58 = vpop.f32.mrb[101].mxu1  ;;  %v10528_v3 = vsel %vm590_vm0, %v11647_v38, 0.0 }
 0x669   : > { %v11648_v4 = vpop.f32.mrb[102].mxu1  ;;  %v10514_v40 = vsel %vm590_vm0, %v9998_v58, 0.0 }
 0x66a   : > { %v10001_v55 = vpop.f32.mrb[103].mxu1  ;;  %v10535_v45 = vsel %vm590_vm0, %v11648_v4, 0.0 }
 0x66b   : > { %v11665_v2 = vpop.f32.mrb[100].mxu0  ;;  %v10521_v59 = vsel %vm590_vm0, %v10001_v55, 0.0 }
 0x66c   : > { %v10529_v10 = vsel %vm590_vm0, %v11665_v2, 0.0  ;;  %v10125_v61 = vpop.f32.mrb[101].mxu0 }
 0x66d   : > { %v16155_v19 = vadd.f32 %v10529_v10, %v10528_v3  ;;  %v10515_v34 = vsel %vm590_vm0, %v10125_v61, 0.0  ;;  %v11666_v7 = vpop.f32.mrb[102].mxu0 }
 0x66e   : > { %v16159_v48 = vadd.f32 %v10515_v34, %v10514_v40  ;;  %v10536_v14 = vsel %vm590_vm0, %v11666_v7, 0.0  ;;  %v10128_v17 = vpop.f32.mrb[103].mxu0 }
 0x66f   : > { %v16163_v6 = vadd.f32 %v10536_v14, %v10535_v45  ;;  %v10522_v46 = vsel %vm590_vm0, %v10128_v17, 0.0 }
 0x670   : > { %v16166_v33 = vadd.f32 %v10522_v46, %v10521_v59 }
 0x677   : > { %v11671_v0 = vpop.f32.mrb[104].mxu1 }
 0x678   : > { %v10447_v51 = vsel %vm590_vm0, %v11671_v0, 0.0  ;;  %v10204_v8 = vpop.f32.mrb[105].mxu1  ;;  %v10420_v0 = vld [vmem:[#allocation2 + $0x30] sm:$0xff] }
 0x679   : > { %v10448_v49 = vadd.f32 %v10447_v51, %v16107_v44  ;;  %v10433_v13 = vsel %vm590_vm0, %v10204_v8, 0.0  ;;  %v11672_v15 = vpop.f32.mrb[106].mxu1 }
 0x67a   : > { %v10434_v22 = vadd.f32 %v10433_v13, %v16111_v21  ;;  %v10454_v29 = vsel %vm590_vm0, %v11672_v15, 0.0  ;;  %v10207_v52 = vpop.f32.mrb[107].mxu1  ;;  %v10418_v13 = vld [vmem:[#allocation2 + $0x20] sm:$0xff] }
 0x67b   : > { %v10455_v60 = vadd.f32 %v10454_v29, %v16115_v53  ;;  %v10440_v41 = vsel %vm590_vm0, %v10207_v52, 0.0  ;;  %v11689_v11 = vpop.f32.mrb[104].mxu0  ;;  %v10421_v29 = vld [vmem:[#allocation2 + $0x38] sm:$0xff] }
 0x67c   : > { %v10441_v50 = vadd.f32 %v10440_v41, %v16118_v20  ;;  %v10449_v1 = vsel %vm590_vm0, %v11689_v11, 0.0  ;;  %v10331_v28 = vpop.f32.mrb[105].mxu0  ;;  %v10419_v11 = vld [vmem:[#allocation2 + $0x28] sm:$0xff] }
 0x67d   : > { %v10450_v44 = vadd.f32 %v10449_v1, %v10448_v49  ;;  %v10435_v43 = vsel %vm590_vm0, %v10331_v28, 0.0  ;;  %v11690_v35 = vpop.f32.mrb[106].mxu0 }
 0x67e   : > { %v10436_v21 = vadd.f32 %v10435_v43, %v10434_v22  ;;  %v10456_v39 = vsel %vm590_vm0, %v11690_v35, 0.0  ;;  %v10334_v53 = vpop.f32.mrb[107].mxu0 }
 0x67f   : > { %v10544_v42 = vadd.f32 %v10450_v44, %v10416_v30  ;;  %v10457_v36 = vadd.f32 %v10456_v39, %v10455_v60  ;;  %v10442_v20 = vsel %vm590_vm0, %v10334_v53, 0.0 }
 0x680   : > { %v10542_v54 = vadd.f32 %v10436_v21, %v10414_v47  ;;  %v10443_v62 = vadd.f32 %v10442_v20, %v10441_v50 }
 0x681   : > { %10560 = vst.msk [vmem:[#allocation2 + $0x10] sm:$0xff] %vm590_vm0, %v10544_v42  ;;  %v10545_v26 = vadd.f32 %v10457_v36, %v10417_v37 }
 0x682   : > { %10558 = vst.msk [vmem:[#allocation2] sm:$0xff] %vm590_vm0, %v10542_v54  ;;  %v10543_v5 = vadd.f32 %v10443_v62, %v10415_v27 }
 0x683   : > { %10561 = vst.msk [vmem:[#allocation2 + $0x18] sm:$0xff] %vm590_vm0, %v10545_v26 }
 0x684   : > { %10559 = vst.msk [vmem:[#allocation2 + $0x8] sm:$0xff] %vm590_vm0, %v10543_v5 }
 0x687   : > { %v11675_v23 = vpop.f32.mrb[108].mxu1 }
 0x688   : > { %v10579_v9 = vld [vmem:[#allocation2 + $0x10] sm:$0xff]  ;;  %v10475_v25 = vsel %vm590_vm0, %v11675_v23, 0.0  ;;  %v10220_v38 = vpop.f32.mrb[109].mxu1 }
 0x689   : > { %v10602_v58 = vadd.f32 %v16188_v31, %v10579_v9  ;;  %v10577_v4 = vld [vmem:[#allocation2] sm:$0xff]  ;;  %v10476_v55 = vadd.f32 %v10475_v25, %v16123_v32  ;;  %v10461_v2 = vsel %vm590_vm0, %v10220_v38, 0.0  ;;  %v11676_v3 = vpop.f32.mrb[110].mxu1 }
 0x68a   : > { %v10600_v10 = vadd.f32 %v16188_v31, %v10577_v4  ;;  %v10580_v61 = vld [vmem:[#allocation2 + $0x18] sm:$0xff]  ;;  %v10462_v40 = vadd.f32 %v10461_v2, %v16127_v16  ;;  %v10482_v34 = vsel %vm590_vm0, %v11676_v3, 0.0  ;;  %v10223_v7 = vpop.f32.mrb[111].mxu1  ;;  %v10422_v3 = vld [vmem:[#allocation2 + $0x40] sm:$0xff] }
 0x68b   : > { %10618 = vst.msk [vmem:[%s16193_s24 + $0x10] sm:$0xff] %vm590_vm0, %v10602_v58  ;;  %v10603_v45 = vadd.f32 %v16188_v31, %v10580_v61  ;;  %v10578_v14 = vld [vmem:[#allocation2 + $0x8] sm:$0xff]  ;;  %v10483_v32 = vadd.f32 %v10482_v34, %v16131_v57  ;;  %v10468_v17 = vsel %vm590_vm0, %v10223_v7, 0.0  ;;  %v11693_v59 = vpop.f32.mrb[108].mxu0  ;;  %v10424_v58 = vld [vmem:[#allocation2 + $0x50] sm:$0xff] }
 0x68c   : > { %10616 = vst.msk [vmem:[%s16193_s24] sm:$0xff] %vm590_vm0, %v10600_v10  ;;  %v10601_v46 = vadd.f32 %v16188_v31, %v10578_v14  ;;  %v10469_v16 = vadd.f32 %v10468_v17, %v16134_v63  ;;  %v10477_v51 = vsel %vm590_vm0, %v11693_v59, 0.0  ;;  %v10347_v8 = vpop.f32.mrb[109].mxu0  ;;  %v10423_v14 = vld [vmem:[#allocation2 + $0x48] sm:$0xff] }
 0x68d   : > { %10619 = vst.msk [vmem:[%s16193_s24 + $0x18] sm:$0xff] %vm590_vm0, %v10603_v45  ;;  %v10478_v49 = vadd.f32 %v10477_v51, %v10476_v55  ;;  %v10463_v15 = vsel %vm590_vm0, %v10347_v8, 0.0  ;;  %v11694_v57 = vpop.f32.mrb[110].mxu0 }
 0x68e   : > { %10617 = vst.msk [vmem:[%s16193_s24 + $0x8] sm:$0xff] %vm590_vm0, %v10601_v46  ;;  %v10464_v22 = vadd.f32 %v10463_v15, %v10462_v40  ;;  %v10484_v52 = vsel %vm590_vm0, %v11694_v57, 0.0  ;;  %v10350_v60 = vpop.f32.mrb[111].mxu0  ;;  %v10425_v40 = vld [vmem:[#allocation2 + $0x58] sm:$0xff] }
 0x68f   : > { %v10548_v41 = vadd.f32 %v10478_v49, %v10420_v0  ;;  %v10485_v63 = vadd.f32 %v10484_v52, %v10483_v32  ;;  %v10470_v50 = vsel %vm590_vm0, %v10350_v60, 0.0 }
 0x690   : > { %v10546_v30 = vadd.f32 %v10464_v22, %v10418_v13  ;;  %v10471_v1 = vadd.f32 %v10470_v50, %v10469_v16 }
 0x691   : > { %10564 = vst.msk [vmem:[#allocation2 + $0x30] sm:$0xff] %vm590_vm0, %v10548_v41  ;;  %v10549_v28 = vadd.f32 %v10485_v63, %v10421_v29 }
 0x692   : > { %10562 = vst.msk [vmem:[#allocation2 + $0x20] sm:$0xff] %vm590_vm0, %v10546_v30  ;;  %v10547_v44 = vadd.f32 %v10471_v1, %v10419_v11 }
 0x693   : > { %10565 = vst.msk [vmem:[#allocation2 + $0x38] sm:$0xff] %vm590_vm0, %v10549_v28 }
 0x694   : > { %10563 = vst.msk [vmem:[#allocation2 + $0x28] sm:$0xff] %vm590_vm0, %v10547_v44 }
 0x697   : > { %v11679_v47 = vpop.f32.mrb[112].mxu1 }
 0x698   : > { %v10583_v43 = vld [vmem:[#allocation2 + $0x30] sm:$0xff]  ;;  %v10503_v35 = vsel %vm590_vm0, %v11679_v47, 0.0  ;;  %v10236_v21 = vpop.f32.mrb[113].mxu1 }
 0x699   : > { %v10606_v37 = vadd.f32 %v16188_v31, %v10583_v43  ;;  %v10581_v39 = vld [vmem:[#allocation2 + $0x20] sm:$0xff]  ;;  %v10504_v53 = vadd.f32 %v10503_v35, %v16139_v24  ;;  %v10489_v42 = vsel %vm590_vm0, %v10236_v21, 0.0  ;;  %v11680_v36 = vpop.f32.mrb[114].mxu1  ;;  %v10428_v47 = vld [vmem:[#allocation2 + $0x70] sm:$0xff] }
 0x69a   : > { %v10604_v27 = vadd.f32 %v16188_v31, %v10581_v39  ;;  %v10584_v20 = vld [vmem:[#allocation2 + $0x38] sm:$0xff]  ;;  %v10490_v54 = vadd.f32 %v10489_v42, %v16143_v18  ;;  %v10510_v62 = vsel %vm590_vm0, %v11680_v36, 0.0  ;;  %v10239_v26 = vpop.f32.mrb[115].mxu1 }
 0x69b   : > { %10622 = vst.msk [vmem:[%s16193_s24 + $0x30] sm:$0xff] %vm590_vm0, %v10606_v37  ;;  %v10607_v5 = vadd.f32 %v16188_v31, %v10584_v20  ;;  %v10582_v23 = vld [vmem:[#allocation2 + $0x28] sm:$0xff]  ;;  %v10511_v24 = vadd.f32 %v10510_v62, %v16147_v56  ;;  %v10496_v9 = vsel %vm590_vm0, %v10239_v26, 0.0  ;;  %v11697_v25 = vpop.f32.mrb[112].mxu0  ;;  %v10426_v37 = vld [vmem:[#allocation2 + $0x60] sm:$0xff]  ;;  %v10429_v42 = vld [vmem:[#allocation2 + $0x78] sm:$0xff] }
 0x69c   : > { %10620 = vst.msk [vmem:[%s16193_s24 + $0x20] sm:$0xff] %vm590_vm0, %v10604_v27  ;;  %v10605_v38 = vadd.f32 %v16188_v31, %v10582_v23  ;;  %v10497_v18 = vadd.f32 %v10496_v9, %v16150_v12  ;;  %v10505_v4 = vsel %vm590_vm0, %v11697_v25, 0.0  ;;  %v10363_v55 = vpop.f32.mrb[113].mxu0 }
 0x69d   : > { %10623 = vst.msk [vmem:[%s16193_s24 + $0x38] sm:$0xff] %vm590_vm0, %v10607_v5  ;;  %v10506_v2 = vadd.f32 %v10505_v4, %v10504_v53  ;;  %v10491_v10 = vsel %vm590_vm0, %v10363_v55, 0.0  ;;  %v11698_v56 = vpop.f32.mrb[114].mxu0 }
 0x69e   : > { %10621 = vst.msk [vmem:[%s16193_s24 + $0x28] sm:$0xff] %vm590_vm0, %v10605_v38  ;;  %v10492_v61 = vadd.f32 %v10491_v10, %v10490_v54  ;;  %v10512_v34 = vsel %vm590_vm0, %v11698_v56, 0.0  ;;  %v10366_v7 = vpop.f32.mrb[115].mxu0  ;;  %v10427_v54 = vld [vmem:[#allocation2 + $0x68] sm:$0xff] }
 0x69f   : > { %v10552_v45 = vadd.f32 %v10506_v2, %v10424_v58  ;;  %v10513_v12 = vadd.f32 %v10512_v34, %v10511_v24  ;;  %v10498_v32 = vsel %vm590_vm0, %v10366_v7, 0.0 }
 0x6a0   : > { %v10550_v17 = vadd.f32 %v10492_v61, %v10422_v3  ;;  %v10499_v59 = vadd.f32 %v10498_v32, %v10497_v18 }
 0x6a1   : > { %10568 = vst.msk [vmem:[#allocation2 + $0x50] sm:$0xff] %vm590_vm0, %v10552_v45  ;;  %v10553_v46 = vadd.f32 %v10513_v12, %v10425_v40 }
 0x6a2   : > { %10566 = vst.msk [vmem:[#allocation2 + $0x40] sm:$0xff] %vm590_vm0, %v10550_v17  ;;  %v10551_v16 = vadd.f32 %v10499_v59, %v10423_v14 }
 0x6a3   : > { %10569 = vst.msk [vmem:[#allocation2 + $0x58] sm:$0xff] %vm590_vm0, %v10553_v46 }
 0x6a4   : > { %10567 = vst.msk [vmem:[#allocation2 + $0x48] sm:$0xff] %vm590_vm0, %v10551_v16 }
 0x6a7   : > { %v11683_v0 = vpop.f32.mrb[116].mxu1 }
 0x6a8   : > { %v10587_v51 = vld [vmem:[#allocation2 + $0x50] sm:$0xff]  ;;  %v10531_v8 = vsel %vm590_vm0, %v11683_v0, 0.0  ;;  %v10252_v49 = vpop.f32.mrb[117].mxu1 }
 0x6a9   : > { %v10610_v13 = vadd.f32 %v16188_v31, %v10587_v51  ;;  %v10585_v15 = vld [vmem:[#allocation2 + $0x40] sm:$0xff]  ;;  %v10532_v57 = vadd.f32 %v10531_v8, %v16155_v19  ;;  %v10517_v22 = vsel %vm590_vm0, %v10252_v49, 0.0  ;;  %v11684_v29 = vpop.f32.mrb[118].mxu1 }
 0x6aa   : > { %v10608_v52 = vadd.f32 %v16188_v31, %v10585_v15  ;;  %v10588_v60 = vld [vmem:[#allocation2 + $0x58] sm:$0xff]  ;;  %v10518_v41 = vadd.f32 %v10517_v22, %v16159_v48  ;;  %v10538_v63 = vsel %vm590_vm0, %v11684_v29, 0.0  ;;  %v10255_v11 = vpop.f32.mrb[119].mxu1 }
 0x6ab   : > { %10626 = vst.msk [vmem:[%s16193_s24 + $0x50] sm:$0xff] %vm590_vm0, %v10610_v13  ;;  %v10611_v50 = vadd.f32 %v16188_v31, %v10588_v60  ;;  %v10586_v30 = vld [vmem:[#allocation2 + $0x48] sm:$0xff]  ;;  %v10539_v19 = vadd.f32 %v10538_v63, %v16163_v6  ;;  %v10524_v1 = vsel %vm590_vm0, %v10255_v11, 0.0 }
 0x6ac   : > { %10624 = vst.msk [vmem:[%s16193_s24 + $0x40] sm:$0xff] %vm590_vm0, %v10608_v52  ;;  %v10609_v28 = vadd.f32 %v16188_v31, %v10586_v30  ;;  %v10525_v44 = vadd.f32 %v10524_v1, %v16166_v33 }
 0x6ad   : > { %10627 = vst.msk [vmem:[%s16193_s24 + $0x58] sm:$0xff] %vm590_vm0, %v10611_v50 }
 0x6ae   : > { %10625 = vst.msk [vmem:[%s16193_s24 + $0x48] sm:$0xff] %vm590_vm0, %v10609_v28  ;;  %v11701_v48 = vpop.f32.mrb[116].mxu0 }
 0x6af   : > { %v10533_v43 = vsel %vm590_vm0, %v11701_v48, 0.0  ;;  %v10379_v35 = vpop.f32.mrb[117].mxu0 }
 0x6b0   : > { %v10534_v21 = vadd.f32 %v10533_v43, %v10532_v57  ;;  %v10519_v6 = vsel %vm590_vm0, %v10379_v35, 0.0  ;;  %v11702_v39 = vpop.f32.mrb[118].mxu0 }
 0x6b1   : > { %v10520_v53 = vadd.f32 %v10519_v6, %v10518_v41  ;;  %v10540_v36 = vsel %vm590_vm0, %v11702_v39, 0.0  ;;  %v10382_v27 = vpop.f32.mrb[119].mxu0 }
 0x6b2   : > { %v10556_v33 = vadd.f32 %v10534_v21, %v10428_v47  ;;  %v10541_v20 = vadd.f32 %v10540_v36, %v10539_v19  ;;  %v10526_v62 = vsel %vm590_vm0, %v10382_v27, 0.0 }
 0x6b3   : > { %v10554_v26 = vadd.f32 %v10520_v53, %v10426_v37  ;;  %v10527_v5 = vadd.f32 %v10526_v62, %v10525_v44 }
 0x6b4   : > { %10572 = vst.msk [vmem:[#allocation2 + $0x70] sm:$0xff] %vm590_vm0, %v10556_v33  ;;  %v10557_v23 = vadd.f32 %v10541_v20, %v10429_v42 }
 0x6b5   : > { %10570 = vst.msk [vmem:[#allocation2 + $0x60] sm:$0xff] %vm590_vm0, %v10554_v26  ;;  %v10555_v24 = vadd.f32 %v10527_v5, %v10427_v54 }
 0x6b6   : > { %10573 = vst.msk [vmem:[#allocation2 + $0x78] sm:$0xff] %vm590_vm0, %v10557_v23 }
 0x6b7   : > { %10571 = vst.msk [vmem:[#allocation2 + $0x68] sm:$0xff] %vm590_vm0, %v10555_v24 }
 0x6bb   : > { %v10591_v9 = vld [vmem:[#allocation2 + $0x70] sm:$0xff] }
 0x6bc   : > { %v10614_v25 = vadd.f32 %v16188_v31, %v10591_v9  ;;  %v10589_v38 = vld [vmem:[#allocation2 + $0x60] sm:$0xff] }
 0x6bd   : > { %v10612_v18 = vadd.f32 %v16188_v31, %v10589_v38  ;;  %v10592_v58 = vld [vmem:[#allocation2 + $0x78] sm:$0xff] }
 0x6be   : > { %10630 = vst.msk [vmem:[%s16193_s24 + $0x70] sm:$0xff] %vm590_vm0, %v10614_v25  ;;  %v10615_v4 = vadd.f32 %v16188_v31, %v10592_v58  ;;  %v10590_v55 = vld [vmem:[#allocation2 + $0x68] sm:$0xff] }
 0x6bf   : > { %10628 = vst.msk [vmem:[%s16193_s24 + $0x60] sm:$0xff] %vm590_vm0, %v10612_v18  ;;  %v10613_v2 = vadd.f32 %v16188_v31, %v10590_v55 }
 0x6c0   : > { %10631 = vst.msk [vmem:[%s16193_s24 + $0x78] sm:$0xff] %vm590_vm0, %v10615_v4 }
 0x6c1   : > { %10629 = vst.msk [vmem:[%s16193_s24 + $0x68] sm:$0xff] %vm590_vm0, %v10613_v2 }
 0x6c2 PF: > { %s19_s29 = sadd.s32 1, %s12083_s29   ;;  %s16976_s27 = smov %s12079_s28 }
 0x6c3   : > { %p16_p5 = scmp.ge.s32.totalorder %s19_s29, 4   ;;  %s16977_s28 = smov %s16979_s30 }
 0x6c5   :  { %18 = sbr.rel (!%p16_p5) target bundleno = 2 (0x2), region = 113 }

</bundles_post_ra>
